<compile_context>
chip_gen: v7x
topology: tpu7x:2x2x1
jax: 0.10.0
libtpu: 0.0.40
codegen_flags: <defaults>
</compile_context>

<pallas_src>
import math

import jax
import jax.numpy as jnp
import numpy as np
from jax import lax
from jax.experimental import pallas as pl
from jax.experimental.pallas import tpu as pltpu

EPSILON = 1e-4        # fast-attention epsilon of BiFPN
BN_EPS = 1e-3         # BatchNorm2d eps used by SeparableConvBlock


# ----------------------------------------------------------------------------
# Pallas kernel: weighted fusion + swish + depthwise 3x3 + pointwise 1x1 + BN
# ----------------------------------------------------------------------------
def make_fused_node_kernel(n_in, H, W, C):
    def kernel(*refs):
        w_ref = refs[0]                              # (n_in,) in SMEM
        x_refs = refs[1:1 + n_in]                    # each (H+2, W+2, C), zero halo
        dwk_ref, pwk_ref, scale_ref, bias_ref, out_ref = refs[1 + n_in:]

        # ---- fast normalized fusion (weights pre-normalized in wrapper) ----
        fused = w_ref[0] * x_refs[0][...]
        for i in range(1, n_in):
            fused = fused + w_ref[i] * x_refs[i][...]

        # ---- Swish: the zero halo stays exactly zero (swish(0) == 0), so it
        #      is equivalent to SAME zero-padding applied after the swish ----
        act = fused * jax.nn.sigmoid(fused)          # (H+2, W+2, C), in vregs

        # ---- depthwise 3x3, stride 1, SAME: taps are in-register shifted
        #      views of `act` — no scratch store/load round trip ----
        dwk = dwk_ref[...]                           # (3, 3, C), read once
        acc = act[0:H, 0:W, :] * dwk[0, 0, :]
        for kh in range(3):
            for kw in range(3):
                if kh == 0 and kw == 0:
                    continue
                acc = acc + act[kh:kh + H, kw:kw + W, :] * dwk[kh, kw, :]

        # ---- pointwise 1x1 conv as a matmul on the MXU ----
        y = jnp.dot(acc.reshape(H * W, C), pwk_ref[...],
                    preferred_element_type=jnp.float32)

        # ---- pointwise bias + BatchNorm (eval) folded into scale/bias ----
        out_ref[...] = y * scale_ref[...] + bias_ref[...]

    return kernel


def fused_node(xs, fuse_w, p):
    """xs: list of NHWC arrays (same shape). fuse_w: normalized fusion weights."""
    B, H, W, C = xs[0].shape
    n = len(xs)
    # 1-pixel zero halo for the depthwise conv; fuses into the XLA producer
    # (transpose / upsample / maxpool), so no separate HBM round trip.
    xs_p = [jnp.pad(x, ((0, 0), (1, 1), (1, 1), (0, 0))) for x in xs]
    kernel = make_fused_node_kernel(n, H, W, C)

    in_specs = [pl.BlockSpec(memory_space=pltpu.MemorySpace.SMEM)]            # fusion weights
    in_specs += [pl.BlockSpec((None, H + 2, W + 2, C), lambda b: (b, 0, 0, 0))
                 for _ in range(n)]                                           # padded feature maps
    in_specs += [pl.BlockSpec((3, 3, C), lambda b: (0, 0, 0)),                # depthwise weights
                 pl.BlockSpec((C, C), lambda b: (0, 0)),                      # pointwise weights
                 pl.BlockSpec((1, C), lambda b: (0, 0)),                      # folded scale
                 pl.BlockSpec((1, C), lambda b: (0, 0))]                      # folded bias

    out_flat = pl.pallas_call(
        kernel,
        out_shape=jax.ShapeDtypeStruct((B, H * W, C), jnp.float32),
        grid=(B,),
        in_specs=in_specs,
        out_specs=pl.BlockSpec((None, H * W, C), lambda b: (b, 0, 0)),
        compiler_params=pltpu.CompilerParams(dimension_semantics=("parallel",)),
    )(fuse_w, *xs_p, p["dwk"], p["pwk"], p["scale"], p["bias"])
    return out_flat.reshape(B, H, W, C)


# ----------------------------------------------------------------------------
# Plain-JAX glue (data movement only)
# ----------------------------------------------------------------------------
def upsample2x(x):  # nearest-neighbor x2 (nn.Upsample(scale_factor=2, mode='nearest'))
    x = jnp.repeat(x, 2, axis=1)
    return jnp.repeat(x, 2, axis=2)


def maxpool_same(x):
    """Pool2dStaticSamePadding(3, 2, 'MAX'): zero-pad to TF-SAME, then 3x3/s2 max pool."""
    _, H, W, _ = x.shape

    def extra(n):
        return max((math.ceil(n / 2) - 1) * 2 - n + 3, 0)

    eh, ew = extra(H), extra(W)
    pt, pb = eh // 2, eh - eh // 2
    pleft, pright = ew // 2, ew - ew // 2
    xp = jnp.pad(x, ((0, 0), (pt, pb), (pleft, pright), (0, 0)))
    return lax.reduce_window(xp, -jnp.inf, lax.max,
                             (1, 3, 3, 1), (1, 2, 2, 1), "VALID")


def normalize_fuse_w(w):
    w = jnp.maximum(w, 0.0)                 # ReLU
    return w / (jnp.sum(w) + EPSILON)


# ----------------------------------------------------------------------------
# BiFPN forward (first_time=False): NCHW in / NCHW out
# ----------------------------------------------------------------------------
def bifpn_forward(p3_nchw, p4_nchw, p5_nchw, params):
    to_nhwc = lambda x: jnp.transpose(x, (0, 2, 3, 1))
    to_nchw = lambda x: jnp.transpose(x, (0, 3, 1, 2))
    p3_in, p4_in, p5_in = to_nhwc(p3_nchw), to_nhwc(p4_nchw), to_nhwc(p5_nchw)

    # P4_1 = conv4_up(swish(w0*P4_0 + w1*up(P5_0)))
    w = normalize_fuse_w(params["p4_w1"])
    p4_up = fused_node([p4_in, upsample2x(p5_in)], w, params["conv4_up"])

    # P3_2 = conv3_up(swish(w0*P3_0 + w1*up(P4_1)))
    w = normalize_fuse_w(params["p3_w1"])
    p3_out = fused_node([p3_in, upsample2x(p4_up)], w, params["conv3_up"])

    # P4_2 = conv4_down(swish(w0*P4_0 + w1*P4_1 + w2*down(P3_2)))
    w = normalize_fuse_w(params["p4_w2"])
    p4_out = fused_node([p4_in, p4_up, maxpool_same(p3_out)], w, params["conv4_down"])

    # P5_2 = conv5_down(swish(w0*P5_0 + w1*down(P4_2)))
    w = normalize_fuse_w(params["p5_w2"])
    p5_out = fused_node([p5_in, maxpool_same(p4_out)], w, params["conv5_down"])

    return to_nchw(p3_out), to_nchw(p4_out), to_nchw(p5_out)


# ----------------------------------------------------------------------------
# Pure-JAX reference (to check the Pallas node kernel)
# ----------------------------------------------------------------------------
def ref_sepconv(x, p):
    C = x.shape[-1]
    dwk = p["dwk"].reshape(3, 3, 1, C)
    y = lax.conv_general_dilated(x, dwk, (1, 1), "SAME",
                                 dimension_numbers=("NHWC", "HWIO", "NHWC"),
                                 feature_group_count=C,
                                 precision=lax.Precision.HIGHEST)
    y = jnp.einsum("bhwc,cd->bhwd", y, p["pwk"], precision=lax.Precision.HIGHEST)
    return y * p["scale"] + p["bias"]


def ref_node(xs, fuse_w, p):
    w = normalize_fuse_w(fuse_w)
    fused = w[0] * xs[0]
    for i in range(1, len(xs)):
        fused = fused + w[i] * xs[i]
    act = fused * jax.nn.sigmoid(fused)
    return ref_sepconv(act, p)


def ref_bifpn(p3_nchw, p4_nchw, p5_nchw, params):
    to_nhwc = lambda x: jnp.transpose(x, (0, 2, 3, 1))
    to_nchw = lambda x: jnp.transpose(x, (0, 3, 1, 2))
    p3_in, p4_in, p5_in = to_nhwc(p3_nchw), to_nhwc(p4_nchw), to_nhwc(p5_nchw)

    p4_up = ref_node([p4_in, upsample2x(p5_in)], params["p4_w1"], params["conv4_up"])
    p3_out = ref_node([p3_in, upsample2x(p4_up)], params["p3_w1"], params["conv3_up"])
    p4_out = ref_node([p4_in, p4_up, maxpool_same(p3_out)], params["p4_w2"], params["conv4_down"])
    p5_out = ref_node([p5_in, maxpool_same(p4_out)], params["p5_w2"], params["conv5_down"])
    return to_nchw(p3_out), to_nchw(p4_out), to_nchw(p5_out)


# ----------------------------------------------------------------------------
# Deterministic parameter init (SeparableConvBlock: dw3x3 no-bias, pw1x1 bias,
# BatchNorm2d eval with gamma=1, beta=0, running_mean=0, running_var=1)
# ----------------------------------------------------------------------------
def init_sepconv(key, C):
    k1, k2, k3 = jax.random.split(key, 3)
    dwk = jax.random.normal(k1, (3, 3, C), jnp.float32) * 0.1
    pwk = jax.random.normal(k2, (C, C), jnp.float32) * (1.0 / math.sqrt(C))
    pw_bias = jax.random.normal(k3, (C,), jnp.float32) * 0.01
    bn_scale = jnp.ones((C,), jnp.float32) / jnp.sqrt(1.0 + BN_EPS)   # gamma/sqrt(var+eps)
    bn_shift = jnp.zeros((C,), jnp.float32)                           # beta - mean*scale
    scale = bn_scale.reshape(1, C)
    bias = (pw_bias * bn_scale + bn_shift).reshape(1, C)
    return {"dwk": dwk, "pwk": pwk, "scale": scale, "bias": bias}


def init_params(key, C):
    keys = jax.random.split(key, 4)
    return {
        "conv4_up": init_sepconv(keys[0], C),
        "conv3_up": init_sepconv(keys[1], C),
        "conv4_down": init_sepconv(keys[2], C),
        "conv5_down": init_sepconv(keys[3], C),
        # nn.Parameter(torch.ones(...)) inits
        "p4_w1": jnp.ones((2,), jnp.float32),
        "p3_w1": jnp.ones((2,), jnp.float32),
        "p4_w2": jnp.ones((3,), jnp.float32),
        "p5_w2": jnp.ones((2,), jnp.float32),
    }
    # TODO(synk): first_time=True down-channel branch (1x1 conv + BN per level) not exercised.


if __name__ == "__main__":
    B, C = 2, 64
    key = jax.random.PRNGKey(0)
    kp, k3, k4, k5 = jax.random.split(key, 4)

    params = init_params(kp, C)
    # NCHW inputs (PyTorch convention): P3 16x16, P4 8x8, P5 4x4
    p3 = jax.random.normal(k3, (B, C, 16, 16), jnp.float32)
    p4 = jax.random.normal(k4, (B, C, 8, 8), jnp.float32)
    p5 = jax.random.normal(k5, (B, C, 4, 4), jnp.float32)

    out = jax.block_until_ready(jax.jit(bifpn_forward)(p3, p4, p5, params))
    ref = jax.block_until_ready(jax.jit(ref_bifpn)(p3, p4, p5, params))

    for o, r in zip(out, ref):
        np.testing.assert_allclose(np.asarray(o), np.asarray(r), rtol=2e-3, atol=2e-3)

    print("KERNEL_OK")
</pallas_src>

<mosaic_0001>
module attributes {stable_mosaic.version = 11 : i64} {
  func.func @kernel(%arg0: i32, %arg1: memref<2xf32, #tpu.memory_space<smem>>, %arg2: memref<1x10x10x64xf32, #tpu.memory_space<vmem>>, %arg3: memref<1x10x10x64xf32, #tpu.memory_space<vmem>>, %arg4: memref<3x3x64xf32, #tpu.memory_space<vmem>>, %arg5: memref<64x64xf32, #tpu.memory_space<vmem>>, %arg6: memref<1x64xf32, #tpu.memory_space<vmem>>, %arg7: memref<1x64xf32, #tpu.memory_space<vmem>>, %arg8: memref<1x64x64xf32, #tpu.memory_space<vmem>>) attributes {dimension_semantics = [#tpu.dimension_semantics<parallel>], iteration_bounds = array<i64: 2>, scalar_prefetch = 0 : i64, scratch_operands = 0 : i64, tpu.core_type = #tpu.core_type<tc>, window_params = [{transform_indices = @transform_0, window_bounds = array<i64: 2>}, {transform_indices = @transform_1, window_bounds = array<i64: 1, 10, 10, 64>}, {transform_indices = @transform_2, window_bounds = array<i64: 1, 10, 10, 64>}, {pipeline_mode = #tpu.pipeline_mode<synchronous>, transform_indices = @transform_3, window_bounds = array<i64: 3, 3, 64>}, {pipeline_mode = #tpu.pipeline_mode<synchronous>, transform_indices = @transform_4, window_bounds = array<i64: 64, 64>}, {pipeline_mode = #tpu.pipeline_mode<synchronous>, transform_indices = @transform_5, window_bounds = array<i64: 1, 64>}, {pipeline_mode = #tpu.pipeline_mode<synchronous>, transform_indices = @transform_6, window_bounds = array<i64: 1, 64>}, {transform_indices = @transform_7, window_bounds = array<i64: 1, 64, 64>}]} {
    %c0 = arith.constant 0 : index
    %0 = memref.load %arg1[%c0] : memref<2xf32, #tpu.memory_space<smem>>
    %c0_0 = arith.constant 0 : index
    %c0_1 = arith.constant 0 : index
    %c0_2 = arith.constant 0 : index
    %c0_3 = arith.constant 0 : index
    %1 = vector.load %arg2[%c0_0, %c0_1, %c0_2, %c0_3] : memref<1x10x10x64xf32, #tpu.memory_space<vmem>>, vector<1x10x10x64xf32>
    %2 = vector.shape_cast %1 : vector<1x10x10x64xf32> to vector<10x10x64xf32>
    %3 = vector.broadcast %0 : f32 to vector<10x10x64xf32>
    %4 = arith.mulf %3, %2 : vector<10x10x64xf32>
    %c1 = arith.constant 1 : index
    %5 = memref.load %arg1[%c1] : memref<2xf32, #tpu.memory_space<smem>>
    %c0_4 = arith.constant 0 : index
    %c0_5 = arith.constant 0 : index
    %c0_6 = arith.constant 0 : index
    %c0_7 = arith.constant 0 : index
    %6 = vector.load %arg3[%c0_4, %c0_5, %c0_6, %c0_7] : memref<1x10x10x64xf32, #tpu.memory_space<vmem>>, vector<1x10x10x64xf32>
    %7 = vector.shape_cast %6 : vector<1x10x10x64xf32> to vector<10x10x64xf32>
    %8 = vector.broadcast %5 : f32 to vector<10x10x64xf32>
    %9 = arith.mulf %8, %7 : vector<10x10x64xf32>
    %10 = arith.addf %4, %9 : vector<10x10x64xf32>
    %11 = arith.negf %10 : vector<10x10x64xf32>
    %12 = math.exp %11 : vector<10x10x64xf32>
    %cst = arith.constant 1.000000e+00 : f32
    %13 = vector.broadcast %cst : f32 to vector<10x10x64xf32>
    %14 = arith.addf %13, %12 : vector<10x10x64xf32>
    %15 = arith.divf %13, %14 : vector<10x10x64xf32>
    %16 = arith.mulf %10, %15 : vector<10x10x64xf32>
    %c0_8 = arith.constant 0 : index
    %c0_9 = arith.constant 0 : index
    %c0_10 = arith.constant 0 : index
    %17 = vector.load %arg4[%c0_8, %c0_9, %c0_10] : memref<3x3x64xf32, #tpu.memory_space<vmem>>, vector<3x3x64xf32>
    %18 = vector.extract_strided_slice %16 {offsets = [0, 0, 0], sizes = [8, 8, 64], strides = [1, 1, 1]} : vector<10x10x64xf32> to vector<8x8x64xf32>
    %19 = vector.extract_strided_slice %17 {offsets = [0, 0, 0], sizes = [1, 1, 64], strides = [1, 1, 1]} : vector<3x3x64xf32> to vector<1x1x64xf32>
    %20 = vector.shape_cast %19 : vector<1x1x64xf32> to vector<64xf32>
    %21 = vector.shape_cast %20 : vector<64xf32> to vector<1x1x64xf32>
    %22 = vector.broadcast %21 : vector<1x1x64xf32> to vector<8x8x64xf32>
    %23 = arith.mulf %18, %22 : vector<8x8x64xf32>
    %24 = vector.extract_strided_slice %16 {offsets = [0, 1, 0], sizes = [8, 8, 64], strides = [1, 1, 1]} : vector<10x10x64xf32> to vector<8x8x64xf32>
    %25 = vector.extract_strided_slice %17 {offsets = [0, 1, 0], sizes = [1, 1, 64], strides = [1, 1, 1]} : vector<3x3x64xf32> to vector<1x1x64xf32>
    %26 = vector.shape_cast %25 : vector<1x1x64xf32> to vector<64xf32>
    %27 = vector.shape_cast %26 : vector<64xf32> to vector<1x1x64xf32>
    %28 = vector.broadcast %27 : vector<1x1x64xf32> to vector<8x8x64xf32>
    %29 = arith.mulf %24, %28 : vector<8x8x64xf32>
    %30 = arith.addf %23, %29 : vector<8x8x64xf32>
    %31 = vector.extract_strided_slice %16 {offsets = [0, 2, 0], sizes = [8, 8, 64], strides = [1, 1, 1]} : vector<10x10x64xf32> to vector<8x8x64xf32>
    %32 = vector.extract_strided_slice %17 {offsets = [0, 2, 0], sizes = [1, 1, 64], strides = [1, 1, 1]} : vector<3x3x64xf32> to vector<1x1x64xf32>
    %33 = vector.shape_cast %32 : vector<1x1x64xf32> to vector<64xf32>
    %34 = vector.shape_cast %33 : vector<64xf32> to vector<1x1x64xf32>
    %35 = vector.broadcast %34 : vector<1x1x64xf32> to vector<8x8x64xf32>
    %36 = arith.mulf %31, %35 : vector<8x8x64xf32>
    %37 = arith.addf %30, %36 : vector<8x8x64xf32>
    %38 = vector.extract_strided_slice %16 {offsets = [1, 0, 0], sizes = [8, 8, 64], strides = [1, 1, 1]} : vector<10x10x64xf32> to vector<8x8x64xf32>
    %39 = vector.extract_strided_slice %17 {offsets = [1, 0, 0], sizes = [1, 1, 64], strides = [1, 1, 1]} : vector<3x3x64xf32> to vector<1x1x64xf32>
    %40 = vector.shape_cast %39 : vector<1x1x64xf32> to vector<64xf32>
    %41 = vector.shape_cast %40 : vector<64xf32> to vector<1x1x64xf32>
    %42 = vector.broadcast %41 : vector<1x1x64xf32> to vector<8x8x64xf32>
    %43 = arith.mulf %38, %42 : vector<8x8x64xf32>
    %44 = arith.addf %37, %43 : vector<8x8x64xf32>
    %45 = vector.extract_strided_slice %16 {offsets = [1, 1, 0], sizes = [8, 8, 64], strides = [1, 1, 1]} : vector<10x10x64xf32> to vector<8x8x64xf32>
    %46 = vector.extract_strided_slice %17 {offsets = [1, 1, 0], sizes = [1, 1, 64], strides = [1, 1, 1]} : vector<3x3x64xf32> to vector<1x1x64xf32>
    %47 = vector.shape_cast %46 : vector<1x1x64xf32> to vector<64xf32>
    %48 = vector.shape_cast %47 : vector<64xf32> to vector<1x1x64xf32>
    %49 = vector.broadcast %48 : vector<1x1x64xf32> to vector<8x8x64xf32>
    %50 = arith.mulf %45, %49 : vector<8x8x64xf32>
    %51 = arith.addf %44, %50 : vector<8x8x64xf32>
    %52 = vector.extract_strided_slice %16 {offsets = [1, 2, 0], sizes = [8, 8, 64], strides = [1, 1, 1]} : vector<10x10x64xf32> to vector<8x8x64xf32>
    %53 = vector.extract_strided_slice %17 {offsets = [1, 2, 0], sizes = [1, 1, 64], strides = [1, 1, 1]} : vector<3x3x64xf32> to vector<1x1x64xf32>
    %54 = vector.shape_cast %53 : vector<1x1x64xf32> to vector<64xf32>
    %55 = vector.shape_cast %54 : vector<64xf32> to vector<1x1x64xf32>
    %56 = vector.broadcast %55 : vector<1x1x64xf32> to vector<8x8x64xf32>
    %57 = arith.mulf %52, %56 : vector<8x8x64xf32>
    %58 = arith.addf %51, %57 : vector<8x8x64xf32>
    %59 = vector.extract_strided_slice %16 {offsets = [2, 0, 0], sizes = [8, 8, 64], strides = [1, 1, 1]} : vector<10x10x64xf32> to vector<8x8x64xf32>
    %60 = vector.extract_strided_slice %17 {offsets = [2, 0, 0], sizes = [1, 1, 64], strides = [1, 1, 1]} : vector<3x3x64xf32> to vector<1x1x64xf32>
    %61 = vector.shape_cast %60 : vector<1x1x64xf32> to vector<64xf32>
    %62 = vector.shape_cast %61 : vector<64xf32> to vector<1x1x64xf32>
    %63 = vector.broadcast %62 : vector<1x1x64xf32> to vector<8x8x64xf32>
    %64 = arith.mulf %59, %63 : vector<8x8x64xf32>
    %65 = arith.addf %58, %64 : vector<8x8x64xf32>
    %66 = vector.extract_strided_slice %16 {offsets = [2, 1, 0], sizes = [8, 8, 64], strides = [1, 1, 1]} : vector<10x10x64xf32> to vector<8x8x64xf32>
    %67 = vector.extract_strided_slice %17 {offsets = [2, 1, 0], sizes = [1, 1, 64], strides = [1, 1, 1]} : vector<3x3x64xf32> to vector<1x1x64xf32>
    %68 = vector.shape_cast %67 : vector<1x1x64xf32> to vector<64xf32>
    %69 = vector.shape_cast %68 : vector<64xf32> to vector<1x1x64xf32>
    %70 = vector.broadcast %69 : vector<1x1x64xf32> to vector<8x8x64xf32>
    %71 = arith.mulf %66, %70 : vector<8x8x64xf32>
    %72 = arith.addf %65, %71 : vector<8x8x64xf32>
    %73 = vector.extract_strided_slice %16 {offsets = [2, 2, 0], sizes = [8, 8, 64], strides = [1, 1, 1]} : vector<10x10x64xf32> to vector<8x8x64xf32>
    %74 = vector.extract_strided_slice %17 {offsets = [2, 2, 0], sizes = [1, 1, 64], strides = [1, 1, 1]} : vector<3x3x64xf32> to vector<1x1x64xf32>
    %75 = vector.shape_cast %74 : vector<1x1x64xf32> to vector<64xf32>
    %76 = vector.shape_cast %75 : vector<64xf32> to vector<1x1x64xf32>
    %77 = vector.broadcast %76 : vector<1x1x64xf32> to vector<8x8x64xf32>
    %78 = arith.mulf %73, %77 : vector<8x8x64xf32>
    %79 = arith.addf %72, %78 : vector<8x8x64xf32>
    %80 = vector.shape_cast %79 : vector<8x8x64xf32> to vector<64x64xf32>
    %c0_11 = arith.constant 0 : index
    %c0_12 = arith.constant 0 : index
    %81 = vector.load %arg5[%c0_11, %c0_12] : memref<64x64xf32, #tpu.memory_space<vmem>>, vector<64x64xf32>
    %cst_13 = arith.constant dense<0.000000e+00> : vector<64x64xf32>
    %82 = tpu.matmul %80, %81, %cst_13 {dimension_numbers = #tpu.dot_dimension_numbers<[1], [0], [0], [1], [0, 0, 1, 1], [], []>} : vector<64x64xf32>, vector<64x64xf32>, vector<64x64xf32> -> vector<64x64xf32>
    %c0_14 = arith.constant 0 : index
    %c0_15 = arith.constant 0 : index
    %83 = vector.load %arg6[%c0_14, %c0_15] : memref<1x64xf32, #tpu.memory_space<vmem>>, vector<1x64xf32>
    %84 = vector.broadcast %83 : vector<1x64xf32> to vector<64x64xf32>
    %85 = arith.mulf %82, %84 : vector<64x64xf32>
    %c0_16 = arith.constant 0 : index
    %c0_17 = arith.constant 0 : index
    %86 = vector.load %arg7[%c0_16, %c0_17] : memref<1x64xf32, #tpu.memory_space<vmem>>, vector<1x64xf32>
    %87 = vector.broadcast %86 : vector<1x64xf32> to vector<64x64xf32>
    %88 = arith.addf %85, %87 : vector<64x64xf32>
    %c0_18 = arith.constant 0 : index
    %c0_19 = arith.constant 0 : index
    %c0_20 = arith.constant 0 : index
    %89 = vector.load %arg8[%c0_18, %c0_19, %c0_20] : memref<1x64x64xf32, #tpu.memory_space<vmem>>, vector<1x64x64xf32>
    %90 = vector.shape_cast %89 : vector<1x64x64xf32> to vector<64x64xf32>
    %91 = vector.shape_cast %88 : vector<64x64xf32> to vector<1x64x64xf32>
    tpu.vector_store %arg8[%c0_18, %c0_19, %c0_20], %91 {strides = array<i32>} : memref<1x64x64xf32, #tpu.memory_space<vmem>>, vector<1x64x64xf32>,
    return
  }
  func.func @transform_0(%arg0: i32) -> i32 {
    %c0_i32 = arith.constant 0 : i32
    %c0_i32_0 = arith.constant 0 : i32
    return %c0_i32 : i32
  }
  func.func @transform_1(%arg0: i32) -> (i32, i32, i32, i32) {
    %c0_i32 = arith.constant 0 : i32
    %c0_i32_0 = arith.constant 0 : i32
    %c0_i32_1 = arith.constant 0 : i32
    %c0_i32_2 = arith.constant 0 : i32
    return %arg0, %c0_i32, %c0_i32_0, %c0_i32_1 : i32, i32, i32, i32
  }
  func.func @transform_2(%arg0: i32) -> (i32, i32, i32, i32) {
    %c0_i32 = arith.constant 0 : i32
    %c0_i32_0 = arith.constant 0 : i32
    %c0_i32_1 = arith.constant 0 : i32
    %c0_i32_2 = arith.constant 0 : i32
    return %arg0, %c0_i32, %c0_i32_0, %c0_i32_1 : i32, i32, i32, i32
  }
  func.func @transform_3(%arg0: i32) -> (i32, i32, i32) {
    %c0_i32 = arith.constant 0 : i32
    %c0_i32_0 = arith.constant 0 : i32
    %c0_i32_1 = arith.constant 0 : i32
    %c0_i32_2 = arith.constant 0 : i32
    return %c0_i32, %c0_i32_0, %c0_i32_1 : i32, i32, i32
  }
  func.func @transform_4(%arg0: i32) -> (i32, i32) {
    %c0_i32 = arith.constant 0 : i32
    %c0_i32_0 = arith.constant 0 : i32
    %c0_i32_1 = arith.constant 0 : i32
    return %c0_i32, %c0_i32_0 : i32, i32
  }
  func.func @transform_5(%arg0: i32) -> (i32, i32) {
    %c0_i32 = arith.constant 0 : i32
    %c0_i32_0 = arith.constant 0 : i32
    %c0_i32_1 = arith.constant 0 : i32
    return %c0_i32, %c0_i32_0 : i32, i32
  }
  func.func @transform_6(%arg0: i32) -> (i32, i32) {
    %c0_i32 = arith.constant 0 : i32
    %c0_i32_0 = arith.constant 0 : i32
    %c0_i32_1 = arith.constant 0 : i32
    return %c0_i32, %c0_i32_0 : i32, i32
  }
  func.func @transform_7(%arg0: i32) -> (i32, i32, i32) {
    %c0_i32 = arith.constant 0 : i32
    %c0_i32_0 = arith.constant 0 : i32
    %c0_i32_1 = arith.constant 0 : i32
    return %arg0, %c0_i32, %c0_i32_0 : i32, i32, i32
  }
}

module attributes {stable_mosaic.version = 11 : i64} {
  func.func @kernel(%arg0: i32, %arg1: memref<2xf32, #tpu.memory_space<smem>>, %arg2: memref<1x18x18x64xf32, #tpu.memory_space<vmem>>, %arg3: memref<1x18x18x64xf32, #tpu.memory_space<vmem>>, %arg4: memref<3x3x64xf32, #tpu.memory_space<vmem>>, %arg5: memref<64x64xf32, #tpu.memory_space<vmem>>, %arg6: memref<1x64xf32, #tpu.memory_space<vmem>>, %arg7: memref<1x64xf32, #tpu.memory_space<vmem>>, %arg8: memref<1x256x64xf32, #tpu.memory_space<vmem>>) attributes {dimension_semantics = [#tpu.dimension_semantics<parallel>], iteration_bounds = array<i64: 2>, scalar_prefetch = 0 : i64, scratch_operands = 0 : i64, tpu.core_type = #tpu.core_type<tc>, window_params = [{transform_indices = @transform_0, window_bounds = array<i64: 2>}, {transform_indices = @transform_1, window_bounds = array<i64: 1, 18, 18, 64>}, {transform_indices = @transform_2, window_bounds = array<i64: 1, 18, 18, 64>}, {pipeline_mode = #tpu.pipeline_mode<synchronous>, transform_indices = @transform_3, window_bounds = array<i64: 3, 3, 64>}, {pipeline_mode = #tpu.pipeline_mode<synchronous>, transform_indices = @transform_4, window_bounds = array<i64: 64, 64>}, {pipeline_mode = #tpu.pipeline_mode<synchronous>, transform_indices = @transform_5, window_bounds = array<i64: 1, 64>}, {pipeline_mode = #tpu.pipeline_mode<synchronous>, transform_indices = @transform_6, window_bounds = array<i64: 1, 64>}, {transform_indices = @transform_7, window_bounds = array<i64: 1, 256, 64>}]} {
    %c0 = arith.constant 0 : index
    %0 = memref.load %arg1[%c0] : memref<2xf32, #tpu.memory_space<smem>>
    %c0_0 = arith.constant 0 : index
    %c0_1 = arith.constant 0 : index
    %c0_2 = arith.constant 0 : index
    %c0_3 = arith.constant 0 : index
    %1 = vector.load %arg2[%c0_0, %c0_1, %c0_2, %c0_3] : memref<1x18x18x64xf32, #tpu.memory_space<vmem>>, vector<1x18x18x64xf32>
    %2 = vector.shape_cast %1 : vector<1x18x18x64xf32> to vector<18x18x64xf32>
    %3 = vector.broadcast %0 : f32 to vector<18x18x64xf32>
    %4 = arith.mulf %3, %2 : vector<18x18x64xf32>
    %c1 = arith.constant 1 : index
    %5 = memref.load %arg1[%c1] : memref<2xf32, #tpu.memory_space<smem>>
    %c0_4 = arith.constant 0 : index
    %c0_5 = arith.constant 0 : index
    %c0_6 = arith.constant 0 : index
    %c0_7 = arith.constant 0 : index
    %6 = vector.load %arg3[%c0_4, %c0_5, %c0_6, %c0_7] : memref<1x18x18x64xf32, #tpu.memory_space<vmem>>, vector<1x18x18x64xf32>
    %7 = vector.shape_cast %6 : vector<1x18x18x64xf32> to vector<18x18x64xf32>
    %8 = vector.broadcast %5 : f32 to vector<18x18x64xf32>
    %9 = arith.mulf %8, %7 : vector<18x18x64xf32>
    %10 = arith.addf %4, %9 : vector<18x18x64xf32>
    %11 = arith.negf %10 : vector<18x18x64xf32>
    %12 = math.exp %11 : vector<18x18x64xf32>
    %cst = arith.constant 1.000000e+00 : f32
    %13 = vector.broadcast %cst : f32 to vector<18x18x64xf32>
    %14 = arith.addf %13, %12 : vector<18x18x64xf32>
    %15 = arith.divf %13, %14 : vector<18x18x64xf32>
    %16 = arith.mulf %10, %15 : vector<18x18x64xf32>
    %c0_8 = arith.constant 0 : index
    %c0_9 = arith.constant 0 : index
    %c0_10 = arith.constant 0 : index
    %17 = vector.load %arg4[%c0_8, %c0_9, %c0_10] : memref<3x3x64xf32, #tpu.memory_space<vmem>>, vector<3x3x64xf32>
    %18 = vector.extract_strided_slice %16 {offsets = [0, 0, 0], sizes = [16, 16, 64], strides = [1, 1, 1]} : vector<18x18x64xf32> to vector<16x16x64xf32>
    %19 = vector.extract_strided_slice %17 {offsets = [0, 0, 0], sizes = [1, 1, 64], strides = [1, 1, 1]} : vector<3x3x64xf32> to vector<1x1x64xf32>
    %20 = vector.shape_cast %19 : vector<1x1x64xf32> to vector<64xf32>
    %21 = vector.shape_cast %20 : vector<64xf32> to vector<1x1x64xf32>
    %22 = vector.broadcast %21 : vector<1x1x64xf32> to vector<16x16x64xf32>
    %23 = arith.mulf %18, %22 : vector<16x16x64xf32>
    %24 = vector.extract_strided_slice %16 {offsets = [0, 1, 0], sizes = [16, 16, 64], strides = [1, 1, 1]} : vector<18x18x64xf32> to vector<16x16x64xf32>
    %25 = vector.extract_strided_slice %17 {offsets = [0, 1, 0], sizes = [1, 1, 64], strides = [1, 1, 1]} : vector<3x3x64xf32> to vector<1x1x64xf32>
    %26 = vector.shape_cast %25 : vector<1x1x64xf32> to vector<64xf32>
    %27 = vector.shape_cast %26 : vector<64xf32> to vector<1x1x64xf32>
    %28 = vector.broadcast %27 : vector<1x1x64xf32> to vector<16x16x64xf32>
    %29 = arith.mulf %24, %28 : vector<16x16x64xf32>
    %30 = arith.addf %23, %29 : vector<16x16x64xf32>
    %31 = vector.extract_strided_slice %16 {offsets = [0, 2, 0], sizes = [16, 16, 64], strides = [1, 1, 1]} : vector<18x18x64xf32> to vector<16x16x64xf32>
    %32 = vector.extract_strided_slice %17 {offsets = [0, 2, 0], sizes = [1, 1, 64], strides = [1, 1, 1]} : vector<3x3x64xf32> to vector<1x1x64xf32>
    %33 = vector.shape_cast %32 : vector<1x1x64xf32> to vector<64xf32>
    %34 = vector.shape_cast %33 : vector<64xf32> to vector<1x1x64xf32>
    %35 = vector.broadcast %34 : vector<1x1x64xf32> to vector<16x16x64xf32>
    %36 = arith.mulf %31, %35 : vector<16x16x64xf32>
    %37 = arith.addf %30, %36 : vector<16x16x64xf32>
    %38 = vector.extract_strided_slice %16 {offsets = [1, 0, 0], sizes = [16, 16, 64], strides = [1, 1, 1]} : vector<18x18x64xf32> to vector<16x16x64xf32>
    %39 = vector.extract_strided_slice %17 {offsets = [1, 0, 0], sizes = [1, 1, 64], strides = [1, 1, 1]} : vector<3x3x64xf32> to vector<1x1x64xf32>
    %40 = vector.shape_cast %39 : vector<1x1x64xf32> to vector<64xf32>
    %41 = vector.shape_cast %40 : vector<64xf32> to vector<1x1x64xf32>
    %42 = vector.broadcast %41 : vector<1x1x64xf32> to vector<16x16x64xf32>
    %43 = arith.mulf %38, %42 : vector<16x16x64xf32>
    %44 = arith.addf %37, %43 : vector<16x16x64xf32>
    %45 = vector.extract_strided_slice %16 {offsets = [1, 1, 0], sizes = [16, 16, 64], strides = [1, 1, 1]} : vector<18x18x64xf32> to vector<16x16x64xf32>
    %46 = vector.extract_strided_slice %17 {offsets = [1, 1, 0], sizes = [1, 1, 64], strides = [1, 1, 1]} : vector<3x3x64xf32> to vector<1x1x64xf32>
    %47 = vector.shape_cast %46 : vector<1x1x64xf32> to vector<64xf32>
    %48 = vector.shape_cast %47 : vector<64xf32> to vector<1x1x64xf32>
    %49 = vector.broadcast %48 : vector<1x1x64xf32> to vector<16x16x64xf32>
    %50 = arith.mulf %45, %49 : vector<16x16x64xf32>
    %51 = arith.addf %44, %50 : vector<16x16x64xf32>
    %52 = vector.extract_strided_slice %16 {offsets = [1, 2, 0], sizes = [16, 16, 64], strides = [1, 1, 1]} : vector<18x18x64xf32> to vector<16x16x64xf32>
    %53 = vector.extract_strided_slice %17 {offsets = [1, 2, 0], sizes = [1, 1, 64], strides = [1, 1, 1]} : vector<3x3x64xf32> to vector<1x1x64xf32>
    %54 = vector.shape_cast %53 : vector<1x1x64xf32> to vector<64xf32>
    %55 = vector.shape_cast %54 : vector<64xf32> to vector<1x1x64xf32>
    %56 = vector.broadcast %55 : vector<1x1x64xf32> to vector<16x16x64xf32>
    %57 = arith.mulf %52, %56 : vector<16x16x64xf32>
    %58 = arith.addf %51, %57 : vector<16x16x64xf32>
    %59 = vector.extract_strided_slice %16 {offsets = [2, 0, 0], sizes = [16, 16, 64], strides = [1, 1, 1]} : vector<18x18x64xf32> to vector<16x16x64xf32>
    %60 = vector.extract_strided_slice %17 {offsets = [2, 0, 0], sizes = [1, 1, 64], strides = [1, 1, 1]} : vector<3x3x64xf32> to vector<1x1x64xf32>
    %61 = vector.shape_cast %60 : vector<1x1x64xf32> to vector<64xf32>
    %62 = vector.shape_cast %61 : vector<64xf32> to vector<1x1x64xf32>
    %63 = vector.broadcast %62 : vector<1x1x64xf32> to vector<16x16x64xf32>
    %64 = arith.mulf %59, %63 : vector<16x16x64xf32>
    %65 = arith.addf %58, %64 : vector<16x16x64xf32>
    %66 = vector.extract_strided_slice %16 {offsets = [2, 1, 0], sizes = [16, 16, 64], strides = [1, 1, 1]} : vector<18x18x64xf32> to vector<16x16x64xf32>
    %67 = vector.extract_strided_slice %17 {offsets = [2, 1, 0], sizes = [1, 1, 64], strides = [1, 1, 1]} : vector<3x3x64xf32> to vector<1x1x64xf32>
    %68 = vector.shape_cast %67 : vector<1x1x64xf32> to vector<64xf32>
    %69 = vector.shape_cast %68 : vector<64xf32> to vector<1x1x64xf32>
    %70 = vector.broadcast %69 : vector<1x1x64xf32> to vector<16x16x64xf32>
    %71 = arith.mulf %66, %70 : vector<16x16x64xf32>
    %72 = arith.addf %65, %71 : vector<16x16x64xf32>
    %73 = vector.extract_strided_slice %16 {offsets = [2, 2, 0], sizes = [16, 16, 64], strides = [1, 1, 1]} : vector<18x18x64xf32> to vector<16x16x64xf32>
    %74 = vector.extract_strided_slice %17 {offsets = [2, 2, 0], sizes = [1, 1, 64], strides = [1, 1, 1]} : vector<3x3x64xf32> to vector<1x1x64xf32>
    %75 = vector.shape_cast %74 : vector<1x1x64xf32> to vector<64xf32>
    %76 = vector.shape_cast %75 : vector<64xf32> to vector<1x1x64xf32>
    %77 = vector.broadcast %76 : vector<1x1x64xf32> to vector<16x16x64xf32>
    %78 = arith.mulf %73, %77 : vector<16x16x64xf32>
    %79 = arith.addf %72, %78 : vector<16x16x64xf32>
    %80 = vector.shape_cast %79 : vector<16x16x64xf32> to vector<256x64xf32>
    %c0_11 = arith.constant 0 : index
    %c0_12 = arith.constant 0 : index
    %81 = vector.load %arg5[%c0_11, %c0_12] : memref<64x64xf32, #tpu.memory_space<vmem>>, vector<64x64xf32>
    %cst_13 = arith.constant dense<0.000000e+00> : vector<256x64xf32>
    %82 = tpu.matmul %80, %81, %cst_13 {dimension_numbers = #tpu.dot_dimension_numbers<[1], [0], [0], [1], [0, 0, 1, 1], [], []>} : vector<256x64xf32>, vector<64x64xf32>, vector<256x64xf32> -> vector<256x64xf32>
    %c0_14 = arith.constant 0 : index
    %c0_15 = arith.constant 0 : index
    %83 = vector.load %arg6[%c0_14, %c0_15] : memref<1x64xf32, #tpu.memory_space<vmem>>, vector<1x64xf32>
    %84 = vector.broadcast %83 : vector<1x64xf32> to vector<256x64xf32>
    %85 = arith.mulf %82, %84 : vector<256x64xf32>
    %c0_16 = arith.constant 0 : index
    %c0_17 = arith.constant 0 : index
    %86 = vector.load %arg7[%c0_16, %c0_17] : memref<1x64xf32, #tpu.memory_space<vmem>>, vector<1x64xf32>
    %87 = vector.broadcast %86 : vector<1x64xf32> to vector<256x64xf32>
    %88 = arith.addf %85, %87 : vector<256x64xf32>
    %c0_18 = arith.constant 0 : index
    %c0_19 = arith.constant 0 : index
    %c0_20 = arith.constant 0 : index
    %89 = vector.load %arg8[%c0_18, %c0_19, %c0_20] : memref<1x256x64xf32, #tpu.memory_space<vmem>>, vector<1x256x64xf32>
    %90 = vector.shape_cast %89 : vector<1x256x64xf32> to vector<256x64xf32>
    %91 = vector.shape_cast %88 : vector<256x64xf32> to vector<1x256x64xf32>
    tpu.vector_store %arg8[%c0_18, %c0_19, %c0_20], %91 {strides = array<i32>} : memref<1x256x64xf32, #tpu.memory_space<vmem>>, vector<1x256x64xf32>,
    return
  }
  func.func @transform_0(%arg0: i32) -> i32 {
    %c0_i32 = arith.constant 0 : i32
    %c0_i32_0 = arith.constant 0 : i32
    return %c0_i32 : i32
  }
  func.func @transform_1(%arg0: i32) -> (i32, i32, i32, i32) {
    %c0_i32 = arith.constant 0 : i32
    %c0_i32_0 = arith.constant 0 : i32
    %c0_i32_1 = arith.constant 0 : i32
    %c0_i32_2 = arith.constant 0 : i32
    return %arg0, %c0_i32, %c0_i32_0, %c0_i32_1 : i32, i32, i32, i32
  }
  func.func @transform_2(%arg0: i32) -> (i32, i32, i32, i32) {
    %c0_i32 = arith.constant 0 : i32
    %c0_i32_0 = arith.constant 0 : i32
    %c0_i32_1 = arith.constant 0 : i32
    %c0_i32_2 = arith.constant 0 : i32
    return %arg0, %c0_i32, %c0_i32_0, %c0_i32_1 : i32, i32, i32, i32
  }
  func.func @transform_3(%arg0: i32) -> (i32, i32, i32) {
    %c0_i32 = arith.constant 0 : i32
    %c0_i32_0 = arith.constant 0 : i32
    %c0_i32_1 = arith.constant 0 : i32
    %c0_i32_2 = arith.constant 0 : i32
    return %c0_i32, %c0_i32_0, %c0_i32_1 : i32, i32, i32
  }
  func.func @transform_4(%arg0: i32) -> (i32, i32) {
    %c0_i32 = arith.constant 0 : i32
    %c0_i32_0 = arith.constant 0 : i32
    %c0_i32_1 = arith.constant 0 : i32
    return %c0_i32, %c0_i32_0 : i32, i32
  }
  func.func @transform_5(%arg0: i32) -> (i32, i32) {
    %c0_i32 = arith.constant 0 : i32
    %c0_i32_0 = arith.constant 0 : i32
    %c0_i32_1 = arith.constant 0 : i32
    return %c0_i32, %c0_i32_0 : i32, i32
  }
  func.func @transform_6(%arg0: i32) -> (i32, i32) {
    %c0_i32 = arith.constant 0 : i32
    %c0_i32_0 = arith.constant 0 : i32
    %c0_i32_1 = arith.constant 0 : i32
    return %c0_i32, %c0_i32_0 : i32, i32
  }
  func.func @transform_7(%arg0: i32) -> (i32, i32, i32) {
    %c0_i32 = arith.constant 0 : i32
    %c0_i32_0 = arith.constant 0 : i32
    %c0_i32_1 = arith.constant 0 : i32
    return %arg0, %c0_i32, %c0_i32_0 : i32, i32, i32
  }
}

module attributes {stable_mosaic.version = 11 : i64} {
  func.func @kernel(%arg0: i32, %arg1: memref<3xf32, #tpu.memory_space<smem>>, %arg2: memref<1x10x10x64xf32, #tpu.memory_space<vmem>>, %arg3: memref<1x10x10x64xf32, #tpu.memory_space<vmem>>, %arg4: memref<1x10x10x64xf32, #tpu.memory_space<vmem>>, %arg5: memref<3x3x64xf32, #tpu.memory_space<vmem>>, %arg6: memref<64x64xf32, #tpu.memory_space<vmem>>, %arg7: memref<1x64xf32, #tpu.memory_space<vmem>>, %arg8: memref<1x64xf32, #tpu.memory_space<vmem>>, %arg9: memref<1x64x64xf32, #tpu.memory_space<vmem>>) attributes {dimension_semantics = [#tpu.dimension_semantics<parallel>], iteration_bounds = array<i64: 2>, scalar_prefetch = 0 : i64, scratch_operands = 0 : i64, tpu.core_type = #tpu.core_type<tc>, window_params = [{transform_indices = @transform_0, window_bounds = array<i64: 3>}, {transform_indices = @transform_1, window_bounds = array<i64: 1, 10, 10, 64>}, {transform_indices = @transform_2, window_bounds = array<i64: 1, 10, 10, 64>}, {transform_indices = @transform_3, window_bounds = array<i64: 1, 10, 10, 64>}, {pipeline_mode = #tpu.pipeline_mode<synchronous>, transform_indices = @transform_4, window_bounds = array<i64: 3, 3, 64>}, {pipeline_mode = #tpu.pipeline_mode<synchronous>, transform_indices = @transform_5, window_bounds = array<i64: 64, 64>}, {pipeline_mode = #tpu.pipeline_mode<synchronous>, transform_indices = @transform_6, window_bounds = array<i64: 1, 64>}, {pipeline_mode = #tpu.pipeline_mode<synchronous>, transform_indices = @transform_7, window_bounds = array<i64: 1, 64>}, {transform_indices = @transform_8, window_bounds = array<i64: 1, 64, 64>}]} {
    %c0 = arith.constant 0 : index
    %0 = memref.load %arg1[%c0] : memref<3xf32, #tpu.memory_space<smem>>
    %c0_0 = arith.constant 0 : index
    %c0_1 = arith.constant 0 : index
    %c0_2 = arith.constant 0 : index
    %c0_3 = arith.constant 0 : index
    %1 = vector.load %arg2[%c0_0, %c0_1, %c0_2, %c0_3] : memref<1x10x10x64xf32, #tpu.memory_space<vmem>>, vector<1x10x10x64xf32>
    %2 = vector.shape_cast %1 : vector<1x10x10x64xf32> to vector<10x10x64xf32>
    %3 = vector.broadcast %0 : f32 to vector<10x10x64xf32>
    %4 = arith.mulf %3, %2 : vector<10x10x64xf32>
    %c1 = arith.constant 1 : index
    %5 = memref.load %arg1[%c1] : memref<3xf32, #tpu.memory_space<smem>>
    %c0_4 = arith.constant 0 : index
    %c0_5 = arith.constant 0 : index
    %c0_6 = arith.constant 0 : index
    %c0_7 = arith.constant 0 : index
    %6 = vector.load %arg3[%c0_4, %c0_5, %c0_6, %c0_7] : memref<1x10x10x64xf32, #tpu.memory_space<vmem>>, vector<1x10x10x64xf32>
    %7 = vector.shape_cast %6 : vector<1x10x10x64xf32> to vector<10x10x64xf32>
    %8 = vector.broadcast %5 : f32 to vector<10x10x64xf32>
    %9 = arith.mulf %8, %7 : vector<10x10x64xf32>
    %10 = arith.addf %4, %9 : vector<10x10x64xf32>
    %c2 = arith.constant 2 : index
    %11 = memref.load %arg1[%c2] : memref<3xf32, #tpu.memory_space<smem>>
    %c0_8 = arith.constant 0 : index
    %c0_9 = arith.constant 0 : index
    %c0_10 = arith.constant 0 : index
    %c0_11 = arith.constant 0 : index
    %12 = vector.load %arg4[%c0_8, %c0_9, %c0_10, %c0_11] : memref<1x10x10x64xf32, #tpu.memory_space<vmem>>, vector<1x10x10x64xf32>
    %13 = vector.shape_cast %12 : vector<1x10x10x64xf32> to vector<10x10x64xf32>
    %14 = vector.broadcast %11 : f32 to vector<10x10x64xf32>
    %15 = arith.mulf %14, %13 : vector<10x10x64xf32>
    %16 = arith.addf %10, %15 : vector<10x10x64xf32>
    %17 = arith.negf %16 : vector<10x10x64xf32>
    %18 = math.exp %17 : vector<10x10x64xf32>
    %cst = arith.constant 1.000000e+00 : f32
    %19 = vector.broadcast %cst : f32 to vector<10x10x64xf32>
    %20 = arith.addf %19, %18 : vector<10x10x64xf32>
    %21 = arith.divf %19, %20 : vector<10x10x64xf32>
    %22 = arith.mulf %16, %21 : vector<10x10x64xf32>
    %c0_12 = arith.constant 0 : index
    %c0_13 = arith.constant 0 : index
    %c0_14 = arith.constant 0 : index
    %23 = vector.load %arg5[%c0_12, %c0_13, %c0_14] : memref<3x3x64xf32, #tpu.memory_space<vmem>>, vector<3x3x64xf32>
    %24 = vector.extract_strided_slice %22 {offsets = [0, 0, 0], sizes = [8, 8, 64], strides = [1, 1, 1]} : vector<10x10x64xf32> to vector<8x8x64xf32>
    %25 = vector.extract_strided_slice %23 {offsets = [0, 0, 0], sizes = [1, 1, 64], strides = [1, 1, 1]} : vector<3x3x64xf32> to vector<1x1x64xf32>
    %26 = vector.shape_cast %25 : vector<1x1x64xf32> to vector<64xf32>
    %27 = vector.shape_cast %26 : vector<64xf32> to vector<1x1x64xf32>
    %28 = vector.broadcast %27 : vector<1x1x64xf32> to vector<8x8x64xf32>
    %29 = arith.mulf %24, %28 : vector<8x8x64xf32>
    %30 = vector.extract_strided_slice %22 {offsets = [0, 1, 0], sizes = [8, 8, 64], strides = [1, 1, 1]} : vector<10x10x64xf32> to vector<8x8x64xf32>
    %31 = vector.extract_strided_slice %23 {offsets = [0, 1, 0], sizes = [1, 1, 64], strides = [1, 1, 1]} : vector<3x3x64xf32> to vector<1x1x64xf32>
    %32 = vector.shape_cast %31 : vector<1x1x64xf32> to vector<64xf32>
    %33 = vector.shape_cast %32 : vector<64xf32> to vector<1x1x64xf32>
    %34 = vector.broadcast %33 : vector<1x1x64xf32> to vector<8x8x64xf32>
    %35 = arith.mulf %30, %34 : vector<8x8x64xf32>
    %36 = arith.addf %29, %35 : vector<8x8x64xf32>
    %37 = vector.extract_strided_slice %22 {offsets = [0, 2, 0], sizes = [8, 8, 64], strides = [1, 1, 1]} : vector<10x10x64xf32> to vector<8x8x64xf32>
    %38 = vector.extract_strided_slice %23 {offsets = [0, 2, 0], sizes = [1, 1, 64], strides = [1, 1, 1]} : vector<3x3x64xf32> to vector<1x1x64xf32>
    %39 = vector.shape_cast %38 : vector<1x1x64xf32> to vector<64xf32>
    %40 = vector.shape_cast %39 : vector<64xf32> to vector<1x1x64xf32>
    %41 = vector.broadcast %40 : vector<1x1x64xf32> to vector<8x8x64xf32>
    %42 = arith.mulf %37, %41 : vector<8x8x64xf32>
    %43 = arith.addf %36, %42 : vector<8x8x64xf32>
    %44 = vector.extract_strided_slice %22 {offsets = [1, 0, 0], sizes = [8, 8, 64], strides = [1, 1, 1]} : vector<10x10x64xf32> to vector<8x8x64xf32>
    %45 = vector.extract_strided_slice %23 {offsets = [1, 0, 0], sizes = [1, 1, 64], strides = [1, 1, 1]} : vector<3x3x64xf32> to vector<1x1x64xf32>
    %46 = vector.shape_cast %45 : vector<1x1x64xf32> to vector<64xf32>
    %47 = vector.shape_cast %46 : vector<64xf32> to vector<1x1x64xf32>
    %48 = vector.broadcast %47 : vector<1x1x64xf32> to vector<8x8x64xf32>
    %49 = arith.mulf %44, %48 : vector<8x8x64xf32>
    %50 = arith.addf %43, %49 : vector<8x8x64xf32>
    %51 = vector.extract_strided_slice %22 {offsets = [1, 1, 0], sizes = [8, 8, 64], strides = [1, 1, 1]} : vector<10x10x64xf32> to vector<8x8x64xf32>
    %52 = vector.extract_strided_slice %23 {offsets = [1, 1, 0], sizes = [1, 1, 64], strides = [1, 1, 1]} : vector<3x3x64xf32> to vector<1x1x64xf32>
    %53 = vector.shape_cast %52 : vector<1x1x64xf32> to vector<64xf32>
    %54 = vector.shape_cast %53 : vector<64xf32> to vector<1x1x64xf32>
    %55 = vector.broadcast %54 : vector<1x1x64xf32> to vector<8x8x64xf32>
    %56 = arith.mulf %51, %55 : vector<8x8x64xf32>
    %57 = arith.addf %50, %56 : vector<8x8x64xf32>
    %58 = vector.extract_strided_slice %22 {offsets = [1, 2, 0], sizes = [8, 8, 64], strides = [1, 1, 1]} : vector<10x10x64xf32> to vector<8x8x64xf32>
    %59 = vector.extract_strided_slice %23 {offsets = [1, 2, 0], sizes = [1, 1, 64], strides = [1, 1, 1]} : vector<3x3x64xf32> to vector<1x1x64xf32>
    %60 = vector.shape_cast %59 : vector<1x1x64xf32> to vector<64xf32>
    %61 = vector.shape_cast %60 : vector<64xf32> to vector<1x1x64xf32>
    %62 = vector.broadcast %61 : vector<1x1x64xf32> to vector<8x8x64xf32>
    %63 = arith.mulf %58, %62 : vector<8x8x64xf32>
    %64 = arith.addf %57, %63 : vector<8x8x64xf32>
    %65 = vector.extract_strided_slice %22 {offsets = [2, 0, 0], sizes = [8, 8, 64], strides = [1, 1, 1]} : vector<10x10x64xf32> to vector<8x8x64xf32>
    %66 = vector.extract_strided_slice %23 {offsets = [2, 0, 0], sizes = [1, 1, 64], strides = [1, 1, 1]} : vector<3x3x64xf32> to vector<1x1x64xf32>
    %67 = vector.shape_cast %66 : vector<1x1x64xf32> to vector<64xf32>
    %68 = vector.shape_cast %67 : vector<64xf32> to vector<1x1x64xf32>
    %69 = vector.broadcast %68 : vector<1x1x64xf32> to vector<8x8x64xf32>
    %70 = arith.mulf %65, %69 : vector<8x8x64xf32>
    %71 = arith.addf %64, %70 : vector<8x8x64xf32>
    %72 = vector.extract_strided_slice %22 {offsets = [2, 1, 0], sizes = [8, 8, 64], strides = [1, 1, 1]} : vector<10x10x64xf32> to vector<8x8x64xf32>
    %73 = vector.extract_strided_slice %23 {offsets = [2, 1, 0], sizes = [1, 1, 64], strides = [1, 1, 1]} : vector<3x3x64xf32> to vector<1x1x64xf32>
    %74 = vector.shape_cast %73 : vector<1x1x64xf32> to vector<64xf32>
    %75 = vector.shape_cast %74 : vector<64xf32> to vector<1x1x64xf32>
    %76 = vector.broadcast %75 : vector<1x1x64xf32> to vector<8x8x64xf32>
    %77 = arith.mulf %72, %76 : vector<8x8x64xf32>
    %78 = arith.addf %71, %77 : vector<8x8x64xf32>
    %79 = vector.extract_strided_slice %22 {offsets = [2, 2, 0], sizes = [8, 8, 64], strides = [1, 1, 1]} : vector<10x10x64xf32> to vector<8x8x64xf32>
    %80 = vector.extract_strided_slice %23 {offsets = [2, 2, 0], sizes = [1, 1, 64], strides = [1, 1, 1]} : vector<3x3x64xf32> to vector<1x1x64xf32>
    %81 = vector.shape_cast %80 : vector<1x1x64xf32> to vector<64xf32>
    %82 = vector.shape_cast %81 : vector<64xf32> to vector<1x1x64xf32>
    %83 = vector.broadcast %82 : vector<1x1x64xf32> to vector<8x8x64xf32>
    %84 = arith.mulf %79, %83 : vector<8x8x64xf32>
    %85 = arith.addf %78, %84 : vector<8x8x64xf32>
    %86 = vector.shape_cast %85 : vector<8x8x64xf32> to vector<64x64xf32>
    %c0_15 = arith.constant 0 : index
    %c0_16 = arith.constant 0 : index
    %87 = vector.load %arg6[%c0_15, %c0_16] : memref<64x64xf32, #tpu.memory_space<vmem>>, vector<64x64xf32>
    %cst_17 = arith.constant dense<0.000000e+00> : vector<64x64xf32>
    %88 = tpu.matmul %86, %87, %cst_17 {dimension_numbers = #tpu.dot_dimension_numbers<[1], [0], [0], [1], [0, 0, 1, 1], [], []>} : vector<64x64xf32>, vector<64x64xf32>, vector<64x64xf32> -> vector<64x64xf32>
    %c0_18 = arith.constant 0 : index
    %c0_19 = arith.constant 0 : index
    %89 = vector.load %arg7[%c0_18, %c0_19] : memref<1x64xf32, #tpu.memory_space<vmem>>, vector<1x64xf32>
    %90 = vector.broadcast %89 : vector<1x64xf32> to vector<64x64xf32>
    %91 = arith.mulf %88, %90 : vector<64x64xf32>
    %c0_20 = arith.constant 0 : index
    %c0_21 = arith.constant 0 : index
    %92 = vector.load %arg8[%c0_20, %c0_21] : memref<1x64xf32, #tpu.memory_space<vmem>>, vector<1x64xf32>
    %93 = vector.broadcast %92 : vector<1x64xf32> to vector<64x64xf32>
    %94 = arith.addf %91, %93 : vector<64x64xf32>
    %c0_22 = arith.constant 0 : index
    %c0_23 = arith.constant 0 : index
    %c0_24 = arith.constant 0 : index
    %95 = vector.load %arg9[%c0_22, %c0_23, %c0_24] : memref<1x64x64xf32, #tpu.memory_space<vmem>>, vector<1x64x64xf32>
    %96 = vector.shape_cast %95 : vector<1x64x64xf32> to vector<64x64xf32>
    %97 = vector.shape_cast %94 : vector<64x64xf32> to vector<1x64x64xf32>
    tpu.vector_store %arg9[%c0_22, %c0_23, %c0_24], %97 {strides = array<i32>} : memref<1x64x64xf32, #tpu.memory_space<vmem>>, vector<1x64x64xf32>,
    return
  }
  func.func @transform_0(%arg0: i32) -> i32 {
    %c0_i32 = arith.constant 0 : i32
    %c0_i32_0 = arith.constant 0 : i32
    return %c0_i32 : i32
  }
  func.func @transform_1(%arg0: i32) -> (i32, i32, i32, i32) {
    %c0_i32 = arith.constant 0 : i32
    %c0_i32_0 = arith.constant 0 : i32
    %c0_i32_1 = arith.constant 0 : i32
    %c0_i32_2 = arith.constant 0 : i32
    return %arg0, %c0_i32, %c0_i32_0, %c0_i32_1 : i32, i32, i32, i32
  }
  func.func @transform_2(%arg0: i32) -> (i32, i32, i32, i32) {
    %c0_i32 = arith.constant 0 : i32
    %c0_i32_0 = arith.constant 0 : i32
    %c0_i32_1 = arith.constant 0 : i32
    %c0_i32_2 = arith.constant 0 : i32
    return %arg0, %c0_i32, %c0_i32_0, %c0_i32_1 : i32, i32, i32, i32
  }
  func.func @transform_3(%arg0: i32) -> (i32, i32, i32, i32) {
    %c0_i32 = arith.constant 0 : i32
    %c0_i32_0 = arith.constant 0 : i32
    %c0_i32_1 = arith.constant 0 : i32
    %c0_i32_2 = arith.constant 0 : i32
    return %arg0, %c0_i32, %c0_i32_0, %c0_i32_1 : i32, i32, i32, i32
  }
  func.func @transform_4(%arg0: i32) -> (i32, i32, i32) {
    %c0_i32 = arith.constant 0 : i32
    %c0_i32_0 = arith.constant 0 : i32
    %c0_i32_1 = arith.constant 0 : i32
    %c0_i32_2 = arith.constant 0 : i32
    return %c0_i32, %c0_i32_0, %c0_i32_1 : i32, i32, i32
  }
  func.func @transform_5(%arg0: i32) -> (i32, i32) {
    %c0_i32 = arith.constant 0 : i32
    %c0_i32_0 = arith.constant 0 : i32
    %c0_i32_1 = arith.constant 0 : i32
    return %c0_i32, %c0_i32_0 : i32, i32
  }
  func.func @transform_6(%arg0: i32) -> (i32, i32) {
    %c0_i32 = arith.constant 0 : i32
    %c0_i32_0 = arith.constant 0 : i32
    %c0_i32_1 = arith.constant 0 : i32
    return %c0_i32, %c0_i32_0 : i32, i32
  }
  func.func @transform_7(%arg0: i32) -> (i32, i32) {
    %c0_i32 = arith.constant 0 : i32
    %c0_i32_0 = arith.constant 0 : i32
    %c0_i32_1 = arith.constant 0 : i32
    return %c0_i32, %c0_i32_0 : i32, i32
  }
  func.func @transform_8(%arg0: i32) -> (i32, i32, i32) {
    %c0_i32 = arith.constant 0 : i32
    %c0_i32_0 = arith.constant 0 : i32
    %c0_i32_1 = arith.constant 0 : i32
    return %arg0, %c0_i32, %c0_i32_0 : i32, i32, i32
  }
}

module attributes {stable_mosaic.version = 11 : i64} {
  func.func @kernel(%arg0: i32, %arg1: memref<2xf32, #tpu.memory_space<smem>>, %arg2: memref<1x6x6x64xf32, #tpu.memory_space<vmem>>, %arg3: memref<1x6x6x64xf32, #tpu.memory_space<vmem>>, %arg4: memref<3x3x64xf32, #tpu.memory_space<vmem>>, %arg5: memref<64x64xf32, #tpu.memory_space<vmem>>, %arg6: memref<1x64xf32, #tpu.memory_space<vmem>>, %arg7: memref<1x64xf32, #tpu.memory_space<vmem>>, %arg8: memref<1x16x64xf32, #tpu.memory_space<vmem>>) attributes {dimension_semantics = [#tpu.dimension_semantics<parallel>], iteration_bounds = array<i64: 2>, scalar_prefetch = 0 : i64, scratch_operands = 0 : i64, tpu.core_type = #tpu.core_type<tc>, window_params = [{transform_indices = @transform_0, window_bounds = array<i64: 2>}, {transform_indices = @transform_1, window_bounds = array<i64: 1, 6, 6, 64>}, {transform_indices = @transform_2, window_bounds = array<i64: 1, 6, 6, 64>}, {pipeline_mode = #tpu.pipeline_mode<synchronous>, transform_indices = @transform_3, window_bounds = array<i64: 3, 3, 64>}, {pipeline_mode = #tpu.pipeline_mode<synchronous>, transform_indices = @transform_4, window_bounds = array<i64: 64, 64>}, {pipeline_mode = #tpu.pipeline_mode<synchronous>, transform_indices = @transform_5, window_bounds = array<i64: 1, 64>}, {pipeline_mode = #tpu.pipeline_mode<synchronous>, transform_indices = @transform_6, window_bounds = array<i64: 1, 64>}, {transform_indices = @transform_7, window_bounds = array<i64: 1, 16, 64>}]} {
    %c0 = arith.constant 0 : index
    %0 = memref.load %arg1[%c0] : memref<2xf32, #tpu.memory_space<smem>>
    %c0_0 = arith.constant 0 : index
    %c0_1 = arith.constant 0 : index
    %c0_2 = arith.constant 0 : index
    %c0_3 = arith.constant 0 : index
    %1 = vector.load %arg2[%c0_0, %c0_1, %c0_2, %c0_3] : memref<1x6x6x64xf32, #tpu.memory_space<vmem>>, vector<1x6x6x64xf32>
    %2 = vector.shape_cast %1 : vector<1x6x6x64xf32> to vector<6x6x64xf32>
    %3 = vector.broadcast %0 : f32 to vector<6x6x64xf32>
    %4 = arith.mulf %3, %2 : vector<6x6x64xf32>
    %c1 = arith.constant 1 : index
    %5 = memref.load %arg1[%c1] : memref<2xf32, #tpu.memory_space<smem>>
    %c0_4 = arith.constant 0 : index
    %c0_5 = arith.constant 0 : index
    %c0_6 = arith.constant 0 : index
    %c0_7 = arith.constant 0 : index
    %6 = vector.load %arg3[%c0_4, %c0_5, %c0_6, %c0_7] : memref<1x6x6x64xf32, #tpu.memory_space<vmem>>, vector<1x6x6x64xf32>
    %7 = vector.shape_cast %6 : vector<1x6x6x64xf32> to vector<6x6x64xf32>
    %8 = vector.broadcast %5 : f32 to vector<6x6x64xf32>
    %9 = arith.mulf %8, %7 : vector<6x6x64xf32>
    %10 = arith.addf %4, %9 : vector<6x6x64xf32>
    %11 = arith.negf %10 : vector<6x6x64xf32>
    %12 = math.exp %11 : vector<6x6x64xf32>
    %cst = arith.constant 1.000000e+00 : f32
    %13 = vector.broadcast %cst : f32 to vector<6x6x64xf32>
    %14 = arith.addf %13, %12 : vector<6x6x64xf32>
    %15 = arith.divf %13, %14 : vector<6x6x64xf32>
    %16 = arith.mulf %10, %15 : vector<6x6x64xf32>
    %c0_8 = arith.constant 0 : index
    %c0_9 = arith.constant 0 : index
    %c0_10 = arith.constant 0 : index
    %17 = vector.load %arg4[%c0_8, %c0_9, %c0_10] : memref<3x3x64xf32, #tpu.memory_space<vmem>>, vector<3x3x64xf32>
    %18 = vector.extract_strided_slice %16 {offsets = [0, 0, 0], sizes = [4, 4, 64], strides = [1, 1, 1]} : vector<6x6x64xf32> to vector<4x4x64xf32>
    %19 = vector.extract_strided_slice %17 {offsets = [0, 0, 0], sizes = [1, 1, 64], strides = [1, 1, 1]} : vector<3x3x64xf32> to vector<1x1x64xf32>
    %20 = vector.shape_cast %19 : vector<1x1x64xf32> to vector<64xf32>
    %21 = vector.shape_cast %20 : vector<64xf32> to vector<1x1x64xf32>
    %22 = vector.broadcast %21 : vector<1x1x64xf32> to vector<4x4x64xf32>
    %23 = arith.mulf %18, %22 : vector<4x4x64xf32>
    %24 = vector.extract_strided_slice %16 {offsets = [0, 1, 0], sizes = [4, 4, 64], strides = [1, 1, 1]} : vector<6x6x64xf32> to vector<4x4x64xf32>
    %25 = vector.extract_strided_slice %17 {offsets = [0, 1, 0], sizes = [1, 1, 64], strides = [1, 1, 1]} : vector<3x3x64xf32> to vector<1x1x64xf32>
    %26 = vector.shape_cast %25 : vector<1x1x64xf32> to vector<64xf32>
    %27 = vector.shape_cast %26 : vector<64xf32> to vector<1x1x64xf32>
    %28 = vector.broadcast %27 : vector<1x1x64xf32> to vector<4x4x64xf32>
    %29 = arith.mulf %24, %28 : vector<4x4x64xf32>
    %30 = arith.addf %23, %29 : vector<4x4x64xf32>
    %31 = vector.extract_strided_slice %16 {offsets = [0, 2, 0], sizes = [4, 4, 64], strides = [1, 1, 1]} : vector<6x6x64xf32> to vector<4x4x64xf32>
    %32 = vector.extract_strided_slice %17 {offsets = [0, 2, 0], sizes = [1, 1, 64], strides = [1, 1, 1]} : vector<3x3x64xf32> to vector<1x1x64xf32>
    %33 = vector.shape_cast %32 : vector<1x1x64xf32> to vector<64xf32>
    %34 = vector.shape_cast %33 : vector<64xf32> to vector<1x1x64xf32>
    %35 = vector.broadcast %34 : vector<1x1x64xf32> to vector<4x4x64xf32>
    %36 = arith.mulf %31, %35 : vector<4x4x64xf32>
    %37 = arith.addf %30, %36 : vector<4x4x64xf32>
    %38 = vector.extract_strided_slice %16 {offsets = [1, 0, 0], sizes = [4, 4, 64], strides = [1, 1, 1]} : vector<6x6x64xf32> to vector<4x4x64xf32>
    %39 = vector.extract_strided_slice %17 {offsets = [1, 0, 0], sizes = [1, 1, 64], strides = [1, 1, 1]} : vector<3x3x64xf32> to vector<1x1x64xf32>
    %40 = vector.shape_cast %39 : vector<1x1x64xf32> to vector<64xf32>
    %41 = vector.shape_cast %40 : vector<64xf32> to vector<1x1x64xf32>
    %42 = vector.broadcast %41 : vector<1x1x64xf32> to vector<4x4x64xf32>
    %43 = arith.mulf %38, %42 : vector<4x4x64xf32>
    %44 = arith.addf %37, %43 : vector<4x4x64xf32>
    %45 = vector.extract_strided_slice %16 {offsets = [1, 1, 0], sizes = [4, 4, 64], strides = [1, 1, 1]} : vector<6x6x64xf32> to vector<4x4x64xf32>
    %46 = vector.extract_strided_slice %17 {offsets = [1, 1, 0], sizes = [1, 1, 64], strides = [1, 1, 1]} : vector<3x3x64xf32> to vector<1x1x64xf32>
    %47 = vector.shape_cast %46 : vector<1x1x64xf32> to vector<64xf32>
    %48 = vector.shape_cast %47 : vector<64xf32> to vector<1x1x64xf32>
    %49 = vector.broadcast %48 : vector<1x1x64xf32> to vector<4x4x64xf32>
    %50 = arith.mulf %45, %49 : vector<4x4x64xf32>
    %51 = arith.addf %44, %50 : vector<4x4x64xf32>
    %52 = vector.extract_strided_slice %16 {offsets = [1, 2, 0], sizes = [4, 4, 64], strides = [1, 1, 1]} : vector<6x6x64xf32> to vector<4x4x64xf32>
    %53 = vector.extract_strided_slice %17 {offsets = [1, 2, 0], sizes = [1, 1, 64], strides = [1, 1, 1]} : vector<3x3x64xf32> to vector<1x1x64xf32>
    %54 = vector.shape_cast %53 : vector<1x1x64xf32> to vector<64xf32>
    %55 = vector.shape_cast %54 : vector<64xf32> to vector<1x1x64xf32>
    %56 = vector.broadcast %55 : vector<1x1x64xf32> to vector<4x4x64xf32>
    %57 = arith.mulf %52, %56 : vector<4x4x64xf32>
    %58 = arith.addf %51, %57 : vector<4x4x64xf32>
    %59 = vector.extract_strided_slice %16 {offsets = [2, 0, 0], sizes = [4, 4, 64], strides = [1, 1, 1]} : vector<6x6x64xf32> to vector<4x4x64xf32>
    %60 = vector.extract_strided_slice %17 {offsets = [2, 0, 0], sizes = [1, 1, 64], strides = [1, 1, 1]} : vector<3x3x64xf32> to vector<1x1x64xf32>
    %61 = vector.shape_cast %60 : vector<1x1x64xf32> to vector<64xf32>
    %62 = vector.shape_cast %61 : vector<64xf32> to vector<1x1x64xf32>
    %63 = vector.broadcast %62 : vector<1x1x64xf32> to vector<4x4x64xf32>
    %64 = arith.mulf %59, %63 : vector<4x4x64xf32>
    %65 = arith.addf %58, %64 : vector<4x4x64xf32>
    %66 = vector.extract_strided_slice %16 {offsets = [2, 1, 0], sizes = [4, 4, 64], strides = [1, 1, 1]} : vector<6x6x64xf32> to vector<4x4x64xf32>
    %67 = vector.extract_strided_slice %17 {offsets = [2, 1, 0], sizes = [1, 1, 64], strides = [1, 1, 1]} : vector<3x3x64xf32> to vector<1x1x64xf32>
    %68 = vector.shape_cast %67 : vector<1x1x64xf32> to vector<64xf32>
    %69 = vector.shape_cast %68 : vector<64xf32> to vector<1x1x64xf32>
    %70 = vector.broadcast %69 : vector<1x1x64xf32> to vector<4x4x64xf32>
    %71 = arith.mulf %66, %70 : vector<4x4x64xf32>
    %72 = arith.addf %65, %71 : vector<4x4x64xf32>
    %73 = vector.extract_strided_slice %16 {offsets = [2, 2, 0], sizes = [4, 4, 64], strides = [1, 1, 1]} : vector<6x6x64xf32> to vector<4x4x64xf32>
    %74 = vector.extract_strided_slice %17 {offsets = [2, 2, 0], sizes = [1, 1, 64], strides = [1, 1, 1]} : vector<3x3x64xf32> to vector<1x1x64xf32>
    %75 = vector.shape_cast %74 : vector<1x1x64xf32> to vector<64xf32>
    %76 = vector.shape_cast %75 : vector<64xf32> to vector<1x1x64xf32>
    %77 = vector.broadcast %76 : vector<1x1x64xf32> to vector<4x4x64xf32>
    %78 = arith.mulf %73, %77 : vector<4x4x64xf32>
    %79 = arith.addf %72, %78 : vector<4x4x64xf32>
    %80 = vector.shape_cast %79 : vector<4x4x64xf32> to vector<16x64xf32>
    %c0_11 = arith.constant 0 : index
    %c0_12 = arith.constant 0 : index
    %81 = vector.load %arg5[%c0_11, %c0_12] : memref<64x64xf32, #tpu.memory_space<vmem>>, vector<64x64xf32>
    %cst_13 = arith.constant dense<0.000000e+00> : vector<16x64xf32>
    %82 = tpu.matmul %80, %81, %cst_13 {dimension_numbers = #tpu.dot_dimension_numbers<[1], [0], [0], [1], [0, 0, 1, 1], [], []>} : vector<16x64xf32>, vector<64x64xf32>, vector<16x64xf32> -> vector<16x64xf32>
    %c0_14 = arith.constant 0 : index
    %c0_15 = arith.constant 0 : index
    %83 = vector.load %arg6[%c0_14, %c0_15] : memref<1x64xf32, #tpu.memory_space<vmem>>, vector<1x64xf32>
    %84 = vector.broadcast %83 : vector<1x64xf32> to vector<16x64xf32>
    %85 = arith.mulf %82, %84 : vector<16x64xf32>
    %c0_16 = arith.constant 0 : index
    %c0_17 = arith.constant 0 : index
    %86 = vector.load %arg7[%c0_16, %c0_17] : memref<1x64xf32, #tpu.memory_space<vmem>>, vector<1x64xf32>
    %87 = vector.broadcast %86 : vector<1x64xf32> to vector<16x64xf32>
    %88 = arith.addf %85, %87 : vector<16x64xf32>
    %c0_18 = arith.constant 0 : index
    %c0_19 = arith.constant 0 : index
    %c0_20 = arith.constant 0 : index
    %89 = vector.load %arg8[%c0_18, %c0_19, %c0_20] : memref<1x16x64xf32, #tpu.memory_space<vmem>>, vector<1x16x64xf32>
    %90 = vector.shape_cast %89 : vector<1x16x64xf32> to vector<16x64xf32>
    %91 = vector.shape_cast %88 : vector<16x64xf32> to vector<1x16x64xf32>
    tpu.vector_store %arg8[%c0_18, %c0_19, %c0_20], %91 {strides = array<i32>} : memref<1x16x64xf32, #tpu.memory_space<vmem>>, vector<1x16x64xf32>,
    return
  }
  func.func @transform_0(%arg0: i32) -> i32 {
    %c0_i32 = arith.constant 0 : i32
    %c0_i32_0 = arith.constant 0 : i32
    return %c0_i32 : i32
  }
  func.func @transform_1(%arg0: i32) -> (i32, i32, i32, i32) {
    %c0_i32 = arith.constant 0 : i32
    %c0_i32_0 = arith.constant 0 : i32
    %c0_i32_1 = arith.constant 0 : i32
    %c0_i32_2 = arith.constant 0 : i32
    return %arg0, %c0_i32, %c0_i32_0, %c0_i32_1 : i32, i32, i32, i32
  }
  func.func @transform_2(%arg0: i32) -> (i32, i32, i32, i32) {
    %c0_i32 = arith.constant 0 : i32
    %c0_i32_0 = arith.constant 0 : i32
    %c0_i32_1 = arith.constant 0 : i32
    %c0_i32_2 = arith.constant 0 : i32
    return %arg0, %c0_i32, %c0_i32_0, %c0_i32_1 : i32, i32, i32, i32
  }
  func.func @transform_3(%arg0: i32) -> (i32, i32, i32) {
    %c0_i32 = arith.constant 0 : i32
    %c0_i32_0 = arith.constant 0 : i32
    %c0_i32_1 = arith.constant 0 : i32
    %c0_i32_2 = arith.constant 0 : i32
    return %c0_i32, %c0_i32_0, %c0_i32_1 : i32, i32, i32
  }
  func.func @transform_4(%arg0: i32) -> (i32, i32) {
    %c0_i32 = arith.constant 0 : i32
    %c0_i32_0 = arith.constant 0 : i32
    %c0_i32_1 = arith.constant 0 : i32
    return %c0_i32, %c0_i32_0 : i32, i32
  }
  func.func @transform_5(%arg0: i32) -> (i32, i32) {
    %c0_i32 = arith.constant 0 : i32
    %c0_i32_0 = arith.constant 0 : i32
    %c0_i32_1 = arith.constant 0 : i32
    return %c0_i32, %c0_i32_0 : i32, i32
  }
  func.func @transform_6(%arg0: i32) -> (i32, i32) {
    %c0_i32 = arith.constant 0 : i32
    %c0_i32_0 = arith.constant 0 : i32
    %c0_i32_1 = arith.constant 0 : i32
    return %c0_i32, %c0_i32_0 : i32, i32
  }
  func.func @transform_7(%arg0: i32) -> (i32, i32, i32) {
    %c0_i32 = arith.constant 0 : i32
    %c0_i32_0 = arith.constant 0 : i32
    %c0_i32_1 = arith.constant 0 : i32
    return %arg0, %c0_i32, %c0_i32_0 : i32, i32, i32
  }
}

</mosaic_0001>

<bundles_post_ra>
// kernel: bifpn_forward.4
= control target key start
LH: loop header
LB: loop body
LE: loop exit
PB: predicated region body
PF: predicated region fallthrough
CT: control target
= control target key end

     0   :  { %12 = vsyncpa [#allocation3], 0  ;;  %s1606_s24 = smov 0   ;;  %s2230_s0 = inlined_call_operand.vmem [shape: f32[2], index: 0, kind: input, shape index: {}]   ;;  %s2231_s1 = inlined_call_operand.vmem [shape: f32[2,10,10,64], index: 1, kind: input, shape index: {}]   ;;  %s2232_s2 = inlined_call_operand.vmem [shape: f32[2,10,10,64], index: 2, kind: input, shape index: {}]   ;;  %s2233_s3 = inlined_call_operand.vmem [shape: f32[3,3,64], index: 3, kind: input, shape index: {}]   ;;  %s2234_s4 = inlined_call_operand.vmem [shape: f32[64,64], index: 4, kind: input, shape index: {}]   ;;  %s2235_s5 = inlined_call_operand.vmem [shape: f32[1,64], index: 5, kind: input, shape index: {}]   ;;  %s2236_s6 = inlined_call_operand.vmem [shape: f32[1,64], index: 6, kind: input, shape index: {}]   ;;  %s2237_s7 = inlined_call_operand.vmem [shape: f32[2,64,64], index: 7, kind: output, shape index: {}]  }
   0x1 LB: > { %s1612_s25 = sadd.s32 4294967295, %s1563_s24   ;;  %p1327_p0 = scmp.ge.s32.totalorder %s1563_s24, 1  ;;  %s1563_s24 = sphi %s1606_s24, %s18_s24  }
   0x2   : > { %p206_p1 = scmp.lt.s32.totalorder %s1563_s24, 3  ;;  %s219_s28 = sshll.u32 %s2230_s0, 4  ;;  %s220_s28 = int_to_ptr.vmem [resolvable:$true] %s219_s28 }
   0x3   : > { %p1447_p3 = scmp.eq.s32.totalorder %s1612_s25, 0  ;;  %s1538_s30 = scalar_lea.vmem %s220_s28, 16 }
   0x4   : > { %p1619_p2 = pnand %p1327_p0, %p206_p1  ;;  %p1539_p6 = scmp.ne.s32.totalorder %s220_s28, %s1538_s30 }
   0x5   : > { %p1546_p10 = scmp.lt.s32.totalorder %s220_s28, %s220_s28  ;;  %p1547_p11 = scmp.lt.s32.totalorder %s1538_s30, %s1538_s30 }
   0x6   : > { %p1443_p4 = pneg %p1619_p2 }
   0x7   : > { %p1548_p12 = por %p1547_p11, %p1546_p10 }
   0x8   : > { %p1444_p5 = pnand %p1447_p3, %p1443_p4 }
   0xa   : > { %p1540_p7 = pneg %p1444_p5 }
   0xc   : > { %p1541_p8 = pnand %p1540_p7, %p1539_p6 }
   0xe   : > { %p1542_p9 = pneg %p1541_p8 }
  0x10   : > { %p1549_p13 = pnand %p1548_p12, %p1542_p9 }
  0x12   : > { %1552 = shalt.err (!%p1549_p13)
}
  0x13   : > { %s1565_s8 = smov [#allocation2]   ;;  %260 = sbr.rel (%p1619_p2) target bundleno = 397 (0x18d), region = 48 }
  0x14   : > { %1446 = dma.vmem_to_smem (!%p1444_p5), %s220_s28, 16, %s1565_s8, [#allocation3]  }
  0x1a   : > { %1558 = dma.done.wait (%p1447_p3), [#allocation3], 16  }
  0x1b   : > { %1560 = vsyncadd (%p1447_p3), [#allocation3], 4294967280 }
  0x1c   : > { %266 = sfence }
  0x1d   : > { %v1070_v0 = vld [vmem:[%s2234_s4] sm:$0xff]  ;;  %v1071_v1 = vld [vmem:[%s2234_s4 + $0x8] sm:$0xff]  ;;  %v1072_v2 = vld [vmem:[%s2234_s4 + $0x10] sm:$0xff]  ;;  %p298_p0 = scmp.lt.s32.totalorder %s1612_s25, 1  ;;  %s313_s15 = sld [smem:[#allocation2]]  ;;  %v560_v10 = vlaneseq  ;;  %vm608_vm0 = vcmask 1046528  }
  0x1e   : > { %v1414_v3 = vpack.c.bf16 %v1071_v1, %v1070_v0  ;;  %v1073_v4 = vld [vmem:[%s2234_s4 + $0x18] sm:$0xff]  ;;  %s1336_s18 = sld [smem:[#allocation2 + $0x1]]  ;;  %v1074_v6 = vld [vmem:[%s2234_s4 + $0x20] sm:$0xff]  ;;  %v1075_v7 = vld [vmem:[%s2234_s4 + $0x28] sm:$0xff]  ;;  %vm685_vm1 = vcmask 1045504   ;;  %vm1078_vm2 = vcmask 523264  }
  0x1f   : > { %v1418_v5 = vpack.c.bf16 %v1073_v4, %v1072_v2  ;;  %s2240_s25 = smov (!%p298_p0, %s1612_s25), 1  ;;  %v1076_v8 = vld [vmem:[%s2234_s4 + $0x30] sm:$0xff]  ;;  %v1077_v9 = vld [vmem:[%s2234_s4 + $0x38] sm:$0xff]  ;;  %v1422_v11 = vpack.c.bf16 %v1075_v7, %v1074_v6  ;;  %v561_v24 = vshrl.u32 %v560_v10, 7 }
  0x20   : > { %1415 = vmatprep.subr.bf16.mxu0 %v1414_v3  ;;  %1430 = vmatprep.subr.bf16.mxu1 %v1414_v3  ;;  %s1438_s29 = smul.u32 160, %s2240_s25  ;;  %v1426_v13 = vpack.c.bf16 %v1077_v9, %v1076_v8  ;;  %s1369_s21 = sshll.u32 %s2240_s25, 6 }
  0x21   : > { %1417 = vmatpush3.bf16.msra.mxu0 %v1414_v3  ;;  %1434 = vmatpush3.bf16.msra.mxu1 %v1414_v3  ;;  %v1701_v40 = vsub.s32 0, %v561_v24  ;;  %v1712_v47 = vsub.s32 1, %v561_v24  ;;  %v1723_v54 = vsub.s32 2, %v561_v24  ;;  %s312_s28 = scalar_lea.vmem %s2237_s7, %s1369_s21 }
  0x22   : > { %1419 = vmatprep.subr.bf16.mxu0 %v1418_v5  ;;  %1431 = vmatprep.subr.bf16.mxu1 %v1418_v5  ;;  %s1666_s9 = scalar_lea.vmem %s2231_s1, %s1438_s29  ;;  %s1671_s12 = scalar_lea.vmem %s2232_s2, %s1438_s29 }
  0x23   : > { %v1673_v12 = vstv %s313_s15  ;;  %v314_v14 = vld [vmem:[%s1666_s9] sm:$0xff]  ;;  %v315_v15 = vld [vmem:[%s1666_s9 + $0x8] sm:$0x3]  ;;  %v316_v16 = vld [vmem:[%s1666_s9 + $0x10] sm:$0xff] }
  0x24   : > { %v1678_v17 = vstv %s1336_s18  ;;  %v317_v18 = vld [vmem:[%s1666_s9 + $0x18] sm:$0x3]  ;;  %v318_v19 = vld [vmem:[%s1666_s9 + $0x20] sm:$0xff]  ;;  %v319_v20 = vld [vmem:[%s1666_s9 + $0x28] sm:$0x3]  ;;  %v335_v21 = vmul.f32 %v1673_v12, %v314_v14  ;;  %v336_v22 = vmul.f32 %v1673_v12, %v315_v15  ;;  %v337_v23 = vmul.f32 %v1673_v12, %v316_v16 }
  0x25   : > { %1421 = vmatpush3.bf16.msra.mxu0 %v1418_v5  ;;  %1435 = vmatpush3.bf16.msra.mxu1 %v1418_v5  ;;  %v338_v25 = vmul.f32 %v1673_v12, %v317_v18  ;;  %v339_v26 = vmul.f32 %v1673_v12, %v318_v19  ;;  %v340_v27 = vmul.f32 %v1673_v12, %v319_v20  ;;  %v356_v28 = vld [vmem:[%s1671_s12] sm:$0xff]  ;;  %v357_v29 = vld [vmem:[%s1671_s12 + $0x8] sm:$0x3]  ;;  %v358_v30 = vld [vmem:[%s1671_s12 + $0x10] sm:$0xff] }
  0x26   : > { %1423 = vmatprep.subr.bf16.mxu0 %v1422_v11  ;;  %1432 = vmatprep.subr.bf16.mxu1 %v1422_v11  ;;  %v359_v31 = vld [vmem:[%s1671_s12 + $0x18] sm:$0x3]  ;;  %v360_v32 = vld [vmem:[%s1671_s12 + $0x20] sm:$0xff]  ;;  %v361_v33 = vld [vmem:[%s1671_s12 + $0x28] sm:$0x3]  ;;  %v377_v34 = vmul.f32 %v1678_v17, %v356_v28  ;;  %v378_v35 = vmul.f32 %v1678_v17, %v357_v29  ;;  %v379_v36 = vmul.f32 %v1678_v17, %v358_v30 }
  0x27   : > { %v380_v37 = vmul.f32 %v1678_v17, %v359_v31  ;;  %v381_v38 = vmul.f32 %v1678_v17, %v360_v32  ;;  %v382_v39 = vmul.f32 %v1678_v17, %v361_v33  ;;  %v322_v41 = vld [vmem:[%s1666_s9 + $0x40] sm:$0xff]  ;;  %v323_v42 = vld [vmem:[%s1666_s9 + $0x48] sm:$0x3]  ;;  %v324_v43 = vld [vmem:[%s1666_s9 + $0x50] sm:$0xff] }
  0x28   : > { %v1706_v44 = vadd.f32 %v377_v34, %v335_v21  ;;  %v1708_v45 = vadd.f32 %v378_v35, %v336_v22  ;;  %v1710_v46 = vadd.f32 %v379_v36, %v337_v23  ;;  %v325_v48 = vld [vmem:[%s1666_s9 + $0x58] sm:$0x3]  ;;  %v326_v49 = vld [vmem:[%s1666_s9 + $0x60] sm:$0xff]  ;;  %v327_v50 = vld [vmem:[%s1666_s9 + $0x68] sm:$0x3]  ;;  %v343_v0 = vmul.f32 %v1673_v12, %v322_v41 }
  0x29   : > { %1425 = vmatpush3.bf16.msra.mxu0 %v1422_v11  ;;  %1436 = vmatpush3.bf16.msra.mxu1 %v1422_v11  ;;  %v1717_v51 = vadd.f32 %v380_v37, %v338_v25  ;;  %v1719_v52 = vadd.f32 %v381_v38, %v339_v26  ;;  %v1721_v53 = vadd.f32 %v382_v39, %v340_v27  ;;  %v364_v55 = vld [vmem:[%s1671_s12 + $0x40] sm:$0xff]  ;;  %v365_v56 = vld [vmem:[%s1671_s12 + $0x48] sm:$0x3]  ;;  %v366_v57 = vld [vmem:[%s1671_s12 + $0x50] sm:$0xff] }
  0x2a   : > { %1427 = vmatprep.subr.bf16.mxu0 %v1426_v13  ;;  %1433 = vmatprep.subr.bf16.mxu1 %v1426_v13  ;;  %v1337_v58 = vmul.f32 -1.442695, %v1706_v44  ;;  %v1338_v59 = vmul.f32 -1.442695, %v1708_v45  ;;  %v1339_v60 = vmul.f32 -1.442695, %v1710_v46  ;;  %v344_v1 = vmul.f32 %v1673_v12, %v323_v42 }
  0x2b   : > { %v1340_v61 = vmul.f32 -1.442695, %v1717_v51  ;;  %v1341_v62 = vmul.f32 -1.442695, %v1719_v52  ;;  %v1342_v63 = vmul.f32 -1.442695, %v1721_v53  ;;  %v345_v2 = vmul.f32 %v1673_v12, %v324_v43 }
  0x2c   : > { %1458 = vpow2.f32 %v1337_v58  ;;  %v346_v3 = vmul.f32 %v1673_v12, %v325_v48  ;;  %v367_v4 = vld [vmem:[%s1671_s12 + $0x58] sm:$0x3]  ;;  %v368_v5 = vld [vmem:[%s1671_s12 + $0x60] sm:$0xff]  ;;  %v369_v6 = vld [vmem:[%s1671_s12 + $0x68] sm:$0x3]  ;;  %v347_v7 = vmul.f32 %v1673_v12, %v326_v49  ;;  %v348_v8 = vmul.f32 %v1673_v12, %v327_v50 }
  0x2d   : > { %1429 = vmatpush3.bf16.msra.mxu0 %v1426_v13  ;;  %1437 = vmatpush3.bf16.msra.mxu1 %v1426_v13  ;;  %1460 = vpow2.f32 %v1338_v59  ;;  %v385_v9 = vmul.f32 %v1678_v17, %v364_v55  ;;  %v386_v10 = vmul.f32 %v1678_v17, %v365_v56  ;;  %v387_v11 = vmul.f32 %v1678_v17, %v366_v57  ;;  %v320_v18 = vld [vmem:[%s1666_s9 + $0x30] sm:$0xff]  ;;  %v557_v19 = vld [vmem:[%s2233_s3] sm:$0x7]  ;;  %v1764_v23 = vld [vmem:[%s2233_s3 + $0x4] sm:$0x7] }
  0x2e   : > { %1462 = vpow2.f32 %v1339_v60  ;;  %v388_v13 = vmul.f32 %v1678_v17, %v367_v4  ;;  %v389_v14 = vmul.f32 %v1678_v17, %v368_v5  ;;  %v390_v15 = vmul.f32 %v1678_v17, %v369_v6  ;;  %v362_v27 = vld [vmem:[%s1671_s12 + $0x30] sm:$0xff]  ;;  %v321_v34 = vld [vmem:[%s1666_s9 + $0x38] sm:$0x3]  ;;  %v330_v35 = vld [vmem:[%s1666_s9 + $0x80] sm:$0xff] }
  0x2f   : > { %1464 = vpow2.f32 %v1340_v61  ;;  %v1749_v16 = vadd.f32 %v385_v9, %v343_v0  ;;  %v1755_v20 = vadd.f32 %v386_v10, %v344_v1  ;;  %v1757_v21 = vadd.f32 %v387_v11, %v345_v2  ;;  %v363_v38 = vld [vmem:[%s1671_s12 + $0x38] sm:$0x3]  ;;  %v328_v41 = vld [vmem:[%s1666_s9 + $0x70] sm:$0xff]  ;;  %v331_v0 = vld [vmem:[%s1666_s9 + $0x88] sm:$0x3] }
  0x30   : > { %1466 = vpow2.f32 %v1341_v62  ;;  %v1759_v22 = vadd.f32 %v388_v13, %v346_v3  ;;  %v1766_v24 = vadd.f32 %v389_v14, %v347_v7  ;;  %v1768_v25 = vadd.f32 %v390_v15, %v348_v8  ;;  %v329_v49 = vld [vmem:[%s1666_s9 + $0x78] sm:$0x3]  ;;  %v370_v50 = vld [vmem:[%s1671_s12 + $0x70] sm:$0xff]  ;;  %v372_v1 = vld [vmem:[%s1671_s12 + $0x80] sm:$0xff] }
  0x31   : > { %1468 = vpow2.f32 %v1342_v63  ;;  %v1345_v26 = vmul.f32 -1.442695, %v1749_v16  ;;  %v1346_v28 = vmul.f32 -1.442695, %v1755_v20  ;;  %v1347_v29 = vmul.f32 -1.442695, %v1757_v21 }
  0x32   : > { %v1348_v30 = vmul.f32 -1.442695, %v1759_v22  ;;  %v341_v31 = vmul.f32 %v1673_v12, %v320_v18  ;;  %v1777_v32 = vrot.slane %v557_v19, %v1701_v40  ;;  %v1349_v33 = vmul.f32 -1.442695, %v1766_v24  ;;  %v371_v58 = vld [vmem:[%s1671_s12 + $0x78] sm:$0x3] }
  0x33   : > { %1470 = vpow2.f32 %v1345_v26  ;;  %v1783_v36 = vrot.slane %v557_v19, %v1712_v47  ;;  %v1350_v37 = vmul.f32 -1.442695, %v1768_v25  ;;  %v383_v39 = vmul.f32 %v1678_v17, %v362_v27  ;;  %v373_v6 = vld [vmem:[%s1671_s12 + $0x88] sm:$0x3]  ;;  %v332_v7 = vld [vmem:[%s1666_s9 + $0x90] sm:$0xff] }
  0x34   : > { %1472 = vpow2.f32 %v1346_v28  ;;  %v1790_v42 = vrot.slane %v557_v19, %v1723_v54  ;;  %v1794_v43 = vrot.slane %v1764_v23, %v1701_v40  ;;  %v1798_v48 = vrot.slane %v1764_v23, %v1712_v47  ;;  %v333_v13 = vld [vmem:[%s1666_s9 + $0x98] sm:$0x3]  ;;  %v374_v26 = vld [vmem:[%s1671_s12 + $0x90] sm:$0xff] }
  0x35   : > { %1474 = vpow2.f32 %v1347_v29  ;;  %v342_v56 = vmul.f32 %v1673_v12, %v321_v34  ;;  %v1803_v57 = vadd.f32 %v383_v39, %v341_v31  ;;  %v351_v59 = vmul.f32 %v1673_v12, %v330_v35  ;;  %v375_v27 = vld [vmem:[%s1671_s12 + $0x98] sm:$0x3] }
  0x36   : > { %v1459_v55 = vpop.eup %1458  ;;  %1476 = vpow2.f32 %v1348_v30  ;;  %v384_v62 = vmul.f32 %v1678_v17, %v363_v38  ;;  %v349_v63 = vmul.f32 %v1673_v12, %v328_v41  ;;  %v350_v4 = vmul.f32 %v1673_v12, %v329_v49 }
  0x37   : > { %v1461_v60 = vpop.eup %1460  ;;  %v477_v61 = vadd.f32 1.0, %v1459_v55  ;;  %1478 = vpow2.f32 %v1349_v33  ;;  %v391_v5 = vmul.f32 %v1678_v17, %v370_v50  ;;  %v1343_v10 = vmul.f32 -1.442695, %v1803_v57  ;;  %v559_v50 = vld [vmem:[%s2233_s3 + $0x8] sm:$0x7] }
  0x38   : > { %v1463_v2 = vpop.eup %1462  ;;  %v478_v3 = vadd.f32 1.0, %v1461_v60  ;;  %1480 = vpow2.f32 %v1350_v37  ;;  %v392_v11 = vmul.f32 %v1678_v17, %v371_v58  ;;  %v352_v18 = vmul.f32 %v1673_v12, %v331_v0 }
  0x39   : > { %v1465_v8 = vpop.eup %1464  ;;  %v479_v9 = vadd.f32 1.0, %v1463_v2  ;;  %1482 = vrcp.f32 %v477_v61  ;;  %v393_v19 = vmul.f32 %v1678_v17, %v372_v1  ;;  %v394_v30 = vmul.f32 %v1678_v17, %v373_v6 }
  0x3a   : > { %v1467_v14 = vpop.eup %1466  ;;  %v480_v15 = vadd.f32 1.0, %v1465_v8  ;;  %1484 = vrcp.f32 %v478_v3  ;;  %v353_v31 = vmul.f32 %v1673_v12, %v332_v7  ;;  %v354_v35 = vmul.f32 %v1673_v12, %v333_v13 }
  0x3b   : > { %v1469_v28 = vpop.eup %1468  ;;  %v481_v29 = vadd.f32 1.0, %v1467_v14  ;;  %1486 = vrcp.f32 %v479_v9  ;;  %v1824_v34 = vadd.f32 %v393_v19, %v351_v59  ;;  %v1827_v38 = vadd.f32 %v394_v30, %v352_v18 }
  0x3c   : > { %v482_v33 = vadd.f32 1.0, %v1469_v28  ;;  %1488 = vrcp.f32 %v480_v15  ;;  %v395_v39 = vmul.f32 %v1678_v17, %v374_v26  ;;  %v396_v41 = vmul.f32 %v1678_v17, %v375_v27 }
  0x3d   : > { %v1471_v37 = vpop.eup %1470  ;;  %1490 = vrcp.f32 %v481_v29  ;;  %v1834_v58 = vadd.f32 %v384_v62, %v342_v56  ;;  %v1836_v59 = vadd.f32 %v391_v5, %v349_v63  ;;  %v1838_v61 = vadd.f32 %v392_v11, %v350_v4 }
  0x3e   : > { %v1473_v49 = vpop.eup %1472  ;;  %1492 = vrcp.f32 %v482_v33  ;;  %v485_v55 = vadd.f32 1.0, %v1471_v37  ;;  %v1840_v0 = vadd.f32 %v395_v39, %v353_v31  ;;  %v1844_v17 = vrot.slane %v1764_v23, %v1723_v54 }
  0x3f   : > { %v1475_v12 = vpop.eup %1474  ;;  %v486_v60 = vadd.f32 1.0, %v1473_v49  ;;  %1494 = vpow2.f32 %v1343_v10  ;;  %v1846_v56 = vadd.f32 %v396_v41, %v354_v35  ;;  %v1849_v63 = vrot.slane %v559_v50, %v1701_v40 }
  0x40   : > { %v1477_v1 = vpop.eup %1476  ;;  %v487_v2 = vadd.f32 1.0, %v1475_v12  ;;  %1496 = vrcp.f32 %v485_v55  ;;  %v1852_v3 = vrot.slane %v559_v50, %v1712_v47  ;;  %v1855_v6 = vrot.slane %v559_v50, %v1723_v54 }
  0x41   : > { %v1479_v62 = vpop.eup %1478  ;;  %v488_v4 = vadd.f32 1.0, %v1477_v1  ;;  %1498 = vrcp.f32 %v486_v60  ;;  %v1344_v23 = vmul.f32 -1.442695, %v1834_v58  ;;  %v1859_v10 = vmul.f32 -1.442695, %v1836_v59 }
  0x42   : > { %v1481_v5 = vpop.eup %1480  ;;  %v489_v7 = vadd.f32 1.0, %v1479_v62  ;;  %1500 = vrcp.f32 %v487_v2  ;;  %v1862_v40 = vmul.f32 -1.442695, %v1838_v61  ;;  %v1866_v54 = vmul.f32 -1.442695, %v1824_v34 }
  0x43   : > { %v1483_v8 = vpop.eup %1482  ;;  %v490_v9 = vadd.f32 1.0, %v1481_v5  ;;  %1502 = vrcp.f32 %v488_v4  ;;  %v1869_v13 = vmul.f32 -1.442695, %v1827_v38  ;;  %v1873_v18 = vmul.f32 -1.442695, %v1840_v0 }
  0x44   : > { %v1485_v47 = vpop.eup %1484  ;;  %v537_v11 = vmul.f32 %v1483_v8, %v1706_v44  ;;  %1504 = vrcp.f32 %v489_v7  ;;  %v1876_v19 = vmul.f32 -1.442695, %v1846_v56 }
  0x45   : > { %v1487_v14 = vpop.eup %1486  ;;  %v538_v15 = vmul.f32 %v1485_v47, %v1708_v45  ;;  %1506 = vrcp.f32 %v490_v9 }
  0x46   : > { %v1489_v26 = vpop.eup %1488  ;;  %v1879_v44 = vmul.f32 %v1487_v14, %v1710_v46  ;;  %v564_v27 = vmul.f32 %v1777_v32, %v537_v11  ;;  %v576_v28 = vmul.f32 %v1783_v36, %v537_v11  ;;  %v653_v29 = vmul.f32 %v1790_v42, %v537_v11 }
  0x47   : > { %v1491_v30 = vpop.eup %1490  ;;  %v1885_v45 = vmul.f32 %v1489_v26, %v1717_v51  ;;  %v577_v31 = vmul.f32 %v1783_v36, %v538_v15  ;;  %v654_v33 = vmul.f32 %v1790_v42, %v538_v15  ;;  %1508 = vpow2.f32 %v1344_v23 }
  0x48   : > { %v1493_v35 = vpop.eup %1492  ;;  %v1890_v37 = vmul.f32 %v1491_v30, %v1719_v52  ;;  %v609_v46 = vrot.slane %v576_v28, 1  ;;  %v686_v39 = vrot.slane %v653_v29, 2  ;;  %v730_v41 = vmul.f32 %v1794_v43, %v1879_v44 }
  0x49   : > { %v1894_v49 = vpop.eup %1494  ;;  %v1897_v50 = vmul.f32 %v1493_v35, %v1721_v53  ;;  %v610_v51 = vrot.slane %v577_v31, 1  ;;  %v687_v55 = vrot.slane %v654_v33, 2  ;;  %v750_v12 = vmul.f32 %v1798_v48, %v1879_v44 }
  0x4a   : > { %v1497_v60 = vpop.eup %1496  ;;  %v751_v52 = vmul.f32 %v1798_v48, %v1885_v45  ;;  %v826_v1 = vmul.f32 %v1844_v17, %v1879_v44  ;;  %v827_v2 = vmul.f32 %v1844_v17, %v1885_v45  ;;  %v902_v62 = vmul.f32 %v1849_v63, %v1890_v37 }
  0x4b   : > { %v1499_v53 = vpop.eup %1498  ;;  %v611_v4 = vsel %vm608_vm0, %v609_v46, %v610_v51  ;;  %v688_v5 = vsel %vm685_vm1, %v686_v39, %v687_v55  ;;  %v782_v7 = vrot.slane %v750_v12, 1  ;;  %v922_v23 = vmul.f32 %v1852_v3, %v1890_v37 }
  0x4c   : > { %v1501_v8 = vpop.eup %1500  ;;  %v641_v9 = vadd.f32 %v611_v4, %v564_v27  ;;  %v783_v47 = vrot.slane %v751_v52, 1  ;;  %v858_v11 = vrot.slane %v826_v1, 2  ;;  %v859_v14 = vrot.slane %v827_v2, 2 }
  0x4d   : > { %v1503_v15 = vpop.eup %1502  ;;  %v923_v26 = vmul.f32 %v1852_v3, %v1897_v50  ;;  %v954_v28 = vrot.slane %v922_v23, 1  ;;  %v998_v29 = vmul.f32 %v1855_v6, %v1890_v37  ;;  %v999_v30 = vmul.f32 %v1855_v6, %v1897_v50 }
  0x4e   : > { %v1505_v31 = vpop.eup %1504  ;;  %v718_v33 = vadd.f32 %v688_v5, %v641_v9  ;;  %v784_v35 = vsel %vm608_vm0, %v782_v7, %v783_v47  ;;  %v860_v27 = vsel %vm685_vm1, %v858_v11, %v859_v14  ;;  %v1922_v46 = vmul.f32 %v1497_v60, %v1749_v16 }
  0x4f   : > { %v1507_v39 = vpop.eup %1506  ;;  %v955_v51 = vrot.slane %v923_v26, 1  ;;  %v1030_v55 = vrot.slane %v998_v29, 2  ;;  %v1031_v12 = vrot.slane %v999_v30, 2  ;;  %v1925_v52 = vmul.f32 %v1499_v53, %v1755_v20 }
  0x50   : > { %v738_v1 = vadd.f32 %v730_v41, %v718_v33  ;;  %v1928_v2 = vmul.f32 %v1501_v8, %v1757_v21  ;;  %v1931_v4 = vmul.f32 %v1503_v15, %v1759_v22  ;;  %v1934_v5 = vmul.f32 %v1505_v31, %v1766_v24 }
  0x51   : > { %v1509_v7 = vpop.eup %1508  ;;  %v956_v16 = vsel %vm608_vm0, %v954_v28, %v955_v51  ;;  %v1032_v60 = vsel %vm685_vm1, %v1030_v55, %v1031_v12  ;;  %v1939_v23 = vmul.f32 %v1507_v39, %v1768_v25  ;;  %v568_v20 = vmul.f32 %v1777_v32, %v1922_v46 }
  0x52   : > { %v814_v21 = vadd.f32 %v784_v35, %v738_v1  ;;  %v584_v22 = vmul.f32 %v1783_v36, %v1922_v46  ;;  %v585_v24 = vmul.f32 %v1783_v36, %v1925_v52  ;;  %v661_v41 = vmul.f32 %v1790_v42, %v1922_v46 }
  0x53   : > { %v662_v53 = vmul.f32 %v1790_v42, %v1925_v52  ;;  %v734_v25 = vmul.f32 %v1794_v43, %v1928_v2  ;;  %v758_v8 = vmul.f32 %v1798_v48, %v1928_v2  ;;  %v759_v9 = vmul.f32 %v1798_v48, %v1931_v4 }
  0x54   : > { %v890_v47 = vadd.f32 %v860_v27, %v814_v21  ;;  %v621_v11 = vrot.slane %v584_v22, 1  ;;  %v622_v14 = vrot.slane %v585_v24, 1  ;;  %v698_v15 = vrot.slane %v661_v41, 2 }
  0x55   : > { %v699_v26 = vrot.slane %v662_v53, 2  ;;  %v794_v28 = vrot.slane %v758_v8, 1  ;;  %v795_v29 = vrot.slane %v759_v9, 1  ;;  %v834_v30 = vmul.f32 %v1844_v17, %v1928_v2 }
  0x56   : > { %v910_v31 = vadd.f32 %v902_v62, %v890_v47  ;;  %v623_v33 = vsel %vm608_vm0, %v621_v11, %v622_v14  ;;  %v835_v35 = vmul.f32 %v1844_v17, %v1931_v4  ;;  %v906_v39 = vmul.f32 %v1849_v63, %v1934_v5 }
  0x57   : > { %v645_v51 = vadd.f32 %v623_v33, %v568_v20  ;;  %v700_v27 = vsel %vm685_vm1, %v698_v15, %v699_v26  ;;  %v796_v55 = vsel %vm608_vm0, %v794_v28, %v795_v29  ;;  %v870_v12 = vrot.slane %v834_v30, 2 }
  0x58   : > { %v986_v1 = vadd.f32 %v956_v16, %v910_v31  ;;  %v871_v21 = vrot.slane %v835_v35, 2  ;;  %v930_v22 = vmul.f32 %v1852_v3, %v1934_v5  ;;  %v931_v62 = vmul.f32 %v1852_v3, %v1939_v23 }
  0x59   : > { %v722_v24 = vadd.f32 %v700_v27, %v645_v51  ;;  %v1006_v41 = vmul.f32 %v1855_v6, %v1934_v5  ;;  %v1007_v20 = vmul.f32 %v1855_v6, %v1939_v23  ;;  %v483_v53 = vadd.f32 1.0, %v1894_v49 }
  0x5a   : > { %v1062_v8 = vadd.f32 %v1032_v60, %v986_v1  ;;  %v872_v9 = vsel %vm685_vm1, %v870_v12, %v871_v21  ;;  %v966_v16 = vrot.slane %v930_v22, 1  ;;  %v967_v47 = vrot.slane %v931_v62, 1 }
  0x5b   : > { %v742_v11 = vadd.f32 %v734_v25, %v722_v24  ;;  %v1042_v14 = vrot.slane %v1006_v41, 2  ;;  %v1043_v15 = vrot.slane %v1007_v20, 2  ;;  %v484_v26 = vadd.f32 1.0, %v1509_v7 }
  0x5c   : > { %1402 = vmatprep.mubr.msk.f32.mxu0 %vm1078_vm2, %v1062_v8  ;;  %v968_v28 = vsel %vm608_vm0, %v966_v16, %v967_v47  ;;  %1510 = vrcp.f32 %v483_v53  ;;  %v565_v29 = vmul.f32 %v1777_v32, %v1879_v44  ;;  %v578_v49 = vmul.f32 %v1783_v36, %v1879_v44 }
  0x5d   : > { %v818_v60 = vadd.f32 %v796_v55, %v742_v11  ;;  %v1044_v30 = vsel %vm685_vm1, %v1042_v14, %v1043_v15  ;;  %1512 = vrcp.f32 %v484_v26  ;;  %v579_v25 = vmul.f32 %v1783_v36, %v1885_v45 }
  0x5e   : > { %v612_v31 = vrot.slane %v578_v49, 1  ;;  %v655_v7 = vmul.f32 %v1790_v42, %v1879_v44  ;;  %v656_v33 = vmul.f32 %v1790_v42, %v1885_v45  ;;  %v731_v35 = vmul.f32 %v1794_v43, %v1890_v37 }
  0x5f   : > { %v894_v51 = vadd.f32 %v872_v9, %v818_v60  ;;  %v613_v27 = vrot.slane %v579_v25, 1  ;;  %v752_v55 = vmul.f32 %v1798_v48, %v1890_v37  ;;  %v753_v12 = vmul.f32 %v1798_v48, %v1897_v50 }
  0x60   : > { %v689_v1 = vrot.slane %v655_v7, 2  ;;  %v690_v21 = vrot.slane %v656_v33, 2  ;;  %v828_v22 = vmul.f32 %v1844_v17, %v1890_v37  ;;  %v829_v44 = vmul.f32 %v1844_v17, %v1897_v50 }
  0x61   : > { %v914_v45 = vadd.f32 %v906_v39, %v894_v51  ;;  %v614_v62 = vsel %vm608_vm0, %v612_v31, %v613_v27  ;;  %v785_v24 = vrot.slane %v752_v55, 1  ;;  %v786_v41 = vrot.slane %v753_v12, 1 }
  0x62   : > { %v642_v20 = vadd.f32 %v614_v62, %v565_v29  ;;  %v691_v53 = vsel %vm685_vm1, %v689_v1, %v690_v21  ;;  %v861_v8 = vrot.slane %v828_v22, 2  ;;  %v862_v9 = vrot.slane %v829_v44, 2 }
  0x63   : > { %v990_v16 = vadd.f32 %v968_v28, %v914_v45  ;;  %v787_v47 = vsel %vm608_vm0, %v785_v24, %v786_v41  ;;  %1514 = vpow2.f32 %v1859_v10  ;;  %v569_v11 = vmul.f32 %v1777_v32, %v1928_v2 }
  0x64   : > { %v719_v14 = vadd.f32 %v691_v53, %v642_v20  ;;  %v863_v39 = vsel %vm685_vm1, %v861_v8, %v862_v9  ;;  %1516 = vpow2.f32 %v1862_v40  ;;  %v586_v15 = vmul.f32 %v1783_v36, %v1928_v2 }
  0x65   : > { %v1066_v26 = vadd.f32 %v1044_v30, %v990_v16  ;;  %v587_v29 = vmul.f32 %v1783_v36, %v1931_v4  ;;  %v663_v28 = vmul.f32 %v1790_v42, %v1928_v2  ;;  %v664_v10 = vmul.f32 %v1790_v42, %v1931_v4 }
  0x66   : > { %v1511_v49 = vpop.eup %1510  ;;  %v739_v60 = vadd.f32 %v731_v35, %v719_v14  ;;  %v624_v25 = vrot.slane %v586_v15, 1  ;;  %v735_v31 = vmul.f32 %v1794_v43, %v1934_v5  ;;  %v760_v40 = vmul.f32 %v1798_v48, %v1934_v5 }
  0x67   : > { %v1513_v7 = vpop.eup %1512  ;;  %1408 = vmatprep.mubr.msk.f32.mxu1 %vm1078_vm2, %v1066_v26  ;;  %v2021_v30 = vmul.f32 %v1511_v49, %v1803_v57  ;;  %v625_v33 = vrot.slane %v587_v29, 1  ;;  %v701_v51 = vrot.slane %v663_v28, 2  ;;  %v702_v27 = vrot.slane %v664_v10, 2 }
  0x68   : > { %v2024_v55 = vmul.f32 %v1513_v7, %v1834_v58  ;;  %v815_v35 = vadd.f32 %v787_v47, %v739_v60  ;;  %v761_v12 = vmul.f32 %v1798_v48, %v1939_v23  ;;  %v797_v1 = vrot.slane %v760_v40, 1 }
  0x69   : > { %v903_v21 = vmul.f32 %v1849_v63, %v2021_v30  ;;  %v924_v22 = vmul.f32 %v1852_v3, %v2021_v30  ;;  %v1000_v57 = vmul.f32 %v1855_v6, %v2021_v30  ;;  %v626_v44 = vsel %vm608_vm0, %v624_v25, %v625_v33 }
  0x6a   : > { %v891_v45 = vadd.f32 %v863_v39, %v815_v35  ;;  %v925_v58 = vmul.f32 %v1852_v3, %v2024_v55  ;;  %v1001_v62 = vmul.f32 %v1855_v6, %v2024_v55  ;;  %v646_v24 = vadd.f32 %v626_v44, %v569_v11 }
  0x6b   : > { %v957_v41 = vrot.slane %v924_v22, 1  ;;  %v1033_v20 = vrot.slane %v1000_v57, 2  ;;  %v703_v53 = vsel %vm685_vm1, %v701_v51, %v702_v27  ;;  %v798_v8 = vrot.slane %v761_v12, 1 }
  0x6c   : > { %v911_v9 = vadd.f32 %v903_v21, %v891_v45  ;;  %v958_v16 = vrot.slane %v925_v58, 1  ;;  %v1034_v47 = vrot.slane %v1001_v62, 2  ;;  %v723_v14 = vadd.f32 %v703_v53, %v646_v24 }
  0x6d   : > { %v1515_v15 = vpop.eup %1514  ;;  %v799_v26 = vsel %vm608_vm0, %v797_v1, %v798_v8  ;;  %v836_v39 = vmul.f32 %v1844_v17, %v1934_v5  ;;  %v837_v29 = vmul.f32 %v1844_v17, %v1939_v23  ;;  %v566_v11 = vmul.f32 %v1777_v32, %v1890_v37 }
  0x6e   : > { %v1517_v28 = vpop.eup %1516  ;;  %v959_v10 = vsel %vm608_vm0, %v957_v41, %v958_v16  ;;  %v1035_v49 = vsel %vm685_vm1, %v1033_v20, %v1034_v47  ;;  %v491_v60 = vadd.f32 1.0, %v1515_v15  ;;  %v743_v25 = vadd.f32 %v735_v31, %v723_v14 }
  0x6f   : > { %v987_v40 = vadd.f32 %v959_v10, %v911_v9  ;;  %v492_v7 = vadd.f32 1.0, %v1517_v28  ;;  %v873_v33 = vrot.slane %v836_v39, 2  ;;  %v874_v51 = vrot.slane %v837_v29, 2 }
  0x70   : > { %1518 = vrcp.f32 %v491_v60  ;;  %v819_v27 = vadd.f32 %v799_v26, %v743_v25  ;;  %v580_v35 = vmul.f32 %v1783_v36, %v1890_v37  ;;  %v581_v12 = vmul.f32 %v1783_v36, %v1897_v50 }
  0x71   : > { %v1063_v1 = vadd.f32 %v1035_v49, %v987_v40  ;;  %1520 = vrcp.f32 %v492_v7  ;;  %v875_v21 = vsel %vm685_vm1, %v873_v33, %v874_v51  ;;  %v657_v22 = vmul.f32 %v1790_v42, %v1890_v37 }
  0x72   : > { %v895_v31 = vadd.f32 %v875_v21, %v819_v27  ;;  %v615_v57 = vrot.slane %v580_v35, 1  ;;  %v616_v44 = vrot.slane %v581_v12, 1  ;;  %v658_v45 = vmul.f32 %v1790_v42, %v1897_v50 }
  0x73   : > { %1403 = vmatmul.mubr.msk.f32.vlgmr.msra.gmra.mrb[0].mxu0 %vm1078_vm2, %v1063_v1  ;;  %v692_v58 = vrot.slane %v657_v22, 2  ;;  %v732_v62 = vmul.f32 %v1794_v43, %v2021_v30  ;;  %v754_v24 = vmul.f32 %v1798_v48, %v2021_v30  ;;  %v755_v41 = vmul.f32 %v1798_v48, %v2024_v55 }
  0x74   : > { %v617_v37 = vsel %vm608_vm0, %v615_v57, %v616_v44  ;;  %v693_v20 = vrot.slane %v658_v45, 2  ;;  %v830_v53 = vmul.f32 %v1844_v17, %v2021_v30  ;;  %v831_v50 = vmul.f32 %v1844_v17, %v2024_v55 }
  0x75   : > { %v643_v8 = vadd.f32 %v617_v37, %v566_v11  ;;  %v788_v9 = vrot.slane %v754_v24, 1  ;;  %v789_v16 = vrot.slane %v755_v41, 1  ;;  %v904_v47 = vmul.f32 %v1849_v63, %v1922_v46 }
  0x76   : > { %v694_v14 = vsel %vm685_vm1, %v692_v58, %v693_v20  ;;  %v864_v15 = vrot.slane %v830_v53, 2  ;;  %v865_v26 = vrot.slane %v831_v50, 2  ;;  %v926_v39 = vmul.f32 %v1852_v3, %v1922_v46 }
  0x77   : > { %v720_v29 = vadd.f32 %v694_v14, %v643_v8  ;;  %v790_v28 = vsel %vm608_vm0, %v788_v9, %v789_v16  ;;  %v927_v10 = vmul.f32 %v1852_v3, %v1925_v52  ;;  %v1002_v11 = vmul.f32 %v1855_v6, %v1922_v46 }
  0x78   : > { %v866_v49 = vsel %vm685_vm1, %v864_v15, %v865_v26  ;;  %v960_v60 = vrot.slane %v926_v39, 1  ;;  %v1003_v25 = vmul.f32 %v1855_v6, %v1925_v52  ;;  %1522 = vpow2.f32 %v1866_v54 }
  0x79   : > { %v740_v40 = vadd.f32 %v732_v62, %v720_v29  ;;  %v961_v7 = vrot.slane %v927_v10, 1  ;;  %v1036_v33 = vrot.slane %v1002_v11, 2  ;;  %1524 = vpow2.f32 %v1869_v13 }
  0x7a   : > { %v1519_v51 = vpop.eup %1518  ;;  %v1037_v27 = vrot.slane %v1003_v25, 2  ;;  %v570_v35 = vmul.f32 %v1777_v32, %v1934_v5  ;;  %v588_v12 = vmul.f32 %v1783_v36, %v1934_v5  ;;  %v589_v1 = vmul.f32 %v1783_v36, %v1939_v23 }
  0x7b   : > { %v1521_v21 = vpop.eup %1520  ;;  %v2092_v22 = vmul.f32 %v1519_v51, %v1836_v59  ;;  %v816_v54 = vadd.f32 %v790_v28, %v740_v40  ;;  %v962_v57 = vsel %vm608_vm0, %v960_v60, %v961_v7  ;;  %v665_v13 = vmul.f32 %v1790_v42, %v1934_v5 }
  0x7c   : > { %v2098_v44 = vmul.f32 %v1521_v21, %v1838_v61  ;;  %v1038_v45 = vsel %vm685_vm1, %v1036_v33, %v1037_v27  ;;  %v627_v58 = vrot.slane %v588_v12, 1  ;;  %v628_v62 = vrot.slane %v589_v1, 1 }
  0x7d   : > { %v907_v24 = vmul.f32 %v1849_v63, %v2092_v22  ;;  %v932_v59 = vmul.f32 %v1852_v3, %v2092_v22  ;;  %v1008_v41 = vmul.f32 %v1855_v6, %v2092_v22  ;;  %v892_v37 = vadd.f32 %v866_v49, %v816_v54 }
  0x7e   : > { %v933_v5 = vmul.f32 %v1852_v3, %v2098_v44  ;;  %v1009_v61 = vmul.f32 %v1855_v6, %v2098_v44  ;;  %v629_v20 = vsel %vm608_vm0, %v627_v58, %v628_v62  ;;  %v666_v53 = vmul.f32 %v1790_v42, %v1939_v23 }
  0x7f   : > { %v915_v50 = vadd.f32 %v907_v24, %v895_v31  ;;  %v969_v8 = vrot.slane %v932_v59, 1  ;;  %v1045_v9 = vrot.slane %v1008_v41, 2  ;;  %v912_v16 = vadd.f32 %v904_v47, %v892_v37 }
  0x80   : > { %v970_v14 = vrot.slane %v933_v5, 1  ;;  %v1046_v15 = vrot.slane %v1009_v61, 2  ;;  %v647_v26 = vadd.f32 %v629_v20, %v570_v35  ;;  %v704_v39 = vrot.slane %v665_v13, 2 }
  0x81   : > { %v988_v29 = vadd.f32 %v962_v57, %v912_v16  ;;  %v705_v28 = vrot.slane %v666_v53, 2  ;;  %v736_v10 = vmul.f32 %v1794_v43, %v2092_v22  ;;  %v762_v11 = vmul.f32 %v1798_v48, %v2092_v22 }
  0x82   : > { %v1523_v49 = vpop.eup %1522  ;;  %v971_v60 = vsel %vm608_vm0, %v969_v8, %v970_v14  ;;  %v1047_v23 = vsel %vm685_vm1, %v1045_v9, %v1046_v15  ;;  %v763_v31 = vmul.f32 %v1798_v48, %v2098_v44  ;;  %v838_v47 = vmul.f32 %v1844_v17, %v2092_v22 }
  0x83   : > { %v1525_v25 = vpop.eup %1524  ;;  %v991_v40 = vadd.f32 %v971_v60, %v915_v50  ;;  %v1064_v7 = vadd.f32 %v1038_v45, %v988_v29  ;;  %v493_v33 = vadd.f32 1.0, %v1523_v49  ;;  %v706_v51 = vsel %vm685_vm1, %v704_v39, %v705_v28 }
  0x84   : > { %v494_v27 = vadd.f32 1.0, %v1525_v25  ;;  %v724_v35 = vadd.f32 %v706_v51, %v647_v26  ;;  %v800_v12 = vrot.slane %v762_v11, 1  ;;  %v801_v1 = vrot.slane %v763_v31, 1 }
  0x85   : > { %v1067_v21 = vadd.f32 %v1047_v23, %v991_v40  ;;  %1405 = vmatprep.mubr.msk.f32.mxu0 %vm1078_vm2, %v1064_v7  ;;  %1526 = vrcp.f32 %v493_v33  ;;  %v839_v54 = vmul.f32 %v1844_v17, %v2098_v44  ;;  %v876_v57 = vrot.slane %v838_v47, 2 }
  0x86   : > { %1528 = vrcp.f32 %v494_v27  ;;  %v744_v13 = vadd.f32 %v736_v10, %v724_v35  ;;  %v802_v58 = vsel %vm608_vm0, %v800_v12, %v801_v1  ;;  %v567_v45 = vmul.f32 %v1777_v32, %v2021_v30 }
  0x87   : > { %1409 = vmatmul.mubr.msk.f32.vlgmr.msra.gmra.mrb[0].mxu1 %vm1078_vm2, %v1067_v21  ;;  %v877_v62 = vrot.slane %v839_v54, 2  ;;  %v582_v24 = vmul.f32 %v1783_v36, %v2021_v30  ;;  %v583_v59 = vmul.f32 %v1783_v36, %v2024_v55  ;;  %v659_v41 = vmul.f32 %v1790_v42, %v2021_v30 }
  0x88   : > { %v820_v37 = vadd.f32 %v802_v58, %v744_v13  ;;  %v660_v5 = vmul.f32 %v1790_v42, %v2024_v55  ;;  %v733_v61 = vmul.f32 %v1794_v43, %v1922_v46  ;;  %v756_v20 = vmul.f32 %v1798_v48, %v1922_v46 }
  0x89   : > { %v878_v53 = vsel %vm685_vm1, %v876_v57, %v877_v62  ;;  %v618_v50 = vrot.slane %v582_v24, 1  ;;  %v619_v8 = vrot.slane %v583_v59, 1  ;;  %v695_v9 = vrot.slane %v659_v41, 2 }
  0x8a   : > { %v896_v16 = vadd.f32 %v878_v53, %v820_v37  ;;  %v696_v14 = vrot.slane %v660_v5, 2  ;;  %v757_v30 = vmul.f32 %v1798_v48, %v1925_v52  ;;  %v791_v15 = vrot.slane %v756_v20, 1 }
  0x8b   : > { %v620_v26 = vsel %vm608_vm0, %v618_v50, %v619_v8  ;;  %v832_v55 = vmul.f32 %v1844_v17, %v1922_v46  ;;  %v833_v39 = vmul.f32 %v1844_v17, %v1925_v52  ;;  %v905_v29 = vmul.f32 %v1849_v63, %v1928_v2 }
  0x8c   : > { %v644_v28 = vadd.f32 %v620_v26, %v567_v45  ;;  %v697_v10 = vsel %vm685_vm1, %v695_v9, %v696_v14  ;;  %v792_v11 = vrot.slane %v757_v30, 1  ;;  %v928_v49 = vmul.f32 %v1852_v3, %v1928_v2 }
  0x8d   : > { %v867_v60 = vrot.slane %v832_v55, 2  ;;  %v868_v23 = vrot.slane %v833_v39, 2  ;;  %v929_v31 = vmul.f32 %v1852_v3, %v1931_v4  ;;  %v1004_v46 = vmul.f32 %v1855_v6, %v1928_v2 }
  0x8e   : > { %v721_v47 = vadd.f32 %v697_v10, %v644_v28  ;;  %v793_v52 = vsel %vm608_vm0, %v791_v15, %v792_v11  ;;  %v963_v25 = vrot.slane %v928_v49, 1  ;;  %v1005_v40 = vmul.f32 %v1855_v6, %v1931_v4 }
  0x8f   : > { %v1527_v7 = vpop.eup %1526  ;;  %v869_v33 = vsel %vm685_vm1, %v867_v60, %v868_v23  ;;  %v964_v51 = vrot.slane %v929_v31, 1  ;;  %v1039_v27 = vrot.slane %v1004_v46, 2  ;;  %1530 = vpow2.f32 %v1873_v18 }
  0x90   : > { %v1529_v35 = vpop.eup %1528  ;;  %v553_v12 = vmul.f32 %v1527_v7, %v1824_v34  ;;  %v741_v1 = vadd.f32 %v733_v61, %v721_v47  ;;  %v1040_v21 = vrot.slane %v1005_v40, 2  ;;  %1532 = vpow2.f32 %v1876_v19 }
  0x91   : > { %v554_v2 = vmul.f32 %v1529_v35, %v1827_v38  ;;  %v965_v54 = vsel %vm608_vm0, %v963_v25, %v964_v51  ;;  %v571_v4 = vmul.f32 %v1777_v32, %v2092_v22  ;;  %v590_v57 = vmul.f32 %v1783_v36, %v2092_v22 }
  0x92   : > { %v908_v13 = vmul.f32 %v1849_v63, %v553_v12  ;;  %v934_v18 = vmul.f32 %v1852_v3, %v553_v12  ;;  %v1010_v34 = vmul.f32 %v1855_v6, %v553_v12  ;;  %v817_v58 = vadd.f32 %v793_v52, %v741_v1 }
  0x93   : > { %v935_v45 = vmul.f32 %v1852_v3, %v554_v2  ;;  %v1011_v19 = vmul.f32 %v1855_v6, %v554_v2  ;;  %v1041_v38 = vsel %vm685_vm1, %v1039_v27, %v1040_v21  ;;  %v591_v62 = vmul.f32 %v1783_v36, %v2098_v44 }
  0x94   : > { %v916_v32 = vadd.f32 %v908_v13, %v896_v16  ;;  %v972_v24 = vrot.slane %v934_v18, 1  ;;  %v1048_v59 = vrot.slane %v1010_v34, 2  ;;  %v893_v41 = vadd.f32 %v869_v33, %v817_v58 }
  0x95   : > { %v973_v37 = vrot.slane %v935_v45, 1  ;;  %v1049_v5 = vrot.slane %v1011_v19, 2  ;;  %v630_v61 = vrot.slane %v590_v57, 1  ;;  %v631_v20 = vrot.slane %v591_v62, 1  ;;  %v1365_v19 = vld [vmem:[%s2235_s5] ss:$0 sm:$0xff] }
  0x96   : > { %v913_v53 = vadd.f32 %v905_v29, %v893_v41  ;;  %v667_v50 = vmul.f32 %v1790_v42, %v2092_v22  ;;  %v668_v8 = vmul.f32 %v1790_v42, %v2098_v44  ;;  %v737_v9 = vmul.f32 %v1794_v43, %v553_v12 }
  0x97   : > { %v974_v14 = vsel %vm608_vm0, %v972_v24, %v973_v37  ;;  %v1050_v36 = vsel %vm685_vm1, %v1048_v59, %v1049_v5  ;;  %v632_v16 = vsel %vm608_vm0, %v630_v61, %v631_v20  ;;  %v764_v30 = vmul.f32 %v1798_v48, %v553_v12 }
  0x98   : > { %v992_v15 = vadd.f32 %v974_v14, %v916_v32  ;;  %v989_v26 = vadd.f32 %v965_v54, %v913_v53  ;;  %v648_v55 = vadd.f32 %v632_v16, %v571_v4  ;;  %v707_v39 = vrot.slane %v667_v50, 2 }
  0x99   : > { %v1531_v29 = vpop.eup %1530  ;;  %v708_v28 = vrot.slane %v668_v8, 2  ;;  %v765_v22 = vmul.f32 %v1798_v48, %v554_v2  ;;  %v803_v10 = vrot.slane %v764_v30, 1  ;;  %v840_v42 = vmul.f32 %v1844_v17, %v553_v12 }
  0x9a   : > { %v1533_v43 = vpop.eup %1532  ;;  %v1068_v44 = vadd.f32 %v1050_v36, %v992_v15  ;;  %v1065_v11 = vadd.f32 %v1041_v38, %v989_v26  ;;  %v495_v49 = vadd.f32 1.0, %v1531_v29  ;;  %v841_v60 = vmul.f32 %v1844_v17, %v554_v2 }
  0x9b   : > { %v496_v23 = vadd.f32 1.0, %v1533_v43  ;;  %v709_v31 = vsel %vm685_vm1, %v707_v39, %v708_v28  ;;  %v804_v46 = vrot.slane %v765_v22, 1  ;;  %v879_v47 = vrot.slane %v840_v42, 2 }
  0x9c   : > { %1411 = vmatprep.mubr.msk.f32.mxu1 %vm1078_vm2, %v1068_v44  ;;  %1406 = vmatmul.mubr.msk.f32.gmra.mrb[2].mxu0 %vm1078_vm2, %v1065_v11  ;;  %1534 = vrcp.f32 %v495_v49  ;;  %v725_v48 = vadd.f32 %v709_v31, %v648_v55  ;;  %v880_v52 = vrot.slane %v841_v60, 2 }
  0x9d   : > { %1536 = vrcp.f32 %v496_v23  ;;  %v805_v25 = vsel %vm608_vm0, %v803_v10, %v804_v46 }
  0x9e   : > { %v745_v40 = vadd.f32 %v737_v9, %v725_v48  ;;  %v881_v7 = vsel %vm685_vm1, %v879_v47, %v880_v52 }
  0xa0   : > { %v821_v33 = vadd.f32 %v805_v25, %v745_v40 }
  0xa2   : > { %v897_v17 = vadd.f32 %v881_v7, %v821_v33 }
  0xa6   : > { %v1535_v51 = vpop.eup %1534 }
  0xa7   : > { %v1537_v27 = vpop.eup %1536  ;;  %v555_v35 = vmul.f32 %v1535_v51, %v1840_v0 }
  0xa8   : > { %v556_v12 = vmul.f32 %v1537_v27, %v1846_v56 }
  0xa9   : > { %v909_v1 = vmul.f32 %v1849_v63, %v555_v35  ;;  %v936_v21 = vmul.f32 %v1852_v3, %v555_v35  ;;  %v1012_v2 = vmul.f32 %v1855_v6, %v555_v35 }
  0xaa   : > { %v937_v54 = vmul.f32 %v1852_v3, %v556_v12  ;;  %v1013_v4 = vmul.f32 %v1855_v6, %v556_v12  ;;  %v1366_v6 = vld [vmem:[%s2236_s6] ss:$0 sm:$0xff] }
  0xab   : > { %v917_v57 = vadd.f32 %v909_v1, %v897_v17  ;;  %v975_v13 = vrot.slane %v936_v21, 1  ;;  %v1051_v18 = vrot.slane %v1012_v2, 2 }
  0xac   : > { %v976_v34 = vrot.slane %v937_v54, 1  ;;  %v1052_v58 = vrot.slane %v1013_v4, 2 }
  0xae   : > { %v977_v0 = vsel %vm608_vm0, %v975_v13, %v976_v34  ;;  %v1053_v56 = vsel %vm685_vm1, %v1051_v18, %v1052_v58 }
  0xaf   : > { %v993_v45 = vadd.f32 %v977_v0, %v917_v57 }
  0xb1   : > { %v1069_v63 = vadd.f32 %v1053_v56, %v993_v45 }
  0xb3   : > { %1412 = vmatmul.mubr.msk.f32.gmra.mrb[2].mxu1 %vm1078_vm2, %v1069_v63 }
 0x146   : > { %v1404_v3 = vpop.f32.mrb[0].mxu0 }
 0x147   : > { %v1216_v38 = vmul.f32 %v1404_v3, %v1365_v19  ;;  %v1169_v62 = vpop.f32.mrb[1].mxu0 }
 0x148   : > { %v1215_v32 = vmul.f32 %v1365_v19, %v1169_v62 }
 0x149   : > { %v1231_v24 = vadd.f32 %v1366_v6, %v1216_v38 }
 0x14a   : > { %v1230_v59 = vadd.f32 %v1366_v6, %v1215_v32 }
 0x14b   : > { %1239 = vst.msk [vmem:[%s312_s28 + $0x8] sm:$0xff] %vm1078_vm2, %v1231_v24 }
 0x14c   : > { %1238 = vst.msk [vmem:[%s312_s28] sm:$0xff] %vm1078_vm2, %v1230_v59 }
 0x15a   : > { %v1410_v41 = vpop.f32.mrb[0].mxu1 }
 0x15b   : > { %v1220_v37 = vmul.f32 %v1410_v41, %v1365_v19  ;;  %v1189_v5 = vpop.f32.mrb[1].mxu1 }
 0x15c   : > { %v1219_v61 = vmul.f32 %v1365_v19, %v1189_v5 }
 0x15d   : > { %v1235_v20 = vadd.f32 %v1366_v6, %v1220_v37 }
 0x15e   : > { %v1234_v53 = vadd.f32 %v1366_v6, %v1219_v61 }
 0x15f   : > { %1243 = vst.msk [vmem:[%s312_s28 + $0x28] sm:$0xff] %vm1078_vm2, %v1235_v20 }
 0x160   : > { %1242 = vst.msk [vmem:[%s312_s28 + $0x20] sm:$0xff] %vm1078_vm2, %v1234_v53 }
 0x16f   : > { %v1407_v50 = vpop.f32.mrb[2].mxu0 }
 0x170   : > { %v1218_v8 = vmul.f32 %v1407_v50, %v1365_v19  ;;  %v1179_v9 = vpop.f32.mrb[3].mxu0 }
 0x171   : > { %v1217_v14 = vmul.f32 %v1365_v19, %v1179_v9 }
 0x172   : > { %v1233_v36 = vadd.f32 %v1366_v6, %v1218_v8 }
 0x173   : > { %v1232_v16 = vadd.f32 %v1366_v6, %v1217_v14 }
 0x174   : > { %1241 = vst.msk [vmem:[%s312_s28 + $0x18] sm:$0xff] %vm1078_vm2, %v1233_v36 }
 0x175   : > { %1240 = vst.msk [vmem:[%s312_s28 + $0x10] sm:$0xff] %vm1078_vm2, %v1232_v16 }
 0x186   : > { %v1413_v30 = vpop.f32.mrb[2].mxu1 }
 0x187   : > { %v1222_v15 = vmul.f32 %v1413_v30, %v1365_v19  ;;  %v1199_v26 = vpop.f32.mrb[3].mxu1 }
 0x188   : > { %v1221_v55 = vmul.f32 %v1365_v19, %v1199_v26 }
 0x189   : > { %v1237_v39 = vadd.f32 %v1366_v6, %v1222_v15 }
 0x18a   : > { %v1236_v29 = vadd.f32 %v1366_v6, %v1221_v55 }
 0x18b   : > { %1245 = vst.msk [vmem:[%s312_s28 + $0x38] sm:$0xff] %vm1078_vm2, %v1237_v39 }
 0x18c   : > { %1244 = vst.msk [vmem:[%s312_s28 + $0x30] sm:$0xff] %vm1078_vm2, %v1236_v29 }
 0x18d PF: > { %s18_s24 = sadd.s32 1, %s1563_s24  }
 0x18e   : > { %p15_p1 = scmp.ge.s32.totalorder %s18_s24, 4  }
 0x190   :  { %17 = sbr.rel (!%p15_p1) target bundleno = 1 (0x1), region = 86 }
 0x197   :  { %1267 = vsyncpa [#allocation3], 1 }
 0x198   :  { %1269 = vsyncpa [#allocation3 + $0x1], 1 }

// kernel: bifpn_forward.5
= control target key start
LH: loop header
LB: loop body
LE: loop exit
PB: predicated region body
PF: predicated region fallthrough
CT: control target
= control target key end

     0   :  { %12 = vsyncpa [#allocation3], 0  ;;  %s3660_s24 = smov 0   ;;  %s6213_s0 = inlined_call_operand.vmem [shape: f32[2], index: 0, kind: input, shape index: {}]   ;;  %s6214_s1 = inlined_call_operand.vmem [shape: f32[2,18,18,64], index: 1, kind: input, shape index: {}]   ;;  %s6215_s2 = inlined_call_operand.vmem [shape: f32[2,18,18,64], index: 2, kind: input, shape index: {}]   ;;  %s6216_s3 = inlined_call_operand.vmem [shape: f32[3,3,64], index: 3, kind: input, shape index: {}]   ;;  %s6217_s4 = inlined_call_operand.vmem [shape: f32[64,64], index: 4, kind: input, shape index: {}]   ;;  %s6218_s5 = inlined_call_operand.vmem [shape: f32[1,64], index: 5, kind: input, shape index: {}]   ;;  %s6219_s6 = inlined_call_operand.vmem [shape: f32[1,64], index: 6, kind: input, shape index: {}]   ;;  %s6220_s7 = inlined_call_operand.vmem [shape: f32[2,256,64], index: 7, kind: output, shape index: {}]  }
   0x1 LB: > { %s3666_s25 = sadd.s32 4294967295, %s3617_s24   ;;  %p3127_p0 = scmp.ge.s32.totalorder %s3617_s24, 1  ;;  %s3617_s24 = sphi %s3660_s24, %s18_s24  }
   0x2   : > { %p206_p1 = scmp.lt.s32.totalorder %s3617_s24, 3  ;;  %s219_s28 = sshll.u32 %s6213_s0, 4  ;;  %s220_s28 = int_to_ptr.vmem [resolvable:$true] %s219_s28 }
   0x3   : > { %p3365_p3 = scmp.eq.s32.totalorder %s3666_s25, 0  ;;  %s3592_s30 = scalar_lea.vmem %s220_s28, 16 }
   0x4   : > { %p3673_p2 = pnand %p3127_p0, %p206_p1  ;;  %p3593_p6 = scmp.ne.s32.totalorder %s220_s28, %s3592_s30 }
   0x5   : > { %p3600_p10 = scmp.lt.s32.totalorder %s220_s28, %s220_s28  ;;  %p3601_p11 = scmp.lt.s32.totalorder %s3592_s30, %s3592_s30 }
   0x6   : > { %p3361_p4 = pneg %p3673_p2 }
   0x7   : > { %p3602_p12 = por %p3601_p11, %p3600_p10 }
   0x8   : > { %p3362_p5 = pnand %p3365_p3, %p3361_p4 }
   0xa   : > { %p3594_p7 = pneg %p3362_p5 }
   0xc   : > { %p3595_p8 = pnand %p3594_p7, %p3593_p6 }
   0xe   : > { %p3596_p9 = pneg %p3595_p8 }
  0x10   : > { %p3603_p13 = pnand %p3602_p12, %p3596_p9 }
  0x12   : > { %3606 = shalt.err (!%p3603_p13)
}
  0x13   : > { %s3619_s8 = smov [#allocation2]   ;;  %260 = sbr.rel (%p3673_p2) target bundleno = 681 (0x2a9), region = 48 }
  0x14   : > { %3364 = dma.vmem_to_smem (!%p3362_p5), %s220_s28, 16, %s3619_s8, [#allocation3]  }
  0x1a   : > { %3612 = dma.done.wait (%p3365_p3), [#allocation3], 16  }
  0x1b   : > { %3614 = vsyncadd (%p3365_p3), [#allocation3], 4294967280 }
  0x1c   : > { %266 = sfence }
  0x1d   : > { %v2606_v0 = vld [vmem:[%s6217_s4] sm:$0xff]  ;;  %v2607_v1 = vld [vmem:[%s6217_s4 + $0x8] sm:$0xff]  ;;  %v2608_v2 = vld [vmem:[%s6217_s4 + $0x10] sm:$0xff]  ;;  %p298_p0 = scmp.lt.s32.totalorder %s3666_s25, 1  ;;  %s313_s15 = sld [smem:[#allocation2]]  ;;  %v968_v3 = vlaneseq  ;;  %vm1104_vm0 = vcmask 1046528  }
  0x1e   : > { %v3332_v4 = vpack.c.bf16 %v2607_v1, %v2606_v0  ;;  %v2609_v5 = vld [vmem:[%s6217_s4 + $0x18] sm:$0xff]  ;;  %s3701_s18 = sld [smem:[#allocation2 + $0x1]]  ;;  %v2610_v7 = vld [vmem:[%s6217_s4 + $0x20] sm:$0xff]  ;;  %v2611_v8 = vld [vmem:[%s6217_s4 + $0x28] sm:$0xff]  ;;  %vm1349_vm1 = vcmask 1045504   ;;  %vm2614_vm2 = vcmask 523264  }
  0x1f   : > { %v3336_v6 = vpack.c.bf16 %v2609_v5, %v2608_v2  ;;  %s6402_s25 = smov (!%p298_p0, %s3666_s25), 1  ;;  %v969_v9 = vshrl.u32 %v968_v3, 7  ;;  %v2612_v10 = vld [vmem:[%s6217_s4 + $0x30] sm:$0xff]  ;;  %v2613_v11 = vld [vmem:[%s6217_s4 + $0x38] sm:$0xff]  ;;  %v965_v12 = vld [vmem:[%s6216_s3] sm:$0x7]  ;;  %v3340_v17 = vpack.c.bf16 %v2611_v8, %v2610_v7 }
  0x20   : > { %3333 = vmatprep.subr.bf16.mxu0 %v3332_v4  ;;  %3348 = vmatprep.subr.bf16.mxu1 %v3332_v4  ;;  %s3356_s8 = smul.u32 432, %s6402_s25  ;;  %v966_v13 = vld [vmem:[%s6216_s3 + $0x4] sm:$0x7]  ;;  %v3729_v18 = vpack.c.bf16 %v2613_v11, %v2612_v10  ;;  %v3746_v20 = vld [vmem:[%s6216_s3 + $0x8] sm:$0x7]  ;;  %s3227_s21 = sshll.u32 %s6402_s25, 8 }
  0x21   : > { %3335 = vmatpush3.bf16.msra.mxu0 %v3332_v4  ;;  %3352 = vmatpush3.bf16.msra.mxu1 %v3332_v4  ;;  %v970_v14 = vsub.s32 0, %v969_v9  ;;  %v3725_v15 = vsub.s32 1, %v969_v9  ;;  %v3727_v16 = vsub.s32 2, %v969_v9  ;;  %s6030_s27 = scalar_lea.vmem %s6220_s7, %s3227_s21 }
  0x22   : > { %3337 = vmatprep.subr.bf16.mxu0 %v3336_v6  ;;  %3349 = vmatprep.subr.bf16.mxu1 %v3336_v6  ;;  %s3734_s13 = scalar_lea.vmem %s6214_s1, %s3356_s8  ;;  %s3739_s17 = scalar_lea.vmem %s6215_s2, %s3356_s8 }
  0x23   : > { %v3741_v19 = vstv %s313_s15  ;;  %v3748_v21 = vrot.slane %v965_v12, %v970_v14  ;;  %v3751_v22 = vrot.slane %v965_v12, %v3725_v15  ;;  %v314_v23 = vld [vmem:[%s3734_s13] sm:$0xff]  ;;  %v315_v24 = vld [vmem:[%s3734_s13 + $0x8] sm:$0xff]  ;;  %v317_v25 = vld [vmem:[%s3734_s13 + $0x18] sm:$0xff]  ;;  %v3760_v27 = vrot.slane %v965_v12, %v3727_v16 }
  0x24   : > { %6299 = vst [vmem:[#allocation5_spill] sm:$0xff] %v3741_v19  ;;  %v3757_v26 = vstv %s3701_s18  ;;  %v3762_v28 = vrot.slane %v966_v13, %v970_v14  ;;  %v3765_v29 = vrot.slane %v966_v13, %v3725_v15  ;;  %v318_v30 = vld [vmem:[%s3734_s13 + $0x20] sm:$0xff]  ;;  %v320_v31 = vld [vmem:[%s3734_s13 + $0x30] sm:$0xff]  ;;  %v321_v32 = vld [vmem:[%s3734_s13 + $0x38] sm:$0xff]  ;;  %v369_v33 = vmul.f32 %v3741_v19, %v314_v23 }
  0x25   : > { %6300 = vst [vmem:[#allocation6_spill] sm:$0xff] %v3757_v26  ;;  %3339 = vmatpush3.bf16.msra.mxu0 %v3336_v6  ;;  %3353 = vmatpush3.bf16.msra.mxu1 %v3336_v6  ;;  %v370_v34 = vmul.f32 %v3741_v19, %v315_v24  ;;  %v372_v35 = vmul.f32 %v3741_v19, %v317_v25  ;;  %v424_v39 = vld [vmem:[%s3739_s17] sm:$0xff]  ;;  %v425_v40 = vld [vmem:[%s3739_s17 + $0x8] sm:$0xff]  ;;  %v427_v41 = vld [vmem:[%s3739_s17 + $0x18] sm:$0xff] }
  0x26   : > { %3341 = vmatprep.subr.bf16.mxu0 %v3340_v17  ;;  %3350 = vmatprep.subr.bf16.mxu1 %v3340_v17  ;;  %v373_v36 = vmul.f32 %v3741_v19, %v318_v30  ;;  %v375_v37 = vmul.f32 %v3741_v19, %v320_v31  ;;  %v376_v38 = vmul.f32 %v3741_v19, %v321_v32  ;;  %v428_v42 = vld [vmem:[%s3739_s17 + $0x20] sm:$0xff]  ;;  %v430_v43 = vld [vmem:[%s3739_s17 + $0x30] sm:$0xff]  ;;  %v431_v44 = vld [vmem:[%s3739_s17 + $0x38] sm:$0xff] }
  0x27   : > { %v479_v45 = vmul.f32 %v3757_v26, %v424_v39  ;;  %v480_v46 = vmul.f32 %v3757_v26, %v425_v40  ;;  %v482_v47 = vmul.f32 %v3757_v26, %v427_v41  ;;  %v3786_v48 = vrot.slane %v966_v13, %v3727_v16  ;;  %v338_v53 = vld [vmem:[%s3734_s13 + $0xc0] sm:$0xff]  ;;  %v339_v54 = vld [vmem:[%s3734_s13 + $0xc8] sm:$0xff]  ;;  %v341_v55 = vld [vmem:[%s3734_s13 + $0xd8] sm:$0xff] }
  0x28   : > { %v483_v49 = vmul.f32 %v3757_v26, %v428_v42  ;;  %v485_v50 = vmul.f32 %v3757_v26, %v430_v43  ;;  %v486_v51 = vmul.f32 %v3757_v26, %v431_v44  ;;  %v3792_v52 = vrot.slane %v3746_v20, %v970_v14  ;;  %v342_v59 = vld [vmem:[%s3734_s13 + $0xe0] sm:$0xff]  ;;  %v344_v60 = vld [vmem:[%s3734_s13 + $0xf0] sm:$0xff]  ;;  %v345_v61 = vld [vmem:[%s3734_s13 + $0xf8] sm:$0xff] }
  0x29   : > { %3343 = vmatpush3.bf16.msra.mxu0 %v3340_v17  ;;  %3354 = vmatpush3.bf16.msra.mxu1 %v3340_v17  ;;  %v3797_v56 = vadd.f32 %v479_v45, %v369_v33  ;;  %v3799_v57 = vadd.f32 %v480_v46, %v370_v34  ;;  %v3801_v58 = vadd.f32 %v482_v47, %v372_v35  ;;  %v448_v1 = vld [vmem:[%s3739_s17 + $0xc0] sm:$0xff]  ;;  %v449_v2 = vld [vmem:[%s3739_s17 + $0xc8] sm:$0xff]  ;;  %v451_v3 = vld [vmem:[%s3739_s17 + $0xd8] sm:$0xff] }
  0x2a   : > { %3345 = vmatprep.subr.bf16.mxu0 %v3729_v18  ;;  %3351 = vmatprep.subr.bf16.mxu1 %v3729_v18  ;;  %v3808_v62 = vadd.f32 %v483_v49, %v373_v36  ;;  %v3810_v63 = vadd.f32 %v485_v50, %v375_v37  ;;  %v3812_v0 = vadd.f32 %v486_v51, %v376_v38  ;;  %v454_v17 = vld [vmem:[%s3739_s17 + $0xf0] sm:$0xff]  ;;  %v455_v23 = vld [vmem:[%s3739_s17 + $0xf8] sm:$0xff]  ;;  %v319_v37 = vld [vmem:[%s3734_s13 + $0x28] sm:$0x3] }
  0x2b   : > { %v3137_v4 = vmul.f32 -1.442695, %v3797_v56  ;;  %v3138_v5 = vmul.f32 -1.442695, %v3799_v57  ;;  %v3140_v6 = vmul.f32 -1.442695, %v3801_v58  ;;  %v3822_v7 = vrot.slane %v3746_v20, %v3725_v15 }
  0x2c   : > { %v3141_v8 = vmul.f32 -1.442695, %v3808_v62  ;;  %v3143_v9 = vmul.f32 -1.442695, %v3810_v63  ;;  %v3144_v10 = vmul.f32 -1.442695, %v3812_v0  ;;  %v393_v11 = vmul.f32 %v3741_v19, %v338_v53 }
  0x2d   : > { %3347 = vmatpush3.bf16.msra.mxu0 %v3729_v18  ;;  %3355 = vmatpush3.bf16.msra.mxu1 %v3729_v18  ;;  %3376 = vpow2.f32 %v3137_v4  ;;  %v394_v12 = vmul.f32 %v3741_v19, %v339_v54  ;;  %v396_v13 = vmul.f32 %v3741_v19, %v341_v55  ;;  %v397_v14 = vmul.f32 %v3741_v19, %v342_v59  ;;  %v452_v15 = vld [vmem:[%s3739_s17 + $0xe0] sm:$0xff]  ;;  %v316_v36 = vld [vmem:[%s3734_s13 + $0x10] sm:$0x3]  ;;  %v429_v43 = vld [vmem:[%s3739_s17 + $0x28] sm:$0x3] }
  0x2e   : > { %3378 = vpow2.f32 %v3138_v5  ;;  %v399_v24 = vmul.f32 %v3741_v19, %v344_v60  ;;  %v400_v25 = vmul.f32 %v3741_v19, %v345_v61  ;;  %v503_v18 = vmul.f32 %v3757_v26, %v448_v1  ;;  %v322_v41 = vld [vmem:[%s3734_s13 + $0x40] sm:$0x3]  ;;  %v426_v42 = vld [vmem:[%s3739_s17 + $0x10] sm:$0x3]  ;;  %v343_v61 = vld [vmem:[%s3734_s13 + $0xe8] sm:$0x3] }
  0x2f   : > { %3380 = vpow2.f32 %v3140_v6  ;;  %v504_v30 = vmul.f32 %v3757_v26, %v449_v2  ;;  %v506_v31 = vmul.f32 %v3757_v26, %v451_v3  ;;  %v507_v32 = vmul.f32 %v3757_v26, %v452_v15  ;;  %v432_v47 = vld [vmem:[%s3739_s17 + $0x40] sm:$0x3]  ;;  %v340_v49 = vld [vmem:[%s3734_s13 + $0xd0] sm:$0x3] }
  0x30   : > { %3382 = vpow2.f32 %v3141_v8  ;;  %v509_v33 = vmul.f32 %v3757_v26, %v454_v17  ;;  %v510_v34 = vmul.f32 %v3757_v26, %v455_v23  ;;  %v3844_v35 = vadd.f32 %v503_v18, %v393_v11  ;;  %v346_v4 = vld [vmem:[%s3734_s13 + $0x100] sm:$0x3]  ;;  %v450_v5 = vld [vmem:[%s3739_s17 + $0xd0] sm:$0x3] }
  0x31   : > { %3384 = vpow2.f32 %v3143_v9  ;;  %v3848_v38 = vadd.f32 %v504_v30, %v394_v12  ;;  %v3850_v39 = vadd.f32 %v506_v31, %v396_v13  ;;  %v3852_v40 = vadd.f32 %v507_v32, %v397_v14  ;;  %v453_v14 = vld [vmem:[%s3739_s17 + $0xe8] sm:$0x3] }
  0x32   : > { %3386 = vpow2.f32 %v3144_v10  ;;  %v3857_v44 = vadd.f32 %v509_v33, %v399_v24  ;;  %v3859_v45 = vadd.f32 %v510_v34, %v400_v25  ;;  %v3161_v46 = vmul.f32 -1.442695, %v3844_v35  ;;  %v323_v31 = vld [vmem:[%s3734_s13 + $0x48] sm:$0xff] }
  0x33   : > { %v3162_v50 = vmul.f32 -1.442695, %v3848_v38  ;;  %v3164_v51 = vmul.f32 -1.442695, %v3850_v39  ;;  %v3165_v53 = vmul.f32 -1.442695, %v3852_v40  ;;  %v371_v54 = vmul.f32 %v3741_v19, %v316_v36 }
  0x34   : > { %3388 = vpow2.f32 %v3161_v46  ;;  %v3167_v55 = vmul.f32 -1.442695, %v3857_v44  ;;  %v3168_v59 = vmul.f32 -1.442695, %v3859_v45  ;;  %v374_v60 = vmul.f32 %v3741_v19, %v319_v37  ;;  %v324_v46 = vld [vmem:[%s3734_s13 + $0x50] sm:$0xff] }
  0x35   : > { %3390 = vpow2.f32 %v3162_v50  ;;  %v377_v1 = vmul.f32 %v3741_v19, %v322_v41  ;;  %v481_v2 = vmul.f32 %v3757_v26, %v426_v42  ;;  %v484_v3 = vmul.f32 %v3757_v26, %v429_v43 }
  0x36   : > { %v3879_v6 = vrot.slane %v3746_v20, %v3727_v16  ;;  %3392 = vpow2.f32 %v3164_v51  ;;  %v487_v8 = vmul.f32 %v3757_v26, %v432_v47  ;;  %v395_v9 = vmul.f32 %v3741_v19, %v340_v49  ;;  %v456_v20 = vld [vmem:[%s3739_s17 + $0x100] sm:$0x3]  ;;  %v433_v47 = vld [vmem:[%s3739_s17 + $0x48] sm:$0xff] }
  0x37   : > { %v3377_v10 = vpop.eup %3376  ;;  %3394 = vpow2.f32 %v3165_v53  ;;  %v3883_v11 = vadd.f32 %v481_v2, %v371_v54  ;;  %v3885_v12 = vadd.f32 %v484_v3, %v374_v60  ;;  %v398_v13 = vmul.f32 %v3741_v19, %v343_v61  ;;  %v434_v54 = vld [vmem:[%s3739_s17 + $0x50] sm:$0xff]  ;;  %v347_v61 = vld [vmem:[%s3734_s13 + $0x108] sm:$0xff] }
  0x38   : > { %v3379_v15 = vpop.eup %3378  ;;  %v749_v17 = vadd.f32 1.0, %v3377_v10  ;;  %3396 = vpow2.f32 %v3167_v55  ;;  %v401_v16 = vmul.f32 %v3741_v19, %v346_v4  ;;  %v505_v23 = vmul.f32 %v3757_v26, %v450_v5  ;;  %v348_v5 = vld [vmem:[%s3734_s13 + $0x110] sm:$0xff] }
  0x39   : > { %v3381_v24 = vpop.eup %3380  ;;  %v750_v25 = vadd.f32 1.0, %v3379_v15  ;;  %3398 = vpow2.f32 %v3168_v59  ;;  %v3892_v18 = vadd.f32 %v487_v8, %v377_v1  ;;  %v3139_v30 = vmul.f32 -1.442695, %v3883_v11 }
  0x3a   : > { %v3383_v32 = vpop.eup %3382  ;;  %v752_v33 = vadd.f32 1.0, %v3381_v24  ;;  %3400 = vrcp.f32 %v749_v17  ;;  %v3897_v34 = vmul.f32 -1.442695, %v3885_v12  ;;  %v508_v36 = vmul.f32 %v3757_v26, %v453_v14  ;;  %v457_v14 = vld [vmem:[%s3739_s17 + $0x108] sm:$0xff] }
  0x3b   : > { %v3385_v37 = vpop.eup %3384  ;;  %v753_v41 = vadd.f32 1.0, %v3383_v32  ;;  %3402 = vrcp.f32 %v750_v25  ;;  %v511_v42 = vmul.f32 %v3757_v26, %v456_v20  ;;  %v3901_v43 = vadd.f32 %v505_v23, %v395_v9  ;;  %v458_v23 = vld [vmem:[%s3739_s17 + $0x110] sm:$0xff] }
  0x3c   : > { %v3387_v49 = vpop.eup %3386  ;;  %v755_v50 = vadd.f32 1.0, %v3385_v37  ;;  %3404 = vrcp.f32 %v752_v33  ;;  %v3905_v51 = vadd.f32 %v508_v36, %v398_v13  ;;  %v378_v53 = vmul.f32 %v3741_v19, %v323_v31 }
  0x3d   : > { %v756_v55 = vadd.f32 1.0, %v3387_v49  ;;  %3406 = vrcp.f32 %v753_v41  ;;  %v3910_v59 = vmul.f32 -1.442695, %v3892_v18  ;;  %v3912_v60 = vadd.f32 %v511_v42, %v401_v16  ;;  %v325_v41 = vld [vmem:[%s3734_s13 + $0x58] sm:$0x3] }
  0x3e   : > { %v3389_v1 = vpop.eup %3388  ;;  %3408 = vrcp.f32 %v755_v50  ;;  %v3916_v2 = vmul.f32 -1.442695, %v3901_v43  ;;  %v379_v3 = vmul.f32 %v3741_v19, %v324_v46  ;;  %v488_v4 = vmul.f32 %v3757_v26, %v433_v47  ;;  %v435_v50 = vld [vmem:[%s3739_s17 + $0x58] sm:$0x3] }
  0x3f   : > { %v3391_v8 = vpop.eup %3390  ;;  %3410 = vrcp.f32 %v756_v55  ;;  %v773_v9 = vadd.f32 1.0, %v3389_v1  ;;  %v3922_v10 = vmul.f32 -1.442695, %v3905_v51  ;;  %v489_v13 = vmul.f32 %v3757_v26, %v434_v54  ;;  %v349_v1 = vld [vmem:[%s3734_s13 + $0x118] sm:$0x3] }
  0x40   : > { %v3393_v15 = vpop.eup %3392  ;;  %v774_v17 = vadd.f32 1.0, %v3391_v8  ;;  %3412 = vpow2.f32 %v3139_v30  ;;  %v3926_v16 = vadd.f32 %v488_v4, %v378_v53  ;;  %v402_v20 = vmul.f32 %v3741_v19, %v347_v61 }
  0x41   : > { %v3395_v24 = vpop.eup %3394  ;;  %v776_v25 = vadd.f32 1.0, %v3393_v15  ;;  %3414 = vrcp.f32 %v773_v9  ;;  %v3930_v31 = vadd.f32 %v489_v13, %v379_v3  ;;  %v403_v32 = vmul.f32 %v3741_v19, %v348_v5 }
  0x42   : > { %6301 = vst [vmem:[#allocation7_spill] sm:$0xff] %v3926_v16  ;;  %v3397_v33 = vpop.eup %3396  ;;  %v777_v36 = vadd.f32 1.0, %v3395_v24  ;;  %3416 = vrcp.f32 %v774_v17  ;;  %v3934_v30 = vmul.f32 -1.442695, %v3912_v60  ;;  %v512_v37 = vmul.f32 %v3757_v26, %v457_v14 }
  0x43   : > { %6302 = vst [vmem:[#allocation8_spill] sm:$0xff] %v3930_v31  ;;  %v3399_v42 = vpop.eup %3398  ;;  %v779_v46 = vadd.f32 1.0, %v3397_v33  ;;  %3418 = vrcp.f32 %v776_v25  ;;  %v3939_v47 = vmul.f32 -1.442695, %v3926_v16  ;;  %v513_v49 = vmul.f32 %v3757_v26, %v458_v23 }
  0x44   : > { %v3401_v53 = vpop.eup %3400  ;;  %v780_v54 = vadd.f32 1.0, %v3399_v42  ;;  %3420 = vrcp.f32 %v777_v36  ;;  %v3944_v55 = vmul.f32 -1.442695, %v3930_v31  ;;  %v3946_v61 = vadd.f32 %v512_v37, %v402_v20 }
  0x45   : > { %v3403_v3 = vpop.eup %3402  ;;  %v911_v4 = vmul.f32 %v3401_v53, %v3797_v56  ;;  %3422 = vrcp.f32 %v779_v46  ;;  %v3950_v5 = vadd.f32 %v513_v49, %v403_v32  ;;  %v3953_v8 = vmul.f32 %v3741_v19, %v325_v41 }
  0x46   : > { %6303 = vst [vmem:[#allocation9_spill] sm:$0xff] %v3946_v61  ;;  %v3405_v9 = vpop.eup %3404  ;;  %v3956_v13 = vmul.f32 %v3403_v3, %v3799_v57  ;;  %3424 = vrcp.f32 %v780_v54  ;;  %v3959_v14 = vmul.f32 -1.442695, %v3946_v61  ;;  %v3962_v15 = vmul.f32 %v3757_v26, %v435_v50 }
  0x47   : > { %6304 = vst [vmem:[#allocation10_spill] sm:$0xff] %v3953_v8  ;;  %v3407_v17 = vpop.eup %3406  ;;  %v3965_v56 = vmul.f32 %v3405_v9, %v3801_v58  ;;  %v1008_v20 = vmul.f32 %v3751_v22, %v911_v4  ;;  %v1253_v23 = vmul.f32 %v3760_v27, %v911_v4  ;;  %v3970_v24 = vmul.f32 %v3741_v19, %v349_v1 }
  0x48   : > { %6305 = vst [vmem:[#allocation11_spill] sm:$0xff] %v3962_v15  ;;  %v3409_v57 = vpop.eup %3408  ;;  %v3973_v25 = vmul.f32 %v3407_v17, %v3808_v62  ;;  %v972_v32 = vmul.f32 %v3748_v21, %v911_v4  ;;  %v3978_v33 = vmul.f32 %v3751_v22, %v3956_v13  ;;  %v3982_v58 = vmul.f32 %v3760_v27, %v3956_v13 }
  0x49   : > { %6306 = vst [vmem:[#allocation12_spill] sm:$0xff] %v3970_v24  ;;  %v3411_v36 = vpop.eup %3410  ;;  %v3985_v37 = vmul.f32 %v3409_v57, %v3810_v63  ;;  %v1105_v41 = vrot.slane %v1008_v20, 1  ;;  %v1350_v42 = vrot.slane %v1253_v23, 2  ;;  %3426 = vpow2.f32 %v3897_v34 }
  0x4a   : > { %v3988_v62 = vpop.eup %3412  ;;  %v6226_v46 = vrot.slane %v3978_v33, 1  ;;  %v6225_v49 = vrot.slane %v3982_v58, 2  ;;  %v1498_v50 = vmul.f32 %v3762_v28, %v3965_v56  ;;  %v1566_v53 = vmul.f32 %v3765_v29, %v3965_v56 }
  0x4b   : > { %6307 = vst [vmem:[#allocation13_spill] sm:$0xff] %v3985_v37  ;;  %v3415_v54 = vpop.eup %3414  ;;  %v3997_v63 = vmul.f32 %v3411_v36, %v3812_v0  ;;  %v4001_v1 = vmul.f32 %v3765_v29, %v3973_v25  ;;  %v1810_v34 = vmul.f32 %v3786_v48, %v3965_v56  ;;  %v4007_v3 = vmul.f32 %v3786_v48, %v3973_v25 }
  0x4c   : > { %v3417_v4 = vpop.eup %3416  ;;  %v1107_v9 = vsel %vm1104_vm0, %v1105_v41, %v6226_v46  ;;  %v1352_v0 = vsel %vm1349_vm1, %v1350_v42, %v6225_v49  ;;  %v1662_v17 = vrot.slane %v1566_v53, 1  ;;  %v2122_v20 = vmul.f32 %v3822_v7, %v3985_v37 }
  0x4d   : > { %v3419_v23 = vpop.eup %3418  ;;  %v1217_v57 = vadd.f32 %v1107_v9, %v972_v32  ;;  %v6229_v36 = vrot.slane %v4001_v1, 1  ;;  %v1906_v19 = vrot.slane %v1810_v34, 2  ;;  %v4021_v15 = vmul.f32 %v3822_v7, %v3997_v63 }
  0x4e   : > { %v3421_v26 = vpop.eup %3420  ;;  %v2218_v41 = vrot.slane %v2122_v20, 1  ;;  %v2366_v42 = vmul.f32 %v3879_v6, %v3985_v37  ;;  %v4027_v53 = vmul.f32 %v3879_v6, %v3997_v63  ;;  %v2054_v9 = vmul.f32 %v3792_v52, %v3985_v37 }
  0x4f   : > { %v3423_v49 = vpop.eup %3422  ;;  %v1462_v32 = vadd.f32 %v1352_v0, %v1217_v57  ;;  %v1664_v34 = vsel %vm1104_vm0, %v1662_v17, %v6229_v36  ;;  %v4035_v46 = vmul.f32 %v3415_v54, %v3844_v35  ;;  %v6231_v24 = vrot.slane %v4021_v15, 1 }
  0x50   : > { %v3425_v20 = vpop.eup %3424  ;;  %v2462_v8 = vrot.slane %v2366_v42, 2  ;;  %v6230_v61 = vrot.slane %v4027_v53, 2  ;;  %v4040_v31 = vmul.f32 %v3417_v4, %v3848_v38  ;;  %v6310_v57 = vrot.slane %v4007_v3, 2 }
  0x51   : > { %6308 = vst [vmem:[#allocation14_spill] sm:$0xff] %v4035_v46  ;;  %v1530_v0 = vadd.f32 %v1498_v50, %v1462_v32  ;;  %v4046_v36 = vmul.f32 %v3419_v23, %v3850_v39  ;;  %v4049_v35 = vmul.f32 %v3421_v26, %v3852_v40  ;;  %v2220_v54 = vsel %vm1104_vm0, %v2218_v41, %v6231_v24 }
  0x52   : > { %6309 = vst [vmem:[#allocation15_spill] sm:$0xff] %v4040_v31  ;;  %v1908_v17 = vsel %vm1349_vm1, %v1906_v19, %v6310_v57  ;;  %v2464_v38 = vsel %vm1349_vm1, %v2462_v8, %v6230_v61  ;;  %v4058_v50 = vmul.f32 %v3423_v49, %v3857_v44  ;;  %v4061_v19 = vmul.f32 %v3425_v20, %v3859_v45 }
  0x53   : > { %6311 = vst [vmem:[#allocation16_spill] sm:$0xff] %v4049_v35  ;;  %v3427_v39 = vpop.eup %3426  ;;  %v1774_v4 = vadd.f32 %v1664_v34, %v1530_v0  ;;  %v1032_v26 = vmul.f32 %v3751_v22, %v4035_v46  ;;  %v4067_v40 = vmul.f32 %v3751_v22, %v4040_v31  ;;  %v1277_v23 = vmul.f32 %v3760_v27, %v4035_v46 }
  0x54   : > { %v988_v8 = vmul.f32 %v3748_v21, %v4035_v46  ;;  %v4075_v44 = vmul.f32 %v3760_v27, %v4040_v31  ;;  %v1590_v45 = vmul.f32 %v3765_v29, %v4046_v36  ;;  %v4081_v49 = vmul.f32 %v3765_v29, %v4049_v35 }
  0x55   : > { %6312 = vst [vmem:[#allocation17_spill] sm:$0xff] %v4067_v40  ;;  %v2018_v41 = vadd.f32 %v1908_v17, %v1774_v4  ;;  %v1145_v42 = vrot.slane %v1032_v26, 1  ;;  %v6235_v32 = vrot.slane %v4067_v40, 1  ;;  %v1390_v34 = vrot.slane %v1277_v23, 2 }
  0x56   : > { %6313 = vst [vmem:[#allocation18_spill] sm:$0xff] %v4075_v44  ;;  %v6236_v20 = vrot.slane %v4075_v44, 2  ;;  %v1514_v0 = vmul.f32 %v3762_v28, %v4046_v36  ;;  %v1702_v57 = vrot.slane %v1590_v45, 1  ;;  %v1834_v61 = vmul.f32 %v3786_v48, %v4046_v36 }
  0x57   : > { %v2086_v24 = vadd.f32 %v2054_v9, %v2018_v41  ;;  %v1147_v46 = vsel %vm1104_vm0, %v1145_v42, %v6235_v32  ;;  %v4095_v4 = vmul.f32 %v3786_v48, %v4049_v35  ;;  %v2070_v16 = vmul.f32 %v3792_v52, %v4058_v50 }
  0x58   : > { %v1233_v26 = vadd.f32 %v1147_v46, %v988_v8  ;;  %v1392_v23 = vsel %vm1349_vm1, %v1390_v34, %v6236_v20  ;;  %v1946_v45 = vrot.slane %v1834_v61, 2  ;;  %v2146_v42 = vmul.f32 %v3822_v7, %v4058_v50 }
  0x59   : > { %v2330_v9 = vadd.f32 %v2220_v54, %v2086_v24  ;;  %v4107_v32 = vmul.f32 %v3822_v7, %v4061_v19  ;;  %v2390_v46 = vmul.f32 %v3879_v6, %v4058_v50  ;;  %v4113_v61 = vmul.f32 %v3879_v6, %v4061_v19 }
  0x5a   : > { %v1478_v17 = vadd.f32 %v1392_v23, %v1233_v26  ;;  %3428 = vpow2.f32 %v3910_v59  ;;  %v6314_v54 = vrot.slane %v4081_v49, 1  ;;  %v2258_v34 = vrot.slane %v2146_v42, 1 }
  0x5b   : > { %v2574_v24 = vadd.f32 %v2464_v38, %v2330_v9  ;;  %v6243_v20 = vrot.slane %v4107_v32, 1  ;;  %v2502_v44 = vrot.slane %v2390_v46, 2  ;;  %v6242_v26 = vrot.slane %v4113_v61, 2 }
  0x5c   : > { %v1704_v8 = vsel %vm1104_vm0, %v1702_v57, %v6314_v54  ;;  %v1546_v41 = vadd.f32 %v1514_v0, %v1478_v17  ;;  %v751_v23 = vadd.f32 1.0, %v3988_v62  ;;  %v6315_v40 = vrot.slane %v4095_v4, 2 }
  0x5d   : > { %3284 = vmatprep.mubr.msk.f32.mxu0 %vm2614_vm2, %v2574_v24  ;;  %v2260_v38 = vsel %vm1104_vm0, %v2258_v34, %v6243_v20  ;;  %v754_v57 = vadd.f32 1.0, %v3427_v39  ;;  %v4131_v9 = vmul.f32 %v3748_v21, %v3956_v13  ;;  %v2504_v62 = vsel %vm1349_vm1, %v2502_v44, %v6242_v26 }
  0x5e   : > { %v1948_v59 = vsel %vm1349_vm1, %v1946_v45, %v6315_v40  ;;  %v1790_v0 = vadd.f32 %v1704_v8, %v1546_v41  ;;  %3430 = vrcp.f32 %v751_v23  ;;  %v4138_v17 = vmul.f32 %v3762_v28, %v3973_v25 }
  0x5f   : > { %3432 = vrcp.f32 %v754_v57  ;;  %v4142_v40 = vmul.f32 %v3792_v52, %v3997_v63  ;;  %v4146_v39 = vmul.f32 %v3748_v21, %v4040_v31  ;;  %v4150_v13 = vmul.f32 %v3762_v28, %v4049_v35 }
  0x60   : > { %v2034_v45 = vadd.f32 %v1948_v59, %v1790_v0  ;;  %3434 = vpow2.f32 %v3916_v2  ;;  %v974_v44 = vmul.f32 %v3748_v21, %v3965_v56  ;;  %v1011_v41 = vmul.f32 %v3751_v22, %v3965_v56 }
  0x61   : > { %3436 = vpow2.f32 %v3922_v10  ;;  %v4160_v42 = vmul.f32 %v3751_v22, %v3973_v25  ;;  %v1256_v46 = vmul.f32 %v3760_v27, %v3965_v56  ;;  %v4166_v24 = vmul.f32 %v3760_v27, %v3973_v25 }
  0x62   : > { %v2102_v2 = vadd.f32 %v2070_v16, %v2034_v45  ;;  %3438 = vpow2.f32 %v3934_v30  ;;  %v1110_v54 = vrot.slane %v1011_v41, 1  ;;  %v1500_v8 = vmul.f32 %v3762_v28, %v3985_v37 }
  0x63   : > { %6316 = vst [vmem:[#allocation19_spill] sm:$0xff] %v4160_v42  ;;  %6317 = vst [vmem:[#allocation20_spill] sm:$0xff] %v4166_v24  ;;  %3440 = vpow2.f32 %v3939_v47  ;;  %v6239_v10 = vrot.slane %v4160_v42, 1  ;;  %v1355_v34 = vrot.slane %v1256_v46, 2  ;;  %v6241_v23 = vrot.slane %v4166_v24, 2 }
  0x64   : > { %v3429_v59 = vpop.eup %3428  ;;  %v2346_v56 = vadd.f32 %v2260_v38, %v2102_v2  ;;  %3442 = vpow2.f32 %v3944_v55  ;;  %v1569_v16 = vmul.f32 %v3765_v29, %v3985_v37  ;;  %v4179_v30 = vmul.f32 %v3765_v29, %v3997_v63 }
  0x65   : > { %v757_v57 = vadd.f32 1.0, %v3429_v59  ;;  %v1112_v47 = vsel %vm1104_vm0, %v1110_v54, %v6239_v10  ;;  %v1357_v0 = vsel %vm1349_vm1, %v1355_v34, %v6241_v23  ;;  %v1813_v38 = vmul.f32 %v3786_v48, %v3985_v37 }
  0x66   : > { %6318 = vst [vmem:[#allocation21_spill] sm:$0xff] %v4179_v30  ;;  %v2590_v55 = vadd.f32 %v2504_v62, %v2346_v56  ;;  %v1219_v45 = vadd.f32 %v1112_v47, %v974_v44  ;;  %v1667_v41 = vrot.slane %v1569_v16, 1  ;;  %v6240_v46 = vrot.slane %v4179_v30, 1 }
  0x67   : > { %3444 = vrcp.f32 %v757_v57  ;;  %v4192_v2 = vmul.f32 %v3786_v48, %v3997_v63  ;;  %v1911_v59 = vrot.slane %v1813_v38, 2  ;;  %v3171_v54 = vmul.f32 -1.442695, %v3950_v5 }
  0x68   : > { %v3431_v10 = vpop.eup %3430  ;;  %3308 = vmatprep.mubr.msk.f32.mxu1 %vm2614_vm2, %v2590_v55  ;;  %v4198_v34 = vmul.f32 %v3792_v52, %v4061_v19  ;;  %v1464_v62 = vadd.f32 %v1357_v0, %v1219_v45  ;;  %v1669_v44 = vsel %vm1104_vm0, %v1667_v41, %v6240_v46  ;;  %3446 = vpow2.f32 %v3959_v14 }
  0x69   : > { %6319 = vst [vmem:[#allocation22_spill] sm:$0xff] %v4192_v2  ;;  %v3433_v56 = vpop.eup %3432  ;;  %v913_v16 = vmul.f32 %v3431_v10, %v3883_v11  ;;  %v6250_v57 = vrot.slane %v4192_v2, 2  ;;  %3448 = vpow2.f32 %v3171_v54  ;;  %v1035_v47 = vmul.f32 %v3751_v22, %v4046_v36 }
  0x6a   : > { %v3435_v38 = vpop.eup %3434  ;;  %v4209_v55 = vmul.f32 %v3433_v56, %v3885_v12  ;;  %v1532_v0 = vadd.f32 %v1500_v8, %v1464_v62  ;;  %v4213_v45 = vmul.f32 %v3751_v22, %v4049_v35  ;;  %v1280_v14 = vmul.f32 %v3760_v27, %v4046_v36 }
  0x6b   : > { %v3437_v41 = vpop.eup %3436  ;;  %v1010_v11 = vmul.f32 %v3751_v22, %v913_v16  ;;  %v1255_v10 = vmul.f32 %v3760_v27, %v913_v16  ;;  %v775_v54 = vadd.f32 1.0, %v3435_v38  ;;  %v1913_v46 = vsel %vm1349_vm1, %v1911_v59, %v6250_v57 }
  0x6c   : > { %v3439_v12 = vpop.eup %3438  ;;  %v1568_v8 = vmul.f32 %v3765_v29, %v4209_v55  ;;  %v1812_v62 = vmul.f32 %v3786_v48, %v4209_v55  ;;  %v778_v56 = vadd.f32 1.0, %v3437_v41  ;;  %v1776_v23 = vadd.f32 %v1669_v44, %v1532_v0 }
  0x6d   : > { %v3441_v26 = vpop.eup %3440  ;;  %v1108_v20 = vrot.slane %v1010_v11, 1  ;;  %v1353_v31 = vrot.slane %v1255_v10, 2  ;;  %v781_v37 = vadd.f32 1.0, %v3439_v12  ;;  %3450 = vrcp.f32 %v775_v54 }
  0x6e   : > { %v3443_v16 = vpop.eup %3442  ;;  %v1665_v38 = vrot.slane %v1568_v8, 1  ;;  %v1909_v30 = vrot.slane %v1812_v62, 2  ;;  %3452 = vrcp.f32 %v778_v56  ;;  %v758_v2 = vadd.f32 1.0, %v3441_v26 }
  0x6f   : > { %v6320_v59 = vrot.slane %v3978_v33, 1  ;;  %v6321_v24 = vrot.slane %v3982_v58, 2  ;;  %3454 = vrcp.f32 %v781_v37  ;;  %v759_v44 = vadd.f32 1.0, %v3443_v16 }
  0x70   : > { %v6322_v41 = vrot.slane %v4001_v1, 1  ;;  %3456 = vrcp.f32 %v758_v2  ;;  %v990_v26 = vmul.f32 %v3748_v21, %v4046_v36  ;;  %v6323_v33 = vrot.slane %v4007_v3, 2 }
  0x71   : > { %v1109_v57 = vsel %vm1104_vm0, %v6320_v59, %v1108_v20  ;;  %v1354_v42 = vsel %vm1349_vm1, %v6321_v24, %v1353_v31  ;;  %v3445_v10 = vpop.eup %3444  ;;  %3458 = vrcp.f32 %v759_v44  ;;  %v1150_v58 = vrot.slane %v1035_v47, 1 }
  0x72   : > { %v1218_v0 = vadd.f32 %v1109_v57, %v4131_v9  ;;  %v1666_v11 = vsel %vm1104_vm0, %v6322_v41, %v1665_v38  ;;  %v1910_v20 = vsel %vm1349_vm1, %v6323_v33, %v1909_v30  ;;  %v1151_v31 = vrot.slane %v4213_v45, 1  ;;  %v3447_v37 = vpop.eup %3446 }
  0x73   : > { %v4243_v9 = vmul.f32 %v3445_v10, %v3892_v18  ;;  %v4245_v24 = vadd.f32 %v1913_v46, %v1776_v23  ;;  %v4249_v2 = vmul.f32 %v3760_v27, %v4049_v35  ;;  %v3449_v57 = vpop.eup %3448  ;;  %v782_v54 = vadd.f32 1.0, %v3447_v37 }
  0x74   : > { %v1463_v1 = vadd.f32 %v1354_v42, %v1218_v0  ;;  %v1152_v3 = vsel %vm1104_vm0, %v1150_v58, %v1151_v31  ;;  %v1395_v30 = vrot.slane %v1280_v14, 2  ;;  %v1593_v47 = vmul.f32 %v3765_v29, %v4058_v50 }
  0x75   : > { %v2124_v42 = vmul.f32 %v3822_v7, %v4243_v9  ;;  %v2368_v23 = vmul.f32 %v3879_v6, %v4243_v9  ;;  %v783_v46 = vadd.f32 1.0, %v3449_v57  ;;  %3460 = vrcp.f32 %v782_v54 }
  0x76   : > { %v1531_v18 = vadd.f32 %v4138_v17, %v1463_v1  ;;  %v1235_v12 = vadd.f32 %v1152_v3, %v990_v26  ;;  %v1396_v8 = vrot.slane %v4249_v2, 2  ;;  %v4264_v62 = vmul.f32 %v3765_v29, %v4061_v19 }
  0x77   : > { %v2221_v56 = vrot.slane %v2124_v42, 1  ;;  %v2465_v16 = vrot.slane %v2368_v23, 2  ;;  %3462 = vrcp.f32 %v783_v46  ;;  %v3451_v17 = vpop.eup %3450  ;;  %v1516_v59 = vmul.f32 %v3762_v28, %v4058_v50  ;;  %v6327_v23 = vld [vmem:[#allocation7_spill] sm:$0xff] }
  0x78   : > { %v1775_v14 = vadd.f32 %v1666_v11, %v1531_v18  ;;  %v1397_v38 = vsel %vm1349_vm1, %v1395_v30, %v1396_v8  ;;  %v1707_v44 = vrot.slane %v1593_v47, 1  ;;  %v1708_v0 = vrot.slane %v4264_v62, 1  ;;  %v3453_v41 = vpop.eup %3452 }
  0x79   : > { %v6324_v10 = vrot.slane %v4021_v15, 1  ;;  %v4276_v33 = vmul.f32 %v3451_v17, %v3901_v43  ;;  %v1837_v58 = vmul.f32 %v3786_v48, %v4058_v50  ;;  %v3455_v37 = vpop.eup %3454  ;;  %v6325_v1 = vrot.slane %v4027_v53, 2 }
  0x7a   : > { %v2019_v26 = vadd.f32 %v1910_v20, %v1775_v14  ;;  %v4284_v54 = vmul.f32 %v3453_v41, %v3905_v51  ;;  %v1480_v3 = vadd.f32 %v1397_v38, %v1235_v12  ;;  %v1709_v15 = vsel %vm1104_vm0, %v1707_v44, %v1708_v0  ;;  %v3457_v20 = vpop.eup %3456  ;;  %v6328_v44 = vld [vmem:[#allocation8_spill] sm:$0xff] }
  0x7b   : > { %v2222_v11 = vsel %vm1104_vm0, %v6324_v10, %v2221_v56  ;;  %v2466_v57 = vsel %vm1349_vm1, %v6325_v1, %v2465_v16  ;;  %v4291_v30 = vmul.f32 %v3455_v37, %v3912_v60  ;;  %v1034_v47 = vmul.f32 %v3751_v22, %v4276_v33  ;;  %v3459_v18 = vpop.eup %3458  ;;  %v6329_v10 = vld [vmem:[#allocation17_spill] sm:$0xff] }
  0x7c   : > { %6326 = vst [vmem:[#allocation23_spill] sm:$0xff] %v4284_v54  ;;  %v2087_v43 = vadd.f32 %v4142_v40, %v2019_v26  ;;  %v1279_v53 = vmul.f32 %v3760_v27, %v4276_v33  ;;  %v1592_v51 = vmul.f32 %v3765_v29, %v4284_v54  ;;  %v1836_v42 = vmul.f32 %v3786_v48, %v4284_v54 }
  0x7d   : > { %v4302_v46 = vmul.f32 %v3457_v20, %v6327_v23  ;;  %v4306_v60 = vmul.f32 %v3786_v48, %v4061_v19  ;;  %v1148_v12 = vrot.slane %v1034_v47, 1  ;;  %v2148_v56 = vmul.f32 %v3822_v7, %v4291_v30  ;;  %v6331_v20 = vld [vmem:[#allocation18_spill] sm:$0xff] }
  0x7e   : > { %v2331_v40 = vadd.f32 %v2222_v11, %v2087_v43  ;;  %v1393_v14 = vrot.slane %v1279_v53, 2  ;;  %v1705_v16 = vrot.slane %v1592_v51, 1  ;;  %v1949_v17 = vrot.slane %v1836_v42, 2 }
  0x7f   : > { %v2392_v38 = vmul.f32 %v3879_v6, %v4291_v30  ;;  %v4313_v41 = vmul.f32 %v3459_v18, %v6328_v44  ;;  %v6330_v37 = vrot.slane %v6329_v10, 1  ;;  %v6332_v11 = vrot.slane %v6331_v20, 2  ;;  %v3461_v53 = vpop.eup %3460  ;;  %v6336_v10 = vld [vmem:[#allocation9_spill] sm:$0xff] }
  0x80   : > { %v2575_v26 = vadd.f32 %v2466_v57, %v2331_v40  ;;  %v2261_v47 = vrot.slane %v2148_v56, 1  ;;  %v6333_v42 = vrot.slane %v4081_v49, 1  ;;  %v6334_v18 = vrot.slane %v4095_v4, 2 }
  0x81   : > { %v1149_v1 = vsel %vm1104_vm0, %v6330_v37, %v1148_v12  ;;  %v1394_v43 = vsel %vm1349_vm1, %v6332_v11, %v1393_v14  ;;  %v1548_v40 = vadd.f32 %v1516_v59, %v1480_v3  ;;  %v3463_v44 = vpop.eup %3462  ;;  %v2505_v12 = vrot.slane %v2392_v38, 2 }
  0x82   : > { %v1234_v51 = vadd.f32 %v1149_v1, %v4146_v39  ;;  %v1706_v23 = vsel %vm1104_vm0, %v6333_v42, %v1705_v16  ;;  %v1950_v57 = vsel %vm1349_vm1, %v6334_v18, %v1949_v17  ;;  %3285 = vmatmul.mubr.msk.f32.vlgmr.msra.gmra.mrb[0].mxu0 %vm2614_vm2, %v2575_v26  ;;  %v2056_v14 = vmul.f32 %v3792_v52, %v4302_v46 }
  0x83   : > { %v2125_v56 = vmul.f32 %v3822_v7, %v4302_v46  ;;  %v4335_v49 = vmul.f32 %v3822_v7, %v4313_v41  ;;  %v6335_v4 = vrot.slane %v4107_v32, 1  ;;  %v2369_v59 = vmul.f32 %v3879_v6, %v4302_v46 }
  0x84   : > { %v1479_v39 = vadd.f32 %v1394_v43, %v1234_v51  ;;  %v4344_v3 = vmul.f32 %v3879_v6, %v4313_v41  ;;  %v2088_v17 = vadd.f32 %v2056_v14, %v4245_v24  ;;  %v4349_v37 = vmul.f32 %v3461_v53, %v6336_v10 }
  0x85   : > { %v2262_v16 = vsel %vm1104_vm0, %v6335_v4, %v2261_v47  ;;  %v2223_v38 = vrot.slane %v2125_v56, 1  ;;  %v2224_v26 = vrot.slane %v4335_v49, 1  ;;  %v2467_v32 = vrot.slane %v2369_v59, 2 }
  0x86   : > { %v1547_v1 = vadd.f32 %v4150_v13, %v1479_v39  ;;  %v6255_v20 = vrot.slane %v4344_v3, 2  ;;  %v4354_v11 = vmul.f32 %v3463_v44, %v3950_v5  ;;  %v1792_v47 = vadd.f32 %v1709_v15, %v1548_v40 }
  0x87   : > { %v2225_v43 = vsel %vm1104_vm0, %v2223_v38, %v2224_v26  ;;  %v1951_v24 = vrot.slane %v1837_v58, 2  ;;  %v1952_v51 = vrot.slane %v4306_v60, 2  ;;  %v2072_v53 = vmul.f32 %v3792_v52, %v4349_v37  ;;  %v6338_v38 = vld [vmem:[#allocation11_spill] sm:$0xff] }
  0x88   : > { %v1791_v42 = vadd.f32 %v1706_v23, %v1547_v1  ;;  %v2332_v18 = vadd.f32 %v2225_v43, %v2088_v17  ;;  %v2469_v13 = vsel %vm1349_vm1, %v2467_v32, %v6255_v20  ;;  %v2149_v44 = vmul.f32 %v3822_v7, %v4349_v37  ;;  %v6337_v17 = vld [vmem:[#allocation10_spill] sm:$0xff] }
  0x89   : > { %v1953_v5 = vsel %vm1349_vm1, %v1951_v24, %v1952_v51  ;;  %v4372_v58 = vmul.f32 %v3822_v7, %v4354_v11  ;;  %v2393_v15 = vmul.f32 %v3879_v6, %v4349_v37  ;;  %v4378_v56 = vmul.f32 %v3879_v6, %v4354_v11 }
  0x8a   : > { %v2035_v23 = vadd.f32 %v1950_v57, %v1791_v42  ;;  %v2576_v40 = vadd.f32 %v2469_v13, %v2332_v18  ;;  %v2036_v14 = vadd.f32 %v1953_v5, %v1792_v47  ;;  %v2263_v39 = vrot.slane %v2149_v44, 1  ;;  %v459_v5 = vld [vmem:[%s3739_s17 + $0x118] sm:$0x3] }
  0x8b   : > { %v6254_v4 = vrot.slane %v4372_v58, 1  ;;  %v2507_v59 = vrot.slane %v2393_v15, 2  ;;  %v4383_v10 = vadd.f32 %v6338_v38, %v6337_v17  ;;  %v6339_v32 = vrot.slane %v4113_v61, 2  ;;  %v6342_v17 = vld [vmem:[#allocation20_spill] sm:$0xff] }
  0x8c   : > { %v2103_v1 = vadd.f32 %v4198_v34, %v2035_v23  ;;  %3287 = vmatprep.mubr.msk.f32.mxu0 %vm2614_vm2, %v2576_v40  ;;  %v2104_v43 = vadd.f32 %v2072_v53, %v2036_v14  ;;  %v6253_v47 = vrot.slane %v4378_v56, 2  ;;  %v1013_v18 = vmul.f32 %v3751_v22, %v4209_v55 }
  0x8d   : > { %v2506_v57 = vsel %vm1349_vm1, %v6339_v32, %v2505_v12  ;;  %v2265_v24 = vsel %vm1104_vm0, %v2263_v39, %v6254_v4  ;;  %v3148_v42 = vmul.f32 -1.442695, %v4383_v10  ;;  %v1258_v34 = vmul.f32 %v3760_v27, %v4209_v55  ;;  %v6340_v39 = vld [vmem:[#allocation19_spill] sm:$0xff]  ;;  %v437_v4 = vld [vmem:[%s3739_s17 + $0x68] sm:$0xff] }
  0x8e   : > { %v2347_v61 = vadd.f32 %v2262_v16, %v2103_v1  ;;  %v2348_v13 = vadd.f32 %v2265_v24, %v2104_v43  ;;  %v2509_v12 = vsel %vm1349_vm1, %v2507_v59, %v6253_v47  ;;  %v975_v53 = vmul.f32 %v3748_v21, %v3973_v25  ;;  %v6344_v43 = vld [vmem:[#allocation6_spill] sm:$0xff] }
  0x8f   : > { %3464 = vpow2.f32 %v3148_v42  ;;  %v1113_v44 = vrot.slane %v1013_v18, 1  ;;  %v1358_v15 = vrot.slane %v1258_v34, 2  ;;  %v1571_v23 = vmul.f32 %v3765_v29, %v4243_v9 }
  0x90   : > { %v2591_v40 = vadd.f32 %v2506_v57, %v2347_v61  ;;  %v2592_v14 = vadd.f32 %v2509_v12, %v2348_v13  ;;  %v1501_v55 = vmul.f32 %v3762_v28, %v3997_v63  ;;  %v1815_v16 = vmul.f32 %v3786_v48, %v4243_v9  ;;  %v6345_v61 = vld [vmem:[#allocation21_spill] sm:$0xff] }
  0x91   : > { %v6341_v59 = vrot.slane %v6340_v39, 1  ;;  %v6343_v38 = vrot.slane %v6342_v17, 2  ;;  %v1670_v32 = vrot.slane %v1571_v23, 1  ;;  %v514_v24 = vmul.f32 %v6344_v43, %v459_v5  ;;  %v6347_v5 = vld [vmem:[#allocation12_spill] sm:$0xff]  ;;  %v326_v23 = vld [vmem:[%s3734_s13 + $0x60] sm:$0xff] }
  0x92   : > { %3309 = vmatmul.mubr.msk.f32.vlgmr.msra.gmra.mrb[0].mxu1 %vm2614_vm2, %v2591_v40  ;;  %v1914_v42 = vrot.slane %v1815_v16, 2  ;;  %v4421_v18 = vmul.f32 %v3792_v52, %v4313_v41  ;;  %v1037_v34 = vmul.f32 %v3751_v22, %v4284_v54  ;;  %v6346_v13 = vrot.slane %v6345_v61, 1  ;;  %v327_v61 = vld [vmem:[%s3734_s13 + $0x68] sm:$0xff] }
  0x93   : > { %v1114_v25 = vsel %vm1104_vm0, %v6341_v59, %v1113_v44  ;;  %v1359_v1 = vsel %vm1349_vm1, %v6343_v38, %v1358_v15  ;;  %3311 = vmatprep.mubr.msk.f32.mxu1 %vm2614_vm2, %v2592_v14  ;;  %v4430_v44 = vadd.f32 %v514_v24, %v6347_v5  ;;  %v1282_v15 = vmul.f32 %v3760_v27, %v4284_v54  ;;  %v6348_v59 = vld [vmem:[#allocation22_spill] sm:$0xff]  ;;  %v6350_v5 = vld [vmem:[#allocation5_spill] sm:$0xff] }
  0x94   : > { %v1220_v57 = vadd.f32 %v1114_v25, %v975_v53  ;;  %v1671_v12 = vsel %vm1104_vm0, %v6346_v13, %v1670_v32  ;;  %v991_v53 = vmul.f32 %v3748_v21, %v4049_v35  ;;  %v1153_v16 = vrot.slane %v1037_v34, 1  ;;  %v436_v13 = vld [vmem:[%s3739_s17 + $0x60] sm:$0xff] }
  0x95   : > { %v1517_v14 = vmul.f32 %v3762_v28, %v4061_v19  ;;  %v1595_v39 = vmul.f32 %v3765_v29, %v4291_v30  ;;  %v6349_v25 = vrot.slane %v6348_v59, 2  ;;  %v3172_v38 = vmul.f32 -1.442695, %v4430_v44 }
  0x96   : > { %v1465_v40 = vadd.f32 %v1359_v1, %v1220_v57  ;;  %v1398_v32 = vrot.slane %v1282_v15, 2  ;;  %v1839_v24 = vmul.f32 %v3786_v48, %v4291_v30  ;;  %v1154_v57 = vsel %vm1104_vm0, %v1151_v31, %v1153_v16  ;;  %v6351_v16 = vld [vmem:[#allocation13_spill] sm:$0xff] }
  0x97   : > { %v1915_v17 = vsel %vm1349_vm1, %v6349_v25, %v1914_v42  ;;  %v1710_v34 = vrot.slane %v1595_v39, 1  ;;  %v381_v47 = vmul.f32 %v6350_v5, %v326_v23  ;;  %3466 = vpow2.f32 %v3172_v38 }
  0x98   : > { %v1533_v1 = vadd.f32 %v1501_v55, %v1465_v40  ;;  %v1236_v59 = vadd.f32 %v1154_v57, %v991_v53  ;;  %v1399_v42 = vsel %vm1349_vm1, %v1396_v8, %v1398_v32  ;;  %v1954_v15 = vrot.slane %v1839_v24, 2 }
  0x99   : > { %v2073_v20 = vmul.f32 %v3792_v52, %v4354_v11  ;;  %v382_v55 = vmul.f32 %v6350_v5, %v327_v61  ;;  %v491_v45 = vmul.f32 %v6344_v43, %v436_v13  ;;  %v3465_v31 = vpop.eup %3464  ;;  %v1711_v23 = vsel %vm1104_vm0, %v1708_v0, %v1710_v34  ;;  %v350_v34 = vld [vmem:[%s3734_s13 + $0x120] sm:$0xff] }
  0x9a   : > { %v1777_v25 = vadd.f32 %v1671_v12, %v1533_v1  ;;  %v1481_v40 = vadd.f32 %v1399_v42, %v1236_v59  ;;  %v1955_v2 = vsel %vm1349_vm1, %v1952_v51, %v1954_v15  ;;  %v492_v8 = vmul.f32 %v6344_v43, %v437_v4 }
  0x9b   : > { %v760_v12 = vadd.f32 1.0, %v3465_v31  ;;  %v4468_v53 = vadd.f32 %v491_v45, %v381_v47  ;;  %v976_v39 = vmul.f32 %v3748_v21, %v6351_v16  ;;  %v1014_v38 = vmul.f32 %v3751_v22, %v6351_v16 }
  0x9c   : > { %v1549_v32 = vadd.f32 %v1517_v14, %v1481_v40  ;;  %v4474_v62 = vadd.f32 %v492_v8, %v382_v55  ;;  %v4478_v0 = vmul.f32 %v3751_v22, %v3997_v63  ;;  %v1259_v60 = vmul.f32 %v3760_v27, %v6351_v16  ;;  %v351_v40 = vld [vmem:[%s3734_s13 + $0x128] sm:$0xff] }
  0x9d   : > { %3468 = vrcp.f32 %v760_v12  ;;  %v2021_v51 = vadd.f32 %v1915_v17, %v1777_v25  ;;  %v3149_v4 = vmul.f32 -1.442695, %v4468_v53  ;;  %v1115_v47 = vrot.slane %v1014_v38, 1  ;;  %v461_v8 = vld [vmem:[%s3739_s17 + $0x128] sm:$0xff] }
  0x9e   : > { %v1793_v24 = vadd.f32 %v1711_v23, %v1549_v32  ;;  %v3150_v61 = vmul.f32 -1.442695, %v4474_v62  ;;  %v1116_v14 = vrot.slane %v4478_v0, 1  ;;  %v4487_v13 = vmul.f32 %v3760_v27, %v3997_v63  ;;  %v460_v23 = vld [vmem:[%s3739_s17 + $0x120] sm:$0xff] }
  0x9f   : > { %3470 = vpow2.f32 %v3149_v4  ;;  %v1360_v1 = vrot.slane %v1259_v60, 2  ;;  %v1502_v17 = vmul.f32 %v3762_v28, %v4302_v46  ;;  %v1572_v57 = vmul.f32 %v3765_v29, %v4302_v46 }
  0xa0   : > { %v2037_v59 = vadd.f32 %v1955_v2, %v1793_v24  ;;  %3472 = vpow2.f32 %v3150_v61  ;;  %v1117_v42 = vsel %vm1104_vm0, %v1115_v47, %v1116_v14  ;;  %v6260_v15 = vrot.slane %v4487_v13, 2 }
  0xa1   : > { %v1221_v25 = vadd.f32 %v1117_v42, %v976_v39  ;;  %v4500_v55 = vmul.f32 %v3765_v29, %v4313_v41  ;;  %v1672_v45 = vrot.slane %v1572_v57, 1  ;;  %v1816_v31 = vmul.f32 %v3786_v48, %v4302_v46  ;;  %v3467_v2 = vpop.eup %3466 }
  0xa2   : > { %v2089_v12 = vadd.f32 %v4421_v18, %v2021_v51  ;;  %v1362_v16 = vsel %vm1349_vm1, %v1360_v1, %v6260_v15  ;;  %v4513_v39 = vmul.f32 %v3786_v48, %v4313_v41  ;;  %v405_v38 = vmul.f32 %v6350_v5, %v350_v34 }
  0xa3   : > { %v784_v32 = vadd.f32 1.0, %v3467_v2  ;;  %v1466_v60 = vadd.f32 %v1362_v16, %v1221_v25  ;;  %v6257_v4 = vrot.slane %v4500_v55, 1  ;;  %v1916_v47 = vrot.slane %v1816_v31, 2 }
  0xa4   : > { %v6256_v24 = vrot.slane %v4513_v39, 2  ;;  %v406_v61 = vmul.f32 %v6350_v5, %v351_v40  ;;  %v515_v18 = vmul.f32 %v6344_v43, %v460_v23  ;;  %v516_v51 = vmul.f32 %v6344_v43, %v461_v8 }
  0xa5   : > { %3474 = vrcp.f32 %v784_v32  ;;  %v4521_v1 = vadd.f32 %v2073_v20, %v2037_v59  ;;  %v1534_v57 = vadd.f32 %v1502_v17, %v1466_v60  ;;  %v1674_v34 = vsel %vm1104_vm0, %v1672_v45, %v6257_v4 }
  0xa6   : > { %v4526_v42 = vadd.f32 %v515_v18, %v405_v38  ;;  %v4528_v25 = vadd.f32 %v516_v51, %v406_v61  ;;  %v992_v31 = vmul.f32 %v3748_v21, %v4058_v50  ;;  %v1038_v40 = vmul.f32 %v3751_v22, %v4058_v50 }
  0xa7   : > { %v3469_v23 = vpop.eup %3468  ;;  %v1918_v20 = vsel %vm1349_vm1, %v1916_v47, %v6256_v24  ;;  %v4539_v17 = vmul.f32 %v3751_v22, %v4061_v19  ;;  %v1283_v59 = vmul.f32 %v3760_v27, %v4058_v50  ;;  %v4545_v45 = vmul.f32 %v3760_v27, %v4061_v19 }
  0xa8   : > { %v4548_v8 = vmul.f32 %v3469_v23, %v4383_v10  ;;  %v3173_v2 = vmul.f32 -1.442695, %v4526_v42  ;;  %v3174_v16 = vmul.f32 -1.442695, %v4528_v25  ;;  %v1155_v38 = vrot.slane %v1038_v40, 1 }
  0xa9   : > { %v3471_v32 = vpop.eup %3470  ;;  %v1778_v60 = vadd.f32 %v1674_v34, %v1534_v57  ;;  %v6259_v47 = vrot.slane %v4539_v17, 1  ;;  %v1400_v61 = vrot.slane %v1283_v59, 2  ;;  %v6258_v18 = vrot.slane %v4545_v45, 2 }
  0xaa   : > { %v3473_v50 = vpop.eup %3472  ;;  %v2127_v51 = vmul.f32 %v3822_v7, %v4548_v8  ;;  %v2371_v10 = vmul.f32 %v3879_v6, %v4548_v8  ;;  %v761_v23 = vadd.f32 1.0, %v3471_v32  ;;  %3476 = vpow2.f32 %v3173_v2 }
  0xab   : > { %v762_v24 = vadd.f32 1.0, %v3473_v50  ;;  %3478 = vpow2.f32 %v3174_v16  ;;  %v1157_v57 = vsel %vm1104_vm0, %v1155_v38, %v6259_v47  ;;  %v1402_v34 = vsel %vm1349_vm1, %v1400_v61, %v6258_v18  ;;  %v328_v38 = vld [vmem:[%s3734_s13 + $0x70] sm:$0x3] }
  0xac   : > { %v2226_v40 = vrot.slane %v2127_v51, 1  ;;  %v2470_v59 = vrot.slane %v2371_v10, 2  ;;  %3480 = vrcp.f32 %v761_v23  ;;  %v1237_v4 = vadd.f32 %v1157_v57, %v992_v31  ;;  %v438_v10 = vld [vmem:[%s3739_s17 + $0x70] sm:$0x3] }
  0xad   : > { %3482 = vrcp.f32 %v762_v24  ;;  %v1518_v32 = vmul.f32 %v3762_v28, %v4349_v37  ;;  %v1596_v2 = vmul.f32 %v3765_v29, %v4349_v37  ;;  %v4570_v16 = vmul.f32 %v3765_v29, %v4354_v11 }
  0xae   : > { %v2227_v61 = vsel %vm1104_vm0, %v2224_v26, %v2226_v40  ;;  %v6352_v50 = vrot.slane %v4344_v3, 2  ;;  %v1482_v24 = vadd.f32 %v1402_v34, %v1237_v4  ;;  %v1840_v51 = vmul.f32 %v3786_v48, %v4349_v37 }
  0xaf   : > { %v3475_v23 = vpop.eup %3474  ;;  %v2333_v57 = vadd.f32 %v2227_v61, %v2089_v12  ;;  %v1712_v18 = vrot.slane %v1596_v2, 1  ;;  %v1713_v47 = vrot.slane %v4570_v16, 1  ;;  %v4585_v15 = vmul.f32 %v3786_v48, %v4354_v11 }
  0xb0   : > { %v2471_v31 = vsel %vm1349_vm1, %v6352_v50, %v2470_v59  ;;  %v4588_v49 = vmul.f32 %v3475_v23, %v4430_v44  ;;  %v1550_v3 = vadd.f32 %v1518_v32, %v1482_v24  ;;  %v1956_v26 = vrot.slane %v1840_v51, 2 }
  0xb1   : > { %v383_v4 = vmul.f32 %v6350_v5, %v328_v38  ;;  %v2577_v34 = vadd.f32 %v2471_v31, %v2333_v57  ;;  %v1714_v40 = vsel %vm1104_vm0, %v1712_v18, %v1713_v47  ;;  %v6261_v12 = vrot.slane %v4585_v15, 2 }
  0xb2   : > { %v493_v59 = vmul.f32 %v6344_v43, %v438_v10  ;;  %v2151_v2 = vmul.f32 %v3822_v7, %v4588_v49  ;;  %v2395_v44 = vmul.f32 %v3879_v6, %v4588_v49  ;;  %v2022_v61 = vadd.f32 %v1918_v20, %v1778_v60 }
  0xb3   : > { %v1794_v32 = vadd.f32 %v1714_v40, %v1550_v3  ;;  %3288 = vmatmul.mubr.msk.f32.gmra.mrb[2].mxu0 %vm2614_vm2, %v2577_v34  ;;  %v977_v50 = vmul.f32 %v3748_v21, %v3997_v63  ;;  %v1016_v18 = vmul.f32 %v3751_v22, %v4243_v9  ;;  %v1261_v31 = vmul.f32 %v3760_v27, %v4243_v9 }
  0xb4   : > { %v4601_v38 = vadd.f32 %v493_v59, %v383_v4  ;;  %v3477_v24 = vpop.eup %3476  ;;  %v2266_v51 = vrot.slane %v2151_v2, 1  ;;  %v2510_v10 = vrot.slane %v2395_v44, 2  ;;  %v1958_v20 = vsel %vm1349_vm1, %v1956_v26, %v6261_v12 }
  0xb5   : > { %v1503_v60 = vmul.f32 %v3762_v28, %v4313_v41  ;;  %v3479_v23 = vpop.eup %3478  ;;  %v785_v57 = vadd.f32 1.0, %v3477_v24  ;;  %v1118_v3 = vrot.slane %v1016_v18, 1  ;;  %v1363_v4 = vrot.slane %v1261_v31, 2 }
  0xb6   : > { %v3151_v63 = vmul.f32 -1.442695, %v4601_v38  ;;  %v3481_v34 = vpop.eup %3480  ;;  %v6353_v40 = vrot.slane %v4372_v58, 1  ;;  %v6354_v59 = vrot.slane %v4378_v56, 2  ;;  %v786_v44 = vadd.f32 1.0, %v3479_v23 }
  0xb7   : > { %v1574_v26 = vmul.f32 %v3765_v29, %v4548_v8  ;;  %v3483_v12 = vpop.eup %3482  ;;  %v4625_v18 = vmul.f32 %v3481_v34, %v4468_v53  ;;  %3484 = vrcp.f32 %v785_v57  ;;  %v1119_v58 = vsel %vm1104_vm0, %v1116_v14, %v1118_v3 }
  0xb8   : > { %v2267_v9 = vsel %vm1104_vm0, %v6353_v40, %v2266_v51  ;;  %v2511_v2 = vsel %vm1349_vm1, %v6354_v59, %v2510_v10  ;;  %v4631_v56 = vmul.f32 %v3483_v12, %v4474_v62  ;;  %3486 = vrcp.f32 %v786_v44  ;;  %v352_v12 = vld [vmem:[%s3734_s13 + $0x130] sm:$0x3] }
  0xb9   : > { %v2349_v24 = vadd.f32 %v2267_v9, %v4521_v1  ;;  %v1222_v31 = vadd.f32 %v1119_v58, %v977_v50  ;;  %v6355_v51 = vrot.slane %v4487_v13, 2  ;;  %v2058_v53 = vmul.f32 %v3792_v52, %v4625_v18  ;;  %v462_v50 = vld [vmem:[%s3739_s17 + $0x130] sm:$0x3] }
  0xba   : > { %v2128_v23 = vmul.f32 %v3822_v7, %v4625_v18  ;;  %v2372_v0 = vmul.f32 %v3879_v6, %v4625_v18  ;;  %v4644_v62 = vmul.f32 %v3822_v7, %v4631_v56  ;;  %v4648_v14 = vmul.f32 %v3879_v6, %v4631_v56 }
  0xbb   : > { %v1364_v10 = vsel %vm1349_vm1, %v6355_v51, %v1363_v4  ;;  %v2593_v1 = vadd.f32 %v2511_v2, %v2349_v24  ;;  %3488 = vpow2.f32 %v3151_v63  ;;  %v2090_v57 = vadd.f32 %v2058_v53, %v2022_v61 }
  0xbc   : > { %v1467_v13 = vadd.f32 %v1364_v10, %v1222_v31  ;;  %v2228_v3 = vrot.slane %v2128_v23, 1  ;;  %v2472_v4 = vrot.slane %v2372_v0, 2  ;;  %v1675_v34 = vrot.slane %v1574_v26, 1 }
  0xbd   : > { %3312 = vmatmul.mubr.msk.f32.gmra.mrb[2].mxu1 %vm2614_vm2, %v2593_v1  ;;  %v2229_v40 = vrot.slane %v4644_v62, 1  ;;  %v2473_v9 = vrot.slane %v4648_v14, 2  ;;  %v1818_v2 = vmul.f32 %v3786_v48, %v4548_v8  ;;  %v2038_v44 = vadd.f32 %v1958_v20, %v1794_v32 }
  0xbe   : > { %v1535_v59 = vadd.f32 %v1503_v60, %v1467_v13  ;;  %v6356_v63 = vrot.slane %v4500_v55, 1  ;;  %v407_v58 = vmul.f32 %v6350_v5, %v352_v12  ;;  %v517_v61 = vmul.f32 %v6344_v43, %v462_v50 }
  0xbf   : > { %v2230_v26 = vsel %vm1104_vm0, %v2228_v3, %v2229_v40  ;;  %v2474_v60 = vsel %vm1349_vm1, %v2472_v4, %v2473_v9  ;;  %v1919_v51 = vrot.slane %v1818_v2, 2  ;;  %v2059_v55 = vmul.f32 %v3792_v52, %v4631_v56 }
  0xc0   : > { %v1676_v24 = vsel %vm1104_vm0, %v6356_v63, %v1675_v34  ;;  %v2334_v10 = vadd.f32 %v2230_v26, %v2090_v57  ;;  %v4670_v32 = vadd.f32 %v517_v61, %v407_v58  ;;  %v1040_v20 = vmul.f32 %v3751_v22, %v4291_v30 }
  0xc1   : > { %v1779_v31 = vadd.f32 %v1676_v24, %v1535_v59  ;;  %v6357_v1 = vrot.slane %v4513_v39, 2  ;;  %v993_v23 = vmul.f32 %v3748_v21, %v4061_v19  ;;  %v1285_v0 = vmul.f32 %v3760_v27, %v4291_v30  ;;  %v3485_v12 = vpop.eup %3484 }
  0xc2   : > { %v1598_v13 = vmul.f32 %v3765_v29, %v4588_v49  ;;  %v2578_v50 = vadd.f32 %v2474_v60, %v2334_v10  ;;  %v3175_v57 = vmul.f32 -1.442695, %v4670_v32  ;;  %v1158_v3 = vrot.slane %v1040_v20, 1  ;;  %v3487_v39 = vpop.eup %3486 }
  0xc3   : > { %v1920_v53 = vsel %vm1349_vm1, %v6357_v1, %v1919_v51  ;;  %v1519_v4 = vmul.f32 %v3762_v28, %v4354_v11  ;;  %v4687_v34 = vmul.f32 %v3485_v12, %v4526_v42  ;;  %v1403_v19 = vrot.slane %v1285_v0, 2  ;;  %v329_v1 = vld [vmem:[%s3734_s13 + $0x78] sm:$0xff] }
  0xc4   : > { %v2023_v59 = vadd.f32 %v1920_v53, %v1779_v31  ;;  %v1715_v2 = vrot.slane %v1598_v13, 1  ;;  %3290 = vmatprep.mubr.msk.f32.mxu0 %vm2614_vm2, %v2578_v50  ;;  %v4691_v30 = vmul.f32 %v3487_v39, %v4528_v25  ;;  %3490 = vpow2.f32 %v3175_v57  ;;  %v439_v50 = vld [vmem:[%s3739_s17 + $0x78] sm:$0xff] }
  0xc5   : > { %v6358_v63 = vrot.slane %v4539_v17, 1  ;;  %v1842_v58 = vmul.f32 %v3786_v48, %v4588_v49  ;;  %v3489_v42 = vpop.eup %3488  ;;  %v2074_v61 = vmul.f32 %v3792_v52, %v4687_v34  ;;  %v2152_v26 = vmul.f32 %v3822_v7, %v4687_v34 }
  0xc6   : > { %v2396_v25 = vmul.f32 %v3879_v6, %v4687_v34  ;;  %v4706_v17 = vmul.f32 %v3822_v7, %v4691_v30  ;;  %v4710_v31 = vmul.f32 %v3879_v6, %v4691_v30  ;;  %v763_v51 = vadd.f32 1.0, %v3489_v42 }
  0xc7   : > { %v1159_v24 = vsel %vm1104_vm0, %v6358_v63, %v1158_v3  ;;  %v6359_v10 = vrot.slane %v4545_v45, 2  ;;  %v2106_v53 = vadd.f32 %v2074_v61, %v2038_v44  ;;  %v2268_v0 = vrot.slane %v2152_v26, 1  ;;  %v440_v63 = vld [vmem:[%s3739_s17 + $0x80] sm:$0xff] }
  0xc8   : > { %v1238_v60 = vadd.f32 %v1159_v24, %v993_v23  ;;  %v2512_v13 = vrot.slane %v2396_v25, 2  ;;  %v330_v23 = vld [vmem:[%s3734_s13 + $0x80] sm:$0xff]  ;;  %v2269_v57 = vrot.slane %v4706_v17, 1  ;;  %v2513_v3 = vrot.slane %v4710_v31, 2 }
  0xc9   : > { %v1404_v20 = vsel %vm1349_vm1, %v6359_v10, %v1403_v19  ;;  %3492 = vrcp.f32 %v763_v51  ;;  %v1716_v39 = vsel %vm1104_vm0, %v1713_v47, %v1715_v2  ;;  %v4724_v45 = vadd.f32 %v2059_v55, %v2023_v59 }
  0xca   : > { %v1483_v12 = vadd.f32 %v1404_v20, %v1238_v60  ;;  %v1959_v24 = vrot.slane %v1842_v58, 2  ;;  %v384_v44 = vmul.f32 %v6350_v5, %v329_v1  ;;  %v2270_v42 = vsel %vm1104_vm0, %v2268_v0, %v2269_v57 }
  0xcb   : > { %v2514_v61 = vsel %vm1349_vm1, %v2512_v13, %v2513_v3  ;;  %v385_v26 = vmul.f32 %v6350_v5, %v330_v23  ;;  %v494_v16 = vmul.f32 %v6344_v43, %v439_v50  ;;  %v2350_v47 = vadd.f32 %v2270_v42, %v2106_v53 }
  0xcc   : > { %v1551_v19 = vadd.f32 %v1519_v4, %v1483_v12  ;;  %v2075_v55 = vmul.f32 %v3792_v52, %v4691_v30  ;;  %v495_v4 = vmul.f32 %v6344_v43, %v440_v63  ;;  %v6360_v59 = vrot.slane %v4585_v15, 2 }
  0xcd   : > { %v4741_v25 = vadd.f32 %v494_v16, %v384_v44  ;;  %v1017_v60 = vmul.f32 %v3751_v22, %v4302_v46  ;;  %v4747_v51 = vmul.f32 %v3751_v22, %v4313_v41  ;;  %v2594_v10 = vadd.f32 %v2514_v61, %v2350_v47  ;;  %v353_v16 = vld [vmem:[%s3734_s13 + $0x138] sm:$0xff]  ;;  %v354_v47 = vld [vmem:[%s3734_s13 + $0x140] sm:$0xff] }
  0xce   : > { %v1795_v2 = vadd.f32 %v1716_v39, %v1551_v19  ;;  %v1960_v58 = vsel %vm1349_vm1, %v6360_v59, %v1959_v24  ;;  %v4749_v20 = vadd.f32 %v495_v4, %v385_v26  ;;  %v978_v1 = vmul.f32 %v3748_v21, %v4302_v46  ;;  %v3491_v53 = vpop.eup %3490 }
  0xcf   : > { %v1262_v15 = vmul.f32 %v3760_v27, %v4302_v46  ;;  %v3152_v0 = vmul.f32 -1.442695, %v4741_v25  ;;  %v1120_v13 = vrot.slane %v1017_v60, 1  ;;  %v6263_v12 = vrot.slane %v4747_v51, 1  ;;  %3314 = vmatprep.mubr.msk.f32.mxu1 %vm2614_vm2, %v2594_v10 }
  0xd0   : > { %v4759_v23 = vmul.f32 %v3760_v27, %v4313_v41  ;;  %v787_v50 = vadd.f32 1.0, %v3491_v53  ;;  %v2039_v39 = vadd.f32 %v1960_v58, %v1795_v2  ;;  %v3153_v63 = vmul.f32 -1.442695, %v4749_v20  ;;  %v463_v53 = vld [vmem:[%s3739_s17 + $0x138] sm:$0xff] }
  0xd1   : > { %v1365_v19 = vrot.slane %v1262_v15, 2  ;;  %3494 = vpow2.f32 %v3152_v0  ;;  %v1122_v46 = vsel %vm1104_vm0, %v1120_v13, %v6263_v12  ;;  %v1504_v44 = vmul.f32 %v3762_v28, %v4625_v18  ;;  %v464_v0 = vld [vmem:[%s3739_s17 + $0x140] sm:$0xff] }
  0xd2   : > { %v6262_v24 = vrot.slane %v4759_v23, 2  ;;  %3496 = vrcp.f32 %v787_v50  ;;  %v1223_v42 = vadd.f32 %v1122_v46, %v978_v1  ;;  %v1575_v61 = vmul.f32 %v3765_v29, %v4625_v18 }
  0xd3   : > { %v4773_v26 = vmul.f32 %v3765_v29, %v4631_v56  ;;  %v3493_v2 = vpop.eup %3492  ;;  %3498 = vpow2.f32 %v3153_v63  ;;  %v1819_v59 = vmul.f32 %v3786_v48, %v4625_v18  ;;  %v4784_v58 = vmul.f32 %v3786_v48, %v4631_v56 }
  0xd4   : > { %v1367_v4 = vsel %vm1349_vm1, %v1365_v19, %v6262_v24  ;;  %v4787_v60 = vmul.f32 %v3493_v2, %v4601_v38  ;;  %v1677_v1 = vrot.slane %v1575_v61, 1  ;;  %v408_v63 = vmul.f32 %v6350_v5, %v353_v16 }
  0xd5   : > { %v1468_v10 = vadd.f32 %v1367_v4, %v1223_v42  ;;  %v1678_v15 = vrot.slane %v4773_v26, 1  ;;  %v1921_v13 = vrot.slane %v1819_v59, 2  ;;  %v6264_v50 = vrot.slane %v4784_v58, 2 }
  0xd6   : > { %v409_v19 = vmul.f32 %v6350_v5, %v354_v47  ;;  %v2130_v46 = vmul.f32 %v3822_v7, %v4787_v60  ;;  %v2374_v38 = vmul.f32 %v3879_v6, %v4787_v60  ;;  %v2107_v2 = vadd.f32 %v2075_v55, %v2039_v39 }
  0xd7   : > { %v1536_v42 = vadd.f32 %v1504_v44, %v1468_v10  ;;  %v1679_v61 = vsel %vm1104_vm0, %v1677_v1, %v1678_v15  ;;  %v1923_v4 = vsel %vm1349_vm1, %v1921_v13, %v6264_v50  ;;  %v518_v16 = vmul.f32 %v6344_v43, %v463_v53 }
  0xd8   : > { %v519_v47 = vmul.f32 %v6344_v43, %v464_v0  ;;  %v2231_v59 = vrot.slane %v2130_v46, 1  ;;  %v2475_v24 = vrot.slane %v2374_v38, 2  ;;  %v994_v12 = vmul.f32 %v3748_v21, %v4349_v37 }
  0xd9   : > { %v1041_v55 = vmul.f32 %v3751_v22, %v4349_v37  ;;  %v4811_v39 = vadd.f32 %v518_v16, %v408_v63  ;;  %v4817_v10 = vmul.f32 %v3751_v22, %v4354_v11  ;;  %v1286_v1 = vmul.f32 %v3760_v27, %v4349_v37 }
  0xda   : > { %v4813_v44 = vadd.f32 %v519_v47, %v409_v19  ;;  %v2232_v53 = vsel %vm1104_vm0, %v2229_v40, %v2231_v59  ;;  %v2476_v0 = vsel %vm1349_vm1, %v2473_v9, %v2475_v24  ;;  %v1780_v13 = vadd.f32 %v1679_v61, %v1536_v42 }
  0xdb   : > { %v1160_v63 = vrot.slane %v1041_v55, 1  ;;  %v3495_v46 = vpop.eup %3494  ;;  %v2335_v19 = vadd.f32 %v2232_v53, %v4724_v45  ;;  %v3176_v38 = vmul.f32 -1.442695, %v4811_v39  ;;  %v1161_v47 = vrot.slane %v4817_v10, 1 }
  0xdc   : > { %v3177_v16 = vmul.f32 -1.442695, %v4813_v44  ;;  %v3497_v37 = vpop.eup %3496  ;;  %v764_v50 = vadd.f32 1.0, %v3495_v46  ;;  %v4833_v62 = vmul.f32 %v3760_v27, %v4354_v11  ;;  %v1405_v14 = vrot.slane %v1286_v1, 2  ;;  %v441_v46 = vld [vmem:[%s3739_s17 + $0x88] sm:$0x3] }
  0xdd   : > { %v1520_v40 = vmul.f32 %v3762_v28, %v4687_v34  ;;  %v3499_v9 = vpop.eup %3498  ;;  %v2579_v24 = vadd.f32 %v2476_v0, %v2335_v19  ;;  %v4838_v45 = vmul.f32 %v3497_v37, %v4670_v32  ;;  %3500 = vpow2.f32 %v3176_v38  ;;  %v331_v0 = vld [vmem:[%s3734_s13 + $0x88] sm:$0x3] }
  0xde   : > { %v1162_v42 = vsel %vm1104_vm0, %v1160_v63, %v1161_v47  ;;  %v765_v61 = vadd.f32 1.0, %v3499_v9  ;;  %3502 = vrcp.f32 %v764_v50  ;;  %v6265_v55 = vrot.slane %v4833_v62, 2 }
  0xdf   : > { %v1239_v59 = vadd.f32 %v1162_v42, %v994_v12  ;;  %3291 = vmatmul.mubr.msk.f32.gmra.mrb[4].mxu0 %vm2614_vm2, %v2579_v24  ;;  %v2154_v1 = vmul.f32 %v3822_v7, %v4838_v45  ;;  %v2398_v32 = vmul.f32 %v3879_v6, %v4838_v45  ;;  %3504 = vpow2.f32 %v3177_v16 }
  0xe0   : > { %v1599_v53 = vmul.f32 %v3765_v29, %v4687_v34  ;;  %3506 = vrcp.f32 %v765_v61  ;;  %v1407_v12 = vsel %vm1349_vm1, %v1405_v14, %v6265_v55  ;;  %v4857_v50 = vmul.f32 %v3765_v29, %v4691_v30 }
  0xe1   : > { %v1843_v63 = vmul.f32 %v3786_v48, %v4687_v34  ;;  %v2271_v19 = vrot.slane %v2154_v1, 1  ;;  %v2515_v38 = vrot.slane %v2398_v32, 2  ;;  %v1484_v16 = vadd.f32 %v1407_v12, %v1239_v59 }
  0xe2   : > { %v1717_v37 = vrot.slane %v1599_v53, 1  ;;  %v1718_v9 = vrot.slane %v4857_v50, 1  ;;  %v4865_v24 = vmul.f32 %v3786_v48, %v4691_v30  ;;  %v386_v14 = vmul.f32 %v6350_v5, %v331_v0 }
  0xe3   : > { %v1961_v42 = vrot.slane %v1843_v63, 2  ;;  %v2272_v61 = vsel %vm1104_vm0, %v2269_v57, %v2271_v19  ;;  %v2516_v1 = vsel %vm1349_vm1, %v2513_v3, %v2515_v38  ;;  %v1552_v32 = vadd.f32 %v1520_v40, %v1484_v16  ;;  %v355_v16 = vld [vmem:[%s3734_s13 + $0x148] sm:$0x3] }
  0xe4   : > { %v496_v59 = vmul.f32 %v6344_v43, %v441_v46  ;;  %v2351_v53 = vadd.f32 %v2272_v61, %v2107_v2  ;;  %v2024_v12 = vadd.f32 %v1923_v4, %v1780_v13  ;;  %v1719_v63 = vsel %vm1104_vm0, %v1717_v37, %v1718_v9 }
  0xe5   : > { %v1962_v0 = vrot.slane %v4865_v24, 2  ;;  %v1796_v55 = vadd.f32 %v1719_v63, %v1552_v32  ;;  %v1019_v31 = vmul.f32 %v3751_v22, %v4548_v8  ;;  %v1264_v57 = vmul.f32 %v3760_v27, %v4548_v8 }
  0xe6   : > { %v4879_v17 = vadd.f32 %v496_v59, %v386_v14  ;;  %v2595_v3 = vadd.f32 %v2516_v1, %v2351_v53  ;;  %v979_v4 = vmul.f32 %v3748_v21, %v4313_v41  ;;  %v1577_v13 = vmul.f32 %v3765_v29, %v4787_v60 }
  0xe7   : > { %v1963_v2 = vsel %vm1349_vm1, %v1961_v42, %v1962_v0  ;;  %v3501_v40 = vpop.eup %3500  ;;  %v1123_v19 = vrot.slane %v1019_v31, 1  ;;  %v1368_v38 = vrot.slane %v1264_v57, 2  ;;  %v1505_v8 = vmul.f32 %v3762_v28, %v4631_v56  ;;  %v465_v57 = vld [vmem:[%s3739_s17 + $0x148] sm:$0x3] }
  0xe8   : > { %v3154_v46 = vmul.f32 -1.442695, %v4879_v17  ;;  %v3503_v37 = vpop.eup %3502  ;;  %3315 = vmatmul.mubr.msk.f32.gmra.mrb[4].mxu1 %vm2614_vm2, %v2595_v3  ;;  %v788_v42 = vadd.f32 1.0, %v3501_v40  ;;  %v4897_v14 = vadd.f32 %v1963_v2, %v1796_v55  ;;  %v1680_v41 = vrot.slane %v1577_v13, 1 }
  0xe9   : > { %v1821_v61 = vmul.f32 %v3786_v48, %v4787_v60  ;;  %v3505_v1 = vpop.eup %3504  ;;  %v4902_v32 = vmul.f32 %v3503_v37, %v4741_v25  ;;  %v6361_v59 = vrot.slane %v4747_v51, 1  ;;  %v6362_v63 = vrot.slane %v4759_v23, 2 }
  0xea   : > { %3508 = vpow2.f32 %v3154_v46  ;;  %v3507_v55 = vpop.eup %3506  ;;  %v789_v3 = vadd.f32 1.0, %v3505_v1  ;;  %v410_v13 = vmul.f32 %v6350_v5, %v355_v16  ;;  %v1681_v37 = vsel %vm1104_vm0, %v1678_v15, %v1680_v41 }
  0xeb   : > { %v1124_v53 = vsel %vm1104_vm0, %v6361_v59, %v1123_v19  ;;  %v1369_v31 = vsel %vm1349_vm1, %v6362_v63, %v1368_v38  ;;  %3510 = vrcp.f32 %v788_v42  ;;  %v4913_v40 = vmul.f32 %v3507_v55, %v4749_v20 }
  0xec   : > { %v1224_v2 = vadd.f32 %v1124_v53, %v979_v4  ;;  %v2060_v25 = vmul.f32 %v3792_v52, %v4902_v32  ;;  %v2131_v51 = vmul.f32 %v3822_v7, %v4902_v32  ;;  %v2375_v23 = vmul.f32 %v3879_v6, %v4902_v32 }
  0xed   : > { %3512 = vrcp.f32 %v789_v3  ;;  %v1924_v19 = vrot.slane %v1821_v61, 2  ;;  %v520_v38 = vmul.f32 %v6344_v43, %v465_v57  ;;  %v4924_v4 = vmul.f32 %v3822_v7, %v4913_v40 }
  0xee   : > { %v1469_v46 = vadd.f32 %v1369_v31, %v1224_v2  ;;  %v2233_v20 = vrot.slane %v2131_v51, 1  ;;  %v4928_v16 = vmul.f32 %v3879_v6, %v4913_v40  ;;  %v2092_v42 = vadd.f32 %v2060_v25, %v2024_v12  ;;  %v332_v2 = vld [vmem:[%s3734_s13 + $0x90] sm:$0xff] }
  0xef   : > { %v2477_v1 = vrot.slane %v2375_v23, 2  ;;  %v6363_v61 = vrot.slane %v4784_v58, 2  ;;  %v2234_v63 = vrot.slane %v4924_v4, 1  ;;  %v2061_v57 = vmul.f32 %v3792_v52, %v4913_v40 }
  0xf0   : > { %v1537_v59 = vadd.f32 %v1505_v8, %v1469_v46  ;;  %v6266_v31 = vrot.slane %v4928_v16, 2  ;;  %v4940_v55 = vadd.f32 %v520_v38, %v410_v13  ;;  %v995_v15 = vmul.f32 %v3748_v21, %v4354_v11 }
  0xf1   : > { %v1925_v53 = vsel %vm1349_vm1, %v6363_v61, %v1924_v19  ;;  %v1043_v12 = vmul.f32 %v3751_v22, %v4588_v49  ;;  %v1288_v58 = vmul.f32 %v3760_v27, %v4588_v49  ;;  %v2235_v8 = vsel %vm1104_vm0, %v2233_v20, %v2234_v63  ;;  %v333_v20 = vld [vmem:[%s3734_s13 + $0x98] sm:$0xff] }
  0xf2   : > { %v1781_v26 = vadd.f32 %v1681_v37, %v1537_v59  ;;  %v2479_v41 = vsel %vm1349_vm1, %v2477_v1, %v6266_v31  ;;  %v3178_v3 = vmul.f32 -1.442695, %v4940_v55  ;;  %v1601_v11 = vmul.f32 %v3765_v29, %v4838_v45  ;;  %v442_v37 = vld [vmem:[%s3739_s17 + $0x90] sm:$0xff] }
  0xf3   : > { %v2336_v13 = vadd.f32 %v2235_v8, %v2092_v42  ;;  %v1163_v51 = vrot.slane %v1043_v12, 1  ;;  %v1408_v23 = vrot.slane %v1288_v58, 2  ;;  %v1521_v46 = vmul.f32 %v3762_v28, %v4691_v30 }
  0xf4   : > { %v2025_v25 = vadd.f32 %v1925_v53, %v1781_v26  ;;  %v3509_v49 = vpop.eup %3508  ;;  %3514 = vpow2.f32 %v3178_v3  ;;  %v1720_v19 = vrot.slane %v1601_v11, 1  ;;  %v1845_v38 = vmul.f32 %v3786_v48, %v4838_v45  ;;  %v443_v11 = vld [vmem:[%s3739_s17 + $0x98] sm:$0xff] }
  0xf5   : > { %v3511_v1 = vpop.eup %3510  ;;  %v2580_v59 = vadd.f32 %v2479_v41, %v2336_v13  ;;  %v766_v61 = vadd.f32 1.0, %v3509_v49  ;;  %v1164_v42 = vsel %vm1104_vm0, %v1161_v47, %v1163_v51  ;;  %v387_v53 = vmul.f32 %v6350_v5, %v332_v2 }
  0xf6   : > { %v4969_v26 = vmul.f32 %v3511_v1, %v4811_v39  ;;  %v4971_v12 = vadd.f32 %v2061_v57, %v2025_v25  ;;  %v1240_v58 = vadd.f32 %v1164_v42, %v995_v15  ;;  %v6364_v8 = vrot.slane %v4833_v62, 2 }
  0xf7   : > { %v3513_v31 = vpop.eup %3512  ;;  %3293 = vmatprep.mubr.msk.f32.mxu0 %vm2614_vm2, %v2580_v59  ;;  %3516 = vrcp.f32 %v766_v61  ;;  %v1964_v10 = vrot.slane %v1845_v38, 2  ;;  %v388_v47 = vmul.f32 %v6350_v5, %v333_v20  ;;  %v497_v41 = vmul.f32 %v6344_v43, %v442_v37 }
  0xf8   : > { %v1409_v3 = vsel %vm1349_vm1, %v6364_v8, %v1408_v23  ;;  %v4981_v39 = vmul.f32 %v3513_v31, %v4813_v44  ;;  %v2076_v57 = vmul.f32 %v3792_v52, %v4969_v26  ;;  %v2155_v62 = vmul.f32 %v3822_v7, %v4969_v26 }
  0xf9   : > { %v2399_v15 = vmul.f32 %v3879_v6, %v4969_v26  ;;  %v1485_v2 = vadd.f32 %v1409_v3, %v1240_v58  ;;  %v1721_v13 = vsel %vm1104_vm0, %v1718_v9, %v1720_v19  ;;  %v498_v25 = vmul.f32 %v6344_v43, %v443_v11 }
  0xfa   : > { %v4993_v51 = vadd.f32 %v497_v41, %v387_v53  ;;  %v4997_v44 = vmul.f32 %v3822_v7, %v4981_v39  ;;  %v2273_v31 = vrot.slane %v2155_v62, 1  ;;  %v5001_v23 = vmul.f32 %v3879_v6, %v4981_v39 }
  0xfb   : > { %v1965_v49 = vsel %vm1349_vm1, %v1962_v0, %v1964_v10  ;;  %v2108_v50 = vadd.f32 %v2076_v57, %v4897_v14  ;;  %v2517_v9 = vrot.slane %v2399_v15, 2  ;;  %v1553_v19 = vadd.f32 %v1521_v46, %v1485_v2 }
  0xfc   : > { %v5007_v38 = vadd.f32 %v498_v25, %v388_v47  ;;  %v6269_v20 = vrot.slane %v4997_v44, 1  ;;  %v6268_v37 = vrot.slane %v5001_v23, 2  ;;  %v2077_v1 = vmul.f32 %v3792_v52, %v4981_v39 }
  0xfd   : > { %v3155_v59 = vmul.f32 -1.442695, %v4993_v51  ;;  %v1797_v61 = vadd.f32 %v1721_v13, %v1553_v19  ;;  %v1020_v0 = vmul.f32 %v3751_v22, %v4625_v18  ;;  %v5019_v14 = vmul.f32 %v3751_v22, %v4631_v56 }
  0xfe   : > { %v3156_v24 = vmul.f32 -1.442695, %v5007_v38  ;;  %v3515_v46 = vpop.eup %3514  ;;  %v2275_v42 = vsel %vm1104_vm0, %v2273_v31, %v6269_v20  ;;  %v2519_v53 = vsel %vm1349_vm1, %v2517_v9, %v6268_v37  ;;  %v1265_v58 = vmul.f32 %v3760_v27, %v4625_v18 }
  0xff   : > { %3518 = vpow2.f32 %v3155_v59  ;;  %v2352_v8 = vadd.f32 %v2275_v42, %v2108_v50  ;;  %v790_v3 = vadd.f32 1.0, %v3515_v46  ;;  %v980_v11 = vmul.f32 %v3748_v21, %v4625_v18  ;;  %v356_v59 = vld [vmem:[%s3734_s13 + $0x150] sm:$0xff] }
 0x100   : > { %3520 = vpow2.f32 %v3156_v24  ;;  %v1125_v10 = vrot.slane %v1020_v0, 1  ;;  %v6267_v47 = vrot.slane %v5019_v14, 1  ;;  %v5034_v41 = vmul.f32 %v3760_v27, %v4631_v56 }
 0x101   : > { %v1370_v57 = vrot.slane %v1265_v58, 2  ;;  %v3517_v62 = vpop.eup %3516  ;;  %v2596_v15 = vadd.f32 %v2519_v53, %v2352_v8  ;;  %3522 = vrcp.f32 %v790_v3  ;;  %v2041_v2 = vadd.f32 %v1965_v49, %v1797_v61  ;;  %v357_v61 = vld [vmem:[%s3734_s13 + $0x158] sm:$0xff]  ;;  %v466_v53 = vld [vmem:[%s3739_s17 + $0x150] sm:$0xff] }
 0x102   : > { %v1506_v13 = vmul.f32 %v3762_v28, %v4902_v32  ;;  %v5039_v18 = vmul.f32 %v3517_v62, %v4879_v17  ;;  %v1127_v25 = vsel %vm1104_vm0, %v1125_v10, %v6267_v47  ;;  %v1371_v31 = vrot.slane %v5034_v41, 2  ;;  %v467_v10 = vld [vmem:[%s3739_s17 + $0x158] sm:$0xff] }
 0x103   : > { %v1578_v50 = vmul.f32 %v3765_v29, %v4902_v32  ;;  %3317 = vmatprep.mubr.msk.f32.mxu1 %vm2614_vm2, %v2596_v15  ;;  %v1225_v49 = vadd.f32 %v1127_v25, %v980_v11  ;;  %v5050_v9 = vmul.f32 %v3765_v29, %v4913_v40  ;;  %v1822_v17 = vmul.f32 %v3786_v48, %v4902_v32 }
 0x104   : > { %v5056_v19 = vmul.f32 %v3786_v48, %v4913_v40  ;;  %v2133_v24 = vmul.f32 %v3822_v7, %v5039_v18  ;;  %v2377_v0 = vmul.f32 %v3879_v6, %v5039_v18  ;;  %v1372_v46 = vsel %vm1349_vm1, %v1370_v57, %v1371_v31 }
 0x105   : > { %v1682_v42 = vrot.slane %v1578_v50, 1  ;;  %v1470_v58 = vadd.f32 %v1372_v46, %v1225_v49  ;;  %v6273_v8 = vrot.slane %v5050_v9, 1  ;;  %v1926_v3 = vrot.slane %v1822_v17, 2 }
 0x106   : > { %v6272_v11 = vrot.slane %v5056_v19, 2  ;;  %v2236_v62 = vrot.slane %v2133_v24, 1  ;;  %v2480_v15 = vrot.slane %v2377_v0, 2  ;;  %v411_v25 = vmul.f32 %v6350_v5, %v356_v59 }
 0x107   : > { %v412_v47 = vmul.f32 %v6350_v5, %v357_v61  ;;  %v2109_v37 = vadd.f32 %v2077_v1, %v2041_v2  ;;  %v1538_v20 = vadd.f32 %v1506_v13, %v1470_v58  ;;  %v1684_v57 = vsel %vm1104_vm0, %v1682_v42, %v6273_v8 }
 0x108   : > { %v521_v50 = vmul.f32 %v6344_v43, %v466_v53  ;;  %v2237_v17 = vsel %vm1104_vm0, %v2234_v63, %v2236_v62  ;;  %v6365_v24 = vrot.slane %v4928_v16, 2  ;;  %v1928_v1 = vsel %vm1349_vm1, %v1926_v3, %v6272_v11 }
 0x109   : > { %v3519_v49 = vpop.eup %3518  ;;  %v522_v2 = vmul.f32 %v6344_v43, %v467_v10  ;;  %v2337_v59 = vadd.f32 %v2237_v17, %v4971_v12  ;;  %v996_v4 = vmul.f32 %v3748_v21, %v4687_v34  ;;  %v1044_v16 = vmul.f32 %v3751_v22, %v4687_v34 }
 0x10a   : > { %v2481_v0 = vsel %vm1349_vm1, %v6365_v24, %v2480_v15  ;;  %v3521_v13 = vpop.eup %3520  ;;  %v767_v61 = vadd.f32 1.0, %v3519_v49  ;;  %v5088_v46 = vadd.f32 %v521_v50, %v411_v25  ;;  %v5098_v53 = vmul.f32 %v3751_v22, %v4691_v30 }
 0x10b   : > { %v768_v63 = vadd.f32 1.0, %v3521_v13  ;;  %v5092_v42 = vadd.f32 %v522_v2, %v412_v47  ;;  %v3523_v58 = vpop.eup %3522  ;;  %v2581_v3 = vadd.f32 %v2481_v0, %v2337_v59  ;;  %v1782_v12 = vadd.f32 %v1684_v57, %v1538_v20 }
 0x10c   : > { %3524 = vrcp.f32 %v767_v61  ;;  %v3179_v10 = vmul.f32 -1.442695, %v5088_v46  ;;  %v5102_v62 = vmul.f32 %v3523_v58, %v4940_v55  ;;  %v1165_v15 = vrot.slane %v1044_v16, 1 }
 0x10d   : > { %3526 = vrcp.f32 %v768_v63  ;;  %v3180_v47 = vmul.f32 -1.442695, %v5092_v42  ;;  %3294 = vmatmul.mubr.msk.f32.gmra.mrb[6].mxu0 %vm2614_vm2, %v2581_v3  ;;  %v6271_v25 = vrot.slane %v5098_v53, 1  ;;  %v1289_v50 = vmul.f32 %v3760_v27, %v4687_v34  ;;  %v334_v63 = vld [vmem:[%s3734_s13 + $0xa0] sm:$0x3] }
 0x10e   : > { %3528 = vpow2.f32 %v3179_v10  ;;  %v5111_v20 = vmul.f32 %v3760_v27, %v4691_v30  ;;  %v2157_v55 = vmul.f32 %v3822_v7, %v5102_v62  ;;  %v2401_v57 = vmul.f32 %v3879_v6, %v5102_v62 }
 0x10f   : > { %3530 = vpow2.f32 %v3180_v47  ;;  %v1522_v49 = vmul.f32 %v3762_v28, %v4969_v26  ;;  %v1167_v17 = vsel %vm1104_vm0, %v1165_v15, %v6271_v25  ;;  %v1410_v34 = vrot.slane %v1289_v50, 2  ;;  %v444_v47 = vld [vmem:[%s3739_s17 + $0xa0] sm:$0x3] }
 0x110   : > { %v6270_v24 = vrot.slane %v5111_v20, 2  ;;  %v1602_v0 = vmul.f32 %v3765_v29, %v4969_v26  ;;  %v2276_v2 = vrot.slane %v2157_v55, 1  ;;  %v2520_v13 = vrot.slane %v2401_v57, 2 }
 0x111   : > { %v1241_v59 = vadd.f32 %v1167_v17, %v996_v4  ;;  %v5127_v61 = vmul.f32 %v3765_v29, %v4981_v39  ;;  %v1846_v3 = vmul.f32 %v3786_v48, %v4969_v26  ;;  %v5137_v10 = vmul.f32 %v3786_v48, %v4981_v39 }
 0x112   : > { %v1412_v16 = vsel %vm1349_vm1, %v1410_v34, %v6270_v24  ;;  %v1722_v58 = vrot.slane %v1602_v0, 1  ;;  %v6366_v4 = vrot.slane %v4997_v44, 1  ;;  %v6367_v50 = vrot.slane %v5001_v23, 2 }
 0x113   : > { %v1486_v57 = vadd.f32 %v1412_v16, %v1241_v59  ;;  %v1723_v17 = vrot.slane %v5127_v61, 1  ;;  %v1966_v0 = vrot.slane %v1846_v3, 2  ;;  %v6275_v24 = vrot.slane %v5137_v10, 2 }
 0x114   : > { %v2277_v15 = vsel %vm1104_vm0, %v6366_v4, %v2276_v2  ;;  %v2521_v55 = vsel %vm1349_vm1, %v6367_v50, %v2520_v13  ;;  %v389_v25 = vmul.f32 %v6350_v5, %v334_v63  ;;  %v2026_v11 = vadd.f32 %v1928_v1, %v1782_v12 }
 0x115   : > { %v2353_v34 = vadd.f32 %v2277_v15, %v2109_v37  ;;  %v1554_v8 = vadd.f32 %v1522_v49, %v1486_v57  ;;  %v1724_v44 = vsel %vm1104_vm0, %v1722_v58, %v1723_v17  ;;  %v499_v2 = vmul.f32 %v6344_v43, %v444_v47 }
 0x116   : > { %v3525_v23 = vpop.eup %3524  ;;  %v981_v13 = vmul.f32 %v3748_v21, %v4631_v56  ;;  %v1022_v37 = vmul.f32 %v3751_v22, %v4787_v60  ;;  %v1267_v59 = vmul.f32 %v3760_v27, %v4787_v60  ;;  %v1968_v49 = vsel %vm1349_vm1, %v1966_v0, %v6275_v24 }
 0x117   : > { %v2597_v4 = vadd.f32 %v2521_v55, %v2353_v34  ;;  %v3527_v63 = vpop.eup %3526  ;;  %v5160_v1 = vmul.f32 %v3525_v23, %v4993_v51  ;;  %v1798_v12 = vadd.f32 %v1724_v44, %v1554_v8  ;;  %v5165_v16 = vadd.f32 %v499_v2, %v389_v25 }
 0x118   : > { %v3529_v58 = vpop.eup %3528  ;;  %v5169_v56 = vmul.f32 %v3527_v63, %v5007_v38  ;;  %v1128_v3 = vrot.slane %v1022_v37, 1  ;;  %v1373_v47 = vrot.slane %v1267_v59, 2  ;;  %v1580_v60 = vmul.f32 %v3765_v29, %v5039_v18 }
 0x119   : > { %3318 = vmatmul.mubr.msk.f32.gmra.mrb[6].mxu1 %vm2614_vm2, %v2597_v4  ;;  %v3531_v51 = vpop.eup %3530  ;;  %v2062_v8 = vmul.f32 %v3792_v52, %v5160_v1  ;;  %v2134_v15 = vmul.f32 %v3822_v7, %v5160_v1  ;;  %v2378_v25 = vmul.f32 %v3879_v6, %v5160_v1  ;;  %v791_v50 = vadd.f32 1.0, %v3529_v58 }
 0x11a   : > { %v5181_v38 = vmul.f32 %v3822_v7, %v5169_v56  ;;  %v5185_v55 = vmul.f32 %v3879_v6, %v5169_v56  ;;  %v792_v57 = vadd.f32 1.0, %v3531_v51  ;;  %v1507_v34 = vmul.f32 %v3762_v28, %v4913_v40 }
 0x11b   : > { %v2094_v0 = vadd.f32 %v2062_v8, %v2026_v11  ;;  %v2238_v44 = vrot.slane %v2134_v15, 1  ;;  %v2482_v2 = vrot.slane %v2378_v25, 2  ;;  %3532 = vrcp.f32 %v791_v50  ;;  %v358_v8 = vld [vmem:[%s3734_s13 + $0x160] sm:$0x3] }
 0x11c   : > { %v6274_v23 = vrot.slane %v5181_v38, 1  ;;  %v2483_v4 = vrot.slane %v5185_v55, 2  ;;  %3534 = vrcp.f32 %v792_v57  ;;  %v3157_v37 = vmul.f32 -1.442695, %v5165_v16  ;;  %v468_v15 = vld [vmem:[%s3739_s17 + $0x160] sm:$0x3] }
 0x11d   : > { %v6368_v59 = vrot.slane %v5019_v14, 1  ;;  %v1374_v58 = vsel %vm1349_vm1, %v1371_v31, %v1373_v47  ;;  %v1685_v51 = vrot.slane %v1580_v60, 1  ;;  %v1824_v11 = vmul.f32 %v3786_v48, %v5039_v18 }
 0x11e   : > { %v2240_v25 = vsel %vm1104_vm0, %v2238_v44, %v6274_v23  ;;  %v2484_v14 = vsel %vm1349_vm1, %v2482_v2, %v2483_v4  ;;  %3536 = vpow2.f32 %v3157_v37  ;;  %v2042_v50 = vadd.f32 %v1968_v49, %v1798_v12  ;;  %v335_v49 = vld [vmem:[%s3734_s13 + $0xa8] sm:$0xff] }
 0x11f   : > { %v1129_v63 = vsel %vm1104_vm0, %v6368_v59, %v1128_v3  ;;  %v2338_v41 = vadd.f32 %v2240_v25, %v2094_v0  ;;  %v6369_v31 = vrot.slane %v5050_v9, 1  ;;  %v1929_v60 = vrot.slane %v1824_v11, 2  ;;  %v445_v25 = vld [vmem:[%s3739_s17 + $0xa8] sm:$0xff] }
 0x120   : > { %v1226_v3 = vadd.f32 %v1129_v63, %v981_v13  ;;  %v2063_v59 = vmul.f32 %v3792_v52, %v5169_v56  ;;  %v413_v44 = vmul.f32 %v6350_v5, %v358_v8  ;;  %v523_v23 = vmul.f32 %v6344_v43, %v468_v15 }
 0x121   : > { %v1686_v47 = vsel %vm1104_vm0, %v6369_v31, %v1685_v51  ;;  %v2582_v24 = vadd.f32 %v2484_v14, %v2338_v41  ;;  %v997_v13 = vmul.f32 %v3748_v21, %v4691_v30  ;;  %v1046_v12 = vmul.f32 %v3751_v22, %v4838_v45  ;;  %v336_v51 = vld [vmem:[%s3734_s13 + $0xb0] sm:$0xff] }
 0x122   : > { %v1471_v57 = vadd.f32 %v1374_v58, %v1226_v3  ;;  %v1291_v9 = vmul.f32 %v3760_v27, %v4838_v45  ;;  %v6370_v2 = vrot.slane %v5056_v19, 2  ;;  %v5225_v63 = vadd.f32 %v523_v23, %v413_v44  ;;  %v446_v44 = vld [vmem:[%s3739_s17 + $0xb0] sm:$0xff] }
 0x123   : > { %v1604_v58 = vmul.f32 %v3765_v29, %v5102_v62  ;;  %3296 = vmatprep.mubr.msk.f32.mxu0 %vm2614_vm2, %v2582_v24  ;;  %v1168_v30 = vrot.slane %v1046_v12, 1  ;;  %v1523_v45 = vmul.f32 %v3762_v28, %v4981_v39  ;;  %v390_v15 = vmul.f32 %v6350_v5, %v335_v49 }
 0x124   : > { %v1539_v0 = vadd.f32 %v1507_v34, %v1471_v57  ;;  %v1930_v37 = vsel %vm1349_vm1, %v6370_v2, %v1929_v60  ;;  %v1413_v11 = vrot.slane %v1291_v9, 2  ;;  %v1848_v34 = vmul.f32 %v3786_v48, %v5102_v62 }
 0x125   : > { %v3181_v8 = vmul.f32 -1.442695, %v5225_v63  ;;  %v1725_v23 = vrot.slane %v1604_v58, 1  ;;  %v3533_v14 = vpop.eup %3532  ;;  %v6371_v3 = vrot.slane %v5098_v53, 1  ;;  %v6372_v41 = vrot.slane %v5111_v20, 2 }
 0x126   : > { %v1783_v19 = vadd.f32 %v1686_v47, %v1539_v0  ;;  %v1969_v60 = vrot.slane %v1848_v34, 2  ;;  %v391_v57 = vmul.f32 %v6350_v5, %v336_v51  ;;  %v3535_v47 = vpop.eup %3534  ;;  %v5247_v12 = vmul.f32 %v3533_v14, %v5088_v46 }
 0x127   : > { %v1169_v24 = vsel %vm1104_vm0, %v6371_v3, %v1168_v30  ;;  %v1414_v31 = vsel %vm1349_vm1, %v6372_v41, %v1413_v11  ;;  %3538 = vpow2.f32 %v3181_v8  ;;  %v5250_v0 = vmul.f32 %v3535_v47, %v5092_v42 }
 0x128   : > { %v2027_v9 = vadd.f32 %v1930_v37, %v1783_v19  ;;  %v1242_v49 = vadd.f32 %v1169_v24, %v997_v13  ;;  %v1726_v53 = vsel %vm1104_vm0, %v1723_v17, %v1725_v23  ;;  %v6373_v20 = vrot.slane %v5137_v10, 2  ;;  %v3537_v51 = vpop.eup %3536 }
 0x129   : > { %v500_v58 = vmul.f32 %v6344_v43, %v445_v25  ;;  %v2078_v46 = vmul.f32 %v3792_v52, %v5247_v12  ;;  %v2158_v13 = vmul.f32 %v3822_v7, %v5247_v12  ;;  %v2402_v42 = vmul.f32 %v3879_v6, %v5247_v12 }
 0x12a   : > { %v1970_v2 = vsel %vm1349_vm1, %v6373_v20, %v1969_v60  ;;  %v501_v61 = vmul.f32 %v6344_v43, %v446_v44  ;;  %v5268_v17 = vmul.f32 %v3822_v7, %v5250_v0  ;;  %v5272_v10 = vmul.f32 %v3879_v6, %v5250_v0 }
 0x12b   : > { %v769_v37 = vadd.f32 1.0, %v3537_v51  ;;  %v1487_v30 = vadd.f32 %v1414_v31, %v1242_v49  ;;  %v2110_v11 = vadd.f32 %v2078_v46, %v2042_v50  ;;  %v2278_v34 = vrot.slane %v2158_v13, 1 }
 0x12c   : > { %v2522_v19 = vrot.slane %v2402_v42, 2  ;;  %v5274_v8 = vadd.f32 %v2063_v59, %v2027_v9  ;;  %v2279_v23 = vrot.slane %v5268_v17, 1  ;;  %v2523_v25 = vrot.slane %v5272_v10, 2 }
 0x12d   : > { %3540 = vrcp.f32 %v769_v37  ;;  %v1555_v14 = vadd.f32 %v1523_v45, %v1487_v30  ;;  %v5278_v3 = vadd.f32 %v500_v58, %v390_v15  ;;  %v5280_v24 = vadd.f32 %v501_v61, %v391_v57  ;;  %v359_v37 = vld [vmem:[%s3734_s13 + $0x168] sm:$0xff]  ;;  %v360_v30 = vld [vmem:[%s3734_s13 + $0x170] sm:$0xff] }
 0x12e   : > { %v982_v41 = vmul.f32 %v3748_v21, %v4902_v32  ;;  %v1023_v50 = vmul.f32 %v3751_v22, %v4902_v32  ;;  %v2280_v59 = vsel %vm1104_vm0, %v2278_v34, %v2279_v23  ;;  %v2524_v31 = vsel %vm1349_vm1, %v2522_v19, %v2523_v25 }
 0x12f   : > { %v1799_v60 = vadd.f32 %v1726_v53, %v1555_v14  ;;  %v5294_v45 = vmul.f32 %v3751_v22, %v4913_v40  ;;  %v2354_v15 = vadd.f32 %v2280_v59, %v2110_v11  ;;  %v3158_v57 = vmul.f32 -1.442695, %v5278_v3  ;;  %v469_v14 = vld [vmem:[%s3739_s17 + $0x168] sm:$0xff] }
 0x130   : > { %v3159_v44 = vmul.f32 -1.442695, %v5280_v24  ;;  %v1130_v47 = vrot.slane %v1023_v50, 1  ;;  %v2079_v9 = vmul.f32 %v3792_v52, %v5250_v0  ;;  %v1268_v53 = vmul.f32 %v3760_v27, %v4902_v32 }
 0x131   : > { %v6278_v49 = vrot.slane %v5294_v45, 1  ;;  %v5305_v20 = vmul.f32 %v3760_v27, %v4913_v40  ;;  %v3539_v58 = vpop.eup %3538  ;;  %v2598_v51 = vadd.f32 %v2524_v31, %v2354_v15  ;;  %v2043_v46 = vadd.f32 %v1970_v2, %v1799_v60  ;;  %v470_v60 = vld [vmem:[%s3739_s17 + $0x170] sm:$0xff] }
 0x132   : > { %3542 = vpow2.f32 %v3158_v57  ;;  %v1581_v13 = vmul.f32 %v3765_v29, %v5160_v1  ;;  %v793_v42 = vadd.f32 1.0, %v3539_v58  ;;  %v1508_v32 = vmul.f32 %v3762_v28, %v5160_v1 }
 0x133   : > { %3544 = vpow2.f32 %v3159_v44  ;;  %v1132_v61 = vsel %vm1104_vm0, %v1130_v47, %v6278_v49  ;;  %3320 = vmatprep.mubr.msk.f32.mxu1 %vm2614_vm2, %v2598_v51  ;;  %v1375_v2 = vrot.slane %v1268_v53, 2  ;;  %v6276_v34 = vrot.slane %v5305_v20, 2 }
 0x134   : > { %v1227_v11 = vadd.f32 %v1132_v61, %v982_v41  ;;  %v5320_v19 = vmul.f32 %v3765_v29, %v5169_v56  ;;  %3546 = vrcp.f32 %v793_v42  ;;  %v1687_v50 = vrot.slane %v1581_v13, 1 }
 0x135   : > { %v1825_v59 = vmul.f32 %v3786_v48, %v5160_v1  ;;  %v5327_v31 = vmul.f32 %v3786_v48, %v5169_v56  ;;  %v1377_v41 = vsel %vm1349_vm1, %v1375_v2, %v6276_v34  ;;  %v414_v57 = vmul.f32 %v6350_v5, %v359_v37 }
 0x136   : > { %v6277_v15 = vrot.slane %v5320_v19, 1  ;;  %v415_v44 = vmul.f32 %v6350_v5, %v360_v30  ;;  %v1472_v53 = vadd.f32 %v1377_v41, %v1227_v11  ;;  %v524_v13 = vmul.f32 %v6344_v43, %v469_v14 }
 0x137   : > { %v3541_v47 = vpop.eup %3540  ;;  %v1931_v58 = vrot.slane %v1825_v59, 2  ;;  %v6279_v51 = vrot.slane %v5327_v31, 2  ;;  %v5341_v61 = vadd.f32 %v2079_v9, %v2043_v46  ;;  %v525_v37 = vmul.f32 %v6344_v43, %v470_v60 }
 0x138   : > { %v5339_v42 = vmul.f32 %v3541_v47, %v5165_v16  ;;  %v1689_v2 = vsel %vm1104_vm0, %v1687_v50, %v6277_v15  ;;  %v1540_v34 = vadd.f32 %v1508_v32, %v1472_v53  ;;  %v5347_v30 = vadd.f32 %v524_v13, %v414_v57 }
 0x139   : > { %v998_v11 = vmul.f32 %v3748_v21, %v4969_v26  ;;  %v1047_v14 = vmul.f32 %v3751_v22, %v4969_v26  ;;  %v5357_v46 = vadd.f32 %v525_v37, %v415_v44  ;;  %v5361_v50 = vmul.f32 %v3751_v22, %v4981_v39 }
 0x13a   : > { %v2136_v16 = vmul.f32 %v3822_v7, %v5339_v42  ;;  %v2380_v9 = vmul.f32 %v3879_v6, %v5339_v42  ;;  %v1933_v32 = vsel %vm1349_vm1, %v1931_v58, %v6279_v51  ;;  %v3182_v59 = vmul.f32 -1.442695, %v5347_v30 }
 0x13b   : > { %v1170_v60 = vrot.slane %v1047_v14, 1  ;;  %v1292_v41 = vmul.f32 %v3760_v27, %v4969_v26  ;;  %v3183_v44 = vmul.f32 -1.442695, %v5357_v46  ;;  %v1171_v13 = vrot.slane %v5361_v50, 1 }
 0x13c   : > { %v3543_v57 = vpop.eup %3542  ;;  %v2241_v47 = vrot.slane %v2136_v16, 1  ;;  %v2485_v53 = vrot.slane %v2380_v9, 2  ;;  %v1784_v49 = vadd.f32 %v1689_v2, %v1540_v34  ;;  %3548 = vpow2.f32 %v3182_v59 }
 0x13d   : > { %v3545_v37 = vpop.eup %3544  ;;  %v770_v15 = vadd.f32 1.0, %v3543_v57  ;;  %v5373_v58 = vmul.f32 %v3760_v27, %v4981_v39  ;;  %v6374_v14 = vrot.slane %v5181_v38, 1  ;;  %3550 = vpow2.f32 %v3183_v44 }
 0x13e   : > { %v2486_v26 = vsel %vm1349_vm1, %v2483_v4, %v2485_v53  ;;  %v771_v16 = vadd.f32 1.0, %v3545_v37  ;;  %v3547_v9 = vpop.eup %3546  ;;  %v1172_v34 = vsel %vm1104_vm0, %v1170_v60, %v1171_v13  ;;  %v1415_v2 = vrot.slane %v1292_v41, 2  ;;  %v447_v53 = vld [vmem:[%s3739_s17 + $0xb8] sm:$0x3] }
 0x13f   : > { %v2242_v51 = vsel %vm1104_vm0, %v6374_v14, %v2241_v47  ;;  %3552 = vrcp.f32 %v770_v15  ;;  %v5386_v38 = vmul.f32 %v3547_v9, %v5225_v63  ;;  %v1243_v55 = vadd.f32 %v1172_v34, %v998_v11 }
 0x140   : > { %v2339_v57 = vadd.f32 %v2242_v51, %v5274_v8  ;;  %3554 = vrcp.f32 %v771_v16  ;;  %v6280_v4 = vrot.slane %v5373_v58, 2  ;;  %v1524_v47 = vmul.f32 %v3762_v28, %v5247_v12  ;;  %v337_v51 = vld [vmem:[%s3734_s13 + $0xb8] sm:$0x3] }
 0x141   : > { %v1605_v8 = vmul.f32 %v3765_v29, %v5247_v12  ;;  %v5395_v15 = vmul.f32 %v3765_v29, %v5250_v0  ;;  %v2160_v63 = vmul.f32 %v3822_v7, %v5386_v38  ;;  %v2404_v11 = vmul.f32 %v3879_v6, %v5386_v38 }
 0x142   : > { %v2583_v59 = vadd.f32 %v2486_v26, %v2339_v57  ;;  %v1417_v60 = vsel %vm1349_vm1, %v1415_v2, %v6280_v4  ;;  %v1849_v41 = vmul.f32 %v3786_v48, %v5247_v12  ;;  %v5412_v26 = vmul.f32 %v3786_v48, %v5250_v0 }
 0x143   : > { %v1488_v44 = vadd.f32 %v1417_v60, %v1243_v55  ;;  %v1727_v37 = vrot.slane %v1605_v8, 1  ;;  %v1728_v14 = vrot.slane %v5395_v15, 1  ;;  %v2281_v16 = vrot.slane %v2160_v63, 1 }
 0x144   : > { %3297 = vmatmul.mubr.msk.f32.gmra.mrb[8].mxu0 %vm2614_vm2, %v2583_v59  ;;  %v2525_v9 = vrot.slane %v2404_v11, 2  ;;  %v1971_v57 = vrot.slane %v1849_v41, 2  ;;  %v392_v34 = vmul.f32 %v6350_v5, %v337_v51  ;;  %v1972_v59 = vrot.slane %v5412_v26, 2 }
 0x145   : > { %v1556_v2 = vadd.f32 %v1524_v47, %v1488_v44  ;;  %v1729_v4 = vsel %vm1104_vm0, %v1727_v37, %v1728_v14  ;;  %v502_v55 = vmul.f32 %v6344_v43, %v447_v53  ;;  %v2282_v8 = vsel %vm1104_vm0, %v2279_v23, %v2281_v16 }
 0x146   : > { %v2526_v63 = vsel %vm1349_vm1, %v2523_v25, %v2525_v9  ;;  %v2028_v11 = vadd.f32 %v1933_v32, %v1784_v49  ;;  %v1025_v47 = vmul.f32 %v3751_v22, %v5039_v18  ;;  %v3549_v51 = vpop.eup %3548  ;;  %v2355_v60 = vadd.f32 %v2282_v8, %v5341_v61 }
 0x147   : > { %v1800_v41 = vadd.f32 %v1729_v4, %v1556_v2  ;;  %v5429_v44 = vadd.f32 %v502_v55, %v392_v34  ;;  %v983_v53 = vmul.f32 %v3748_v21, %v4913_v40  ;;  %v3551_v17 = vpop.eup %3550  ;;  %v794_v37 = vadd.f32 1.0, %v3549_v51 }
 0x148   : > { %v1973_v10 = vsel %vm1349_vm1, %v1971_v57, %v1972_v59  ;;  %v1133_v23 = vrot.slane %v1025_v47, 1  ;;  %v1270_v25 = vmul.f32 %v3760_v27, %v5039_v18  ;;  %v2599_v32 = vadd.f32 %v2526_v63, %v2355_v60 }
 0x149   : > { %v3553_v49 = vpop.eup %3552  ;;  %v795_v16 = vadd.f32 1.0, %v3551_v17  ;;  %v3160_v61 = vmul.f32 -1.442695, %v5429_v44  ;;  %v1509_v4 = vmul.f32 %v3762_v28, %v5169_v56  ;;  %3556 = vrcp.f32 %v794_v37  ;;  %v361_v17 = vld [vmem:[%s3734_s13 + $0x178] sm:$0x3] }
 0x14a   : > { %v3555_v9 = vpop.eup %3554  ;;  %v5442_v40 = vmul.f32 %v3553_v49, %v5278_v3  ;;  %v6375_v34 = vrot.slane %v5294_v45, 1  ;;  %v1378_v18 = vrot.slane %v1270_v25, 2  ;;  %3321 = vmatmul.mubr.msk.f32.gmra.mrb[8].mxu1 %vm2614_vm2, %v2599_v32  ;;  %v1583_v8 = vmul.f32 %v3765_v29, %v5339_v42  ;;  %v471_v37 = vld [vmem:[%s3739_s17 + $0x178] sm:$0x3] }
 0x14b   : > { %v5449_v2 = vmul.f32 %v3555_v9, %v5280_v24  ;;  %3558 = vrcp.f32 %v795_v16  ;;  %v6376_v51 = vrot.slane %v5305_v20, 2  ;;  %v6377_v9 = vrot.slane %v5320_v19, 1 }
 0x14c   : > { %v1134_v57 = vsel %vm1104_vm0, %v6375_v34, %v1133_v23  ;;  %v2064_v3 = vmul.f32 %v3792_v52, %v5442_v40  ;;  %v2137_v45 = vmul.f32 %v3822_v7, %v5442_v40  ;;  %v2381_v63 = vmul.f32 %v3879_v6, %v5442_v40 }
 0x14d   : > { %v1228_v55 = vadd.f32 %v1134_v57, %v983_v53  ;;  %3560 = vpow2.f32 %v3160_v61  ;;  %v5461_v47 = vmul.f32 %v3822_v7, %v5449_v2  ;;  %v5465_v24 = vmul.f32 %v3879_v6, %v5449_v2 }
 0x14e   : > { %v1379_v60 = vsel %vm1349_vm1, %v6376_v51, %v1378_v18  ;;  %v1690_v53 = vrot.slane %v1583_v8, 1  ;;  %v2096_v23 = vadd.f32 %v2064_v3, %v2028_v11  ;;  %v2243_v25 = vrot.slane %v2137_v45, 1 }
 0x14f   : > { %v2487_v49 = vrot.slane %v2381_v63, 2  ;;  %v1473_v32 = vadd.f32 %v1379_v60, %v1228_v55  ;;  %v6287_v16 = vrot.slane %v5461_v47, 1  ;;  %v6286_v61 = vrot.slane %v5465_v24, 2 }
 0x150   : > { %v1691_v34 = vsel %vm1104_vm0, %v6377_v9, %v1690_v53  ;;  %v1827_v20 = vmul.f32 %v3786_v48, %v5339_v42  ;;  %v2044_v57 = vadd.f32 %v1973_v10, %v1800_v41  ;;  %v416_v8 = vmul.f32 %v6350_v5, %v361_v17 }
 0x151   : > { %v1541_v18 = vadd.f32 %v1509_v4, %v1473_v32  ;;  %v526_v11 = vmul.f32 %v6344_v43, %v471_v37  ;;  %v2245_v55 = vsel %vm1104_vm0, %v2243_v25, %v6287_v16  ;;  %v2489_v3 = vsel %vm1349_vm1, %v2487_v49, %v6286_v61 }
 0x152   : > { %v1934_v19 = vrot.slane %v1827_v20, 2  ;;  %v2065_v45 = vmul.f32 %v3792_v52, %v5449_v2  ;;  %v2340_v63 = vadd.f32 %v2245_v55, %v2096_v23  ;;  %v1049_v10 = vmul.f32 %v3751_v22, %v5102_v62 }
 0x153   : > { %v1785_v51 = vadd.f32 %v1691_v34, %v1541_v18  ;;  %v5489_v41 = vadd.f32 %v526_v11, %v416_v8  ;;  %v6378_v4 = vrot.slane %v5327_v31, 2  ;;  %v999_v53 = vmul.f32 %v3748_v21, %v4981_v39  ;;  %v3557_v23 = vpop.eup %3556 }
 0x154   : > { %v1294_v17 = vmul.f32 %v3760_v27, %v5102_v62  ;;  %v1607_v37 = vmul.f32 %v3765_v29, %v5386_v38  ;;  %v2584_v25 = vadd.f32 %v2489_v3, %v2340_v63  ;;  %v1173_v32 = vrot.slane %v1049_v10, 1 }
 0x155   : > { %v1935_v60 = vsel %vm1349_vm1, %v6378_v4, %v1934_v19  ;;  %v3184_v49 = vmul.f32 -1.442695, %v5489_v41  ;;  %v1525_v9 = vmul.f32 %v3762_v28, %v5250_v0  ;;  %v3559_v31 = vpop.eup %3558  ;;  %v5506_v34 = vmul.f32 %v3557_v23, %v5347_v30 }
 0x156   : > { %v2029_v20 = vadd.f32 %v1935_v60, %v1785_v51  ;;  %v1418_v39 = vrot.slane %v1294_v17, 2  ;;  %v1730_v18 = vrot.slane %v1607_v37, 1  ;;  %3299 = vmatprep.mubr.msk.f32.mxu0 %vm2614_vm2, %v2584_v25  ;;  %v5510_v62 = vmul.f32 %v3559_v31, %v5357_v46 }
 0x157   : > { %v3561_v8 = vpop.eup %3560  ;;  %3562 = vpow2.f32 %v3184_v49  ;;  %v1174_v11 = vsel %vm1104_vm0, %v1171_v13, %v1173_v32  ;;  %v1851_v55 = vmul.f32 %v3786_v48, %v5386_v38  ;;  %v2080_v30 = vmul.f32 %v3792_v52, %v5506_v34 }
 0x158   : > { %v2161_v3 = vmul.f32 %v3822_v7, %v5506_v34  ;;  %v2405_v19 = vmul.f32 %v3879_v6, %v5506_v34  ;;  %v772_v63 = vadd.f32 1.0, %v3561_v8  ;;  %v5525_v46 = vmul.f32 %v3822_v7, %v5510_v62 }
 0x159   : > { %v5529_v50 = vmul.f32 %v3879_v6, %v5510_v62  ;;  %v1244_v13 = vadd.f32 %v1174_v11, %v999_v53  ;;  %v6379_v51 = vrot.slane %v5373_v58, 2  ;;  %v2112_v4 = vadd.f32 %v2080_v30, %v2044_v57  ;;  %v5561_v11 = vpop.f32.mrb[0].mxu0 }
 0x15a   : > { %v2283_v60 = vrot.slane %v2161_v3, 1  ;;  %v2527_v17 = vrot.slane %v2405_v19, 2  ;;  %3564 = vrcp.f32 %v772_v63  ;;  %v6285_v37 = vrot.slane %v5525_v46, 1  ;;  %6380 = vst [vmem:[#allocation7_spill] sm:$0xff] %v5561_v11  ;;  %v5571_v19 = vpop.f32.mrb[1].mxu0 }
 0x15b   : > { %v1419_v10 = vsel %vm1349_vm1, %v6379_v51, %v1418_v39  ;;  %v6284_v23 = vrot.slane %v5529_v50, 2  ;;  %v5536_v25 = vadd.f32 %v2065_v45, %v2029_v20  ;;  %v1731_v32 = vsel %vm1104_vm0, %v1728_v14, %v1730_v18  ;;  %6381 = vst [vmem:[#allocation8_spill] sm:$0xff] %v5571_v19 }
 0x15c   : > { %v1489_v49 = vadd.f32 %v1419_v10, %v1244_v13  ;;  %v1974_v53 = vrot.slane %v1851_v55, 2  ;;  %v5543_v58 = vmul.f32 %v3792_v52, %v5510_v62  ;;  %v1026_v57 = vmul.f32 %v3751_v22, %v5160_v1 }
 0x15d   : > { %v2285_v31 = vsel %vm1104_vm0, %v2283_v60, %v6285_v37  ;;  %v2529_v45 = vsel %vm1349_vm1, %v2527_v17, %v6284_v23  ;;  %v5555_v15 = vmul.f32 %v3751_v22, %v5169_v56  ;;  %v984_v39 = vmul.f32 %v3748_v21, %v5160_v1 }
 0x15e   : > { %v1557_v20 = vadd.f32 %v1525_v9, %v1489_v49  ;;  %v2356_v14 = vadd.f32 %v2285_v31, %v2112_v4  ;;  %v1135_v18 = vrot.slane %v1026_v57, 1  ;;  %v1271_v8 = vmul.f32 %v3760_v27, %v5160_v1 }
 0x15f   : > { %v1975_v30 = vsel %vm1349_vm1, %v1972_v59, %v1974_v53  ;;  %v6283_v9 = vrot.slane %v5555_v15, 1  ;;  %v5569_v3 = vmul.f32 %v3760_v27, %v5169_v56  ;;  %v1584_v1 = vmul.f32 %v3765_v29, %v5442_v40 }
 0x160   : > { %v1801_v55 = vadd.f32 %v1731_v32, %v1557_v20  ;;  %v2600_v63 = vadd.f32 %v2529_v45, %v2356_v14  ;;  %v1380_v13 = vrot.slane %v1271_v8, 2  ;;  %v5577_v51 = vmul.f32 %v3765_v29, %v5449_v2  ;;  %v362_v14 = vld [vmem:[%s3734_s13 + $0x180] sm:$0xff] }
 0x161   : > { %v3563_v26 = vpop.eup %3562  ;;  %v1137_v59 = vsel %vm1104_vm0, %v1135_v18, %v6283_v9  ;;  %v6282_v10 = vrot.slane %v5569_v3, 2  ;;  %v1510_v4 = vmul.f32 %v3762_v28, %v5442_v40  ;;  %v1828_v60 = vmul.f32 %v3786_v48, %v5442_v40 }
 0x162   : > { %3323 = vmatprep.mubr.msk.f32.mxu1 %vm2614_vm2, %v2600_v63  ;;  %v796_v17 = vadd.f32 1.0, %v3563_v26  ;;  %v1229_v49 = vadd.f32 %v1137_v59, %v984_v39  ;;  %v1692_v32 = vrot.slane %v1584_v1, 1  ;;  %v6281_v53 = vrot.slane %v5577_v51, 1  ;;  %v6383_v26 = vld [vmem:[#allocation15_spill] sm:$0xff] }
 0x163   : > { %v2045_v57 = vadd.f32 %v1975_v30, %v1801_v55  ;;  %v1382_v31 = vsel %vm1349_vm1, %v1380_v13, %v6282_v10  ;;  %v5594_v45 = vmul.f32 %v3786_v48, %v5449_v2  ;;  %v1936_v20 = vrot.slane %v1828_v60, 2  ;;  %v6382_v55 = vld [vmem:[#allocation14_spill] sm:$0xff] }
 0x164   : > { %v3565_v18 = vpop.eup %3564  ;;  %3566 = vrcp.f32 %v796_v17  ;;  %v1474_v8 = vadd.f32 %v1382_v31, %v1229_v49  ;;  %v1694_v39 = vsel %vm1104_vm0, %v1692_v32, %v6281_v53  ;;  %v2066_v30 = vmul.f32 %v3792_v52, %v6382_v55  ;;  %v363_v32 = vld [vmem:[%s3734_s13 + $0x188] sm:$0xff]  ;;  %v472_v31 = vld [vmem:[%s3739_s17 + $0x180] sm:$0xff] }
 0x165   : > { %v5603_v63 = vmul.f32 %v3565_v18, %v5429_v44  ;;  %v1937_v13 = vrot.slane %v5594_v45, 2  ;;  %v2140_v1 = vmul.f32 %v3822_v7, %v6382_v55  ;;  %v5610_v59 = vmul.f32 %v3822_v7, %v6383_v26  ;;  %v473_v10 = vld [vmem:[%s3739_s17 + $0x188] sm:$0xff] }
 0x166   : > { %v1542_v60 = vadd.f32 %v1510_v4, %v1474_v8  ;;  %v2384_v17 = vmul.f32 %v3879_v6, %v6382_v55  ;;  %v5616_v49 = vmul.f32 %v3879_v6, %v6383_v26  ;;  %v417_v44 = vmul.f32 %v6350_v5, %v362_v14 }
 0x167   : > { %v2139_v18 = vmul.f32 %v3822_v7, %v5603_v63  ;;  %v2383_v53 = vmul.f32 %v3879_v6, %v5603_v63  ;;  %v1938_v4 = vsel %vm1349_vm1, %v1936_v20, %v1937_v13  ;;  %v2248_v8 = vrot.slane %v2140_v1, 1 }
 0x168   : > { %v1786_v9 = vadd.f32 %v1694_v39, %v1542_v60  ;;  %v2249_v23 = vrot.slane %v5610_v59, 1  ;;  %v2492_v37 = vrot.slane %v2384_v17, 2  ;;  %v6294_v61 = vrot.slane %v5616_v49, 2 }
 0x169   : > { %v2246_v14 = vrot.slane %v2139_v18, 1  ;;  %v2490_v16 = vrot.slane %v2383_v53, 2  ;;  %v418_v19 = vmul.f32 %v6350_v5, %v363_v32  ;;  %v527_v11 = vmul.f32 %v6344_v43, %v472_v31 }
 0x16a   : > { %v2030_v54 = vadd.f32 %v1938_v4, %v1786_v9  ;;  %v2250_v35 = vsel %vm1104_vm0, %v2248_v8, %v2249_v23  ;;  %v2494_v20 = vsel %vm1349_vm1, %v2492_v37, %v6294_v61  ;;  %v528_v39 = vmul.f32 %v6344_v43, %v473_v10 }
 0x16b   : > { %v6384_v1 = vrot.slane %v5461_v47, 1  ;;  %v6385_v53 = vrot.slane %v5465_v24, 2  ;;  %v5646_v32 = vadd.f32 %v527_v11, %v417_v44  ;;  %v1000_v9 = vmul.f32 %v3748_v21, %v5247_v12 }
 0x16c   : > { %v2098_v18 = vadd.f32 %v2066_v30, %v2030_v54  ;;  %v5651_v4 = vadd.f32 %v528_v39, %v418_v19  ;;  %v1050_v37 = vmul.f32 %v3751_v22, %v5247_v12  ;;  %v5658_v24 = vmul.f32 %v3751_v22, %v5250_v0 }
 0x16d   : > { %v2247_v60 = vsel %vm1104_vm0, %v6384_v1, %v2246_v14  ;;  %v2491_v17 = vsel %vm1349_vm1, %v6385_v53, %v2490_v16  ;;  %v3185_v47 = vmul.f32 -1.442695, %v5646_v32  ;;  %v1295_v16 = vmul.f32 %v3760_v27, %v5247_v12 }
 0x16e   : > { %v2341_v31 = vadd.f32 %v2247_v60, %v5536_v25  ;;  %v5664_v11 = vmul.f32 %v3760_v27, %v5250_v0  ;;  %v5666_v25 = vpop.f32.mrb[0].mxu1  ;;  %v3567_v54 = vpop.eup %3566  ;;  %v2342_v10 = vadd.f32 %v2250_v35, %v2098_v18  ;;  %v3186_v30 = vmul.f32 -1.442695, %v5651_v4 }
 0x16f   : > { %v1175_v44 = vrot.slane %v1050_v37, 1  ;;  %v5669_v8 = vpop.f32.mrb[1].mxu1  ;;  %v5672_v14 = vmul.f32 %v3567_v54, %v5489_v41  ;;  %3568 = vpow2.f32 %v3185_v47  ;;  %v1176_v12 = vrot.slane %v5658_v24, 1 }
 0x170   : > { %v2585_v19 = vadd.f32 %v2491_v17, %v2341_v31  ;;  %v1420_v39 = vrot.slane %v1295_v16, 2  ;;  %v2113_v1 = vadd.f32 %v5543_v58, %v2045_v57  ;;  %v2586_v60 = vadd.f32 %v2494_v20, %v2342_v10 }
 0x171   : > { %3570 = vpow2.f32 %v3186_v30  ;;  %v6293_v35 = vrot.slane %v5664_v11, 2  ;;  %v2163_v53 = vmul.f32 %v3822_v7, %v5672_v14  ;;  %v2407_v17 = vmul.f32 %v3879_v6, %v5672_v14 }
 0x172   : > { %3300 = vmatmul.mubr.msk.f32.gmra.mrb[10].mxu0 %vm2614_vm2, %v2585_v19  ;;  %v1177_v41 = vsel %vm1104_vm0, %v1175_v44, %v1176_v12  ;;  %v1608_v31 = vmul.f32 %v3765_v29, %v5506_v34  ;;  %v5693_v20 = vmul.f32 %v3765_v29, %v5510_v62  ;;  %v1852_v18 = vmul.f32 %v3786_v48, %v5506_v34 }
 0x173   : > { %3302 = vmatprep.mubr.msk.f32.mxu0 %vm2614_vm2, %v2586_v60  ;;  %v1245_v58 = vadd.f32 %v1177_v41, %v1000_v9  ;;  %v1422_v57 = vsel %vm1349_vm1, %v1420_v39, %v6293_v35  ;;  %v2286_v37 = vrot.slane %v2163_v53, 1  ;;  %v2530_v47 = vrot.slane %v2407_v17, 2 }
 0x174   : > { %v1526_v16 = vmul.f32 %v3762_v28, %v5506_v34  ;;  %v5701_v54 = vmul.f32 %v3786_v48, %v5510_v62  ;;  %v1732_v19 = vrot.slane %v1608_v31, 1  ;;  %v6292_v10 = vrot.slane %v5693_v20, 1 }
 0x175   : > { %v1490_v9 = vadd.f32 %v1422_v57, %v1245_v58  ;;  %v6386_v30 = vrot.slane %v5525_v46, 1  ;;  %v6387_v39 = vrot.slane %v5529_v50, 2  ;;  %v1028_v53 = vmul.f32 %v3751_v22, %v5339_v42 }
 0x176   : > { %v1976_v41 = vrot.slane %v1852_v18, 2  ;;  %v985_v58 = vmul.f32 %v3748_v21, %v5169_v56  ;;  %v1273_v31 = vmul.f32 %v3760_v27, %v5339_v42  ;;  %v1977_v46 = vrot.slane %v5701_v54, 2 }
 0x177   : > { %v2287_v44 = vsel %vm1104_vm0, %v6386_v30, %v2286_v37  ;;  %v2531_v60 = vsel %vm1349_vm1, %v6387_v39, %v2530_v47  ;;  %v1558_v57 = vadd.f32 %v1526_v16, %v1490_v9  ;;  %v1138_v37 = vrot.slane %v1028_v53, 1  ;;  %v364_v39 = vld [vmem:[%s3734_s13 + $0x190] sm:$0x3] }
 0x178   : > { %v2357_v17 = vadd.f32 %v2287_v44, %v2113_v1  ;;  %v1586_v50 = vmul.f32 %v3765_v29, %v5603_v63  ;;  %v1734_v1 = vsel %vm1104_vm0, %v1732_v19, %v6292_v10  ;;  %v1383_v18 = vrot.slane %v1273_v31, 2 }
 0x179   : > { %v1830_v56 = vmul.f32 %v3786_v48, %v5603_v63  ;;  %v3569_v30 = vpop.eup %3568  ;;  %v6388_v42 = vrot.slane %v5555_v15, 1  ;;  %v2142_v44 = vmul.f32 %v3822_v7, %v4276_v33  ;;  %v6389_v19 = vrot.slane %v5569_v3, 2  ;;  %v474_v15 = vld [vmem:[%s3739_s17 + $0x190] sm:$0x3] }
 0x17a   : > { %v2601_v47 = vadd.f32 %v2531_v60, %v2357_v17  ;;  %v1695_v9 = vrot.slane %v1586_v50, 1  ;;  %v797_v60 = vadd.f32 1.0, %v3569_v30  ;;  %v1511_v10 = vmul.f32 %v3762_v28, %v5449_v2 }
 0x17b   : > { %v1139_v16 = vsel %vm1104_vm0, %v6388_v42, %v1138_v37  ;;  %v3571_v53 = vpop.eup %3570  ;;  %v1384_v31 = vsel %vm1349_vm1, %v6389_v19, %v1383_v18  ;;  %v1802_v37 = vadd.f32 %v1734_v1, %v1558_v57  ;;  %v1978_v50 = vsel %vm1349_vm1, %v1976_v41, %v1977_v46 }
 0x17c   : > { %3324 = vmatmul.mubr.msk.f32.gmra.mrb[10].mxu1 %vm2614_vm2, %v2601_v47  ;;  %v1230_v17 = vadd.f32 %v1139_v16, %v985_v58  ;;  %v798_v35 = vadd.f32 1.0, %v3571_v53  ;;  %v1939_v42 = vrot.slane %v1830_v56, 2  ;;  %3572 = vrcp.f32 %v797_v60 }
 0x17d   : > { %v2386_v58 = vmul.f32 %v3879_v6, %v4276_v33  ;;  %v419_v3 = vmul.f32 %v6350_v5, %v364_v39  ;;  %v6390_v47 = vrot.slane %v5577_v51, 1  ;;  %v2251_v30 = vrot.slane %v2142_v44, 1 }
 0x17e   : > { %v1475_v61 = vadd.f32 %v1384_v31, %v1230_v17  ;;  %3574 = vrcp.f32 %v798_v35  ;;  %v529_v57 = vmul.f32 %v6344_v43, %v474_v15  ;;  %v1940_v41 = vsel %vm1349_vm1, %v1937_v13, %v1939_v42 }
 0x17f   : > { %v1696_v18 = vsel %vm1104_vm0, %v6390_v47, %v1695_v9  ;;  %v2067_v56 = vmul.f32 %v3792_v52, %v6383_v26  ;;  %v1052_v16 = vmul.f32 %v3751_v22, %v5386_v38  ;;  %v2495_v39 = vrot.slane %v2386_v58, 2 }
 0x180   : > { %v1543_v1 = vadd.f32 %v1511_v10, %v1475_v61  ;;  %v5754_v35 = vadd.f32 %v529_v57, %v419_v3  ;;  %v1297_v51 = vmul.f32 %v3760_v27, %v5386_v38  ;;  %v1610_v9 = vmul.f32 %v3765_v29, %v5672_v14 }
 0x181   : > { %v2046_v61 = vadd.f32 %v1978_v50, %v1802_v37  ;;  %v1178_v45 = vrot.slane %v1052_v16, 1  ;;  %v1854_v13 = vmul.f32 %v3786_v48, %v5672_v14  ;;  %v2252_v44 = vsel %vm1104_vm0, %v2249_v23, %v2251_v30 }
 0x182   : > { %v1787_v10 = vadd.f32 %v1696_v18, %v1543_v1  ;;  %v3187_v53 = vmul.f32 -1.442695, %v5754_v35  ;;  %v1001_v60 = vmul.f32 %v3748_v21, %v5250_v0  ;;  %v1423_v17 = vrot.slane %v1297_v51, 2 }
 0x183   : > { %v1179_v19 = vsel %vm1104_vm0, %v1176_v12, %v1178_v45  ;;  %v1735_v31 = vrot.slane %v1610_v9, 1  ;;  %v1029_v15 = vmul.f32 %v3751_v22, %v5442_v40  ;;  %v6391_v37 = vrot.slane %v5616_v49, 2 }
 0x184   : > { %v2031_v38 = vadd.f32 %v1940_v41, %v1787_v10  ;;  %3576 = vpow2.f32 %v3187_v53  ;;  %v1527_v23 = vmul.f32 %v3762_v28, %v5510_v62  ;;  %v1979_v50 = vrot.slane %v1854_v13, 2 }
 0x185   : > { %v2496_v59 = vsel %vm1349_vm1, %v6391_v37, %v2495_v39  ;;  %v986_v42 = vmul.f32 %v3748_v21, %v5442_v40  ;;  %v5782_v24 = vmul.f32 %v3751_v22, %v5449_v2  ;;  %v1140_v12 = vrot.slane %v1029_v15, 1 }
 0x186   : > { %v2099_v0 = vadd.f32 %v2067_v56, %v2031_v38  ;;  %v1246_v58 = vadd.f32 %v1179_v19, %v1001_v60  ;;  %v6392_v3 = vrot.slane %v5664_v11, 2  ;;  %v1274_v47 = vmul.f32 %v3760_v27, %v5442_v40  ;;  %v3573_v30 = vpop.eup %3572 }
 0x187   : > { %v5791_v18 = vmul.f32 %v3760_v27, %v5449_v2  ;;  %v6393_v1 = vrot.slane %v5693_v20, 1  ;;  %v1141_v56 = vrot.slane %v5782_v24, 1  ;;  %v1587_v11 = vmul.f32 %v3765_v29, %v6382_v55 }
 0x188   : > { %v1424_v49 = vsel %vm1349_vm1, %v6392_v3, %v1423_v17  ;;  %v2343_v57 = vadd.f32 %v2252_v44, %v2099_v0  ;;  %v3575_v16 = vpop.eup %3574  ;;  %v5802_v39 = vmul.f32 %v3573_v30, %v5646_v32  ;;  %v5807_v40 = vsel %vm1349_vm1, %v1977_v46, %v1979_v50 }
 0x189   : > { %v5796_v41 = vsel %vm1104_vm0, %v6393_v1, %v1735_v31  ;;  %v1385_v51 = vrot.slane %v1274_v47, 2  ;;  %v5811_v20 = vmul.f32 %v3765_v29, %v6383_v26  ;;  %v5814_v9 = vmul.f32 %v3575_v16, %v5651_v4 }
 0x18a   : > { %v2587_v10 = vadd.f32 %v2496_v59, %v2343_v57  ;;  %v1142_v45 = vsel %vm1104_vm0, %v1140_v12, %v1141_v56  ;;  %v1386_v32 = vrot.slane %v5791_v18, 2  ;;  %v2082_v54 = vmul.f32 %v3792_v52, %v5802_v39 }
 0x18b   : > { %v2164_v46 = vmul.f32 %v3822_v7, %v5802_v39  ;;  %v2408_v13 = vmul.f32 %v3879_v6, %v5802_v39  ;;  %v1491_v44 = vadd.f32 %v1424_v49, %v1246_v58  ;;  %v5828_v4 = vmul.f32 %v3822_v7, %v5814_v9  ;;  %v5849_v49 = vpop.f32.mrb[2].mxu0 }
 0x18c   : > { %v5832_v53 = vmul.f32 %v3879_v6, %v5814_v9  ;;  %3303 = vmatmul.mubr.msk.f32.gmra.mrb[12].mxu0 %vm2614_vm2, %v2587_v10  ;;  %v1231_v60 = vadd.f32 %v1142_v45, %v986_v42  ;;  %v1697_v17 = vrot.slane %v1587_v11, 1  ;;  %v2114_v38 = vadd.f32 %v2082_v54, %v2046_v61  ;;  %v5860_v57 = vpop.f32.mrb[3].mxu0  ;;  %v365_v10 = vld [vmem:[%s3734_s13 + $0x198] sm:$0xff] }
 0x18d   : > { %v2288_v19 = vrot.slane %v2164_v46, 1  ;;  %v2532_v31 = vrot.slane %v2408_v13, 2  ;;  %v1512_v15 = vmul.f32 %v3762_v28, %v6382_v55  ;;  %v2289_v37 = vrot.slane %v5828_v4, 1  ;;  %v6394_v46 = vld [vmem:[#allocation16_spill] sm:$0xff] }
 0x18e   : > { %v2533_v59 = vrot.slane %v5832_v53, 2  ;;  %v1387_v50 = vsel %vm1349_vm1, %v1385_v51, %v1386_v32  ;;  %v1698_v0 = vrot.slane %v5811_v20, 1  ;;  %v3577_v12 = vpop.eup %3576  ;;  %v1559_v42 = vadd.f32 %v1527_v23, %v1491_v44  ;;  %v366_v44 = vld [vmem:[%s3734_s13 + $0x1a0] sm:$0xff] }
 0x18f   : > { %v1476_v58 = vadd.f32 %v1387_v50, %v1231_v60  ;;  %v1831_v61 = vmul.f32 %v3786_v48, %v6382_v55  ;;  %v5847_v3 = vmul.f32 %v3786_v48, %v6383_v26  ;;  %v2290_v47 = vsel %vm1104_vm0, %v2288_v19, %v2289_v37  ;;  %v475_v60 = vld [vmem:[%s3739_s17 + $0x198] sm:$0xff] }
 0x190   : > { %v2534_v23 = vsel %vm1349_vm1, %v2532_v31, %v2533_v59  ;;  %v799_v30 = vadd.f32 1.0, %v3577_v12  ;;  %v1699_v55 = vsel %vm1104_vm0, %v1697_v17, %v1698_v0  ;;  %v2358_v1 = vadd.f32 %v2290_v47, %v2114_v38 }
 0x191   : > { %v1544_v11 = vadd.f32 %v1512_v15, %v1476_v58  ;;  %v1941_v16 = vrot.slane %v1831_v61, 2  ;;  %v1942_v51 = vrot.slane %v5847_v3, 2  ;;  %v2068_v45 = vmul.f32 %v3792_v52, %v4046_v36  ;;  %v476_v15 = vld [vmem:[%s3739_s17 + $0x1a0] sm:$0xff] }
 0x192   : > { %3578 = vrcp.f32 %v799_v30  ;;  %v2143_v54 = vmul.f32 %v3822_v7, %v4046_v36  ;;  %v5870_v13 = vmul.f32 %v3822_v7, %v6394_v46  ;;  %v2602_v17 = vadd.f32 %v2534_v23, %v2358_v1  ;;  %v6003_v3 = vld [vmem:[%s6218_s5] ss:$0 sm:$0xff] }
 0x193   : > { %v1788_v38 = vadd.f32 %v1699_v55, %v1544_v11  ;;  %v1943_v19 = vsel %vm1349_vm1, %v1941_v16, %v1942_v51  ;;  %v2387_v31 = vmul.f32 %v3879_v6, %v4046_v36  ;;  %v5883_v58 = vmul.f32 %v3879_v6, %v6394_v46 }
 0x194   : > { %v2253_v50 = vrot.slane %v2143_v54, 1  ;;  %v6297_v12 = vrot.slane %v5870_v13, 1  ;;  %v420_v61 = vmul.f32 %v6350_v5, %v365_v10  ;;  %3326 = vmatprep.mubr.msk.f32.mxu1 %vm2614_vm2, %v2602_v17  ;;  %v421_v30 = vmul.f32 %v6350_v5, %v366_v44 }
 0x195   : > { %v2032_v47 = vadd.f32 %v1943_v19, %v1788_v38  ;;  %v2497_v23 = vrot.slane %v2387_v31, 2  ;;  %v530_v55 = vmul.f32 %v6344_v43, %v475_v60  ;;  %v1803_v36 = vadd.f32 %v5796_v41, %v1559_v42  ;;  %v5903_v60 = vpop.f32.mrb[2].mxu1 }
 0x196   : > { %v2255_v1 = vsel %vm1104_vm0, %v2253_v50, %v6297_v12  ;;  %v6295_v11 = vrot.slane %v5883_v58, 2  ;;  %v531_v16 = vmul.f32 %v6344_v43, %v476_v15  ;;  %v1053_v17 = vmul.f32 %v3751_v22, %v5506_v34  ;;  %v5916_v19 = vpop.f32.mrb[3].mxu1 }
 0x197   : > { %v2100_v54 = vadd.f32 %v2068_v45, %v2032_v47  ;;  %v5895_v10 = vadd.f32 %v530_v55, %v420_v61  ;;  %v5901_v44 = vmul.f32 %v3751_v22, %v5510_v62  ;;  %v1298_v45 = vmul.f32 %v3760_v27, %v5506_v34 }
 0x198   : > { %v2499_v41 = vsel %vm1349_vm1, %v2497_v23, %v6295_v11  ;;  %v5908_v42 = vadd.f32 %v531_v16, %v421_v30  ;;  %v5914_v38 = vmul.f32 %v3760_v27, %v5510_v62  ;;  %v1180_v50 = vrot.slane %v1053_v17, 1 }
 0x199   : > { %v2344_v31 = vadd.f32 %v2255_v1, %v2100_v54  ;;  %v3188_v15 = vmul.f32 -1.442695, %v5895_v10  ;;  %v6296_v61 = vrot.slane %v5901_v44, 1  ;;  %v2047_v47 = vadd.f32 %v5807_v40, %v1803_v36 }
 0x19a   : > { %v2083_v23 = vmul.f32 %v3792_v52, %v5814_v9  ;;  %v3189_v30 = vmul.f32 -1.442695, %v5908_v42  ;;  %v1002_v16 = vmul.f32 %v3748_v21, %v5506_v34  ;;  %v1425_v54 = vrot.slane %v1298_v45, 2 }
 0x19b   : > { %v2588_v55 = vadd.f32 %v2499_v41, %v2344_v31  ;;  %3580 = vpow2.f32 %v3188_v15  ;;  %v1182_v1 = vsel %vm1104_vm0, %v1180_v50, %v6296_v61  ;;  %v1426_v17 = vrot.slane %v5914_v38, 2 }
 0x19c   : > { %v3579_v11 = vpop.eup %3578  ;;  %3582 = vpow2.f32 %v3189_v30  ;;  %v5936_v36 = vmul.f32 %v3765_v29, %v5802_v39  ;;  %v2115_v41 = vadd.f32 %v2083_v23, %v2047_v47  ;;  %v1528_v34 = vmul.f32 %v3762_v28, %v5802_v39 }
 0x19d   : > { %v5931_v40 = vmul.f32 %v3579_v11, %v5754_v35  ;;  %3305 = vmatprep.mubr.msk.f32.mxu0 %vm2614_vm2, %v2588_v55  ;;  %v1031_v31 = vmul.f32 %v3751_v22, %v5603_v63  ;;  %v1247_v11 = vadd.f32 %v1182_v1, %v1002_v16  ;;  %v987_v15 = vmul.f32 %v3748_v21, %v5449_v2 }
 0x19e   : > { %v1427_v50 = vsel %vm1349_vm1, %v1425_v54, %v1426_v17  ;;  %v5953_v47 = vmul.f32 %v3765_v29, %v5814_v9  ;;  %v1276_v30 = vmul.f32 %v3760_v27, %v5603_v63  ;;  %v1737_v12 = vrot.slane %v5936_v36, 1 }
 0x19f   : > { %v2166_v45 = vmul.f32 %v3822_v7, %v5931_v40  ;;  %v2410_v35 = vmul.f32 %v3879_v6, %v5931_v40  ;;  %v1143_v23 = vrot.slane %v1031_v31, 1  ;;  %v1855_v16 = vmul.f32 %v3786_v48, %v5802_v39 }
 0x1a0   : > { %v1388_v1 = vrot.slane %v1276_v30, 2  ;;  %v1513_v54 = vmul.f32 %v3762_v28, %v6383_v26  ;;  %v1589_v63 = vmul.f32 %v3765_v29, %v4276_v33  ;;  %v5977_v26 = vmul.f32 %v3786_v48, %v5814_v9  ;;  %v6395_v30 = vld [vmem:[#allocation23_spill] sm:$0xff] }
 0x1a1   : > { %v2291_v55 = vrot.slane %v2166_v45, 1  ;;  %v2535_v61 = vrot.slane %v2410_v35, 2  ;;  %v1144_v2 = vsel %vm1104_vm0, %v1141_v56, %v1143_v23  ;;  %v1833_v56 = vmul.f32 %v3786_v48, %v4276_v33 }
 0x1a2   : > { %v1232_v24 = vadd.f32 %v1144_v2, %v987_v15  ;;  %v1389_v45 = vsel %vm1349_vm1, %v1386_v32, %v1388_v1  ;;  %v1700_v4 = vrot.slane %v1589_v63, 1  ;;  %v477_v15 = vld [vmem:[%s3739_s17 + $0x1a8] sm:$0x3]  ;;  %v2389_v18 = vmul.f32 %v3879_v6, %v6395_v30 }
 0x1a3   : > { %v2292_v36 = vsel %vm1104_vm0, %v2289_v37, %v2291_v55  ;;  %v2536_v39 = vsel %vm1349_vm1, %v2533_v59, %v2535_v61  ;;  %v1492_v37 = vadd.f32 %v1427_v50, %v1247_v11  ;;  %v1944_v53 = vrot.slane %v1833_v56, 2  ;;  %v367_v61 = vld [vmem:[%s3734_s13 + $0x1a8] sm:$0x3] }
 0x1a4   : > { %v2359_v31 = vadd.f32 %v2292_v36, %v2115_v41  ;;  %v1477_v23 = vadd.f32 %v1389_v45, %v1232_v24  ;;  %v2145_v59 = vmul.f32 %v3822_v7, %v6395_v30  ;;  %v1701_v2 = vsel %vm1104_vm0, %v1698_v0, %v1700_v4 }
 0x1a5   : > { %v3581_v35 = vpop.eup %3580  ;;  %v1738_v11 = vrot.slane %v5953_v47, 1  ;;  %v1945_v1 = vsel %vm1349_vm1, %v1942_v51, %v1944_v53  ;;  %v422_v20 = vmul.f32 %v6350_v5, %v367_v61  ;;  %v532_v0 = vmul.f32 %v6344_v43, %v477_v15 }
 0x1a6   : > { %v3583_v33 = vpop.eup %3582  ;;  %v2603_v41 = vadd.f32 %v2536_v39, %v2359_v31  ;;  %v800_v55 = vadd.f32 1.0, %v3581_v35  ;;  %v1545_v50 = vadd.f32 %v1513_v54, %v1477_v23  ;;  %v2256_v63 = vrot.slane %v2145_v59, 1 }
 0x1a7   : > { %v801_v32 = vadd.f32 1.0, %v3583_v33  ;;  %v1981_v36 = vrot.slane %v1855_v16, 2  ;;  %v2069_v24 = vmul.f32 %v3792_v52, %v6394_v46  ;;  %v1982_v51 = vrot.slane %v5977_v26, 2  ;;  %v6016_v46 = vld [vmem:[%s6219_s6] ss:$0 sm:$0xff] }
 0x1a8   : > { %3327 = vmatmul.mubr.msk.f32.gmra.mrb[12].mxu1 %vm2614_vm2, %v2603_v41  ;;  %3584 = vrcp.f32 %v800_v55  ;;  %v1789_v39 = vadd.f32 %v1701_v2, %v1545_v50  ;;  %v2500_v54 = vrot.slane %v2389_v18, 2  ;;  %v6006_v56 = vadd.f32 %v532_v0, %v422_v20  ;;  %v6399_v41 = vld [vmem:[#allocation8_spill] sm:$0xff] }
 0x1a9   : > { %3586 = vrcp.f32 %v801_v32  ;;  %v1055_v5 = vmul.f32 %v3751_v22, %v5672_v14  ;;  %v1560_v43 = vadd.f32 %v1528_v34, %v1492_v37  ;;  %v1300_v31 = vmul.f32 %v3760_v27, %v5672_v14  ;;  %v6397_v34 = vld [vmem:[#allocation7_spill] sm:$0xff] }
 0x1aa   : > { %v2033_v16 = vadd.f32 %v1945_v1, %v1789_v39  ;;  %v1739_v45 = vsel %vm1104_vm0, %v1737_v12, %v1738_v11  ;;  %v6396_v4 = vrot.slane %v5870_v13, 1  ;;  %v3190_v22 = vmul.f32 -1.442695, %v6006_v56 }
 0x1ab   : > { %v2944_v37 = vmul.f32 %v6397_v34, %v6003_v3  ;;  %v1183_v27 = vrot.slane %v1055_v5, 1  ;;  %v2960_v14 = vmul.f32 %v5666_v25, %v6003_v3  ;;  %v1983_v13 = vsel %vm1349_vm1, %v1981_v36, %v1982_v51 }
 0x1ac   : > { %v2257_v35 = vsel %vm1104_vm0, %v6396_v4, %v2256_v63  ;;  %v2101_v23 = vadd.f32 %v2069_v24, %v2033_v16  ;;  %v6398_v12 = vrot.slane %v5883_v58, 2  ;;  %3588 = vpow2.f32 %v3190_v22 }
 0x1ad   : > { %v2983_v30 = vadd.f32 %v6016_v46, %v2944_v37  ;;  %v1804_v59 = vadd.f32 %v1739_v45, %v1560_v43  ;;  %v1003_v15 = vmul.f32 %v3748_v21, %v5510_v62  ;;  %v1428_v33 = vrot.slane %v1300_v31, 2 }
 0x1ae   : > { %v2501_v53 = vsel %vm1349_vm1, %v6398_v12, %v2500_v54  ;;  %v2345_v61 = vadd.f32 %v2257_v35, %v2101_v23  ;;  %v2999_v25 = vadd.f32 %v6016_v46, %v2960_v14  ;;  %v2943_v55 = vmul.f32 %v6003_v3, %v6399_v41 }
 0x1af   : > { %3015 = vst.msk [vmem:[%s6030_s27 + $0x8] sm:$0xff] %vm2614_vm2, %v2983_v30  ;;  %v2959_v58 = vmul.f32 %v6003_v3, %v5669_v8  ;;  %v2946_v2 = vmul.f32 %v5849_v49, %v6003_v3  ;;  %v6400_v32 = vrot.slane %v5901_v44, 1  ;;  %v2962_v21 = vmul.f32 %v5903_v60, %v6003_v3 }
 0x1b0   : > { %v2589_v18 = vadd.f32 %v2501_v53, %v2345_v61  ;;  %v2945_v62 = vmul.f32 %v6003_v3, %v5860_v57  ;;  %3031 = vst.msk [vmem:[%s6030_s27 + $0x88] sm:$0xff] %vm2614_vm2, %v2999_v25  ;;  %v2982_v8 = vadd.f32 %v6016_v46, %v2943_v55  ;;  %v2961_v63 = vmul.f32 %v6003_v3, %v5916_v19 }
 0x1b1   : > { %v1184_v50 = vsel %vm1104_vm0, %v6400_v32, %v1183_v27  ;;  %v2998_v49 = vadd.f32 %v6016_v46, %v2959_v58  ;;  %v2985_v44 = vadd.f32 %v6016_v46, %v2946_v2  ;;  %v2048_v0 = vadd.f32 %v1983_v13, %v1804_v59 }
 0x1b2   : > { %v3585_v1 = vpop.eup %3584  ;;  %3306 = vmatmul.mubr.msk.f32.gmra.mrb[14].mxu0 %vm2614_vm2, %v2589_v18  ;;  %v3001_v57 = vadd.f32 %v6016_v46, %v2962_v21  ;;  %v2984_v36 = vadd.f32 %v6016_v46, %v2945_v62  ;;  %3014 = vst.msk [vmem:[%s6030_s27] sm:$0xff] %vm2614_vm2, %v2982_v8  ;;  %v3000_v19 = vadd.f32 %v6016_v46, %v2961_v63 }
 0x1b3   : > { %v3587_v20 = vpop.eup %3586  ;;  %v962_v60 = vmul.f32 %v3585_v1, %v5895_v10  ;;  %3030 = vst.msk [vmem:[%s6030_s27 + $0x80] sm:$0xff] %vm2614_vm2, %v2998_v49  ;;  %3017 = vst.msk [vmem:[%s6030_s27 + $0x18] sm:$0xff] %vm2614_vm2, %v2985_v44  ;;  %v1248_v5 = vadd.f32 %v1184_v50, %v1003_v15  ;;  %v1429_v16 = vsel %vm1349_vm1, %v1426_v17, %v1428_v33  ;;  %v3292_v17 = vpop.f32.mrb[4].mxu0 }
 0x1b4   : > { %v963_v39 = vmul.f32 %v3587_v20, %v5908_v42  ;;  %3033 = vst.msk [vmem:[%s6030_s27 + $0x98] sm:$0xff] %vm2614_vm2, %v3001_v57  ;;  %3016 = vst.msk [vmem:[%s6030_s27 + $0x10] sm:$0xff] %vm2614_vm2, %v2984_v36  ;;  %v1613_v31 = vmul.f32 %v3765_v29, %v5931_v40  ;;  %v1529_v14 = vmul.f32 %v3762_v28, %v5814_v9  ;;  %v2797_v30 = vpop.f32.mrb[5].mxu0 }
 0x1b5   : > { %v2084_v10 = vmul.f32 %v3792_v52, %v962_v60  ;;  %v2167_v24 = vmul.f32 %v3822_v7, %v962_v60  ;;  %v2411_v54 = vmul.f32 %v3879_v6, %v962_v60  ;;  %3032 = vst.msk [vmem:[%s6030_s27 + $0x90] sm:$0xff] %vm2614_vm2, %v3000_v19  ;;  %v1493_v27 = vadd.f32 %v1429_v16, %v1248_v5 }
 0x1b6   : > { %v2168_v42 = vmul.f32 %v3822_v7, %v963_v39  ;;  %v2412_v43 = vmul.f32 %v3879_v6, %v963_v39  ;;  %v3589_v22 = vpop.eup %3588  ;;  %v1857_v38 = vmul.f32 %v3786_v48, %v5931_v40  ;;  %v1740_v12 = vrot.slane %v1613_v31, 1 }
 0x1b7   : > { %v2116_v45 = vadd.f32 %v2084_v10, %v2048_v0  ;;  %v2293_v4 = vrot.slane %v2167_v24, 1  ;;  %v2537_v35 = vrot.slane %v2411_v54, 2  ;;  %v802_v23 = vadd.f32 1.0, %v3589_v22 }
 0x1b8   : > { %v2294_v34 = vrot.slane %v2168_v42, 1  ;;  %v2538_v37 = vrot.slane %v2412_v43, 2  ;;  %v2948_v53 = vmul.f32 %v3292_v17, %v6003_v3  ;;  %v2947_v61 = vmul.f32 %v6003_v3, %v2797_v30 }
 0x1b9   : > { %3590 = vrcp.f32 %v802_v23  ;;  %v1561_v15 = vadd.f32 %v1529_v14, %v1493_v27  ;;  %v1741_v40 = vsel %vm1104_vm0, %v1738_v11, %v1740_v12  ;;  %v1984_v33 = vrot.slane %v1857_v38, 2 }
 0x1ba   : > { %v2295_v29 = vsel %vm1104_vm0, %v2293_v4, %v2294_v34  ;;  %v2539_v13 = vsel %vm1349_vm1, %v2537_v35, %v2538_v37  ;;  %v2987_v28 = vadd.f32 %v6016_v46, %v2948_v53  ;;  %v2986_v48 = vadd.f32 %v6016_v46, %v2947_v61 }
 0x1bb   : > { %v2360_v59 = vadd.f32 %v2295_v29, %v2116_v45  ;;  %v1805_v25 = vadd.f32 %v1741_v40, %v1561_v15  ;;  %v1985_v41 = vsel %vm1349_vm1, %v1982_v51, %v1984_v33  ;;  %v3316_v55 = vpop.f32.mrb[4].mxu1  ;;  %v2085_v32 = vmul.f32 %v3792_v52, %v963_v39 }
 0x1bc   : > { %3019 = vst.msk [vmem:[%s6030_s27 + $0x28] sm:$0xff] %vm2614_vm2, %v2987_v28  ;;  %3018 = vst.msk [vmem:[%s6030_s27 + $0x20] sm:$0xff] %vm2614_vm2, %v2986_v48  ;;  %v2964_v58 = vmul.f32 %v3316_v55, %v6003_v3  ;;  %v2877_v47 = vpop.f32.mrb[5].mxu1 }
 0x1bd   : > { %v2604_v9 = vadd.f32 %v2539_v13, %v2360_v59  ;;  %v2963_v11 = vmul.f32 %v6003_v3, %v2877_v47  ;;  %v2049_v18 = vadd.f32 %v1985_v41, %v1805_v25 }
 0x1be   : > { %v3003_v50 = vadd.f32 %v6016_v46, %v2964_v58 }
 0x1bf   : > { %3329 = vmatprep.mubr.msk.f32.mxu1 %vm2614_vm2, %v2604_v9  ;;  %v3002_v62 = vadd.f32 %v6016_v46, %v2963_v11  ;;  %v2117_v1 = vadd.f32 %v2085_v32, %v2049_v18 }
 0x1c0   : > { %3035 = vst.msk [vmem:[%s6030_s27 + $0xa8] sm:$0xff] %vm2614_vm2, %v3003_v50 }
 0x1c1   : > { %3034 = vst.msk [vmem:[%s6030_s27 + $0xa0] sm:$0xff] %vm2614_vm2, %v3002_v62 }
 0x1c3   : > { %v3591_v2 = vpop.eup %3590 }
 0x1c4   : > { %v964_v21 = vmul.f32 %v3591_v2, %v6006_v56 }
 0x1c6   : > { %v2169_v26 = vmul.f32 %v3822_v7, %v964_v21  ;;  %v2413_v51 = vmul.f32 %v3879_v6, %v964_v21 }
 0x1c8   : > { %v2296_v8 = vrot.slane %v2169_v26, 1  ;;  %v2540_v49 = vrot.slane %v2413_v51, 2 }
 0x1ca   : > { %v2297_v52 = vsel %vm1104_vm0, %v2294_v34, %v2296_v8  ;;  %v2541_v44 = vsel %vm1349_vm1, %v2538_v37, %v2540_v49 }
 0x1cb   : > { %v2361_v56 = vadd.f32 %v2297_v52, %v2117_v1 }
 0x1cd   : > { %v2605_v63 = vadd.f32 %v2541_v44, %v2361_v56 }
 0x1cf   : > { %3330 = vmatmul.mubr.msk.f32.gmra.mrb[14].mxu1 %vm2614_vm2, %v2605_v63 }
 0x1e0   : > { %v3295_v7 = vpop.f32.mrb[6].mxu0 }
 0x1e1   : > { %v2950_v6 = vmul.f32 %v3295_v7, %v6003_v3  ;;  %v2807_v20 = vpop.f32.mrb[7].mxu0 }
 0x1e2   : > { %v2949_v60 = vmul.f32 %v6003_v3, %v2807_v20 }
 0x1e3   : > { %v2989_v0 = vadd.f32 %v6016_v46, %v2950_v6 }
 0x1e4   : > { %v2988_v57 = vadd.f32 %v6016_v46, %v2949_v60 }
 0x1e5   : > { %3021 = vst.msk [vmem:[%s6030_s27 + $0x38] sm:$0xff] %vm2614_vm2, %v2989_v0 }
 0x1e6   : > { %3020 = vst.msk [vmem:[%s6030_s27 + $0x30] sm:$0xff] %vm2614_vm2, %v2988_v57 }
 0x1ec   : > { %v3319_v36 = vpop.f32.mrb[6].mxu1 }
 0x1ed   : > { %v2966_v39 = vmul.f32 %v3319_v36, %v6003_v3  ;;  %v2887_v19 = vpop.f32.mrb[7].mxu1 }
 0x1ee   : > { %v2965_v10 = vmul.f32 %v6003_v3, %v2887_v19 }
 0x1ef   : > { %v3005_v24 = vadd.f32 %v6016_v46, %v2966_v39 }
 0x1f0   : > { %v3004_v54 = vadd.f32 %v6016_v46, %v2965_v10 }
 0x1f1   : > { %3037 = vst.msk [vmem:[%s6030_s27 + $0xb8] sm:$0xff] %vm2614_vm2, %v3005_v24 }
 0x1f2   : > { %3036 = vst.msk [vmem:[%s6030_s27 + $0xb0] sm:$0xff] %vm2614_vm2, %v3004_v54 }
 0x217   : > { %v3298_v5 = vpop.f32.mrb[8].mxu0 }
 0x218   : > { %v2952_v42 = vmul.f32 %v3298_v5, %v6003_v3  ;;  %v2817_v43 = vpop.f32.mrb[9].mxu0 }
 0x219   : > { %v2951_v16 = vmul.f32 %v6003_v3, %v2817_v43 }
 0x21a   : > { %v2991_v31 = vadd.f32 %v6016_v46, %v2952_v42 }
 0x21b   : > { %v2990_v45 = vadd.f32 %v6016_v46, %v2951_v16 }
 0x21c   : > { %3023 = vst.msk [vmem:[%s6030_s27 + $0x48] sm:$0xff] %vm2614_vm2, %v2991_v31 }
 0x21d   : > { %3022 = vst.msk [vmem:[%s6030_s27 + $0x40] sm:$0xff] %vm2614_vm2, %v2990_v45  ;;  %v3322_v4 = vpop.f32.mrb[8].mxu1 }
 0x21e   : > { %v2968_v35 = vmul.f32 %v3322_v4, %v6003_v3  ;;  %v2897_v22 = vpop.f32.mrb[9].mxu1 }
 0x21f   : > { %v2967_v34 = vmul.f32 %v6003_v3, %v2897_v22 }
 0x220   : > { %v3007_v37 = vadd.f32 %v6016_v46, %v2968_v35 }
 0x221   : > { %v3006_v23 = vadd.f32 %v6016_v46, %v2967_v34 }
 0x222   : > { %3039 = vst.msk [vmem:[%s6030_s27 + $0xc8] sm:$0xff] %vm2614_vm2, %v3007_v37 }
 0x223   : > { %3038 = vst.msk [vmem:[%s6030_s27 + $0xc0] sm:$0xff] %vm2614_vm2, %v3006_v23 }
 0x245   : > { %v3301_v27 = vpop.f32.mrb[10].mxu0 }
 0x246   : > { %v2954_v14 = vmul.f32 %v3301_v27, %v6003_v3  ;;  %v2827_v38 = vpop.f32.mrb[11].mxu0 }
 0x247   : > { %v2953_v17 = vmul.f32 %v6003_v3, %v2827_v38 }
 0x248   : > { %v2993_v29 = vadd.f32 %v6016_v46, %v2954_v14 }
 0x249   : > { %v2992_v13 = vadd.f32 %v6016_v46, %v2953_v17 }
 0x24a   : > { %3025 = vst.msk [vmem:[%s6030_s27 + $0x58] sm:$0xff] %vm2614_vm2, %v2993_v29 }
 0x24b   : > { %3024 = vst.msk [vmem:[%s6030_s27 + $0x50] sm:$0xff] %vm2614_vm2, %v2992_v13 }
 0x24f   : > { %v3325_v12 = vpop.f32.mrb[10].mxu1 }
 0x250   : > { %v2970_v53 = vmul.f32 %v3325_v12, %v6003_v3  ;;  %v2907_v30 = vpop.f32.mrb[11].mxu1 }
 0x251   : > { %v2969_v59 = vmul.f32 %v6003_v3, %v2907_v30 }
 0x252   : > { %v3009_v61 = vadd.f32 %v6016_v46, %v2970_v53 }
 0x253   : > { %v3008_v28 = vadd.f32 %v6016_v46, %v2969_v59 }
 0x254   : > { %3041 = vst.msk [vmem:[%s6030_s27 + $0xd8] sm:$0xff] %vm2614_vm2, %v3009_v61 }
 0x255   : > { %3040 = vst.msk [vmem:[%s6030_s27 + $0xd0] sm:$0xff] %vm2614_vm2, %v3008_v28 }
 0x25f   : > { %v3304_v9 = vpop.f32.mrb[12].mxu0 }
 0x260   : > { %v2956_v15 = vmul.f32 %v3304_v9, %v6003_v3  ;;  %v2837_v48 = vpop.f32.mrb[13].mxu0 }
 0x261   : > { %v2955_v40 = vmul.f32 %v6003_v3, %v2837_v48 }
 0x262   : > { %v2995_v33 = vadd.f32 %v6016_v46, %v2956_v15 }
 0x263   : > { %v2994_v25 = vadd.f32 %v6016_v46, %v2955_v40 }
 0x264   : > { %3027 = vst.msk [vmem:[%s6030_s27 + $0x68] sm:$0xff] %vm2614_vm2, %v2995_v33 }
 0x265   : > { %3026 = vst.msk [vmem:[%s6030_s27 + $0x60] sm:$0xff] %vm2614_vm2, %v2994_v25 }
 0x27b   : > { %v3328_v41 = vpop.f32.mrb[12].mxu1 }
 0x27c   : > { %v2972_v55 = vmul.f32 %v3328_v41, %v6003_v3  ;;  %v2917_v58 = vpop.f32.mrb[13].mxu1 }
 0x27d   : > { %v2971_v47 = vmul.f32 %v6003_v3, %v2917_v58 }
 0x27e   : > { %v3011_v11 = vadd.f32 %v6016_v46, %v2972_v55 }
 0x27f   : > { %v3010_v2 = vadd.f32 %v6016_v46, %v2971_v47 }
 0x280   : > { %3043 = vst.msk [vmem:[%s6030_s27 + $0xe8] sm:$0xff] %vm2614_vm2, %v3011_v11 }
 0x281   : > { %3042 = vst.msk [vmem:[%s6030_s27 + $0xe0] sm:$0xff] %vm2614_vm2, %v3010_v2 }
 0x285   : > { %v3307_v18 = vpop.f32.mrb[14].mxu0 }
 0x286   : > { %v2958_v32 = vmul.f32 %v3307_v18, %v6003_v3  ;;  %v2847_v50 = vpop.f32.mrb[15].mxu0 }
 0x287   : > { %v2957_v21 = vmul.f32 %v6003_v3, %v2847_v50 }
 0x288   : > { %v2997_v62 = vadd.f32 %v6016_v46, %v2958_v32 }
 0x289   : > { %v2996_v26 = vadd.f32 %v6016_v46, %v2957_v21 }
 0x28a   : > { %3029 = vst.msk [vmem:[%s6030_s27 + $0x78] sm:$0xff] %vm2614_vm2, %v2997_v62 }
 0x28b   : > { %3028 = vst.msk [vmem:[%s6030_s27 + $0x70] sm:$0xff] %vm2614_vm2, %v2996_v26 }
 0x2a2   : > { %v3331_v51 = vpop.f32.mrb[14].mxu1 }
 0x2a3   : > { %v2974_v1 = vmul.f32 %v3331_v51, %v6003_v3  ;;  %v2927_v8 = vpop.f32.mrb[15].mxu1 }
 0x2a4   : > { %v2973_v49 = vmul.f32 %v6003_v3, %v2927_v8 }
 0x2a5   : > { %v3013_v52 = vadd.f32 %v6016_v46, %v2974_v1 }
 0x2a6   : > { %v3012_v44 = vadd.f32 %v6016_v46, %v2973_v49 }
 0x2a7   : > { %3045 = vst.msk [vmem:[%s6030_s27 + $0xf8] sm:$0xff] %vm2614_vm2, %v3013_v52 }
 0x2a8   : > { %3044 = vst.msk [vmem:[%s6030_s27 + $0xf0] sm:$0xff] %vm2614_vm2, %v3012_v44 }
 0x2a9 PF: > { %s18_s24 = sadd.s32 1, %s3617_s24  }
 0x2aa   : > { %p15_p1 = scmp.ge.s32.totalorder %s18_s24, 4  }
 0x2ac   :  { %17 = sbr.rel (!%p15_p1) target bundleno = 1 (0x1), region = 86 }
 0x2b3   :  { %3067 = vsyncpa [#allocation3], 1 }
 0x2b4   :  { %3069 = vsyncpa [#allocation3 + $0x1], 1 }

// kernel: bifpn_forward.6
= control target key start
LH: loop header
LB: loop body
LE: loop exit
PB: predicated region body
PF: predicated region fallthrough
CT: control target
= control target key end

     0   :  { %13 = vsyncpa [#allocation3], 0  ;;  %s1734_s27 = smov 0   ;;  %s2405_s0 = inlined_call_operand.vmem [shape: f32[3], index: 0, kind: input, shape index: {}]   ;;  %s2406_s1 = inlined_call_operand.vmem [shape: f32[2,10,10,64], index: 1, kind: input, shape index: {}]   ;;  %s2407_s2 = inlined_call_operand.vmem [shape: f32[2,10,10,64], index: 2, kind: input, shape index: {}]   ;;  %s2408_s3 = inlined_call_operand.vmem [shape: f32[2,10,10,64], index: 3, kind: input, shape index: {}]   ;;  %s2409_s4 = inlined_call_operand.vmem [shape: f32[3,3,64], index: 4, kind: input, shape index: {}]   ;;  %s2410_s5 = inlined_call_operand.vmem [shape: f32[64,64], index: 5, kind: input, shape index: {}]   ;;  %s2411_s6 = inlined_call_operand.vmem [shape: f32[1,64], index: 6, kind: input, shape index: {}]   ;;  %s2412_s7 = inlined_call_operand.vmem [shape: f32[1,64], index: 7, kind: input, shape index: {}]   ;;  %s2413_s8 = inlined_call_operand.vmem [shape: f32[2,64,64], index: 8, kind: output, shape index: {}]  }
   0x1 LB: > { %s1740_s28 = sadd.s32 4294967295, %s1686_s27   ;;  %p1448_p0 = scmp.ge.s32.totalorder %s1686_s27, 1  ;;  %s1686_s27 = sphi %s1734_s27, %s19_s27  }
   0x2   : > { %p233_p1 = scmp.lt.s32.totalorder %s1686_s27, 3  ;;  %s246_s9 = sshll.u32 %s2405_s0, 4  ;;  %s247_s9 = int_to_ptr.vmem [resolvable:$true] %s246_s9 }
   0x3   : > { %p1570_p3 = scmp.eq.s32.totalorder %s1740_s28, 0  ;;  %s1661_s11 = scalar_lea.vmem %s247_s9, 16 }
   0x4   : > { %p1747_p2 = pnand %p1448_p0, %p233_p1  ;;  %p1662_p6 = scmp.ne.s32.totalorder %s247_s9, %s1661_s11 }
   0x5   : > { %p1669_p10 = scmp.lt.s32.totalorder %s247_s9, %s247_s9  ;;  %p1670_p11 = scmp.lt.s32.totalorder %s1661_s11, %s1661_s11 }
   0x6   : > { %p1566_p4 = pneg %p1747_p2 }
   0x7   : > { %p1671_p12 = por %p1670_p11, %p1669_p10 }
   0x8   : > { %p1567_p5 = pnand %p1570_p3, %p1566_p4 }
   0xa   : > { %p1663_p7 = pneg %p1567_p5 }
   0xc   : > { %p1664_p8 = pnand %p1663_p7, %p1662_p6 }
   0xe   : > { %p1665_p9 = pneg %p1664_p8 }
  0x10   : > { %p1672_p13 = pnand %p1671_p12, %p1665_p9 }
  0x12   : > { %1675 = shalt.err (!%p1672_p13)
}
  0x13   : > { %s1688_s12 = smov [#allocation2]   ;;  %295 = sbr.rel (%p1747_p2) target bundleno = 412 (0x19c), region = 52 }
  0x14   : > { %1569 = dma.vmem_to_smem (!%p1567_p5), %s247_s9, 16, %s1688_s12, [#allocation3]  }
  0x1a   : > { %1681 = dma.done.wait (%p1570_p3), [#allocation3], 16  }
  0x1b   : > { %1683 = vsyncadd (%p1570_p3), [#allocation3], 4294967280 }
  0x1c   : > { %301 = sfence }
  0x1d   : > { %v1179_v0 = vld [vmem:[%s2410_s5] sm:$0xff]  ;;  %v1180_v1 = vld [vmem:[%s2410_s5 + $0x8] sm:$0xff]  ;;  %v1181_v2 = vld [vmem:[%s2410_s5 + $0x10] sm:$0xff]  ;;  %p340_p0 = scmp.lt.s32.totalorder %s1740_s28, 1  ;;  %s1772_s19 = sld [smem:[#allocation2]]  ;;  %v669_v3 = vlaneseq  ;;  %vm717_vm0 = vcmask 1046528  }
  0x1e   : > { %v1537_v4 = vpack.c.bf16 %v1180_v1, %v1179_v0  ;;  %v1182_v5 = vld [vmem:[%s2410_s5 + $0x18] sm:$0xff]  ;;  %v1183_v6 = vld [vmem:[%s2410_s5 + $0x20] sm:$0xff]  ;;  %s1780_s24 = sld [smem:[#allocation2 + $0x1]]  ;;  %v1184_v8 = vld [vmem:[%s2410_s5 + $0x28] sm:$0xff]  ;;  %s1794_s11 = sld [smem:[#allocation2 + $0x2]]  ;;  %vm794_vm1 = vcmask 1045504  }
  0x1f   : > { %v1541_v7 = vpack.c.bf16 %v1182_v5, %v1181_v2  ;;  %v1185_v9 = vld [vmem:[%s2410_s5 + $0x30] sm:$0xff]  ;;  %v1186_v10 = vld [vmem:[%s2410_s5 + $0x38] sm:$0xff]  ;;  %s2420_s28 = smov (!%p340_p0, %s1740_s28), 1  ;;  %v670_v11 = vshrl.u32 %v669_v3, 7  ;;  %v666_v12 = vld [vmem:[%s2409_s4] sm:$0x7]  ;;  %v1545_v17 = vpack.c.bf16 %v1184_v8, %v1183_v6 }
  0x20   : > { %1538 = vmatprep.subr.bf16.mxu0 %v1537_v4  ;;  %1553 = vmatprep.subr.bf16.mxu1 %v1537_v4  ;;  %s1561_s14 = smul.u32 160, %s2420_s28  ;;  %v667_v13 = vld [vmem:[%s2409_s4 + $0x4] sm:$0x7]  ;;  %v1805_v18 = vpack.c.bf16 %v1186_v10, %v1185_v9  ;;  %v1823_v20 = vld [vmem:[%s2409_s4 + $0x8] sm:$0x7]  ;;  %vm1187_vm2 = vcmask 523264  }
  0x21   : > { %1540 = vmatpush3.bf16.msra.mxu0 %v1537_v4  ;;  %1557 = vmatpush3.bf16.msra.mxu1 %v1537_v4  ;;  %v671_v14 = vsub.s32 0, %v670_v11  ;;  %v683_v15 = vsub.s32 1, %v670_v11  ;;  %v1803_v16 = vsub.s32 2, %v670_v11  ;;  %s1492_s10 = sshll.u32 %s2420_s28, 6 }
  0x22   : > { %1542 = vmatprep.subr.bf16.mxu0 %v1541_v7  ;;  %1554 = vmatprep.subr.bf16.mxu1 %v1541_v7  ;;  %s1810_s20 = scalar_lea.vmem %s2406_s1, %s1561_s14  ;;  %s1815_s23 = scalar_lea.vmem %s2407_s2, %s1561_s14 }
  0x23   : > { %v1818_v19 = vstv %s1772_s19  ;;  %v1825_v21 = vrot.slane %v666_v12, %v671_v14  ;;  %v1827_v22 = vrot.slane %v666_v12, %v683_v15  ;;  %v1830_v23 = vrot.slane %v666_v12, %v1803_v16  ;;  %v361_v24 = vld [vmem:[%s1810_s20] sm:$0xff]  ;;  %v362_v25 = vld [vmem:[%s1810_s20 + $0x8] sm:$0x3]  ;;  %v363_v26 = vld [vmem:[%s1810_s20 + $0x10] sm:$0xff]  ;;  %s1848_s30 = scalar_lea.vmem %s2408_s3, %s1561_s14  ;;  %s359_s15 = scalar_lea.vmem %s2413_s8, %s1492_s10 }
  0x24   : > { %v1836_v27 = vstv %s1780_s24  ;;  %v1838_v28 = vrot.slane %v667_v13, %v671_v14  ;;  %v1840_v29 = vrot.slane %v667_v13, %v683_v15  ;;  %v1843_v30 = vrot.slane %v667_v13, %v1803_v16  ;;  %v364_v31 = vld [vmem:[%s1810_s20 + $0x18] sm:$0x3]  ;;  %v365_v32 = vld [vmem:[%s1810_s20 + $0x20] sm:$0xff]  ;;  %v366_v33 = vld [vmem:[%s1810_s20 + $0x28] sm:$0x3] }
  0x25   : > { %1544 = vmatpush3.bf16.msra.mxu0 %v1541_v7  ;;  %1558 = vmatpush3.bf16.msra.mxu1 %v1541_v7  ;;  %v382_v34 = vmul.f32 %v1818_v19, %v361_v24  ;;  %v383_v35 = vmul.f32 %v1818_v19, %v362_v25  ;;  %v384_v36 = vmul.f32 %v1818_v19, %v363_v26  ;;  %v403_v40 = vld [vmem:[%s1815_s23] sm:$0xff]  ;;  %v404_v41 = vld [vmem:[%s1815_s23 + $0x8] sm:$0x3]  ;;  %v405_v42 = vld [vmem:[%s1815_s23 + $0x10] sm:$0xff]  ;;  %v1863_v43 = vstv %s1794_s11 }
  0x26   : > { %1546 = vmatprep.subr.bf16.mxu0 %v1545_v17  ;;  %1555 = vmatprep.subr.bf16.mxu1 %v1545_v17  ;;  %v385_v37 = vmul.f32 %v1818_v19, %v364_v31  ;;  %v386_v38 = vmul.f32 %v1818_v19, %v365_v32  ;;  %v387_v39 = vmul.f32 %v1818_v19, %v366_v33  ;;  %v406_v44 = vld [vmem:[%s1815_s23 + $0x18] sm:$0x3]  ;;  %v407_v45 = vld [vmem:[%s1815_s23 + $0x20] sm:$0xff]  ;;  %v408_v46 = vld [vmem:[%s1815_s23 + $0x28] sm:$0x3] }
  0x27   : > { %2417 = vst [vmem:[#allocation5_spill] sm:$0xff] %v1863_v43  ;;  %v424_v47 = vmul.f32 %v1836_v27, %v403_v40  ;;  %v425_v48 = vmul.f32 %v1836_v27, %v404_v41  ;;  %v426_v49 = vmul.f32 %v1836_v27, %v405_v42  ;;  %v1872_v50 = vrot.slane %v1823_v20, %v671_v14  ;;  %v465_v54 = vld [vmem:[%s1848_s30] sm:$0xff]  ;;  %v466_v55 = vld [vmem:[%s1848_s30 + $0x8] sm:$0x3]  ;;  %v467_v56 = vld [vmem:[%s1848_s30 + $0x10] sm:$0xff] }
  0x28   : > { %v427_v51 = vmul.f32 %v1836_v27, %v406_v44  ;;  %v428_v52 = vmul.f32 %v1836_v27, %v407_v45  ;;  %v429_v53 = vmul.f32 %v1836_v27, %v408_v46  ;;  %v1881_v57 = vrot.slane %v1823_v20, %v683_v15  ;;  %v468_v61 = vld [vmem:[%s1848_s30 + $0x18] sm:$0x3]  ;;  %v469_v62 = vld [vmem:[%s1848_s30 + $0x20] sm:$0xff]  ;;  %v470_v63 = vld [vmem:[%s1848_s30 + $0x28] sm:$0x3] }
  0x29   : > { %1548 = vmatpush3.bf16.msra.mxu0 %v1545_v17  ;;  %1559 = vmatpush3.bf16.msra.mxu1 %v1545_v17  ;;  %v444_v58 = vadd.f32 %v424_v47, %v382_v34  ;;  %v445_v59 = vadd.f32 %v425_v48, %v383_v35  ;;  %v446_v60 = vadd.f32 %v426_v49, %v384_v36  ;;  %v369_v3 = vld [vmem:[%s1810_s20 + $0x40] sm:$0xff]  ;;  %v370_v8 = vld [vmem:[%s1810_s20 + $0x48] sm:$0x3]  ;;  %v371_v9 = vld [vmem:[%s1810_s20 + $0x50] sm:$0xff] }
  0x2a   : > { %1550 = vmatprep.subr.bf16.mxu0 %v1805_v18  ;;  %1556 = vmatprep.subr.bf16.mxu1 %v1805_v18  ;;  %v447_v0 = vadd.f32 %v427_v51, %v385_v37  ;;  %v448_v1 = vadd.f32 %v428_v52, %v386_v38  ;;  %v449_v2 = vadd.f32 %v429_v53, %v387_v39  ;;  %v372_v13 = vld [vmem:[%s1810_s20 + $0x58] sm:$0x3]  ;;  %v373_v14 = vld [vmem:[%s1810_s20 + $0x60] sm:$0xff]  ;;  %v374_v15 = vld [vmem:[%s1810_s20 + $0x68] sm:$0x3] }
  0x2b   : > { %v486_v4 = vmul.f32 %v1863_v43, %v465_v54  ;;  %v487_v5 = vmul.f32 %v1863_v43, %v466_v55  ;;  %v488_v6 = vmul.f32 %v1863_v43, %v467_v56  ;;  %v489_v7 = vmul.f32 %v1863_v43, %v468_v61  ;;  %v413_v31 = vld [vmem:[%s1815_s23 + $0x50] sm:$0xff]  ;;  %v414_v36 = vld [vmem:[%s1815_s23 + $0x58] sm:$0x3]  ;;  %v415_v37 = vld [vmem:[%s1815_s23 + $0x60] sm:$0xff] }
  0x2c   : > { %v490_v10 = vmul.f32 %v1863_v43, %v469_v62  ;;  %v491_v11 = vmul.f32 %v1863_v43, %v470_v63  ;;  %v1899_v12 = vrot.slane %v1823_v20, %v1803_v16  ;;  %v390_v17 = vmul.f32 %v1818_v19, %v369_v3  ;;  %v411_v16 = vld [vmem:[%s1815_s23 + $0x40] sm:$0xff]  ;;  %v412_v20 = vld [vmem:[%s1815_s23 + $0x48] sm:$0x3]  ;;  %v476_v61 = vld [vmem:[%s1848_s30 + $0x58] sm:$0x3] }
  0x2d   : > { %1552 = vmatpush3.bf16.msra.mxu0 %v1805_v18  ;;  %1560 = vmatpush3.bf16.msra.mxu1 %v1805_v18  ;;  %v1907_v24 = vadd.f32 %v486_v4, %v444_v58  ;;  %v1909_v25 = vadd.f32 %v487_v5, %v445_v59  ;;  %v1911_v26 = vadd.f32 %v488_v6, %v446_v60  ;;  %v416_v18 = vld [vmem:[%s1815_s23 + $0x68] sm:$0x3]  ;;  %v473_v54 = vld [vmem:[%s1848_s30 + $0x40] sm:$0xff]  ;;  %v475_v60 = vld [vmem:[%s1848_s30 + $0x50] sm:$0xff] }
  0x2e   : > { %v1916_v32 = vadd.f32 %v489_v7, %v447_v0  ;;  %v1918_v33 = vadd.f32 %v490_v10, %v448_v1  ;;  %v1920_v34 = vadd.f32 %v491_v11, %v449_v2  ;;  %v391_v35 = vmul.f32 %v1818_v19, %v370_v8  ;;  %v474_v59 = vld [vmem:[%s1848_s30 + $0x48] sm:$0x3]  ;;  %v477_v1 = vld [vmem:[%s1848_s30 + $0x60] sm:$0xff]  ;;  %v367_v3 = vld [vmem:[%s1810_s20 + $0x30] sm:$0xff] }
  0x2f   : > { %v1460_v38 = vmul.f32 -1.442695, %v1907_v24  ;;  %v1461_v39 = vmul.f32 -1.442695, %v1909_v25  ;;  %v1462_v40 = vmul.f32 -1.442695, %v1911_v26  ;;  %v392_v41 = vmul.f32 %v1818_v19, %v371_v9 }
  0x30   : > { %v1463_v42 = vmul.f32 -1.442695, %v1916_v32  ;;  %v1464_v44 = vmul.f32 -1.442695, %v1918_v33  ;;  %v1465_v45 = vmul.f32 -1.442695, %v1920_v34  ;;  %v393_v46 = vmul.f32 %v1818_v19, %v372_v13 }
  0x31   : > { %1581 = vpow2.f32 %v1460_v38  ;;  %v394_v47 = vmul.f32 %v1818_v19, %v373_v14  ;;  %v395_v48 = vmul.f32 %v1818_v19, %v374_v15  ;;  %v432_v49 = vmul.f32 %v1836_v27, %v411_v16  ;;  %v478_v2 = vld [vmem:[%s1848_s30 + $0x68] sm:$0x3]  ;;  %v368_v7 = vld [vmem:[%s1810_s20 + $0x38] sm:$0x3]  ;;  %v409_v11 = vld [vmem:[%s1815_s23 + $0x30] sm:$0xff] }
  0x32   : > { %1583 = vpow2.f32 %v1461_v39  ;;  %v433_v51 = vmul.f32 %v1836_v27, %v412_v20  ;;  %v434_v52 = vmul.f32 %v1836_v27, %v413_v31  ;;  %v435_v53 = vmul.f32 %v1836_v27, %v414_v36  ;;  %v410_v16 = vld [vmem:[%s1815_s23 + $0x38] sm:$0x3] }
  0x33   : > { %1585 = vpow2.f32 %v1462_v40  ;;  %v436_v55 = vmul.f32 %v1836_v27, %v415_v37  ;;  %v437_v56 = vmul.f32 %v1836_v27, %v416_v18  ;;  %v452_v58 = vadd.f32 %v432_v49, %v390_v17  ;;  %v471_v40 = vld [vmem:[%s1848_s30 + $0x30] sm:$0xff] }
  0x34   : > { %1587 = vpow2.f32 %v1463_v42  ;;  %v453_v62 = vadd.f32 %v433_v51, %v391_v35  ;;  %v454_v63 = vadd.f32 %v434_v52, %v392_v41  ;;  %v455_v0 = vadd.f32 %v435_v53, %v393_v46  ;;  %v472_v41 = vld [vmem:[%s1848_s30 + $0x38] sm:$0x3]  ;;  %v375_v42 = vld [vmem:[%s1810_s20 + $0x70] sm:$0xff] }
  0x35   : > { %1589 = vpow2.f32 %v1464_v44  ;;  %v456_v4 = vadd.f32 %v436_v55, %v394_v47  ;;  %v457_v5 = vadd.f32 %v437_v56, %v395_v48  ;;  %v494_v6 = vmul.f32 %v1863_v43, %v473_v54  ;;  %v376_v53 = vld [vmem:[%s1810_s20 + $0x78] sm:$0x3] }
  0x36   : > { %1591 = vpow2.f32 %v1465_v45  ;;  %v495_v8 = vmul.f32 %v1863_v43, %v474_v59  ;;  %v496_v9 = vmul.f32 %v1863_v43, %v475_v60  ;;  %v497_v10 = vmul.f32 %v1863_v43, %v476_v61  ;;  %v417_v59 = vld [vmem:[%s1815_s23 + $0x70] sm:$0xff] }
  0x37   : > { %v498_v13 = vmul.f32 %v1863_v43, %v477_v1  ;;  %v499_v14 = vmul.f32 %v1863_v43, %v478_v2  ;;  %v1957_v15 = vadd.f32 %v494_v6, %v452_v58  ;;  %v388_v17 = vmul.f32 %v1818_v19, %v367_v3 }
  0x38   : > { %v1961_v20 = vadd.f32 %v495_v8, %v453_v62  ;;  %v1963_v31 = vadd.f32 %v496_v9, %v454_v63  ;;  %v1965_v35 = vadd.f32 %v497_v10, %v455_v0  ;;  %v389_v36 = vmul.f32 %v1818_v19, %v368_v7  ;;  %v418_v0 = vld [vmem:[%s1815_s23 + $0x78] sm:$0x3]  ;;  %v479_v9 = vld [vmem:[%s1848_s30 + $0x70] sm:$0xff] }
  0x39   : > { %v1968_v37 = vadd.f32 %v498_v13, %v456_v4  ;;  %v1970_v18 = vadd.f32 %v499_v14, %v457_v5  ;;  %v1468_v38 = vmul.f32 -1.442695, %v1957_v15  ;;  %v430_v39 = vmul.f32 %v1836_v27, %v409_v11  ;;  %v480_v10 = vld [vmem:[%s1848_s30 + $0x78] sm:$0x3]  ;;  %v377_v11 = vld [vmem:[%s1810_s20 + $0x80] sm:$0xff] }
  0x3a   : > { %v1469_v44 = vmul.f32 -1.442695, %v1961_v20  ;;  %v1470_v45 = vmul.f32 -1.442695, %v1963_v31  ;;  %v1471_v46 = vmul.f32 -1.442695, %v1965_v35  ;;  %v431_v47 = vmul.f32 %v1836_v27, %v410_v16 }
  0x3b   : > { %v1582_v48 = vpop.eup %1581  ;;  %1593 = vpow2.f32 %v1468_v38  ;;  %v1472_v49 = vmul.f32 -1.442695, %v1968_v37  ;;  %v1983_v51 = vmul.f32 -1.442695, %v1970_v18  ;;  %v450_v52 = vadd.f32 %v430_v39, %v388_v17  ;;  %v419_v38 = vld [vmem:[%s1815_s23 + $0x80] sm:$0xff] }
  0x3c   : > { %v1584_v54 = vpop.eup %1583  ;;  %v586_v55 = vadd.f32 1.0, %v1582_v48  ;;  %1595 = vpow2.f32 %v1469_v44  ;;  %v451_v56 = vadd.f32 %v431_v47, %v389_v36  ;;  %v492_v58 = vmul.f32 %v1863_v43, %v471_v40  ;;  %v378_v36 = vld [vmem:[%s1810_s20 + $0x88] sm:$0x3]  ;;  %v481_v48 = vld [vmem:[%s1848_s30 + $0x80] sm:$0xff] }
  0x3d   : > { %v1586_v60 = vpop.eup %1585  ;;  %v587_v61 = vadd.f32 1.0, %v1584_v54  ;;  %1597 = vpow2.f32 %v1470_v45  ;;  %v493_v62 = vmul.f32 %v1863_v43, %v472_v41  ;;  %v396_v63 = vmul.f32 %v1818_v19, %v375_v42  ;;  %v420_v42 = vld [vmem:[%s1815_s23 + $0x88] sm:$0x3] }
  0x3e   : > { %v1588_v1 = vpop.eup %1587  ;;  %v588_v2 = vadd.f32 1.0, %v1586_v60  ;;  %1599 = vrcp.f32 %v586_v55  ;;  %v1991_v3 = vadd.f32 %v492_v58, %v450_v52  ;;  %v397_v4 = vmul.f32 %v1818_v19, %v376_v53  ;;  %v482_v52 = vld [vmem:[%s1848_s30 + $0x88] sm:$0x3] }
  0x3f   : > { %v1590_v5 = vpop.eup %1589  ;;  %v589_v6 = vadd.f32 1.0, %v1588_v1  ;;  %1601 = vrcp.f32 %v587_v61  ;;  %v1994_v7 = vadd.f32 %v493_v62, %v451_v56  ;;  %v438_v8 = vmul.f32 %v1836_v27, %v417_v59  ;;  %v380_v1 = vld [vmem:[%s1810_s20 + $0x98] sm:$0x3] }
  0x40   : > { %v1592_v13 = vpop.eup %1591  ;;  %v590_v14 = vadd.f32 1.0, %v1590_v5  ;;  %1603 = vrcp.f32 %v588_v2  ;;  %v1466_v17 = vmul.f32 -1.442695, %v1991_v3  ;;  %v439_v16 = vmul.f32 %v1836_v27, %v418_v0  ;;  %v379_v0 = vld [vmem:[%s1810_s20 + $0x90] sm:$0xff] }
  0x41   : > { %v591_v39 = vadd.f32 1.0, %v1592_v13  ;;  %1605 = vrcp.f32 %v589_v6  ;;  %v1467_v40 = vmul.f32 -1.442695, %v1994_v7  ;;  %v458_v41 = vadd.f32 %v438_v8, %v396_v63 }
  0x42   : > { %1607 = vrcp.f32 %v590_v14  ;;  %v459_v44 = vadd.f32 %v439_v16, %v397_v4  ;;  %v500_v45 = vmul.f32 %v1863_v43, %v479_v9  ;;  %v501_v47 = vmul.f32 %v1863_v43, %v480_v10  ;;  %v421_v10 = vld [vmem:[%s1815_s23 + $0x90] sm:$0xff] }
  0x43   : > { %1609 = vrcp.f32 %v591_v39  ;;  %v398_v53 = vmul.f32 %v1818_v19, %v377_v11  ;;  %v399_v54 = vmul.f32 %v1818_v19, %v378_v36  ;;  %v440_v55 = vmul.f32 %v1836_v27, %v419_v38  ;;  %v422_v11 = vld [vmem:[%s1815_s23 + $0x98] sm:$0x3] }
  0x44   : > { %1611 = vpow2.f32 %v1471_v46  ;;  %v2013_v56 = vadd.f32 %v500_v45, %v458_v41  ;;  %v2015_v58 = vadd.f32 %v501_v47, %v459_v44  ;;  %v441_v59 = vmul.f32 %v1836_v27, %v420_v42 }
  0x45   : > { %v1594_v60 = vpop.eup %1593  ;;  %1613 = vpow2.f32 %v1472_v49  ;;  %v460_v61 = vadd.f32 %v440_v55, %v398_v53  ;;  %v502_v62 = vmul.f32 %v1863_v43, %v481_v48  ;;  %v503_v63 = vmul.f32 %v1863_v43, %v482_v52 }
  0x46   : > { %v1596_v46 = vpop.eup %1595  ;;  %1615 = vpow2.f32 %v1983_v51  ;;  %v594_v2 = vadd.f32 1.0, %v1594_v60  ;;  %v2024_v4 = vmul.f32 -1.442695, %v2013_v56  ;;  %v2027_v5 = vmul.f32 -1.442695, %v2015_v58 }
  0x47   : > { %v1598_v49 = vpop.eup %1597  ;;  %v595_v6 = vadd.f32 1.0, %v1596_v46  ;;  %1617 = vpow2.f32 %v1466_v17  ;;  %v461_v8 = vadd.f32 %v441_v59, %v399_v54  ;;  %v2029_v9 = vadd.f32 %v502_v62, %v460_v61 }
  0x48   : > { %v1600_v13 = vpop.eup %1599  ;;  %v596_v14 = vadd.f32 1.0, %v1598_v49  ;;  %1619 = vrcp.f32 %v594_v2  ;;  %v2034_v51 = vmul.f32 %v1818_v19, %v379_v0  ;;  %v2037_v16 = vmul.f32 %v1818_v19, %v380_v1 }
  0x49   : > { %v1602_v36 = vpop.eup %1601  ;;  %v646_v38 = vmul.f32 %v1600_v13, %v1907_v24  ;;  %1621 = vrcp.f32 %v595_v6  ;;  %v2040_v39 = vadd.f32 %v503_v63, %v461_v8  ;;  %v2043_v17 = vmul.f32 -1.442695, %v2029_v9 }
  0x4a   : > { %v1604_v41 = vpop.eup %1603  ;;  %v647_v42 = vmul.f32 %v1602_v36, %v1909_v25  ;;  %1623 = vrcp.f32 %v596_v14  ;;  %v2047_v44 = vmul.f32 %v1836_v27, %v421_v10  ;;  %v2050_v45 = vmul.f32 %v1836_v27, %v422_v11 }
  0x4b   : > { %v1606_v19 = vpop.eup %1605  ;;  %v2053_v47 = vmul.f32 %v1604_v41, %v1911_v26  ;;  %v673_v24 = vmul.f32 %v1825_v21, %v646_v38  ;;  %v685_v48 = vmul.f32 %v1827_v22, %v646_v38  ;;  %v762_v52 = vmul.f32 %v1830_v23, %v646_v38 }
  0x4c   : > { %v1608_v53 = vpop.eup %1607  ;;  %v2059_v25 = vmul.f32 %v1606_v19, %v1916_v32  ;;  %v686_v54 = vmul.f32 %v1827_v22, %v647_v42  ;;  %v763_v55 = vmul.f32 %v1830_v23, %v647_v42  ;;  %1625 = vpow2.f32 %v1467_v40 }
  0x4d   : > { %v1610_v27 = vpop.eup %1609  ;;  %v2064_v59 = vmul.f32 %v1608_v53, %v1918_v33  ;;  %v718_v26 = vrot.slane %v685_v48, 1  ;;  %v795_v60 = vrot.slane %v762_v52, 2  ;;  %v839_v61 = vmul.f32 %v1838_v28, %v2053_v47 }
  0x4e   : > { %v1612_v62 = vpop.eup %1611  ;;  %v2069_v63 = vmul.f32 %v1610_v27, %v1920_v34  ;;  %v719_v32 = vrot.slane %v686_v54, 1  ;;  %v796_v0 = vrot.slane %v763_v55, 2  ;;  %v859_v1 = vmul.f32 %v1840_v29, %v2053_v47 }
  0x4f   : > { %v1614_v46 = vpop.eup %1613  ;;  %v860_v40 = vmul.f32 %v1840_v29, %v2059_v25  ;;  %v935_v33 = vmul.f32 %v1843_v30, %v2053_v47  ;;  %v936_v2 = vmul.f32 %v1843_v30, %v2059_v25  ;;  %v1011_v49 = vmul.f32 %v1872_v50, %v2064_v59 }
  0x50   : > { %v1616_v34 = vpop.eup %1615  ;;  %v720_v6 = vsel %vm717_vm0, %v718_v26, %v719_v32  ;;  %v797_v8 = vsel %vm794_vm1, %v795_v60, %v796_v0  ;;  %v891_v10 = vrot.slane %v859_v1, 1  ;;  %v1031_v11 = vmul.f32 %v1881_v57, %v2064_v59 }
  0x51   : > { %v1618_v13 = vpop.eup %1617  ;;  %v750_v14 = vadd.f32 %v720_v6, %v673_v24  ;;  %v892_v36 = vrot.slane %v860_v40, 1  ;;  %v967_v38 = vrot.slane %v935_v33, 2  ;;  %v968_v41 = vrot.slane %v936_v2, 2 }
  0x52   : > { %v1620_v42 = vpop.eup %1619  ;;  %v1032_v19 = vmul.f32 %v1881_v57, %v2069_v63  ;;  %v1063_v48 = vrot.slane %v1031_v11, 1  ;;  %v1107_v52 = vmul.f32 %v1899_v12, %v2064_v59  ;;  %v1108_v53 = vmul.f32 %v1899_v12, %v2069_v63 }
  0x53   : > { %v1622_v54 = vpop.eup %1621  ;;  %v827_v55 = vadd.f32 %v797_v8, %v750_v14  ;;  %v893_v27 = vsel %vm717_vm0, %v891_v10, %v892_v36  ;;  %v969_v24 = vsel %vm794_vm1, %v967_v38, %v968_v41  ;;  %v597_v26 = vadd.f32 1.0, %v1612_v62 }
  0x54   : > { %v1624_v60 = vpop.eup %1623  ;;  %v1064_v32 = vrot.slane %v1032_v19, 1  ;;  %v1139_v0 = vrot.slane %v1107_v52, 2  ;;  %v1140_v1 = vrot.slane %v1108_v53, 2  ;;  %v598_v40 = vadd.f32 1.0, %v1614_v46 }
  0x55   : > { %v847_v33 = vadd.f32 %v839_v61, %v827_v55  ;;  %v599_v2 = vadd.f32 1.0, %v1616_v34  ;;  %1627 = vrcp.f32 %v597_v26  ;;  %v2094_v6 = vmul.f32 %v1620_v42, %v1957_v15 }
  0x56   : > { %v1626_v11 = vpop.eup %1625  ;;  %v1065_v43 = vsel %vm717_vm0, %v1063_v48, %v1064_v32  ;;  %v1141_v8 = vsel %vm794_vm1, %v1139_v0, %v1140_v1  ;;  %1629 = vrcp.f32 %v598_v40  ;;  %v2099_v62 = vmul.f32 %v1622_v54, %v1961_v20 }
  0x57   : > { %v923_v10 = vadd.f32 %v893_v27, %v847_v33  ;;  %1631 = vrcp.f32 %v599_v2  ;;  %v2102_v46 = vmul.f32 %v1624_v60, %v1963_v31  ;;  %v677_v61 = vmul.f32 %v1825_v21, %v2094_v6 }
  0x58   : > { %v693_v15 = vmul.f32 %v1827_v22, %v2094_v6  ;;  %v694_v34 = vmul.f32 %v1827_v22, %v2099_v62  ;;  %v770_v14 = vmul.f32 %v1830_v23, %v2094_v6  ;;  %v771_v20 = vmul.f32 %v1830_v23, %v2099_v62 }
  0x59   : > { %v999_v36 = vadd.f32 %v969_v24, %v923_v10  ;;  %v843_v31 = vmul.f32 %v1838_v28, %v2102_v46  ;;  %v867_v38 = vmul.f32 %v1840_v29, %v2102_v46  ;;  %v943_v41 = vmul.f32 %v1843_v30, %v2102_v46 }
  0x5a   : > { %v730_v42 = vrot.slane %v693_v15, 1  ;;  %v731_v19 = vrot.slane %v694_v34, 1  ;;  %v807_v48 = vrot.slane %v770_v14, 2  ;;  %v808_v52 = vrot.slane %v771_v20, 2 }
  0x5b   : > { %v1019_v53 = vadd.f32 %v1011_v49, %v999_v36  ;;  %v903_v54 = vrot.slane %v867_v38, 1  ;;  %v979_v55 = vrot.slane %v943_v41, 2  ;;  %v592_v27 = vadd.f32 1.0, %v1618_v13 }
  0x5c   : > { %v732_v26 = vsel %vm717_vm0, %v730_v42, %v731_v19  ;;  %v809_v24 = vsel %vm794_vm1, %v807_v48, %v808_v52  ;;  %v593_v60 = vadd.f32 1.0, %v1626_v11  ;;  %v674_v32 = vmul.f32 %v1825_v21, %v2053_v47 }
  0x5d   : > { %v1095_v0 = vadd.f32 %v1065_v43, %v1019_v53  ;;  %v754_v1 = vadd.f32 %v732_v26, %v677_v61  ;;  %1633 = vrcp.f32 %v592_v27  ;;  %v687_v40 = vmul.f32 %v1827_v22, %v2053_v47 }
  0x5e   : > { %1635 = vrcp.f32 %v593_v60  ;;  %v688_v49 = vmul.f32 %v1827_v22, %v2059_v25  ;;  %v764_v13 = vmul.f32 %v1830_v23, %v2053_v47  ;;  %v765_v33 = vmul.f32 %v1830_v23, %v2059_v25 }
  0x5f   : > { %v1628_v2 = vpop.eup %1627  ;;  %v1171_v11 = vadd.f32 %v1141_v8, %v1095_v0  ;;  %v831_v10 = vadd.f32 %v809_v24, %v754_v1  ;;  %v721_v15 = vrot.slane %v687_v40, 1  ;;  %v840_v43 = vmul.f32 %v1838_v28, %v2064_v59 }
  0x60   : > { %v1630_v61 = vpop.eup %1629  ;;  %v2135_v34 = vmul.f32 %v1628_v2, %v1965_v35  ;;  %v722_v14 = vrot.slane %v688_v49, 1  ;;  %v798_v20 = vrot.slane %v764_v13, 2  ;;  %v799_v36 = vrot.slane %v765_v33, 2 }
  0x61   : > { %v1632_v38 = vpop.eup %1631  ;;  %1525 = vmatprep.mubr.msk.f32.mxu0 %vm1187_vm2, %v1171_v11  ;;  %v2139_v47 = vmul.f32 %v1630_v61, %v1968_v37  ;;  %v851_v25 = vadd.f32 %v843_v31, %v831_v10  ;;  %v861_v8 = vmul.f32 %v1840_v29, %v2064_v59  ;;  %v862_v41 = vmul.f32 %v1840_v29, %v2069_v63 }
  0x62   : > { %v2146_v42 = vmul.f32 %v1632_v38, %v1970_v18  ;;  %v868_v35 = vmul.f32 %v1840_v29, %v2135_v34  ;;  %v944_v19 = vmul.f32 %v1843_v30, %v2135_v34  ;;  %v723_v48 = vsel %vm717_vm0, %v721_v15, %v722_v14 }
  0x63   : > { %v1015_v37 = vmul.f32 %v1872_v50, %v2139_v47  ;;  %v1039_v31 = vmul.f32 %v1881_v57, %v2139_v47  ;;  %v1115_v52 = vmul.f32 %v1899_v12, %v2139_v47  ;;  %v751_v53 = vadd.f32 %v723_v48, %v674_v32 }
  0x64   : > { %v904_v18 = vrot.slane %v868_v35, 1  ;;  %v980_v27 = vrot.slane %v944_v19, 2  ;;  %v1040_v26 = vmul.f32 %v1881_v57, %v2146_v42  ;;  %v1116_v24 = vmul.f32 %v1899_v12, %v2146_v42 }
  0x65   : > { %v1075_v60 = vrot.slane %v1039_v31, 1  ;;  %v1151_v0 = vrot.slane %v1115_v52, 2  ;;  %v800_v1 = vsel %vm794_vm1, %v798_v20, %v799_v36  ;;  %v894_v40 = vrot.slane %v861_v8, 1 }
  0x66   : > { %v905_v49 = vsel %vm717_vm0, %v903_v54, %v904_v18  ;;  %v981_v13 = vsel %vm794_vm1, %v979_v55, %v980_v27  ;;  %v1076_v33 = vrot.slane %v1040_v26, 1  ;;  %v1152_v2 = vrot.slane %v1116_v24, 2 }
  0x67   : > { %v1634_v32 = vpop.eup %1633  ;;  %v927_v11 = vadd.f32 %v905_v49, %v851_v25  ;;  %v828_v10 = vadd.f32 %v800_v1, %v751_v53  ;;  %v895_v15 = vrot.slane %v862_v41, 1  ;;  %v937_v61 = vmul.f32 %v1843_v30, %v2064_v59 }
  0x68   : > { %v1636_v14 = vpop.eup %1635  ;;  %v1077_v38 = vsel %vm717_vm0, %v1075_v60, %v1076_v33  ;;  %v1153_v35 = vsel %vm794_vm1, %v1151_v0, %v1152_v2  ;;  %v2171_v20 = vmul.f32 %v1634_v32, %v1991_v3  ;;  %v938_v54 = vmul.f32 %v1843_v30, %v2069_v63 }
  0x69   : > { %v1003_v55 = vadd.f32 %v981_v13, %v927_v11  ;;  %v2176_v36 = vmul.f32 %v1636_v14, %v1994_v7  ;;  %v848_v25 = vadd.f32 %v840_v43, %v828_v10  ;;  %v896_v8 = vsel %vm717_vm0, %v894_v40, %v895_v15 }
  0x6a   : > { %v970_v41 = vrot.slane %v937_v61, 2  ;;  %v971_v19 = vrot.slane %v938_v54, 2  ;;  %v1012_v48 = vmul.f32 %v1872_v50, %v2171_v20  ;;  %v1033_v31 = vmul.f32 %v1881_v57, %v2171_v20 }
  0x6b   : > { %v1023_v3 = vadd.f32 %v1015_v37, %v1003_v55  ;;  %v924_v52 = vadd.f32 %v896_v8, %v848_v25  ;;  %v1034_v53 = vmul.f32 %v1881_v57, %v2176_v36  ;;  %v1109_v7 = vmul.f32 %v1899_v12, %v2171_v20 }
  0x6c   : > { %v972_v43 = vsel %vm794_vm1, %v970_v41, %v971_v19  ;;  %v1066_v18 = vrot.slane %v1033_v31, 1  ;;  %v1110_v27 = vmul.f32 %v1899_v12, %v2176_v36  ;;  %1637 = vpow2.f32 %v2024_v4 }
  0x6d   : > { %v1099_v26 = vadd.f32 %v1077_v38, %v1023_v3  ;;  %v1000_v24 = vadd.f32 %v972_v43, %v924_v52  ;;  %v1067_v60 = vrot.slane %v1034_v53, 1  ;;  %v1142_v0 = vrot.slane %v1109_v7, 2 }
  0x6e   : > { %v1143_v37 = vrot.slane %v1110_v27, 2  ;;  %1639 = vpow2.f32 %v2027_v5  ;;  %v678_v1 = vmul.f32 %v1825_v21, %v2102_v46  ;;  %v695_v40 = vmul.f32 %v1827_v22, %v2102_v46 }
  0x6f   : > { %v1175_v49 = vadd.f32 %v1153_v35, %v1099_v26  ;;  %v1020_v13 = vadd.f32 %v1012_v48, %v1000_v24  ;;  %v1068_v33 = vsel %vm717_vm0, %v1066_v18, %v1067_v60  ;;  %v696_v4 = vmul.f32 %v1827_v22, %v2135_v34 }
  0x70   : > { %v1144_v2 = vsel %vm794_vm1, %v1142_v0, %v1143_v37  ;;  %v733_v32 = vrot.slane %v695_v40, 1  ;;  %v772_v11 = vmul.f32 %v1830_v23, %v2102_v46  ;;  %v773_v5 = vmul.f32 %v1830_v23, %v2135_v34 }
  0x71   : > { %1531 = vmatprep.mubr.msk.f32.mxu1 %vm1187_vm2, %v1175_v49  ;;  %v1096_v10 = vadd.f32 %v1068_v33, %v1020_v13  ;;  %v734_v15 = vrot.slane %v696_v4, 1  ;;  %v844_v61 = vmul.f32 %v1838_v28, %v2139_v47  ;;  %v869_v14 = vmul.f32 %v1840_v29, %v2139_v47 }
  0x72   : > { %v810_v38 = vrot.slane %v772_v11, 2  ;;  %v811_v35 = vrot.slane %v773_v5, 2  ;;  %v870_v54 = vmul.f32 %v1840_v29, %v2146_v42  ;;  %v945_v55 = vmul.f32 %v1843_v30, %v2139_v47 }
  0x73   : > { %v1172_v25 = vadd.f32 %v1144_v2, %v1096_v10  ;;  %v735_v8 = vsel %vm717_vm0, %v733_v32, %v734_v15  ;;  %v906_v41 = vrot.slane %v869_v14, 1  ;;  %v946_v19 = vmul.f32 %v1843_v30, %v2146_v42 }
  0x74   : > { %v755_v48 = vadd.f32 %v735_v8, %v678_v1  ;;  %v812_v31 = vsel %vm794_vm1, %v810_v38, %v811_v35  ;;  %v907_v3 = vrot.slane %v870_v54, 1  ;;  %v982_v52 = vrot.slane %v945_v55, 2 }
  0x75   : > { %1526 = vmatmul.mubr.msk.f32.vlgmr.msra.gmra.mrb[0].mxu0 %vm1187_vm2, %v1172_v25  ;;  %v983_v53 = vrot.slane %v946_v19, 2  ;;  %v675_v7 = vmul.f32 %v1825_v21, %v2064_v59  ;;  %v689_v43 = vmul.f32 %v1827_v22, %v2064_v59  ;;  %v690_v18 = vmul.f32 %v1827_v22, %v2069_v63 }
  0x76   : > { %v1638_v27 = vpop.eup %1637  ;;  %v832_v26 = vadd.f32 %v812_v31, %v755_v48  ;;  %v908_v24 = vsel %vm717_vm0, %v906_v41, %v907_v3  ;;  %v766_v60 = vmul.f32 %v1830_v23, %v2064_v59  ;;  %v767_v0 = vmul.f32 %v1830_v23, %v2069_v63 }
  0x77   : > { %v600_v37 = vadd.f32 1.0, %v1638_v27  ;;  %v984_v1 = vsel %vm794_vm1, %v982_v52, %v983_v53  ;;  %v724_v40 = vrot.slane %v689_v43, 1  ;;  %v725_v49 = vrot.slane %v690_v18, 1 }
  0x78   : > { %v1640_v13 = vpop.eup %1639  ;;  %v852_v33 = vadd.f32 %v844_v61, %v832_v26  ;;  %v801_v4 = vrot.slane %v766_v60, 2  ;;  %v802_v2 = vrot.slane %v767_v0, 2  ;;  %v841_v32 = vmul.f32 %v1838_v28, %v2171_v20 }
  0x79   : > { %v601_v11 = vadd.f32 1.0, %v1640_v13  ;;  %1641 = vrcp.f32 %v600_v37  ;;  %v726_v5 = vsel %vm717_vm0, %v724_v40, %v725_v49  ;;  %v863_v59 = vmul.f32 %v1840_v29, %v2171_v20 }
  0x7a   : > { %v928_v63 = vadd.f32 %v908_v24, %v852_v33  ;;  %v752_v10 = vadd.f32 %v726_v5, %v675_v7  ;;  %v803_v15 = vsel %vm794_vm1, %v801_v4, %v802_v2  ;;  %v864_v14 = vmul.f32 %v1840_v29, %v2176_v36 }
  0x7b   : > { %1643 = vrcp.f32 %v601_v11  ;;  %v897_v61 = vrot.slane %v863_v59, 1  ;;  %v939_v38 = vmul.f32 %v1843_v30, %v2171_v20  ;;  %v940_v35 = vmul.f32 %v1843_v30, %v2176_v36 }
  0x7c   : > { %v1004_v54 = vadd.f32 %v984_v1, %v928_v63  ;;  %v829_v55 = vadd.f32 %v803_v15, %v752_v10  ;;  %v898_v25 = vrot.slane %v864_v14, 1  ;;  %v1013_v8 = vmul.f32 %v1872_v50, %v2094_v6 }
  0x7d   : > { %v973_v41 = vrot.slane %v939_v38, 2  ;;  %v974_v19 = vrot.slane %v940_v35, 2  ;;  %v1035_v48 = vmul.f32 %v1881_v57, %v2094_v6  ;;  %v1036_v31 = vmul.f32 %v1881_v57, %v2099_v62 }
  0x7e   : > { %v849_v3 = vadd.f32 %v841_v32, %v829_v55  ;;  %v899_v52 = vsel %vm717_vm0, %v897_v61, %v898_v25  ;;  %v1111_v53 = vmul.f32 %v1899_v12, %v2094_v6  ;;  %v1112_v7 = vmul.f32 %v1899_v12, %v2099_v62 }
  0x7f   : > { %v975_v43 = vsel %vm794_vm1, %v973_v41, %v974_v19  ;;  %v1069_v18 = vrot.slane %v1035_v48, 1  ;;  %v1070_v27 = vrot.slane %v1036_v31, 1  ;;  %1645 = vpow2.f32 %v2043_v17 }
  0x80   : > { %v925_v26 = vadd.f32 %v899_v52, %v849_v3  ;;  %v1145_v24 = vrot.slane %v1111_v53, 2  ;;  %v1146_v60 = vrot.slane %v1112_v7, 2  ;;  %v1477_v0 = vmul.f32 -1.442695, %v2040_v39 }
  0x81   : > { %v1071_v37 = vsel %vm717_vm0, %v1069_v18, %v1070_v27  ;;  %v679_v1 = vmul.f32 %v1825_v21, %v2139_v47  ;;  %v697_v40 = vmul.f32 %v1827_v22, %v2139_v47  ;;  %v698_v49 = vmul.f32 %v1827_v22, %v2146_v42 }
  0x82   : > { %v1001_v13 = vadd.f32 %v975_v43, %v925_v26  ;;  %v1147_v33 = vsel %vm794_vm1, %v1145_v24, %v1146_v60  ;;  %1647 = vpow2.f32 %v1477_v0  ;;  %v774_v17 = vmul.f32 %v1830_v23, %v2139_v47 }
  0x83   : > { %v1642_v4 = vpop.eup %1641  ;;  %v736_v2 = vrot.slane %v697_v40, 1  ;;  %v737_v32 = vrot.slane %v698_v49, 1  ;;  %v775_v11 = vmul.f32 %v1830_v23, %v2146_v42  ;;  %v676_v5 = vmul.f32 %v1825_v21, %v2171_v20 }
  0x84   : > { %v2271_v59 = vmul.f32 %v1642_v4, %v2013_v56  ;;  %v1021_v63 = vadd.f32 %v1013_v8, %v1001_v13  ;;  %v813_v10 = vrot.slane %v774_v17, 2  ;;  %v691_v15 = vmul.f32 %v1827_v22, %v2171_v20 }
  0x85   : > { %v1644_v14 = vpop.eup %1643  ;;  %v738_v47 = vsel %vm717_vm0, %v736_v2, %v737_v32  ;;  %v814_v61 = vrot.slane %v775_v11, 2  ;;  %v692_v38 = vmul.f32 %v1827_v22, %v2176_v36  ;;  %v768_v42 = vmul.f32 %v1830_v23, %v2171_v20 }
  0x86   : > { %v2281_v35 = vmul.f32 %v1644_v14, %v2015_v58  ;;  %v1016_v56 = vmul.f32 %v1872_v50, %v2271_v59  ;;  %v1041_v55 = vmul.f32 %v1881_v57, %v2271_v59  ;;  %v1117_v25 = vmul.f32 %v1899_v12, %v2271_v59 }
  0x87   : > { %v1097_v8 = vadd.f32 %v1071_v37, %v1021_v63  ;;  %v756_v41 = vadd.f32 %v738_v47, %v679_v1  ;;  %v815_v19 = vsel %vm794_vm1, %v813_v10, %v814_v61  ;;  %v845_v48 = vmul.f32 %v1838_v28, %v2271_v59 }
  0x88   : > { %v1024_v20 = vadd.f32 %v1016_v56, %v1004_v54  ;;  %v1042_v58 = vmul.f32 %v1881_v57, %v2281_v35  ;;  %v1078_v31 = vrot.slane %v1041_v55, 1  ;;  %v1118_v3 = vmul.f32 %v1899_v12, %v2281_v35 }
  0x89   : > { %v1646_v52 = vpop.eup %1645  ;;  %v1154_v53 = vrot.slane %v1117_v25, 2  ;;  %v1173_v7 = vadd.f32 %v1147_v33, %v1097_v8  ;;  %v833_v43 = vadd.f32 %v815_v19, %v756_v41  ;;  %v871_v18 = vmul.f32 %v1840_v29, %v2271_v59 }
  0x8a   : > { %v1079_v27 = vrot.slane %v1042_v58, 1  ;;  %v1155_v26 = vrot.slane %v1118_v3, 2  ;;  %v602_v24 = vadd.f32 1.0, %v1646_v52  ;;  %v872_v54 = vmul.f32 %v1840_v29, %v2281_v35 }
  0x8b   : > { %1528 = vmatprep.mubr.msk.f32.mxu0 %vm1187_vm2, %v1173_v7  ;;  %v853_v60 = vadd.f32 %v845_v48, %v833_v43  ;;  %v909_v0 = vrot.slane %v871_v18, 1  ;;  %v947_v37 = vmul.f32 %v1843_v30, %v2271_v59  ;;  %v948_v1 = vmul.f32 %v1843_v30, %v2281_v35 }
  0x8c   : > { %v1648_v40 = vpop.eup %1647  ;;  %v1080_v49 = vsel %vm717_vm0, %v1078_v31, %v1079_v27  ;;  %v1156_v13 = vsel %vm794_vm1, %v1154_v53, %v1155_v26  ;;  %1649 = vrcp.f32 %v602_v24  ;;  %v910_v33 = vrot.slane %v872_v54, 1  ;;  %v483_v24 = vld [vmem:[%s1848_s30 + $0x90] sm:$0xff]  ;;  %v484_v54 = vld [vmem:[%s1848_s30 + $0x98] sm:$0x3] }
  0x8d   : > { %v1100_v17 = vadd.f32 %v1080_v49, %v1024_v20  ;;  %v603_v4 = vadd.f32 1.0, %v1648_v40  ;;  %v985_v2 = vrot.slane %v947_v37, 2  ;;  %v986_v32 = vrot.slane %v948_v1, 2 }
  0x8e   : > { %v911_v11 = vsel %vm717_vm0, %v909_v0, %v910_v33  ;;  %v727_v63 = vrot.slane %v691_v15, 1  ;;  %v728_v10 = vrot.slane %v692_v38, 1  ;;  %v769_v14 = vmul.f32 %v1830_v23, %v2176_v36 }
  0x8f   : > { %v1176_v47 = vadd.f32 %v1156_v13, %v1100_v17  ;;  %1651 = vrcp.f32 %v603_v4  ;;  %v929_v61 = vadd.f32 %v911_v11, %v853_v60  ;;  %v987_v56 = vsel %vm794_vm1, %v985_v2, %v986_v32 }
  0x90   : > { %v729_v55 = vsel %vm717_vm0, %v727_v63, %v728_v10  ;;  %v804_v25 = vrot.slane %v768_v42, 2  ;;  %v805_v8 = vrot.slane %v769_v14, 2  ;;  %v842_v41 = vmul.f32 %v1838_v28, %v2094_v6 }
  0x91   : > { %1532 = vmatmul.mubr.msk.f32.vlgmr.msra.gmra.mrb[0].mxu1 %vm1187_vm2, %v1176_v47  ;;  %v1005_v19 = vadd.f32 %v987_v56, %v929_v61  ;;  %v753_v15 = vadd.f32 %v729_v55, %v676_v5  ;;  %v865_v38 = vmul.f32 %v1840_v29, %v2094_v6  ;;  %v866_v36 = vmul.f32 %v1840_v29, %v2099_v62 }
  0x92   : > { %v806_v48 = vsel %vm794_vm1, %v804_v25, %v805_v8  ;;  %v941_v42 = vmul.f32 %v1843_v30, %v2094_v6  ;;  %v942_v20 = vmul.f32 %v1843_v30, %v2099_v62  ;;  %v1014_v58 = vmul.f32 %v1872_v50, %v2102_v46 }
  0x93   : > { %v830_v5 = vadd.f32 %v806_v48, %v753_v15  ;;  %v900_v31 = vrot.slane %v865_v38, 1  ;;  %v901_v3 = vrot.slane %v866_v36, 1  ;;  %v1037_v52 = vmul.f32 %v1881_v57, %v2102_v46 }
  0x94   : > { %v976_v53 = vrot.slane %v941_v42, 2  ;;  %v977_v7 = vrot.slane %v942_v20, 2  ;;  %v1038_v43 = vmul.f32 %v1881_v57, %v2135_v34  ;;  %v1113_v6 = vmul.f32 %v1899_v12, %v2102_v46 }
  0x95   : > { %v850_v18 = vadd.f32 %v842_v41, %v830_v5  ;;  %v902_v62 = vsel %vm717_vm0, %v900_v31, %v901_v3  ;;  %v1072_v27 = vrot.slane %v1037_v52, 1  ;;  %v1114_v26 = vmul.f32 %v1899_v12, %v2135_v34  ;;  %v2418_v34 = vld [vmem:[#allocation5_spill] sm:$0xff] }
  0x96   : > { %v1650_v60 = vpop.eup %1649  ;;  %v978_v0 = vsel %vm794_vm1, %v976_v53, %v977_v7  ;;  %v1073_v37 = vrot.slane %v1038_v43, 1  ;;  %v1148_v1 = vrot.slane %v1113_v6, 2  ;;  %v462_v40 = vadd.f32 %v2047_v44, %v2034_v51 }
  0x97   : > { %v662_v49 = vmul.f32 %v1650_v60, %v2029_v9  ;;  %v926_v46 = vadd.f32 %v902_v62, %v850_v18  ;;  %v1149_v13 = vrot.slane %v1114_v26, 2  ;;  %v463_v33 = vadd.f32 %v2050_v45, %v2037_v16 }
  0x98   : > { %v1074_v17 = vsel %vm717_vm0, %v1072_v27, %v1073_v37  ;;  %v504_v4 = vmul.f32 %v2418_v34, %v483_v24  ;;  %v505_v2 = vmul.f32 %v2418_v34, %v484_v54  ;;  %v680_v32 = vmul.f32 %v1825_v21, %v2271_v59 }
  0x99   : > { %v1652_v11 = vpop.eup %1651  ;;  %v1017_v63 = vmul.f32 %v1872_v50, %v662_v49  ;;  %v1043_v51 = vmul.f32 %v1881_v57, %v662_v49  ;;  %v1119_v9 = vmul.f32 %v1899_v12, %v662_v49  ;;  %v1002_v44 = vadd.f32 %v978_v0, %v926_v46 }
  0x9a   : > { %v663_v10 = vmul.f32 %v1652_v11, %v2040_v39  ;;  %v1150_v16 = vsel %vm794_vm1, %v1148_v1, %v1149_v13  ;;  %v524_v45 = vadd.f32 %v504_v4, %v462_v40  ;;  %v525_v14 = vadd.f32 %v505_v2, %v463_v33 }
  0x9b   : > { %v1025_v47 = vadd.f32 %v1017_v63, %v1005_v19  ;;  %v1081_v61 = vrot.slane %v1043_v51, 1  ;;  %v1157_v56 = vrot.slane %v1119_v9, 2  ;;  %v1022_v55 = vadd.f32 %v1014_v58, %v1002_v44 }
  0x9c   : > { %v1044_v21 = vmul.f32 %v1881_v57, %v663_v10  ;;  %v1120_v25 = vmul.f32 %v1899_v12, %v663_v10  ;;  %v1478_v8 = vmul.f32 -1.442695, %v524_v45  ;;  %v1479_v41 = vmul.f32 -1.442695, %v525_v14 }
  0x9d   : > { %v1098_v15 = vadd.f32 %v1074_v17, %v1022_v55  ;;  %v699_v38 = vmul.f32 %v1827_v22, %v2271_v59  ;;  %v700_v39 = vmul.f32 %v1827_v22, %v2281_v35  ;;  %v776_v36 = vmul.f32 %v1830_v23, %v2271_v59 }
  0x9e   : > { %v1082_v19 = vrot.slane %v1044_v21, 1  ;;  %v1158_v48 = vrot.slane %v1120_v25, 2  ;;  %1653 = vpow2.f32 %v1478_v8  ;;  %v777_v42 = vmul.f32 %v1830_v23, %v2281_v35 }
  0x9f   : > { %v1174_v20 = vadd.f32 %v1150_v16, %v1098_v15  ;;  %1655 = vpow2.f32 %v1479_v41  ;;  %v739_v58 = vrot.slane %v699_v38, 1  ;;  %v740_v5 = vrot.slane %v700_v39, 1 }
  0xa0   : > { %v1083_v31 = vsel %vm717_vm0, %v1081_v61, %v1082_v19  ;;  %v1159_v3 = vsel %vm794_vm1, %v1157_v56, %v1158_v48  ;;  %v816_v52 = vrot.slane %v776_v36, 2  ;;  %v817_v53 = vrot.slane %v777_v42, 2  ;;  %v1488_v56 = vld [vmem:[%s2411_s6] ss:$0 sm:$0xff] }
  0xa1   : > { %v1101_v22 = vadd.f32 %v1083_v31, %v1025_v47  ;;  %1529 = vmatmul.mubr.msk.f32.gmra.mrb[2].mxu0 %vm1187_vm2, %v1174_v20  ;;  %v741_v59 = vsel %vm717_vm0, %v739_v58, %v740_v5  ;;  %v846_v7 = vmul.f32 %v1838_v28, %v662_v49  ;;  %v873_v43 = vmul.f32 %v1840_v29, %v662_v49 }
  0xa2   : > { %v757_v23 = vadd.f32 %v741_v59, %v680_v32  ;;  %v818_v35 = vsel %vm794_vm1, %v816_v52, %v817_v53  ;;  %v874_v6 = vmul.f32 %v1840_v29, %v663_v10  ;;  %v949_v18 = vmul.f32 %v1843_v30, %v662_v49 }
  0xa3   : > { %v1177_v62 = vadd.f32 %v1159_v3, %v1101_v22  ;;  %v912_v27 = vrot.slane %v873_v43, 1  ;;  %v950_v26 = vmul.f32 %v1843_v30, %v663_v10 }
  0xa4   : > { %v834_v24 = vadd.f32 %v818_v35, %v757_v23  ;;  %v913_v54 = vrot.slane %v874_v6, 1  ;;  %v988_v60 = vrot.slane %v949_v18, 2 }
  0xa5   : > { %1534 = vmatprep.mubr.msk.f32.mxu1 %vm1187_vm2, %v1177_v62  ;;  %v989_v0 = vrot.slane %v950_v26, 2 }
  0xa6   : > { %v854_v28 = vadd.f32 %v846_v7, %v834_v24  ;;  %v914_v37 = vsel %vm717_vm0, %v912_v27, %v913_v54 }
  0xa7   : > { %v990_v1 = vsel %vm794_vm1, %v988_v60, %v989_v0 }
  0xa8   : > { %v1654_v40 = vpop.eup %1653  ;;  %v930_v46 = vadd.f32 %v914_v37, %v854_v28 }
  0xa9   : > { %v1656_v29 = vpop.eup %1655  ;;  %v604_v13 = vadd.f32 1.0, %v1654_v40 }
  0xaa   : > { %v605_v49 = vadd.f32 1.0, %v1656_v29  ;;  %v1006_v33 = vadd.f32 %v990_v1, %v930_v46 }
  0xab   : > { %1657 = vrcp.f32 %v604_v13 }
  0xac   : > { %1659 = vrcp.f32 %v605_v49 }
  0xb5   : > { %v1658_v30 = vpop.eup %1657 }
  0xb6   : > { %v1660_v17 = vpop.eup %1659  ;;  %v664_v34 = vmul.f32 %v1658_v30, %v524_v45 }
  0xb7   : > { %v665_v4 = vmul.f32 %v1660_v17, %v525_v14 }
  0xb8   : > { %v1018_v2 = vmul.f32 %v1872_v50, %v664_v34  ;;  %v1045_v32 = vmul.f32 %v1881_v57, %v664_v34  ;;  %v1121_v11 = vmul.f32 %v1899_v12, %v664_v34 }
  0xb9   : > { %v1046_v63 = vmul.f32 %v1881_v57, %v665_v4  ;;  %v1122_v51 = vmul.f32 %v1899_v12, %v665_v4  ;;  %v1489_v12 = vld [vmem:[%s2412_s7] ss:$0 sm:$0xff] }
  0xba   : > { %v1026_v9 = vadd.f32 %v1018_v2, %v1006_v33  ;;  %v1084_v44 = vrot.slane %v1045_v32, 1  ;;  %v1160_v10 = vrot.slane %v1121_v11, 2 }
  0xbb   : > { %v1085_v16 = vrot.slane %v1046_v63, 1  ;;  %v1161_v47 = vrot.slane %v1122_v51, 2 }
  0xbd   : > { %v1086_v61 = vsel %vm717_vm0, %v1084_v44, %v1085_v16  ;;  %v1162_v45 = vsel %vm794_vm1, %v1160_v10, %v1161_v47 }
  0xbe   : > { %v1102_v14 = vadd.f32 %v1086_v61, %v1026_v9 }
  0xc0   : > { %v1178_v50 = vadd.f32 %v1162_v45, %v1102_v14 }
  0xc2   : > { %1535 = vmatmul.mubr.msk.f32.gmra.mrb[2].mxu1 %vm1187_vm2, %v1178_v50 }
 0x148   : > { %v1527_v57 = vpop.f32.mrb[0].mxu0 }
 0x149   : > { %v1325_v55 = vmul.f32 %v1527_v57, %v1488_v56  ;;  %v1278_v21 = vpop.f32.mrb[1].mxu0 }
 0x14a   : > { %v1324_v25 = vmul.f32 %v1488_v56, %v1278_v21 }
 0x14b   : > { %v1340_v8 = vadd.f32 %v1489_v12, %v1325_v55 }
 0x14c   : > { %v1339_v41 = vadd.f32 %v1489_v12, %v1324_v25 }
 0x14d   : > { %1348 = vst.msk [vmem:[%s359_s15 + $0x8] sm:$0xff] %vm1187_vm2, %v1340_v8 }
 0x14e   : > { %1347 = vst.msk [vmem:[%s359_s15] sm:$0xff] %vm1187_vm2, %v1339_v41 }
 0x164   : > { %v1533_v15 = vpop.f32.mrb[0].mxu1 }
 0x165   : > { %v1329_v38 = vmul.f32 %v1533_v15, %v1488_v56  ;;  %v1298_v39 = vpop.f32.mrb[1].mxu1 }
 0x166   : > { %v1328_v36 = vmul.f32 %v1488_v56, %v1298_v39 }
 0x167   : > { %v1344_v19 = vadd.f32 %v1489_v12, %v1329_v38 }
 0x168   : > { %v1343_v48 = vadd.f32 %v1489_v12, %v1328_v36 }
 0x169   : > { %1352 = vst.msk [vmem:[%s359_s15 + $0x28] sm:$0xff] %vm1187_vm2, %v1344_v19 }
 0x16a   : > { %1351 = vst.msk [vmem:[%s359_s15 + $0x20] sm:$0xff] %vm1187_vm2, %v1343_v48 }
 0x174   : > { %v1530_v42 = vpop.f32.mrb[2].mxu0 }
 0x175   : > { %v1327_v20 = vmul.f32 %v1530_v42, %v1488_v56  ;;  %v1288_v58 = vpop.f32.mrb[3].mxu0 }
 0x176   : > { %v1326_v5 = vmul.f32 %v1488_v56, %v1288_v58 }
 0x177   : > { %v1342_v31 = vadd.f32 %v1489_v12, %v1327_v20 }
 0x178   : > { %v1341_v3 = vadd.f32 %v1489_v12, %v1326_v5 }
 0x179   : > { %1350 = vst.msk [vmem:[%s359_s15 + $0x18] sm:$0xff] %vm1187_vm2, %v1342_v31 }
 0x17a   : > { %1349 = vst.msk [vmem:[%s359_s15 + $0x10] sm:$0xff] %vm1187_vm2, %v1341_v3 }
 0x195   : > { %v1536_v52 = vpop.f32.mrb[2].mxu1 }
 0x196   : > { %v1331_v53 = vmul.f32 %v1536_v52, %v1488_v56  ;;  %v1308_v22 = vpop.f32.mrb[3].mxu1 }
 0x197   : > { %v1330_v59 = vmul.f32 %v1488_v56, %v1308_v22 }
 0x198   : > { %v1346_v7 = vadd.f32 %v1489_v12, %v1331_v53 }
 0x199   : > { %v1345_v43 = vadd.f32 %v1489_v12, %v1330_v59 }
 0x19a   : > { %1354 = vst.msk [vmem:[%s359_s15 + $0x38] sm:$0xff] %vm1187_vm2, %v1346_v7 }
 0x19b   : > { %1353 = vst.msk [vmem:[%s359_s15 + $0x30] sm:$0xff] %vm1187_vm2, %v1345_v43 }
 0x19c PF: > { %s19_s27 = sadd.s32 1, %s1686_s27  }
 0x19d   : > { %p16_p1 = scmp.ge.s32.totalorder %s19_s27, 4  }
 0x19f   :  { %18 = sbr.rel (!%p16_p1) target bundleno = 1 (0x1), region = 93 }
 0x1a6   :  { %1376 = vsyncpa [#allocation3], 1 }
 0x1a7   :  { %1378 = vsyncpa [#allocation3 + $0x1], 1 }

// kernel: bifpn_forward.7
= control target key start
LH: loop header
LB: loop body
LE: loop exit
PB: predicated region body
PF: predicated region fallthrough
CT: control target
= control target key end

     0   :  { %12 = vsyncpa [#allocation4], 0  ;;  %s1264_s0 = inlined_call_operand.vmem [shape: f32[2], index: 0, kind: input, shape index: {}]   ;;  %s1265_s1 = inlined_call_operand.vmem [shape: f32[2,6,6,64], index: 1, kind: input, shape index: {}]   ;;  %s1266_s2 = inlined_call_operand.vmem [shape: f32[2,6,6,64], index: 2, kind: input, shape index: {}]   ;;  %s1267_s3 = inlined_call_operand.vmem [shape: f32[3,3,64], index: 3, kind: input, shape index: {}]   ;;  %s1268_s4 = inlined_call_operand.vmem [shape: f32[64,64], index: 4, kind: input, shape index: {}]   ;;  %s1269_s5 = inlined_call_operand.vmem [shape: f32[1,64], index: 5, kind: input, shape index: {}]   ;;  %s1270_s6 = inlined_call_operand.vmem [shape: f32[1,64], index: 6, kind: input, shape index: {}]   ;;  %s1271_s7 = inlined_call_operand.hbm [shape: f32[2,16,64], index: 7, kind: output, shape index: {}]  }
   0x1   :  { %13 = vsyncpa [#allocation3], 0 }
   0x2   :  { %15 = vsyncpa [#allocation3 + $0x1], 0  ;;  %s1055_s24 = smov 0   ;;  %s1057_s25 = smov 0  }
   0x3   :  { %s1059_s26 = smov 0   ;;  %s1061_s27 = smov 0  }
   0x4 LB: > { %s1076_s28 = sadd.s32 4294967295, %s1009_s27   ;;  %s780_s29 = sadd.s32 4294967294, %s1009_s27   ;;  %s1009_s27 = sphi %s1061_s27, %s1278_s27   ;;  %s1005_s26 = sphi %s1059_s26, %s1277_s26   ;;  %s1001_s25 = sphi %s1057_s25, %s1276_s25   ;;  %s997_s24 = sphi %s1055_s24, %s1275_s24  }
   0x5   : > { %s1080_s30 = sadd.s32 1, %s1009_s27   ;;  %s185_s8 = sadd.s32 1, %s1005_s26 }
   0x6   : > { %s182_s9 = ssub.s32 %s1009_s27, %s1080_s30  ;;  %p195_p0 = scmp.ne.s32.totalorder %s1005_s26, %s1001_s25 }
   0x7   : > { %p183_p1 = scmp.eq.s32.totalorder %s182_s9, 0  ;;  %p196_p2 = scmp.eq.s32.totalorder %s1076_s28, 1 }
   0x8   : > { %p201_p3 = scmp.ne.s32.totalorder %s1001_s25, %s997_s24  ;;  %p202_p4 = scmp.eq.s32.totalorder %s780_s29, 1 }
   0x9   : > { %s1091_s10 = scalar_select %p183_p1, %s1005_s26, %s185_s8  }
   0xa   : > { %p1093_p5 = por %p196_p2, %p195_p0  ;;  %p1097_p6 = por %p202_p4, %p201_p3 }
   0xb   : > { %p781_p7 = scmp.ge.s32.totalorder %s1009_s27, 1  ;;  %p209_p8 = scmp.lt.s32.totalorder %s1009_s27, 3 }
   0xc   : > { %p866_p9 = scmp.eq.s32.totalorder %s1076_s28, 0  ;;  %s222_s16 = sshll.u32 %s1264_s0, 4  ;;  %s223_s16 = int_to_ptr.vmem [resolvable:$true] %s222_s16 }
   0xd   : > { %p1104_p10 = pnand %p781_p7, %p209_p8  ;;  %s928_s17 = scalar_lea.vmem %s223_s16, 16 }
   0xe   : > { %p929_p13 = scmp.ne.s32.totalorder %s223_s16, %s928_s17  ;;  %p936_p3 = scmp.lt.s32.totalorder %s223_s16, %s223_s16 }
   0xf   : > { %p858_p11 = pneg %p1104_p10  ;;  %p937_p4 = scmp.lt.s32.totalorder %s928_s17, %s928_s17 }
  0x11   : > { %p859_p12 = pnand %p866_p9, %p858_p11  ;;  %p938_p7 = por %p937_p4, %p936_p3 }
  0x13   : > { %p930_p0 = pneg %p859_p12 }
  0x15   : > { %p931_p1 = pnand %p930_p0, %p929_p13 }
  0x17   : > { %p932_p2 = pneg %p931_p1 }
  0x19   : > { %p939_p8 = pnand %p938_p7, %p932_p2 }
  0x1b   : > { %942 = shalt.err (!%p939_p8)
}
  0x1c   : > { %s1011_s18 = smov [#allocation2]   ;;  %263 = sbr.rel (%p1104_p10) target bundleno = 344 (0x158), region = 48 }
  0x1d   : > { %861 = dma.vmem_to_smem (!%p859_p12), %s223_s16, 16, %s1011_s18, [#allocation4]  }
  0x23   : > { %988 = dma.done.wait (%p866_p9), [#allocation4], 16  }
  0x24   : > { %990 = vsyncadd (%p866_p9), [#allocation4], 4294967280 }
  0x25   : > { %269 = sfence }
  0x26   : > { %v566_v0 = vld [vmem:[%s1268_s4] sm:$0xff]  ;;  %v567_v1 = vld [vmem:[%s1268_s4 + $0x8] sm:$0xff]  ;;  %v568_v2 = vld [vmem:[%s1268_s4 + $0x10] sm:$0xff]  ;;  %p301_p10 = scmp.lt.s32.totalorder %s1076_s28, 1  ;;  %s311_s8 = sld [smem:[#allocation2]]  ;;  %v390_v51 = vlaneseq  ;;  %vm580_vm0 = vcmask 523264  }
  0x27   : > { %v835_v3 = vpack.c.bf16 %v567_v1, %v566_v0  ;;  %v569_v4 = vld [vmem:[%s1268_s4 + $0x18] sm:$0xff]  ;;  %s789_s14 = sld [smem:[#allocation2 + $0x1]]  ;;  %v570_v6 = vld [vmem:[%s1268_s4 + $0x20] sm:$0xff]  ;;  %v571_v7 = vld [vmem:[%s1268_s4 + $0x28] sm:$0xff]  ;;  %s298_s23 = sand.u32 1, %s1001_s25  }
  0x28   : > { %v839_v5 = vpack.c.bf16 %v569_v4, %v568_v2  ;;  %s302_s19 = scalar_select %p301_p10, %s1076_s28, 1  ;;  %v843_v8 = vpack.c.bf16 %v571_v7, %v570_v6  ;;  %v572_v9 = vld [vmem:[%s1268_s4 + $0x30] sm:$0xff]  ;;  %v573_v10 = vld [vmem:[%s1268_s4 + $0x38] sm:$0xff]  ;;  %v391_v60 = vshrl.u32 %v390_v51, 7  ;;  %v388_v4 = vld [vmem:[%s1267_s3 + $0x4] sm:$0x7] }
  0x29   : > { %836 = vmatprep.subr.bf16.mxu0 %v835_v3  ;;  %v847_v22 = vpack.c.bf16 %v573_v10, %v572_v9  ;;  %s786_s29 = sshll.u32 %s298_s23, 4  ;;  %s1012_s22 = smov [#allocation5]  }
  0x2a   : > { %838 = vmatpush3.bf16.msra.mxu0 %v835_v3  ;;  %s851_s20 = smul.u32 48, %s302_s19  ;;  %v392_v0 = vsub.s32 0, %v391_v60  ;;  %v400_v1 = vsub.s32 1, %v391_v60  ;;  %v424_v2 = vsub.s32 2, %v391_v60  ;;  %v387_v3 = vld [vmem:[%s1267_s3] sm:$0x7] }
  0x2b   : > { %840 = vmatprep.subr.bf16.mxu0 %v839_v5  ;;  %s300_s17 = scalar_lea.vmem [#allocation5], %s786_s29  ;;  %s947_s29 = sshll.u32 %s1012_s22, 4  ;;  %s948_s29 = int_to_ptr.vmem [resolvable:$false] %s947_s29 }
  0x2c   : > { %s305_s15 = scalar_lea.vmem %s1265_s1, %s851_s20  ;;  %s310_s18 = scalar_lea.vmem %s1266_s2, %s851_s20  ;;  %v318_v11 = vstv %s311_s8  ;;  %v393_v6 = vrot.slane %v387_v3, %v392_v0  ;;  %v401_v7 = vrot.slane %v387_v3, %v400_v1 }
  0x2d   : > { %v312_v12 = vld [vmem:[%s305_s15] sm:$0x3f]  ;;  %v313_v13 = vld [vmem:[%s305_s15 + $0x8] sm:$0x3f]  ;;  %v314_v14 = vld [vmem:[%s305_s15 + $0x10] sm:$0x3f]  ;;  %v332_v15 = vstv %s789_s14 }
  0x2e   : > { %842 = vmatpush3.bf16.msra.mxu0 %v839_v5  ;;  %v315_v16 = vld [vmem:[%s305_s15 + $0x18] sm:$0x3f]  ;;  %v319_v17 = vmul.f32 %v318_v11, %v312_v12  ;;  %v320_v18 = vmul.f32 %v318_v11, %v313_v13  ;;  %v321_v19 = vmul.f32 %v318_v11, %v314_v14  ;;  %v326_v20 = vld [vmem:[%s310_s18] sm:$0x3f]  ;;  %v327_v21 = vld [vmem:[%s310_s18 + $0x8] sm:$0x3f]  ;;  %v449_v12 = vrot.slane %v388_v4, %v392_v0 }
  0x2f   : > { %844 = vmatprep.subr.bf16.mxu0 %v843_v8  ;;  %v322_v23 = vmul.f32 %v318_v11, %v315_v16  ;;  %v328_v24 = vld [vmem:[%s310_s18 + $0x10] sm:$0x3f]  ;;  %v329_v25 = vld [vmem:[%s310_s18 + $0x18] sm:$0x3f]  ;;  %v333_v26 = vmul.f32 %v332_v15, %v326_v20  ;;  %v334_v27 = vmul.f32 %v332_v15, %v327_v21  ;;  %v316_v28 = vld [vmem:[%s305_s15 + $0x20] sm:$0x3f]  ;;  %v1171_v13 = vrot.slane %v388_v4, %v400_v1 }
  0x30   : > { %v335_v29 = vmul.f32 %v332_v15, %v328_v24  ;;  %v336_v30 = vmul.f32 %v332_v15, %v329_v25  ;;  %v317_v31 = vld [vmem:[%s305_s15 + $0x28] sm:$0x3f]  ;;  %v323_v32 = vmul.f32 %v318_v11, %v316_v28  ;;  %v330_v33 = vld [vmem:[%s310_s18 + $0x20] sm:$0x3f]  ;;  %v1173_v14 = vrot.slane %v388_v4, %v424_v2  ;;  %s805_s8 = sshll.u32 %s1076_s28, 8  ;;  %s1223_s28 = scalar_lea.sflag [#allocation3], %s298_s23 }
  0x31   : > { %v331_v34 = vld [vmem:[%s310_s18 + $0x28] sm:$0x3f]  ;;  %v339_v35 = vadd.f32 %v333_v26, %v319_v17  ;;  %v340_v36 = vadd.f32 %v334_v27, %v320_v18  ;;  %v324_v37 = vmul.f32 %v318_v11, %v317_v31  ;;  %v337_v38 = vmul.f32 %v332_v15, %v330_v33  ;;  %s694_s18 = sshll.u32 %s300_s17, 4  ;;  %s1217_s20 = scalar_lea.hbm %s1271_s7, %s805_s8  ;;  %s1219_s18 = int_to_ptr.vmem [resolvable:$true] %s694_s18 }
  0x32   : > { %846 = vmatpush3.bf16.msra.mxu0 %v843_v8  ;;  %v341_v39 = vadd.f32 %v335_v29, %v321_v19  ;;  %v1153_v40 = vadd.f32 %v336_v30, %v322_v23  ;;  %v338_v41 = vmul.f32 %v332_v15, %v331_v34  ;;  %v389_v5 = vld [vmem:[%s1267_s3 + $0x8] sm:$0x7]  ;;  %v425_v8 = vrot.slane %v387_v3, %v424_v2  ;;  %s943_s21 = scalar_lea.vmem %s1219_s18, 256  ;;  %s949_s9 = scalar_lea.vmem %s948_s29, 512 }
  0x33   : > { %848 = vmatprep.subr.bf16.mxu0 %v847_v22  ;;  %v790_v42 = vmul.f32 -1.442695, %v339_v35  ;;  %v791_v43 = vmul.f32 -1.442695, %v340_v36  ;;  %v1155_v44 = vadd.f32 %v337_v38, %v323_v32  ;;  %v1175_v17 = vrot.slane %v389_v5, %v392_v0  ;;  %p944_p9 = scmp.ne.s32.totalorder %s1219_s18, %s943_s21  ;;  %p950_p13 = scmp.lt.s32.totalorder %s1219_s18, %s948_s29 }
  0x34   : > { %v792_v45 = vmul.f32 -1.442695, %v341_v39  ;;  %v793_v46 = vmul.f32 -1.442695, %v1153_v40  ;;  %v1158_v47 = vadd.f32 %v338_v41, %v324_v37  ;;  %v1177_v18 = vrot.slane %v389_v5, %v400_v1  ;;  %p951_p0 = scmp.lt.s32.totalorder %s949_s9, %s943_s21 }
  0x35   : > { %904 = vpow2.f32 %v790_v42  ;;  %v794_v48 = vmul.f32 -1.442695, %v1155_v44  ;;  %v1179_v19 = vrot.slane %v389_v5, %v424_v2  ;;  %p945_p11 = pnand %p944_p9, %p1093_p5 }
  0x36   : > { %850 = vmatpush3.bf16.msra.mxu0 %v847_v22  ;;  %906 = vpow2.f32 %v791_v43  ;;  %v795_v49 = vmul.f32 -1.442695, %v1158_v47  ;;  %p952_p1 = por %p951_p0, %p950_p13 }
  0x37   : > { %908 = vpow2.f32 %v792_v45  ;;  %p946_p12 = pneg %p945_p11 }
  0x38   : > { %910 = vpow2.f32 %v793_v46 }
  0x39   : > { %912 = vpow2.f32 %v794_v48  ;;  %p953_p2 = pnand %p952_p1, %p946_p12 }
  0x3a   : > { %914 = vpow2.f32 %v795_v49 }
  0x3f   : > { %v905_v50 = vpop.eup %904 }
  0x40   : > { %v907_v52 = vpop.eup %906  ;;  %v363_v53 = vadd.f32 1.0, %v905_v50 }
  0x41   : > { %v909_v54 = vpop.eup %908  ;;  %v364_v55 = vadd.f32 1.0, %v907_v52 }
  0x42   : > { %v911_v56 = vpop.eup %910  ;;  %v365_v57 = vadd.f32 1.0, %v909_v54  ;;  %916 = vrcp.f32 %v363_v53 }
  0x43   : > { %v913_v58 = vpop.eup %912  ;;  %v366_v59 = vadd.f32 1.0, %v911_v56  ;;  %918 = vrcp.f32 %v364_v55 }
  0x44   : > { %v915_v61 = vpop.eup %914  ;;  %920 = vrcp.f32 %v365_v57  ;;  %v367_v62 = vadd.f32 1.0, %v913_v58 }
  0x45   : > { %922 = vrcp.f32 %v366_v59  ;;  %v368_v63 = vadd.f32 1.0, %v915_v61 }
  0x46   : > { %924 = vrcp.f32 %v367_v62 }
  0x47   : > { %926 = vrcp.f32 %v368_v63 }
  0x4c   : > { %v917_v9 = vpop.eup %916 }
  0x4d   : > { %v919_v10 = vpop.eup %918  ;;  %v381_v11 = vmul.f32 %v917_v9, %v339_v35 }
  0x4e   : > { %v921_v15 = vpop.eup %920  ;;  %v382_v16 = vmul.f32 %v919_v10, %v340_v36 }
  0x4f   : > { %v923_v20 = vpop.eup %922  ;;  %v383_v21 = vmul.f32 %v921_v15, %v341_v39  ;;  %v394_v22 = vmul.f32 %v393_v6, %v381_v11  ;;  %v402_v23 = vmul.f32 %v401_v7, %v381_v11  ;;  %v426_v24 = vmul.f32 %v425_v8, %v381_v11 }
  0x50   : > { %v384_v25 = vmul.f32 %v923_v20, %v1153_v40  ;;  %v395_v26 = vmul.f32 %v393_v6, %v382_v16  ;;  %v403_v27 = vmul.f32 %v401_v7, %v382_v16  ;;  %v427_v28 = vmul.f32 %v425_v8, %v382_v16  ;;  %v925_v37 = vpop.eup %924 }
  0x51   : > { %v410_v29 = vrot.slane %v402_v23, 1  ;;  %v434_v30 = vrot.slane %v426_v24, 2  ;;  %v450_v31 = vmul.f32 %v449_v12, %v382_v16  ;;  %v451_v32 = vmul.f32 %v449_v12, %v383_v21  ;;  %v927_v42 = vpop.eup %926 }
  0x52   : > { %v411_v33 = vrot.slane %v403_v27, 1  ;;  %v435_v34 = vrot.slane %v427_v28, 2  ;;  %v462_v35 = vmul.f32 %v1171_v13, %v382_v16  ;;  %v463_v36 = vmul.f32 %v1171_v13, %v383_v21 }
  0x53   : > { %v418_v38 = vadd.f32 %v410_v29, %v394_v22  ;;  %v486_v39 = vmul.f32 %v1173_v14, %v382_v16  ;;  %v487_v41 = vmul.f32 %v1173_v14, %v383_v21  ;;  %v510_v40 = vmul.f32 %v1175_v17, %v383_v21 }
  0x54   : > { %v419_v43 = vadd.f32 %v411_v33, %v395_v26  ;;  %v470_v45 = vrot.slane %v462_v35, 1  ;;  %v471_v46 = vrot.slane %v463_v36, 1  ;;  %v511_v48 = vmul.f32 %v1175_v17, %v384_v25 }
  0x55   : > { %v442_v49 = vadd.f32 %v434_v30, %v418_v38  ;;  %v494_v50 = vrot.slane %v486_v39, 2  ;;  %v495_v51 = vrot.slane %v487_v41, 2  ;;  %v522_v52 = vmul.f32 %v1177_v18, %v383_v21 }
  0x56   : > { %v443_v53 = vadd.f32 %v435_v34, %v419_v43  ;;  %v523_v54 = vmul.f32 %v1177_v18, %v384_v25  ;;  %v546_v55 = vmul.f32 %v1179_v19, %v383_v21  ;;  %v547_v56 = vmul.f32 %v1179_v19, %v384_v25 }
  0x57   : > { %v454_v57 = vadd.f32 %v450_v31, %v442_v49  ;;  %v530_v58 = vrot.slane %v522_v52, 1  ;;  %v385_v59 = vmul.f32 %v925_v37, %v1155_v44  ;;  %v386_v60 = vmul.f32 %v927_v42, %v1158_v47 }
  0x58   : > { %v455_v61 = vadd.f32 %v451_v32, %v443_v53  ;;  %v531_v62 = vrot.slane %v523_v54, 1  ;;  %v554_v63 = vrot.slane %v546_v55, 2  ;;  %v555_v0 = vrot.slane %v547_v56, 2 }
  0x59   : > { %v478_v1 = vadd.f32 %v470_v45, %v454_v57  ;;  %v396_v2 = vmul.f32 %v393_v6, %v383_v21  ;;  %v397_v3 = vmul.f32 %v393_v6, %v384_v25  ;;  %v404_v4 = vmul.f32 %v401_v7, %v383_v21 }
  0x5a   : > { %v479_v5 = vadd.f32 %v471_v46, %v455_v61  ;;  %v405_v9 = vmul.f32 %v401_v7, %v384_v25  ;;  %v428_v10 = vmul.f32 %v425_v8, %v383_v21  ;;  %v429_v11 = vmul.f32 %v425_v8, %v384_v25 }
  0x5b   : > { %v502_v15 = vadd.f32 %v494_v50, %v478_v1  ;;  %v412_v16 = vrot.slane %v404_v4, 1  ;;  %v452_v20 = vmul.f32 %v449_v12, %v384_v25  ;;  %v453_v22 = vmul.f32 %v449_v12, %v385_v59 }
  0x5c   : > { %v503_v23 = vadd.f32 %v495_v51, %v479_v5  ;;  %v413_v44 = vrot.slane %v405_v9, 1  ;;  %v436_v24 = vrot.slane %v428_v10, 2  ;;  %v437_v47 = vrot.slane %v429_v11, 2 }
  0x5d   : > { %v514_v26 = vadd.f32 %v510_v40, %v502_v15  ;;  %v420_v27 = vadd.f32 %v412_v16, %v396_v2  ;;  %v464_v28 = vmul.f32 %v1171_v13, %v384_v25  ;;  %v465_v29 = vmul.f32 %v1171_v13, %v385_v59 }
  0x5e   : > { %v515_v6 = vadd.f32 %v511_v48, %v503_v23  ;;  %v421_v30 = vadd.f32 %v413_v44, %v397_v3  ;;  %v488_v7 = vmul.f32 %v1173_v14, %v384_v25  ;;  %v489_v8 = vmul.f32 %v1173_v14, %v385_v59 }
  0x5f   : > { %v538_v21 = vadd.f32 %v530_v58, %v514_v26  ;;  %v444_v31 = vadd.f32 %v436_v24, %v420_v27  ;;  %v472_v32 = vrot.slane %v464_v28, 1  ;;  %v473_v34 = vrot.slane %v465_v29, 1 }
  0x60   : > { %v539_v12 = vadd.f32 %v531_v62, %v515_v6  ;;  %v445_v33 = vadd.f32 %v437_v47, %v421_v30  ;;  %v496_v37 = vrot.slane %v488_v7, 2  ;;  %v497_v38 = vrot.slane %v489_v8, 2 }
  0x61   : > { %v562_v35 = vadd.f32 %v554_v63, %v538_v21  ;;  %v456_v36 = vadd.f32 %v452_v20, %v444_v31  ;;  %v524_v13 = vmul.f32 %v1177_v18, %v385_v59  ;;  %v525_v40 = vmul.f32 %v1177_v18, %v386_v60 }
  0x62   : > { %v563_v39 = vadd.f32 %v555_v0, %v539_v12  ;;  %v457_v41 = vadd.f32 %v453_v22, %v445_v33  ;;  %v512_v14 = vmul.f32 %v1175_v17, %v385_v59  ;;  %v548_v42 = vmul.f32 %v1179_v19, %v385_v59 }
  0x63   : > { %v480_v25 = vadd.f32 %v472_v32, %v456_v36  ;;  %v513_v46 = vmul.f32 %v1175_v17, %v386_v60  ;;  %v549_v48 = vmul.f32 %v1179_v19, %v386_v60  ;;  %v532_v50 = vrot.slane %v524_v13, 1  ;;  %v798_v17 = vld [vmem:[%s1269_s5] ss:$0 sm:$0xff] }
  0x64   : > { %v578_v43 = vcombine.low %v562_v35, %v563_v39  ;;  %v481_v45 = vadd.f32 %v473_v34, %v457_v41  ;;  %v533_v52 = vrot.slane %v525_v40, 1  ;;  %v556_v53 = vrot.slane %v548_v42, 2  ;;  %v799_v60 = vld [vmem:[%s1270_s6] ss:$0 sm:$0xff] }
  0x65   : > { %v504_v49 = vadd.f32 %v496_v37, %v480_v25  ;;  %v557_v55 = vrot.slane %v549_v48, 2 }
  0x66   : > { %832 = vmatprep.mubr.msk.f32.mxu0 %vm580_vm0, %v578_v43  ;;  %v505_v51 = vadd.f32 %v497_v38, %v481_v45 }
  0x67   : > { %v516_v18 = vadd.f32 %v512_v14, %v504_v49 }
  0x68   : > { %v517_v54 = vadd.f32 %v513_v46, %v505_v51 }
  0x69   : > { %v540_v56 = vadd.f32 %v532_v50, %v516_v18 }
  0x6a   : > { %v541_v57 = vadd.f32 %v533_v52, %v517_v54 }
  0x6b   : > { %v564_v58 = vadd.f32 %v556_v53, %v540_v56 }
  0x6c   : > { %v565_v59 = vadd.f32 %v557_v55, %v541_v57 }
  0x6e   : > { %v579_v61 = vcombine.low %v564_v58, %v565_v59 }
  0x70   : > { %833 = vmatmul.mubr.msk.f32.vlgmr.msra.gmra.mrb[0].mxu0 %vm580_vm0, %v579_v61 }
 0x143   : > { %v834_v19 = vpop.f32.mrb[0].mxu0 }
 0x144   : > { %v668_v62 = vmul.f32 %v834_v19, %v798_v17  ;;  %v651_v63 = vpop.f32.mrb[1].mxu0 }
 0x145   : > { %v667_v0 = vmul.f32 %v798_v17, %v651_v63 }
 0x146   : > { %v677_v1 = vadd.f32 %v799_v60, %v668_v62 }
 0x147   : > { %v676_v2 = vadd.f32 %v799_v60, %v667_v0 }
 0x148   : > { %679 = vst.msk [vmem:[%s300_s17 + $0x8] sm:$0xff] %vm580_vm0, %v677_v1 }
 0x149   : > { %678 = vst.msk [vmem:[%s300_s17] sm:$0xff] %vm580_vm0, %v676_v2 }
 0x14a   : > { %956 = shalt.err (!%p953_p2)
}
 0x14b   : > { %s957_s23 = scalar_lea.hbm %s1217_s20, 256  ;;  %s961_s16 = scalar_lea.hbm %s1271_s7, 512 }
 0x14c   : > { %p958_p3 = scmp.ne.s32.totalorder %s1217_s20, %s957_s23  ;;  %p962_p8 = scmp.lt.u32.totalorder %s1217_s20, %s1271_s7 }
 0x14d   : > { %p963_p10 = scmp.lt.u32.totalorder %s961_s16, %s957_s23  ;;  %p965_p11 = scmp.lt.u32.totalorder %s957_s23, %s1217_s20 }
 0x14e   : > { %p959_p4 = pnand %p958_p3, %p1093_p5 }
 0x14f   : > { %p964_p9 = por %p963_p10, %p962_p8 }
 0x150   : > { %p960_p7 = pneg %p959_p4 }
 0x151   : > { %p966_p12 = por %p965_p11, %p964_p9 }
 0x153   : > { %p967_p13 = pnand %p966_p12, %p960_p7 }
 0x155   : > { %970 = shalt.err (!%p967_p13)
}
 0x156   : > { %s1013_s14 = smov 128   ;;  %s1014_s19 = smov 8  }
 0x157   : > { %856 = dma.vmem_to_hbm [thread:$0]  (%p1093_p5), %s1219_s18, 256, %s1217_s20, %s1223_s28, %s1013_s14, %s1013_s14, %s1014_s19  }
 0x158 PF: > { %p868_p0 = scmp.ge.s32.totalorder %s1009_s27, 2  ;;  %s709_s21 = sand.u32 1, %s997_s24  }
 0x159   : > { %s710_s22 = scalar_lea.sflag [#allocation3], %s709_s21 }
 0x15a   : > { %p863_p1 = pnand %p868_p0, %p1097_p6 }
 0x15c   : > { %992 = dma.done.wait (!%p863_p1), %s710_s22, 256  }
 0x15d   : > { %994 = vsyncadd (!%p863_p1), %s710_s22, 4294967040  ;;  %p18_p2 = scmp.ge.s32.totalorder %s1080_s30, 4   ;;  %s1275_s24 = smov %s1001_s25 }
 0x15e   : > { %s1276_s25 = smov %s1005_s26  ;;  %s1277_s26 = smov %s1091_s10 }
 0x15f   : > { %s1278_s27 = smov %s1080_s30  ;;  %20 = sbr.rel (!%p18_p2) target bundleno = 4 (0x4), region = 91 }
 0x166   :  { %715 = vsyncpa [#allocation3], 1 }
 0x167   :  { %717 = vsyncpa [#allocation3 + $0x1], 1 }
 0x168   :  { %718 = vsyncpa [#allocation4], 1 }
 0x169   :  { %720 = vsyncpa [#allocation4 + $0x1], 1 }

</bundles_post_ra>
